<compile_context>
chip_gen: v7x
topology: tpu7x:2x2x1
jax: 0.10.0
libtpu: 0.0.40
codegen_flags: <defaults>
</compile_context>

<pallas_src>
import functools
import math

import jax
import jax.numpy as jnp
from jax.experimental import pallas as pl
from jax.experimental.pallas import tpu as pltpu


def _round_up(x, m):
    return (x + m - 1) // m * m


# ----------------------------- Pallas kernels ------------------------------

def _epilogue(y, scale, shift, act):
    """Fused per-channel scale/shift (folded BN or bias) + activation, in f32."""
    y = y * scale + shift
    if act == "relu":
        y = jnp.maximum(y, 0.0)
    elif act == "gelu":  # exact (erf-based) GELU, matches torch nn.GELU()
        y = 0.5 * y * (1.0 + jax.lax.erf(y * (1.0 / math.sqrt(2.0))))
    return y


def _mm_direct_kernel(x_ref, w_ref, scale_ref, shift_ref, o_ref, *, act):
    """Single-K-step bf16 matmul, f32 MXU accumulation, fused f32 epilogue."""
    y = jnp.dot(x_ref[...], w_ref[...], preferred_element_type=jnp.float32)
    o_ref[...] = _epilogue(y, scale_ref[...], shift_ref[...], act).astype(o_ref.dtype)


def _mm_kernel(x_ref, w_ref, scale_ref, shift_ref, o_ref, acc_ref, *, act):
    """K-tiled bf16 matmul accumulated in f32; epilogue on the last K step."""
    k = pl.program_id(2)

    @pl.when(k == 0)
    def _():
        acc_ref[...] = jnp.zeros_like(acc_ref)

    acc_ref[...] += jnp.dot(x_ref[...], w_ref[...],
                            preferred_element_type=jnp.float32)

    @pl.when(k == pl.num_programs(2) - 1)
    def _():
        o_ref[...] = _epilogue(acc_ref[...], scale_ref[...], shift_ref[...],
                               act).astype(o_ref.dtype)


def _ln_mm_kernel(x_ref, g_ref, b_ref, w_ref, scale_ref, shift_ref, o_ref, *,
                  act, eps):
    """LayerNorm prologue (f32 stats computed on bf16 x) fused into a matmul."""
    x = x_ref[...].astype(jnp.float32)
    mu = jnp.mean(x, axis=-1, keepdims=True)
    xc = x - mu
    var = jnp.mean(xc * xc, axis=-1, keepdims=True)
    xn = xc * jax.lax.rsqrt(var + eps) * g_ref[...] + b_ref[...]
    y = jnp.dot(xn.astype(jnp.bfloat16), w_ref[...],
                preferred_element_type=jnp.float32)
    o_ref[...] = _epilogue(y, scale_ref[...], shift_ref[...], act).astype(o_ref.dtype)


def _layernorm_kernel(x_ref, g_ref, b_ref, o_ref, *, eps):
    x = x_ref[...].astype(jnp.float32)
    mu = jnp.mean(x, axis=-1, keepdims=True)
    xc = x - mu
    var = jnp.mean(xc * xc, axis=-1, keepdims=True)
    y = xc * jax.lax.rsqrt(var + eps) * g_ref[...] + b_ref[...]
    o_ref[...] = y.astype(o_ref.dtype)


def _attn_lane_kernel(q_ref, k_ref, v_ref, o_ref, *, scale, nq, nk):
    """Lane-dense attention: groups (batch*head) on the 128-lane axis.

    q_ref: (Nq, dk, Gb), k_ref/v_ref: (Nk, dk, Gb), o_ref: (Nq, dk, Gb).
    Nq/Nk/dk are tiny here (<= 16), so MXU tiles would be >85% padding and the
    stores masked; instead the per-group products run on the VPU/XLU with
    fully lane-dense, unmasked stores.  Math stays f32.
    """
    q = q_ref[...].astype(jnp.float32)
    k = k_ref[...].astype(jnp.float32)
    v = v_ref[...].astype(jnp.float32)
    # scores s[qi, ki, g] = sum_d q[qi, d, g] * k[ki, d, g]
    s = jnp.stack([jnp.sum(q[qi] * k, axis=1) for qi in range(nq)], axis=0)
    s = s * scale
    m = jnp.max(s, axis=1, keepdims=True)
    p = jnp.exp(s - m)
    l = jnp.sum(p, axis=1, keepdims=True)
    p = p * pl.reciprocal(l, approx=True)
    outs = []
    for qi in range(nq):
        acc = p[qi, 0:1, :] * v[0]
        for ki in range(1, nk):
            acc = acc + p[qi, ki:ki + 1, :] * v[ki]
        outs.append(acc)                                   # (dk, Gb)
    o_ref[...] = jnp.stack(outs, axis=0).astype(o_ref.dtype)


def _attention_mxu_kernel(q_ref, k_ref, v_ref, o_ref, *, scale):
    """softmax(q @ k^T * scale) @ v over a block of (batch*head) groups."""
    s = jnp.einsum("bqd,bkd->bqk", q_ref[...], k_ref[...],
                   preferred_element_type=jnp.float32) * scale
    m = jnp.max(s, axis=-1, keepdims=True)
    p = jnp.exp(s - m)
    l = jnp.sum(p, axis=-1, keepdims=True)
    p = p * pl.reciprocal(l, approx=True)
    o_ref[...] = jnp.einsum("bqk,bkd->bqd", p.astype(jnp.bfloat16), v_ref[...],
                            preferred_element_type=jnp.float32).astype(o_ref.dtype)


def _outlook_av_kernel(a_ref, v_ref, o_ref, *, scale, kk):
    """Outlook softmax(a*scale) @ v, lane-dense over groups (batch*seq*head).

    a_ref: (KK, KK, Gb) f32 logits, v_ref: (KK, dk, Gb) bf16,
    o_ref: (KK, dk, Gb) bf16.
    """
    a = a_ref[...] * scale
    m = jnp.max(a, axis=1, keepdims=True)
    p = jnp.exp(a - m)
    l = jnp.sum(p, axis=1, keepdims=True)
    p = p * pl.reciprocal(l, approx=True)
    v = v_ref[...].astype(jnp.float32)
    acc = p[:, 0:1, :] * v[0:1, :, :]
    for q in range(1, kk):
        acc = acc + p[:, q:q + 1, :] * v[q:q + 1, :, :]
    o_ref[...] = acc.astype(o_ref.dtype)


# --------------------------- Pallas call wrappers ---------------------------

def _pick_m_tile(M):
    """Row tile (multiple of 8/16), preferring >= 2 grid steps (v7x megacore)."""
    Mp8 = _round_up(M, 8)
    if Mp8 > 1024:
        return 512
    if Mp8 >= 32:
        return _round_up(Mp8 // 2, 16)
    return Mp8  # tiny: single step, block == (padded) full rows


def _lane_block(Gp):
    """Lane block (multiple of 128) dividing Gp, preferring >= 2 grid steps."""
    for t in (512, 384, 256, 128):
        if Gp % t == 0 and Gp // t >= 2:
            return t
    return Gp


def pallas_linear(x, w, b=None, act="none", scale=None, ln=None,
                  out_dtype=jnp.bfloat16):
    """y = act((LN?(x) @ w) * scale + shift);  x: (..., K), w: (K, N).

    bf16 operands / activations, f32 MXU accumulation + f32 epilogue.
    M/N padded to (8, 128)-aligned tiles; K is tiled with an f32 VMEM
    accumulator only when it is large, otherwise a direct single-step kernel
    (no accumulator / pl.when phases) is used.
    """
    shp = x.shape
    Kd = shp[-1]
    N = w.shape[1]
    x2 = x.reshape(-1, Kd)
    M = x2.shape[0]

    tm = _pick_m_tile(M)
    Mp = _round_up(M, tm)
    Np = _round_up(N, 128)
    if Np <= 512:
        tn = Np
    else:
        tn = next(t for t in (512, 256, 128) if Np % t == 0)
    # v7x megacore: if both M and N collapsed to one step, split N in two.
    if ln is None and Mp // tm == 1 and Np // tn == 1 and Np >= 256:
        if (Np // 2) % 128 == 0:
            tn = Np // 2
    if ln is None and Kd > 512 and Kd % 128 == 0:
        tk = next(t for t in (512, 256, 128) if Kd % t == 0)
    else:
        tk = Kd
    nm, nn, nk = Mp // tm, Np // tn, Kd // tk

    wq = w.astype(jnp.bfloat16)
    if Np != N:
        wq = jnp.pad(wq, ((0, 0), (0, Np - N)))
    scale_v = (jnp.ones((N,), jnp.float32) if scale is None
               else scale.astype(jnp.float32)).reshape(1, N)
    shift_v = (jnp.zeros((N,), jnp.float32) if b is None
               else b.astype(jnp.float32)).reshape(1, N)
    scale_v = jnp.pad(scale_v, ((0, 0), (0, Np - N)))
    shift_v = jnp.pad(shift_v, ((0, 0), (0, Np - N)))

    xq = x2.astype(jnp.bfloat16)
    if Mp != M:
        xq = jnp.pad(xq, ((0, Mp - M), (0, 0)))

    if ln is not None:
        # TODO(synk): if Np ever exceeds 512 the LN prologue is recomputed per
        # N tile; at this config Np <= 512 so nn == 1 always.
        g = ln["g"].reshape(1, Kd).astype(jnp.float32)
        bb = ln["b"].reshape(1, Kd).astype(jnp.float32)
        out = pl.pallas_call(
            functools.partial(_ln_mm_kernel, act=act, eps=ln["eps"]),
            grid=(nm, nn),
            in_specs=[
                pl.BlockSpec((tm, Kd), lambda i, j: (i, 0)),
                pl.BlockSpec((1, Kd), lambda i, j: (0, 0)),
                pl.BlockSpec((1, Kd), lambda i, j: (0, 0)),
                pl.BlockSpec((Kd, tn), lambda i, j: (0, j)),
                pl.BlockSpec((1, tn), lambda i, j: (0, j)),
                pl.BlockSpec((1, tn), lambda i, j: (0, j)),
            ],
            out_specs=pl.BlockSpec((tm, tn), lambda i, j: (i, j)),
            out_shape=jax.ShapeDtypeStruct((Mp, Np), out_dtype),
            compiler_params=pltpu.CompilerParams(
                dimension_semantics=("parallel", "parallel")),
        )(xq, g, bb, wq, scale_v, shift_v)
    elif nk == 1:
        out = pl.pallas_call(
            functools.partial(_mm_direct_kernel, act=act),
            grid=(nm, nn),
            in_specs=[
                pl.BlockSpec((tm, Kd), lambda i, j: (i, 0)),
                pl.BlockSpec((Kd, tn), lambda i, j: (0, j)),
                pl.BlockSpec((1, tn), lambda i, j: (0, j)),
                pl.BlockSpec((1, tn), lambda i, j: (0, j)),
            ],
            out_specs=pl.BlockSpec((tm, tn), lambda i, j: (i, j)),
            out_shape=jax.ShapeDtypeStruct((Mp, Np), out_dtype),
            compiler_params=pltpu.CompilerParams(
                dimension_semantics=("parallel", "parallel")),
        )(xq, wq, scale_v, shift_v)
    else:
        out = pl.pallas_call(
            functools.partial(_mm_kernel, act=act),
            grid=(nm, nn, nk),
            in_specs=[
                pl.BlockSpec((tm, tk), lambda i, j, k: (i, k)),
                pl.BlockSpec((tk, tn), lambda i, j, k: (k, j)),
                pl.BlockSpec((1, tn), lambda i, j, k: (0, j)),
                pl.BlockSpec((1, tn), lambda i, j, k: (0, j)),
            ],
            out_specs=pl.BlockSpec((tm, tn), lambda i, j, k: (i, j)),
            out_shape=jax.ShapeDtypeStruct((Mp, Np), out_dtype),
            scratch_shapes=[pltpu.VMEM((tm, tn), jnp.float32)],
            compiler_params=pltpu.CompilerParams(
                dimension_semantics=("parallel", "parallel", "arbitrary")),
        )(xq, wq, scale_v, shift_v)

    return out[:M, :N].reshape(shp[:-1] + (N,))


def _ln_args(p, eps):
    return {"g": p["g"], "b": p["b"], "eps": eps}


def layer_norm(x, p, eps=1e-6):
    """Standalone LayerNorm (used only where the LN output feeds >1 consumer)."""
    shp = x.shape
    D = shp[-1]
    x2 = x.reshape(-1, D).astype(jnp.bfloat16)
    M = x2.shape[0]
    bm = _pick_m_tile(M)
    Mp = _round_up(M, bm)
    if Mp != M:
        x2 = jnp.pad(x2, ((0, Mp - M), (0, 0)))
    out = pl.pallas_call(
        functools.partial(_layernorm_kernel, eps=eps),
        grid=(Mp // bm,),
        in_specs=[pl.BlockSpec((bm, D), lambda i: (i, 0)),
                  pl.BlockSpec((1, D), lambda i: (0, 0)),
                  pl.BlockSpec((1, D), lambda i: (0, 0))],
        out_specs=pl.BlockSpec((bm, D), lambda i: (i, 0)),
        out_shape=jax.ShapeDtypeStruct((Mp, D), jnp.bfloat16),
        compiler_params=pltpu.CompilerParams(dimension_semantics=("parallel",)),
    )(x2, p["g"].reshape(1, D).astype(jnp.float32),
      p["b"].reshape(1, D).astype(jnp.float32))
    return out[:M].reshape(shp)


def pallas_attention(q, k, v, scale):
    """q: (G, Nq, dk), k/v: (G, Nk, dk) -> (G, Nq, dk) bf16."""
    G, Nq, dk = q.shape
    Nk = k.shape[1]
    if Nq <= 32 and Nk <= 32 and dk <= 64:
        # Lane-dense path: groups (batch*head) on the 128-lane axis.
        q_t = q.transpose(1, 2, 0)
        k_t = k.transpose(1, 2, 0)
        v_t = v.transpose(1, 2, 0)
        Gp = _round_up(G, 128)
        if Gp != G:
            pad = ((0, 0), (0, 0), (0, Gp - G))
            q_t = jnp.pad(q_t, pad)
            k_t = jnp.pad(k_t, pad)
            v_t = jnp.pad(v_t, pad)
        gl = _lane_block(Gp)
        out = pl.pallas_call(
            functools.partial(_attn_lane_kernel, scale=scale, nq=Nq, nk=Nk),
            grid=(Gp // gl,),
            in_specs=[pl.BlockSpec((Nq, dk, gl), lambda g: (0, 0, g)),
                      pl.BlockSpec((Nk, dk, gl), lambda g: (0, 0, g)),
                      pl.BlockSpec((Nk, dk, gl), lambda g: (0, 0, g))],
            out_specs=pl.BlockSpec((Nq, dk, gl), lambda g: (0, 0, g)),
            out_shape=jax.ShapeDtypeStruct((Nq, dk, Gp), jnp.bfloat16),
            compiler_params=pltpu.CompilerParams(
                dimension_semantics=("parallel",)),
        )(q_t.astype(jnp.bfloat16), k_t.astype(jnp.bfloat16),
          v_t.astype(jnp.bfloat16))
        return out[:, :, :G].transpose(2, 0, 1)

    # MXU path for larger sequence lengths / head dims (not used at this cfg).
    gb = G
    for d in range(G, 0, -1):
        if G % d == 0 and d * (Nq + 2 * Nk) * dk * 2 <= (2 << 20):
            gb = d
            break
    if G // gb < 2:  # leave >= 2 parallel steps for v7x when possible
        for d in range(gb - 1, 0, -1):
            if G % d == 0:
                gb = d
                break
    return pl.pallas_call(
        functools.partial(_attention_mxu_kernel, scale=scale),
        grid=(G // gb,),
        in_specs=[pl.BlockSpec((gb, Nq, dk), lambda g: (g, 0, 0)),
                  pl.BlockSpec((gb, Nk, dk), lambda g: (g, 0, 0)),
                  pl.BlockSpec((gb, Nk, dk), lambda g: (g, 0, 0))],
        out_specs=pl.BlockSpec((gb, Nq, dk), lambda g: (g, 0, 0)),
        out_shape=jax.ShapeDtypeStruct((G, Nq, dk), jnp.bfloat16),
        compiler_params=pltpu.CompilerParams(dimension_semantics=("parallel",)),
    )(q.astype(jnp.bfloat16), k.astype(jnp.bfloat16), v.astype(jnp.bfloat16))


def pallas_outlook_av(a_t, v_t, scale):
    """a_t: (KK, KK, G), v_t: (KK, dk, G) -> (KK, dk, G); lane axis = groups."""
    KK, _, G = a_t.shape
    dk = v_t.shape[1]
    Gp = _round_up(G, 128)
    if Gp != G:
        a_t = jnp.pad(a_t, ((0, 0), (0, 0), (0, Gp - G)))
        v_t = jnp.pad(v_t, ((0, 0), (0, 0), (0, Gp - G)))
    gl = _lane_block(Gp)
    out = pl.pallas_call(
        functools.partial(_outlook_av_kernel, scale=scale, kk=KK),
        grid=(Gp // gl,),
        in_specs=[pl.BlockSpec((KK, KK, gl), lambda g: (0, 0, g)),
                  pl.BlockSpec((KK, dk, gl), lambda g: (0, 0, g))],
        out_specs=pl.BlockSpec((KK, dk, gl), lambda g: (0, 0, g)),
        out_shape=jax.ShapeDtypeStruct((KK, dk, Gp), jnp.bfloat16),
        compiler_params=pltpu.CompilerParams(dimension_semantics=("parallel",)),
    )(a_t.astype(jnp.float32), v_t.astype(jnp.bfloat16))
    return out[:, :, :G]


# ------------------------------ conv / im2col ------------------------------

def _im2col(x_nchw, kh, kw, stride, pad):
    x_nchw = x_nchw.astype(jnp.bfloat16)   # halve the im2col blow-up in HBM
    B, C, H, W = x_nchw.shape
    xp = jnp.pad(x_nchw, ((0, 0), (0, 0), (pad, pad), (pad, pad)))
    Ho = (H + 2 * pad - kh) // stride + 1
    Wo = (W + 2 * pad - kw) // stride + 1
    cols = []
    for i in range(kh):
        for j in range(kw):
            cols.append(xp[:, :, i:i + stride * Ho:stride, j:j + stride * Wo:stride])
    col = jnp.stack(cols, axis=2)                       # (B, C, kh*kw, Ho, Wo)
    col = col.transpose(0, 3, 4, 1, 2).reshape(B * Ho * Wo, C * kh * kw)
    return col, Ho, Wo


def conv2d(x_nchw, wmat, k, stride, pad, scale=None, shift=None, act="none"):
    """NCHW conv via im2col + Pallas matmul; wmat pre-transposed (C*k*k, O)."""
    B, C, H, W = x_nchw.shape
    O = wmat.shape[1]
    col, Ho, Wo = _im2col(x_nchw, k, k, stride, pad)
    out = pallas_linear(col, wmat, b=shift, act=act, scale=scale)
    return out.reshape(B, Ho, Wo, O).transpose(0, 3, 1, 2)   # NCHW


def _unfold(x_nchw, K, pad, stride):
    """Matches torch.nn.Unfold: (B, C*K*K, L), channel-major, kernel row-major."""
    B, C, H, W = x_nchw.shape
    xp = jnp.pad(x_nchw, ((0, 0), (0, 0), (pad, pad), (pad, pad)))
    Ho = (H + 2 * pad - K) // stride + 1
    Wo = (W + 2 * pad - K) // stride + 1
    cols = []
    for i in range(K):
        for j in range(K):
            cols.append(xp[:, :, i:i + stride * Ho:stride, j:j + stride * Wo:stride])
    col = jnp.stack(cols, axis=2)                       # (B, C, K*K, Ho, Wo)
    return col.reshape(B, C * K * K, Ho * Wo)


def _fold(cols, H, W, K, pad, stride):
    """Matches torch.nn.Fold (sums overlapping contributions)."""
    B = cols.shape[0]
    C = cols.shape[1] // (K * K)
    Ho = (H + 2 * pad - K) // stride + 1
    Wo = (W + 2 * pad - K) // stride + 1
    cols = cols.reshape(B, C, K, K, Ho, Wo)
    out = jnp.zeros((B, C, H + 2 * pad, W + 2 * pad), jnp.float32)
    for i in range(K):
        for j in range(K):
            out = out.at[:, :, i:i + stride * Ho:stride,
                         j:j + stride * Wo:stride].add(cols[:, :, i, j])
    return out[:, :, pad:pad + H, pad:pad + W]


# ------------------------------ model modules ------------------------------

def mlp(p, x, norm=None):
    h = pallas_linear(x, p["fc1"]["w"], p["fc1"]["b"], act="gelu", ln=norm)
    return pallas_linear(h, p["fc2"]["w"], p["fc2"]["b"])


def mhsa(p, x, head, norm):
    B, N, D = x.shape
    dk = D // head
    qkv = pallas_linear(x, p["qkv_w"], ln=norm)         # LN fused, no bias
    q, k, v = jnp.split(qkv, 3, axis=-1)

    def to_heads(t):
        return t.reshape(B, N, head, dk).transpose(0, 2, 1, 3).reshape(B * head, N, dk)

    q, k, v = map(to_heads, (q, k, v))
    o = pallas_attention(q, k, v, 1.0 / math.sqrt(dk))
    o = o.reshape(B, head, N, dk).transpose(0, 2, 1, 3).reshape(B, N, D)
    return pallas_linear(o, p["proj"]["w"], p["proj"]["b"])


def mhca(p, z, head, norm):
    B, N, D = z.shape
    dk = D // head
    # LayerNorm is per-token, so fusing it into the q and kv matmuls separately
    # is identical to norm1(z) followed by the slices.
    q = pallas_linear(z[:, :1], p["q_w"], ln=norm)      # (B, 1, D), no bias
    kv = pallas_linear(z[:, 1:], p["kv_w"], ln=norm)    # (B, N-1, 2D), no bias
    k, v = jnp.split(kv, 2, axis=-1)
    q = q.reshape(B, 1, head, dk).transpose(0, 2, 1, 3).reshape(B * head, 1, dk)
    k = k.reshape(B, N - 1, head, dk).transpose(0, 2, 1, 3).reshape(B * head, N - 1, dk)
    v = v.reshape(B, N - 1, head, dk).transpose(0, 2, 1, 3).reshape(B * head, N - 1, dk)
    o = pallas_attention(q, k, v, 1.0 / math.sqrt(dk))
    o = o.reshape(B, head, 1, dk).transpose(0, 2, 1, 3).reshape(B, 1, D)
    return pallas_linear(o, p["proj"]["w"], p["proj"]["b"])


def outlook_attn(p, x, cfg):
    B, N, D = x.shape
    H = cfg["H"] // 8
    W = cfg["W"] // 8
    K = cfg["K"]
    pad = cfg["padding"]
    stride = cfg["stride"]
    head = cfg["s1_head"]
    dim = cfg["s1_dim"]
    dk = dim // head
    KK = K * K
    hp, wp = H // stride, W // stride
    seq_len = hp * wp
    G = B * seq_len * head
    scale = (dim / head) ** (-0.5)

    v = pallas_linear(x, p["v_pj_w"])                   # (B, N, dim), no bias
    v_map = v.transpose(0, 2, 1).reshape(B, dim, H, W)
    vu = _unfold(v_map, K, pad, stride)                 # (B, dim*K*K, L)
    vu = vu.reshape(B, head, dk, KK, seq_len)
    v_t = vu.transpose(3, 2, 0, 4, 1).reshape(KK, dk, G)

    xm = x.transpose(0, 2, 1).reshape(B, dim, H, W)
    # AvgPool2d (H, W assumed multiples of stride, matching the reference cfg)
    x_pool = xm.reshape(B, dim, hp, stride, wp, stride).mean(axis=(3, 5))
    a_in = x_pool.transpose(0, 2, 3, 1).reshape(B * seq_len, dim)
    a = pallas_linear(a_in, p["attn_w"], p["attn_b"])   # 1x1 conv == linear
    a = a.reshape(B, seq_len, head, KK, KK)
    a_t = a.transpose(3, 4, 0, 1, 2).reshape(KK, KK, G)

    out = pallas_outlook_av(a_t, v_t, scale)            # (KK, dk, G)
    out = out.reshape(KK, dk, B, seq_len, head)
    out = out.transpose(2, 4, 1, 0, 3).reshape(B, dim * KK, seq_len)
    folded = _fold(out, H, W, K, pad, stride)           # (B, dim, H, W)
    y = folded.transpose(0, 2, 3, 1).reshape(B, H * W, dim)
    return pallas_linear(y, p["proj"]["w"], p["proj"]["b"])


def outlooker(p, x, cfg):
    # ln1 output feeds both v_pj and the avg-pool/attn path -> keep standalone.
    x_hat = outlook_attn(p["oa"], layer_norm(x, p["ln1"], 1e-6), cfg) + x
    z = mlp(p["mlp"], x_hat, norm=_ln_args(p["ln2"], 1e-6)) + x_hat
    return z


def self_attention(p, x, head):
    # DropPath / attention dropout have rate 0.0 here -> identity.
    x = mhsa(p, x, head, norm=_ln_args(p["norm1"], 1e-6)) + x
    x = mlp(p["mlp"], x, norm=_ln_args(p["norm2"], 1e-6)) + x
    return x


def class_attention(p, cls_tok, x, head):
    z = jnp.concatenate([cls_tok, x], axis=1)
    cls_tok = mhca(p, z, head, norm=_ln_args(p["norm1"], 1e-6)) + cls_tok
    cls_tok = mlp(p["mlp"], cls_tok, norm=_ln_args(p["norm2"], 1e-6)) + cls_tok
    return cls_tok, x


def patch_embedding1(p, x):
    h = conv2d(x, p["c1"]["w"], 7, 2, 3, p["c1"]["scale"], p["c1"]["shift"], "relu")
    h = conv2d(h, p["c2"]["w"], 3, 1, 1, p["c2"]["scale"], p["c2"]["shift"], "relu")
    h = conv2d(h, p["c3"]["w"], 3, 1, 1, p["c3"]["scale"], p["c3"]["shift"], "relu")
    h = conv2d(h, p["c4"]["w"], 4, 4, 0, None, p["c4"]["b"], "none")
    B, O, Ho, Wo = h.shape
    return h.transpose(0, 2, 3, 1).reshape(B, Ho * Wo, O)


def patch_embedding2(p, x, cfg):
    B, N, D = x.shape
    H = cfg["H"] // 8
    W = cfg["W"] // 8
    xm = x.transpose(0, 2, 1).reshape(B, D, H, W)
    h = conv2d(xm, p["w"], 2, 2, 0, None, p["b"], "none")
    _, O, Ho, Wo = h.shape
    out = h.transpose(0, 2, 3, 1).reshape(B, Ho * Wo, O)
    return out + p["pe"]


def volo_forward(params, x, cfg):
    x = patch_embedding1(params["pe1"], x)
    for blk in params["stage1"]:
        x = outlooker(blk, x, cfg)
    x = patch_embedding2(params["pe2"], x, cfg)
    for blk in params["stage2"]:
        x = self_attention(blk, x, cfg["s2_head"])

    B = x.shape[0]
    cls_tok = jnp.broadcast_to(params["cls_token"], (B, 1, cfg["s2_dim"]))
    for blk in params["cls"]:
        cls_tok, x = class_attention(blk, cls_tok, x, cfg["s2_head"])

    # final LayerNorm (eps 1e-5) fused into the classifier matmul; logits f32
    out = pallas_linear(cls_tok, params["classifier"]["w"], params["classifier"]["b"],
                        ln=_ln_args(params["norm"], 1e-5), out_dtype=jnp.float32)
    # token-label aux head (reproduces the original broadcasting exactly:
    # (B,1,C) + (B,C) broadcasts to (B,B,C), same as PyTorch)
    x_aux = pallas_linear(x[:, 1:], params["aux_head"]["w"], params["aux_head"]["b"],
                          out_dtype=jnp.float32)
    out = out + 0.5 * jnp.max(x_aux, axis=1)
    return out


# ------------------------------ param init ---------------------------------

def init_params(seed, cfg):
    holder = [jax.random.PRNGKey(seed)]

    def take(shape, scl=0.05):
        holder[0], sub = jax.random.split(holder[0])
        return scl * jax.random.normal(sub, shape, dtype=jnp.float32)

    def dense(din, dout, bias=True):
        d = {"w": take((din, dout))}
        if bias:
            d["b"] = take((dout,), 0.01)
        return d

    def ln(d):
        return {"g": jnp.ones((d,), jnp.float32) + take((d,), 0.01),
                "b": take((d,), 0.01)}

    def conv_mat(cout, cin, k):
        # torch layout (O, I, kh, kw), pre-transposed once to (C*k*k, O)
        return take((cout, cin, k, k)).reshape(cout, cin * k * k).T

    def conv_bn(cin, cout, k):
        gamma = 1.0 + take((cout,), 0.05)
        beta = take((cout,), 0.05)
        mean = take((cout,), 0.05)
        var = 1.0 + jnp.abs(take((cout,), 0.05))
        scale = gamma * jax.lax.rsqrt(var + 1e-5)
        shift = beta - mean * scale
        return {"w": conv_mat(cout, cin, k), "scale": scale, "shift": shift}

    def mlp_p(d, r):
        return {"fc1": dense(d, d * r), "fc2": dense(d * r, d)}

    s1d, s2d = cfg["s1_dim"], cfg["s2_dim"]
    h1 = cfg["s1_head"]
    r1, r2 = cfg["s1_mlp_ratio"], cfg["s2_mlp_ratio"]
    K = cfg["K"]
    hid = cfg["stem_hidden_dim"]
    nc = cfg["num_classes"]

    params = {
        "pe1": {
            "c1": conv_bn(3, hid, 7),
            "c2": conv_bn(hid, hid, 3),
            "c3": conv_bn(hid, hid, 3),
            "c4": {"w": conv_mat(s1d, hid, 4), "b": take((s1d,), 0.01)},
        },
        "stage1": [],
        "pe2": {"w": conv_mat(s2d, s1d, 2), "b": take((s2d,), 0.01),
                "pe": take((1, cfg["pe2_len"], s2d))},
        "stage2": [],
        "cls": [],
        "cls_token": take((1, 1, s2d)),
        "norm": ln(s2d),
        "classifier": dense(s2d, nc),
        "aux_head": dense(s2d, nc),
    }
    for _ in range(cfg["s1_num"]):
        params["stage1"].append({
            "oa": {
                "v_pj_w": take((s1d, s1d)),
                "attn_w": take((s1d, h1 * K ** 4)),
                "attn_b": take((h1 * K ** 4,), 0.01),
                "proj": dense(s1d, s1d),
            },
            "mlp": mlp_p(s1d, r1),
            "ln1": ln(s1d), "ln2": ln(s1d),
        })
    for _ in range(cfg["s2_num"]):
        params["stage2"].append({
            "qkv_w": take((s2d, 3 * s2d)),
            "proj": dense(s2d, s2d),
            "mlp": mlp_p(s2d, r2),
            "norm1": ln(s2d), "norm2": ln(s2d),
        })
    for _ in range(2):
        params["cls"].append({
            "q_w": take((s2d, s2d)),
            "kv_w": take((s2d, 2 * s2d)),
            "proj": dense(s2d, s2d),
            "mlp": mlp_p(s2d, r2),
            "norm1": ln(s2d), "norm2": ln(s2d),
        })
    return params


# ---------------------------------- main ------------------------------------

CFG = dict(num_classes=10,
           s1_num=1, s1_dim=32, s1_head=2, s1_mlp_ratio=2,
           s2_num=1, s2_dim=64, s2_head=4, s2_mlp_ratio=2,
           H=32, W=32, K=3, padding=1, stride=2, stem_hidden_dim=16)
CFG["pe2_len"] = (CFG["H"] // 16) * (CFG["W"] // 16)


if __name__ == "__main__":
    key = jax.random.PRNGKey(0)
    x = jax.random.normal(key, (2, 3, CFG["H"], CFG["W"]), dtype=jnp.float32)  # NCHW
    params = init_params(42, CFG)

    fwd = jax.jit(functools.partial(volo_forward, cfg=CFG))
    out = fwd(params, x)
    jax.block_until_ready(out)
    assert out.shape == (2, 2, CFG["num_classes"])  # (B,1,C)+(B,C) broadcast, as in torch
    assert jnp.all(jnp.isfinite(out))
    print("KERNEL_OK")
</pallas_src>

<mosaic_0001>
module attributes {stable_mosaic.version = 11 : i64} {
  func.func @_mm_direct_kernel(%arg0: i32, %arg1: i32, %arg2: memref<256x147xbf16, #tpu.memory_space<vmem>>, %arg3: memref<147x128xbf16, #tpu.memory_space<vmem>>, %arg4: memref<1x128xf32, #tpu.memory_space<vmem>>, %arg5: memref<1x128xf32, #tpu.memory_space<vmem>>, %arg6: memref<256x128xbf16, #tpu.memory_space<vmem>>) attributes {dimension_semantics = [#tpu.dimension_semantics<parallel>, #tpu.dimension_semantics<parallel>], iteration_bounds = array<i64: 2, 1>, scalar_prefetch = 0 : i64, scratch_operands = 0 : i64, tpu.core_type = #tpu.core_type<tc>, window_params = [{transform_indices = @transform_0, window_bounds = array<i64: 256, 147>}, {transform_indices = @transform_1, window_bounds = array<i64: 147, 128>}, {transform_indices = @transform_2, window_bounds = array<i64: 1, 128>}, {transform_indices = @transform_3, window_bounds = array<i64: 1, 128>}, {transform_indices = @transform_4, window_bounds = array<i64: 256, 128>}]} {
    %c0 = arith.constant 0 : index
    %c0_0 = arith.constant 0 : index
    %0 = vector.load %arg2[%c0, %c0_0] : memref<256x147xbf16, #tpu.memory_space<vmem>>, vector<256x147xbf16>
    %c0_1 = arith.constant 0 : index
    %c0_2 = arith.constant 0 : index
    %1 = vector.load %arg3[%c0_1, %c0_2] : memref<147x128xbf16, #tpu.memory_space<vmem>>, vector<147x128xbf16>
    %cst = arith.constant dense<0.000000e+00> : vector<256x128xf32>
    %2 = tpu.matmul %0, %1, %cst {dimension_numbers = #tpu.dot_dimension_numbers<[1], [0], [0], [1], [0, 0, 1, 1], [], []>} : vector<256x147xbf16>, vector<147x128xbf16>, vector<256x128xf32> -> vector<256x128xf32>
    %c0_3 = arith.constant 0 : index
    %c0_4 = arith.constant 0 : index
    %3 = vector.load %arg4[%c0_3, %c0_4] : memref<1x128xf32, #tpu.memory_space<vmem>>, vector<1x128xf32>
    %c0_5 = arith.constant 0 : index
    %c0_6 = arith.constant 0 : index
    %4 = vector.load %arg5[%c0_5, %c0_6] : memref<1x128xf32, #tpu.memory_space<vmem>>, vector<1x128xf32>
    %5 = vector.broadcast %3 : vector<1x128xf32> to vector<256x128xf32>
    %6 = arith.mulf %2, %5 : vector<256x128xf32>
    %7 = vector.broadcast %4 : vector<1x128xf32> to vector<256x128xf32>
    %8 = arith.addf %6, %7 : vector<256x128xf32>
    %cst_7 = arith.constant 0.000000e+00 : f32
    %9 = vector.broadcast %cst_7 : f32 to vector<256x128xf32>
    %10 = arith.maximumf %8, %9 : vector<256x128xf32>
    %11 = arith.truncf %10 : vector<256x128xf32> to vector<256x128xbf16>
    %c0_8 = arith.constant 0 : index
    %c0_9 = arith.constant 0 : index
    %12 = vector.load %arg6[%c0_8, %c0_9] : memref<256x128xbf16, #tpu.memory_space<vmem>>, vector<256x128xbf16>
    tpu.vector_store %arg6[%c0_8, %c0_9], %11 {strides = array<i32>} : memref<256x128xbf16, #tpu.memory_space<vmem>>, vector<256x128xbf16>,
    return
  }
  func.func @transform_0(%arg0: i32, %arg1: i32) -> (i32, i32) {
    %c0_i32 = arith.constant 0 : i32
    %c0_i32_0 = arith.constant 0 : i32
    return %arg0, %c0_i32 : i32, i32
  }
  func.func @transform_1(%arg0: i32, %arg1: i32) -> (i32, i32) {
    %c0_i32 = arith.constant 0 : i32
    %c0_i32_0 = arith.constant 0 : i32
    return %c0_i32, %arg1 : i32, i32
  }
  func.func @transform_2(%arg0: i32, %arg1: i32) -> (i32, i32) {
    %c0_i32 = arith.constant 0 : i32
    %c0_i32_0 = arith.constant 0 : i32
    return %c0_i32, %arg1 : i32, i32
  }
  func.func @transform_3(%arg0: i32, %arg1: i32) -> (i32, i32) {
    %c0_i32 = arith.constant 0 : i32
    %c0_i32_0 = arith.constant 0 : i32
    return %c0_i32, %arg1 : i32, i32
  }
  func.func @transform_4(%arg0: i32, %arg1: i32) -> (i32, i32) {
    %c0_i32 = arith.constant 0 : i32
    return %arg0, %arg1 : i32, i32
  }
}

module attributes {stable_mosaic.version = 11 : i64} {
  func.func @_mm_direct_kernel(%arg0: i32, %arg1: i32, %arg2: memref<256x144xbf16, #tpu.memory_space<vmem>>, %arg3: memref<144x128xbf16, #tpu.memory_space<vmem>>, %arg4: memref<1x128xf32, #tpu.memory_space<vmem>>, %arg5: memref<1x128xf32, #tpu.memory_space<vmem>>, %arg6: memref<256x128xbf16, #tpu.memory_space<vmem>>) attributes {dimension_semantics = [#tpu.dimension_semantics<parallel>, #tpu.dimension_semantics<parallel>], iteration_bounds = array<i64: 2, 1>, scalar_prefetch = 0 : i64, scratch_operands = 0 : i64, tpu.core_type = #tpu.core_type<tc>, window_params = [{transform_indices = @transform_0, window_bounds = array<i64: 256, 144>}, {transform_indices = @transform_1, window_bounds = array<i64: 144, 128>}, {transform_indices = @transform_2, window_bounds = array<i64: 1, 128>}, {transform_indices = @transform_3, window_bounds = array<i64: 1, 128>}, {transform_indices = @transform_4, window_bounds = array<i64: 256, 128>}]} {
    %c0 = arith.constant 0 : index
    %c0_0 = arith.constant 0 : index
    %0 = vector.load %arg2[%c0, %c0_0] : memref<256x144xbf16, #tpu.memory_space<vmem>>, vector<256x144xbf16>
    %c0_1 = arith.constant 0 : index
    %c0_2 = arith.constant 0 : index
    %1 = vector.load %arg3[%c0_1, %c0_2] : memref<144x128xbf16, #tpu.memory_space<vmem>>, vector<144x128xbf16>
    %cst = arith.constant dense<0.000000e+00> : vector<256x128xf32>
    %2 = tpu.matmul %0, %1, %cst {dimension_numbers = #tpu.dot_dimension_numbers<[1], [0], [0], [1], [0, 0, 1, 1], [], []>} : vector<256x144xbf16>, vector<144x128xbf16>, vector<256x128xf32> -> vector<256x128xf32>
    %c0_3 = arith.constant 0 : index
    %c0_4 = arith.constant 0 : index
    %3 = vector.load %arg4[%c0_3, %c0_4] : memref<1x128xf32, #tpu.memory_space<vmem>>, vector<1x128xf32>
    %c0_5 = arith.constant 0 : index
    %c0_6 = arith.constant 0 : index
    %4 = vector.load %arg5[%c0_5, %c0_6] : memref<1x128xf32, #tpu.memory_space<vmem>>, vector<1x128xf32>
    %5 = vector.broadcast %3 : vector<1x128xf32> to vector<256x128xf32>
    %6 = arith.mulf %2, %5 : vector<256x128xf32>
    %7 = vector.broadcast %4 : vector<1x128xf32> to vector<256x128xf32>
    %8 = arith.addf %6, %7 : vector<256x128xf32>
    %cst_7 = arith.constant 0.000000e+00 : f32
    %9 = vector.broadcast %cst_7 : f32 to vector<256x128xf32>
    %10 = arith.maximumf %8, %9 : vector<256x128xf32>
    %11 = arith.truncf %10 : vector<256x128xf32> to vector<256x128xbf16>
    %c0_8 = arith.constant 0 : index
    %c0_9 = arith.constant 0 : index
    %12 = vector.load %arg6[%c0_8, %c0_9] : memref<256x128xbf16, #tpu.memory_space<vmem>>, vector<256x128xbf16>
    tpu.vector_store %arg6[%c0_8, %c0_9], %11 {strides = array<i32>} : memref<256x128xbf16, #tpu.memory_space<vmem>>, vector<256x128xbf16>,
    return
  }
  func.func @transform_0(%arg0: i32, %arg1: i32) -> (i32, i32) {
    %c0_i32 = arith.constant 0 : i32
    %c0_i32_0 = arith.constant 0 : i32
    return %arg0, %c0_i32 : i32, i32
  }
  func.func @transform_1(%arg0: i32, %arg1: i32) -> (i32, i32) {
    %c0_i32 = arith.constant 0 : i32
    %c0_i32_0 = arith.constant 0 : i32
    return %c0_i32, %arg1 : i32, i32
  }
  func.func @transform_2(%arg0: i32, %arg1: i32) -> (i32, i32) {
    %c0_i32 = arith.constant 0 : i32
    %c0_i32_0 = arith.constant 0 : i32
    return %c0_i32, %arg1 : i32, i32
  }
  func.func @transform_3(%arg0: i32, %arg1: i32) -> (i32, i32) {
    %c0_i32 = arith.constant 0 : i32
    %c0_i32_0 = arith.constant 0 : i32
    return %c0_i32, %arg1 : i32, i32
  }
  func.func @transform_4(%arg0: i32, %arg1: i32) -> (i32, i32) {
    %c0_i32 = arith.constant 0 : i32
    return %arg0, %arg1 : i32, i32
  }
}

module attributes {stable_mosaic.version = 11 : i64} {
  func.func @_mm_direct_kernel(%arg0: i32, %arg1: i32, %arg2: memref<16x256xbf16, #tpu.memory_space<vmem>>, %arg3: memref<256x128xbf16, #tpu.memory_space<vmem>>, %arg4: memref<1x128xf32, #tpu.memory_space<vmem>>, %arg5: memref<1x128xf32, #tpu.memory_space<vmem>>, %arg6: memref<16x128xbf16, #tpu.memory_space<vmem>>) attributes {dimension_semantics = [#tpu.dimension_semantics<parallel>, #tpu.dimension_semantics<parallel>], iteration_bounds = array<i64: 2, 1>, scalar_prefetch = 0 : i64, scratch_operands = 0 : i64, tpu.core_type = #tpu.core_type<tc>, window_params = [{transform_indices = @transform_0, window_bounds = array<i64: 16, 256>}, {transform_indices = @transform_1, window_bounds = array<i64: 256, 128>}, {transform_indices = @transform_2, window_bounds = array<i64: 1, 128>}, {transform_indices = @transform_3, window_bounds = array<i64: 1, 128>}, {transform_indices = @transform_4, window_bounds = array<i64: 16, 128>}]} {
    %c0 = arith.constant 0 : index
    %c0_0 = arith.constant 0 : index
    %0 = vector.load %arg2[%c0, %c0_0] : memref<16x256xbf16, #tpu.memory_space<vmem>>, vector<16x256xbf16>
    %c0_1 = arith.constant 0 : index
    %c0_2 = arith.constant 0 : index
    %1 = vector.load %arg3[%c0_1, %c0_2] : memref<256x128xbf16, #tpu.memory_space<vmem>>, vector<256x128xbf16>
    %cst = arith.constant dense<0.000000e+00> : vector<16x128xf32>
    %2 = tpu.matmul %0, %1, %cst {dimension_numbers = #tpu.dot_dimension_numbers<[1], [0], [0], [1], [0, 0, 1, 1], [], []>} : vector<16x256xbf16>, vector<256x128xbf16>, vector<16x128xf32> -> vector<16x128xf32>
    %c0_3 = arith.constant 0 : index
    %c0_4 = arith.constant 0 : index
    %3 = vector.load %arg4[%c0_3, %c0_4] : memref<1x128xf32, #tpu.memory_space<vmem>>, vector<1x128xf32>
    %c0_5 = arith.constant 0 : index
    %c0_6 = arith.constant 0 : index
    %4 = vector.load %arg5[%c0_5, %c0_6] : memref<1x128xf32, #tpu.memory_space<vmem>>, vector<1x128xf32>
    %5 = vector.broadcast %3 : vector<1x128xf32> to vector<16x128xf32>
    %6 = arith.mulf %2, %5 : vector<16x128xf32>
    %7 = vector.broadcast %4 : vector<1x128xf32> to vector<16x128xf32>
    %8 = arith.addf %6, %7 : vector<16x128xf32>
    %9 = arith.truncf %8 : vector<16x128xf32> to vector<16x128xbf16>
    %c0_7 = arith.constant 0 : index
    %c0_8 = arith.constant 0 : index
    %10 = vector.load %arg6[%c0_7, %c0_8] : memref<16x128xbf16, #tpu.memory_space<vmem>>, vector<16x128xbf16>
    tpu.vector_store %arg6[%c0_7, %c0_8], %9 {strides = array<i32>} : memref<16x128xbf16, #tpu.memory_space<vmem>>, vector<16x128xbf16>,
    return
  }
  func.func @transform_0(%arg0: i32, %arg1: i32) -> (i32, i32) {
    %c0_i32 = arith.constant 0 : i32
    %c0_i32_0 = arith.constant 0 : i32
    return %arg0, %c0_i32 : i32, i32
  }
  func.func @transform_1(%arg0: i32, %arg1: i32) -> (i32, i32) {
    %c0_i32 = arith.constant 0 : i32
    %c0_i32_0 = arith.constant 0 : i32
    return %c0_i32, %arg1 : i32, i32
  }
  func.func @transform_2(%arg0: i32, %arg1: i32) -> (i32, i32) {
    %c0_i32 = arith.constant 0 : i32
    %c0_i32_0 = arith.constant 0 : i32
    return %c0_i32, %arg1 : i32, i32
  }
  func.func @transform_3(%arg0: i32, %arg1: i32) -> (i32, i32) {
    %c0_i32 = arith.constant 0 : i32
    %c0_i32_0 = arith.constant 0 : i32
    return %c0_i32, %arg1 : i32, i32
  }
  func.func @transform_4(%arg0: i32, %arg1: i32) -> (i32, i32) {
    %c0_i32 = arith.constant 0 : i32
    return %arg0, %arg1 : i32, i32
  }
}

module attributes {stable_mosaic.version = 11 : i64} {
  func.func @_layernorm_kernel(%arg0: i32, %arg1: memref<16x32xbf16, #tpu.memory_space<vmem>>, %arg2: memref<1x32xf32, #tpu.memory_space<vmem>>, %arg3: memref<1x32xf32, #tpu.memory_space<vmem>>, %arg4: memref<16x32xbf16, #tpu.memory_space<vmem>>) attributes {dimension_semantics = [#tpu.dimension_semantics<parallel>], iteration_bounds = array<i64: 2>, scalar_prefetch = 0 : i64, scratch_operands = 0 : i64, tpu.core_type = #tpu.core_type<tc>, window_params = [{transform_indices = @transform_0, window_bounds = array<i64: 16, 32>}, {pipeline_mode = #tpu.pipeline_mode<synchronous>, transform_indices = @transform_1, window_bounds = array<i64: 1, 32>}, {pipeline_mode = #tpu.pipeline_mode<synchronous>, transform_indices = @transform_2, window_bounds = array<i64: 1, 32>}, {transform_indices = @transform_3, window_bounds = array<i64: 16, 32>}]} {
    %c0 = arith.constant 0 : index
    %c0_0 = arith.constant 0 : index
    %0 = vector.load %arg1[%c0, %c0_0] : memref<16x32xbf16, #tpu.memory_space<vmem>>, vector<16x32xbf16>
    %1 = arith.extf %0 : vector<16x32xbf16> to vector<16x32xf32>
    %cst = arith.constant dense<0.000000e+00> : vector<16xf32>
    %2 = vector.multi_reduction <add>, %1, %cst [1] : vector<16x32xf32> to vector<16xf32>
    %3 = vector.shape_cast %2 : vector<16xf32> to vector<16x1xf32>
    %cst_1 = arith.constant 3.200000e+01 : f32
    %4 = vector.broadcast %cst_1 : f32 to vector<16x1xf32>
    %5 = arith.divf %3, %4 : vector<16x1xf32>
    %6 = vector.broadcast %5 : vector<16x1xf32> to vector<16x32xf32>
    %7 = arith.subf %1, %6 : vector<16x32xf32>
    %8 = arith.mulf %7, %7 : vector<16x32xf32>
    %cst_2 = arith.constant dense<0.000000e+00> : vector<16xf32>
    %9 = vector.multi_reduction <add>, %8, %cst_2 [1] : vector<16x32xf32> to vector<16xf32>
    %10 = vector.shape_cast %9 : vector<16xf32> to vector<16x1xf32>
    %cst_3 = arith.constant 3.200000e+01 : f32
    %11 = vector.broadcast %cst_3 : f32 to vector<16x1xf32>
    %12 = arith.divf %10, %11 : vector<16x1xf32>
    %cst_4 = arith.constant 9.99999997E-7 : f32
    %13 = vector.broadcast %cst_4 : f32 to vector<16x1xf32>
    %14 = arith.addf %12, %13 : vector<16x1xf32>
    %15 = math.rsqrt %14 : vector<16x1xf32>
    %16 = vector.broadcast %15 : vector<16x1xf32> to vector<16x32xf32>
    %17 = arith.mulf %7, %16 : vector<16x32xf32>
    %c0_5 = arith.constant 0 : index
    %c0_6 = arith.constant 0 : index
    %18 = vector.load %arg2[%c0_5, %c0_6] : memref<1x32xf32, #tpu.memory_space<vmem>>, vector<1x32xf32>
    %19 = vector.broadcast %18 : vector<1x32xf32> to vector<16x32xf32>
    %20 = arith.mulf %17, %19 : vector<16x32xf32>
    %c0_7 = arith.constant 0 : index
    %c0_8 = arith.constant 0 : index
    %21 = vector.load %arg3[%c0_7, %c0_8] : memref<1x32xf32, #tpu.memory_space<vmem>>, vector<1x32xf32>
    %22 = vector.broadcast %21 : vector<1x32xf32> to vector<16x32xf32>
    %23 = arith.addf %20, %22 : vector<16x32xf32>
    %24 = arith.truncf %23 : vector<16x32xf32> to vector<16x32xbf16>
    %c0_9 = arith.constant 0 : index
    %c0_10 = arith.constant 0 : index
    %25 = vector.load %arg4[%c0_9, %c0_10] : memref<16x32xbf16, #tpu.memory_space<vmem>>, vector<16x32xbf16>
    tpu.vector_store %arg4[%c0_9, %c0_10], %24 {strides = array<i32>} : memref<16x32xbf16, #tpu.memory_space<vmem>>, vector<16x32xbf16>,
    return
  }
  func.func @transform_0(%arg0: i32) -> (i32, i32) {
    %c0_i32 = arith.constant 0 : i32
    %c0_i32_0 = arith.constant 0 : i32
    return %arg0, %c0_i32 : i32, i32
  }
  func.func @transform_1(%arg0: i32) -> (i32, i32) {
    %c0_i32 = arith.constant 0 : i32
    %c0_i32_0 = arith.constant 0 : i32
    %c0_i32_1 = arith.constant 0 : i32
    return %c0_i32, %c0_i32_0 : i32, i32
  }
  func.func @transform_2(%arg0: i32) -> (i32, i32) {
    %c0_i32 = arith.constant 0 : i32
    %c0_i32_0 = arith.constant 0 : i32
    %c0_i32_1 = arith.constant 0 : i32
    return %c0_i32, %c0_i32_0 : i32, i32
  }
  func.func @transform_3(%arg0: i32) -> (i32, i32) {
    %c0_i32 = arith.constant 0 : i32
    %c0_i32_0 = arith.constant 0 : i32
    return %arg0, %c0_i32 : i32, i32
  }
}

module attributes {stable_mosaic.version = 11 : i64} {
  func.func @_mm_direct_kernel(%arg0: i32, %arg1: i32, %arg2: memref<16x32xbf16, #tpu.memory_space<vmem>>, %arg3: memref<32x128xbf16, #tpu.memory_space<vmem>>, %arg4: memref<1x128xf32, #tpu.memory_space<vmem>>, %arg5: memref<1x128xf32, #tpu.memory_space<vmem>>, %arg6: memref<16x128xbf16, #tpu.memory_space<vmem>>) attributes {dimension_semantics = [#tpu.dimension_semantics<parallel>, #tpu.dimension_semantics<parallel>], iteration_bounds = array<i64: 2, 1>, scalar_prefetch = 0 : i64, scratch_operands = 0 : i64, tpu.core_type = #tpu.core_type<tc>, window_params = [{transform_indices = @transform_0, window_bounds = array<i64: 16, 32>}, {transform_indices = @transform_1, window_bounds = array<i64: 32, 128>}, {transform_indices = @transform_2, window_bounds = array<i64: 1, 128>}, {transform_indices = @transform_3, window_bounds = array<i64: 1, 128>}, {transform_indices = @transform_4, window_bounds = array<i64: 16, 128>}]} {
    %c0 = arith.constant 0 : index
    %c0_0 = arith.constant 0 : index
    %0 = vector.load %arg2[%c0, %c0_0] : memref<16x32xbf16, #tpu.memory_space<vmem>>, vector<16x32xbf16>
    %c0_1 = arith.constant 0 : index
    %c0_2 = arith.constant 0 : index
    %1 = vector.load %arg3[%c0_1, %c0_2] : memref<32x128xbf16, #tpu.memory_space<vmem>>, vector<32x128xbf16>
    %cst = arith.constant dense<0.000000e+00> : vector<16x128xf32>
    %2 = tpu.matmul %0, %1, %cst {dimension_numbers = #tpu.dot_dimension_numbers<[1], [0], [0], [1], [0, 0, 1, 1], [], []>} : vector<16x32xbf16>, vector<32x128xbf16>, vector<16x128xf32> -> vector<16x128xf32>
    %c0_3 = arith.constant 0 : index
    %c0_4 = arith.constant 0 : index
    %3 = vector.load %arg4[%c0_3, %c0_4] : memref<1x128xf32, #tpu.memory_space<vmem>>, vector<1x128xf32>
    %c0_5 = arith.constant 0 : index
    %c0_6 = arith.constant 0 : index
    %4 = vector.load %arg5[%c0_5, %c0_6] : memref<1x128xf32, #tpu.memory_space<vmem>>, vector<1x128xf32>
    %5 = vector.broadcast %3 : vector<1x128xf32> to vector<16x128xf32>
    %6 = arith.mulf %2, %5 : vector<16x128xf32>
    %7 = vector.broadcast %4 : vector<1x128xf32> to vector<16x128xf32>
    %8 = arith.addf %6, %7 : vector<16x128xf32>
    %9 = arith.truncf %8 : vector<16x128xf32> to vector<16x128xbf16>
    %c0_7 = arith.constant 0 : index
    %c0_8 = arith.constant 0 : index
    %10 = vector.load %arg6[%c0_7, %c0_8] : memref<16x128xbf16, #tpu.memory_space<vmem>>, vector<16x128xbf16>
    tpu.vector_store %arg6[%c0_7, %c0_8], %9 {strides = array<i32>} : memref<16x128xbf16, #tpu.memory_space<vmem>>, vector<16x128xbf16>,
    return
  }
  func.func @transform_0(%arg0: i32, %arg1: i32) -> (i32, i32) {
    %c0_i32 = arith.constant 0 : i32
    %c0_i32_0 = arith.constant 0 : i32
    return %arg0, %c0_i32 : i32, i32
  }
  func.func @transform_1(%arg0: i32, %arg1: i32) -> (i32, i32) {
    %c0_i32 = arith.constant 0 : i32
    %c0_i32_0 = arith.constant 0 : i32
    return %c0_i32, %arg1 : i32, i32
  }
  func.func @transform_2(%arg0: i32, %arg1: i32) -> (i32, i32) {
    %c0_i32 = arith.constant 0 : i32
    %c0_i32_0 = arith.constant 0 : i32
    return %c0_i32, %arg1 : i32, i32
  }
  func.func @transform_3(%arg0: i32, %arg1: i32) -> (i32, i32) {
    %c0_i32 = arith.constant 0 : i32
    %c0_i32_0 = arith.constant 0 : i32
    return %c0_i32, %arg1 : i32, i32
  }
  func.func @transform_4(%arg0: i32, %arg1: i32) -> (i32, i32) {
    %c0_i32 = arith.constant 0 : i32
    return %arg0, %arg1 : i32, i32
  }
}

module attributes {stable_mosaic.version = 11 : i64} {
  func.func @_mm_direct_kernel(%arg0: i32, %arg1: i32, %arg2: memref<8x32xbf16, #tpu.memory_space<vmem>>, %arg3: memref<32x128xbf16, #tpu.memory_space<vmem>>, %arg4: memref<1x128xf32, #tpu.memory_space<vmem>>, %arg5: memref<1x128xf32, #tpu.memory_space<vmem>>, %arg6: memref<8x128xbf16, #tpu.memory_space<vmem>>) attributes {dimension_semantics = [#tpu.dimension_semantics<parallel>, #tpu.dimension_semantics<parallel>], iteration_bounds = array<i64: 1, 2>, scalar_prefetch = 0 : i64, scratch_operands = 0 : i64, tpu.core_type = #tpu.core_type<tc>, window_params = [{transform_indices = @transform_0, window_bounds = array<i64: 8, 32>}, {transform_indices = @transform_1, window_bounds = array<i64: 32, 128>}, {transform_indices = @transform_2, window_bounds = array<i64: 1, 128>}, {transform_indices = @transform_3, window_bounds = array<i64: 1, 128>}, {transform_indices = @transform_4, window_bounds = array<i64: 8, 128>}]} {
    %c0 = arith.constant 0 : index
    %c0_0 = arith.constant 0 : index
    %0 = vector.load %arg2[%c0, %c0_0] : memref<8x32xbf16, #tpu.memory_space<vmem>>, vector<8x32xbf16>
    %c0_1 = arith.constant 0 : index
    %c0_2 = arith.constant 0 : index
    %1 = vector.load %arg3[%c0_1, %c0_2] : memref<32x128xbf16, #tpu.memory_space<vmem>>, vector<32x128xbf16>
    %cst = arith.constant dense<0.000000e+00> : vector<8x128xf32>
    %2 = tpu.matmul %0, %1, %cst {dimension_numbers = #tpu.dot_dimension_numbers<[1], [0], [0], [1], [0, 0, 1, 1], [], []>} : vector<8x32xbf16>, vector<32x128xbf16>, vector<8x128xf32> -> vector<8x128xf32>
    %c0_3 = arith.constant 0 : index
    %c0_4 = arith.constant 0 : index
    %3 = vector.load %arg4[%c0_3, %c0_4] : memref<1x128xf32, #tpu.memory_space<vmem>>, vector<1x128xf32>
    %c0_5 = arith.constant 0 : index
    %c0_6 = arith.constant 0 : index
    %4 = vector.load %arg5[%c0_5, %c0_6] : memref<1x128xf32, #tpu.memory_space<vmem>>, vector<1x128xf32>
    %5 = vector.broadcast %3 : vector<1x128xf32> to vector<8x128xf32>
    %6 = arith.mulf %2, %5 : vector<8x128xf32>
    %7 = vector.broadcast %4 : vector<1x128xf32> to vector<8x128xf32>
    %8 = arith.addf %6, %7 : vector<8x128xf32>
    %9 = arith.truncf %8 : vector<8x128xf32> to vector<8x128xbf16>
    %c0_7 = arith.constant 0 : index
    %c0_8 = arith.constant 0 : index
    %10 = vector.load %arg6[%c0_7, %c0_8] : memref<8x128xbf16, #tpu.memory_space<vmem>>, vector<8x128xbf16>
    tpu.vector_store %arg6[%c0_7, %c0_8], %9 {strides = array<i32>} : memref<8x128xbf16, #tpu.memory_space<vmem>>, vector<8x128xbf16>,
    return
  }
  func.func @transform_0(%arg0: i32, %arg1: i32) -> (i32, i32) {
    %c0_i32 = arith.constant 0 : i32
    %c0_i32_0 = arith.constant 0 : i32
    return %arg0, %c0_i32 : i32, i32
  }
  func.func @transform_1(%arg0: i32, %arg1: i32) -> (i32, i32) {
    %c0_i32 = arith.constant 0 : i32
    %c0_i32_0 = arith.constant 0 : i32
    return %c0_i32, %arg1 : i32, i32
  }
  func.func @transform_2(%arg0: i32, %arg1: i32) -> (i32, i32) {
    %c0_i32 = arith.constant 0 : i32
    %c0_i32_0 = arith.constant 0 : i32
    return %c0_i32, %arg1 : i32, i32
  }
  func.func @transform_3(%arg0: i32, %arg1: i32) -> (i32, i32) {
    %c0_i32 = arith.constant 0 : i32
    %c0_i32_0 = arith.constant 0 : i32
    return %c0_i32, %arg1 : i32, i32
  }
  func.func @transform_4(%arg0: i32, %arg1: i32) -> (i32, i32) {
    %c0_i32 = arith.constant 0 : i32
    return %arg0, %arg1 : i32, i32
  }
}

module attributes {stable_mosaic.version = 11 : i64} {
  func.func @_outlook_av_kernel(%arg0: i32, %arg1: memref<9x9x128xf32, #tpu.memory_space<vmem>>, %arg2: memref<9x16x128xbf16, #tpu.memory_space<vmem>>, %arg3: memref<9x16x128xbf16, #tpu.memory_space<vmem>>) attributes {dimension_semantics = [#tpu.dimension_semantics<parallel>], iteration_bounds = array<i64: 1>, scalar_prefetch = 0 : i64, scratch_operands = 0 : i64, tpu.core_type = #tpu.core_type<tc>, window_params = [{transform_indices = @transform_0, window_bounds = array<i64: 9, 9, 128>}, {transform_indices = @transform_1, window_bounds = array<i64: 9, 16, 128>}, {transform_indices = @transform_2, window_bounds = array<i64: 9, 16, 128>}]} {
    %c0 = arith.constant 0 : index
    %c0_0 = arith.constant 0 : index
    %c0_1 = arith.constant 0 : index
    %0 = vector.load %arg1[%c0, %c0_0, %c0_1] : memref<9x9x128xf32, #tpu.memory_space<vmem>>, vector<9x9x128xf32>
    %cst = arith.constant 2.500000e-01 : f32
    %1 = vector.broadcast %cst : f32 to vector<9x9x128xf32>
    %2 = arith.mulf %0, %1 : vector<9x9x128xf32>
    %cst_2 = arith.constant dense<0xFF800000> : vector<9x128xf32>
    %3 = vector.multi_reduction <maximumf>, %2, %cst_2 [1] : vector<9x9x128xf32> to vector<9x128xf32>
    %4 = vector.shape_cast %3 : vector<9x128xf32> to vector<9x1x128xf32>
    %5 = vector.broadcast %4 : vector<9x1x128xf32> to vector<9x9x128xf32>
    %6 = arith.subf %2, %5 : vector<9x9x128xf32>
    %7 = math.exp %6 : vector<9x9x128xf32>
    %cst_3 = arith.constant dense<0.000000e+00> : vector<9x128xf32>
    %8 = vector.multi_reduction <add>, %7, %cst_3 [1] : vector<9x9x128xf32> to vector<9x128xf32>
    %9 = vector.shape_cast %8 : vector<9x128xf32> to vector<9x1x128xf32>
    %10 = tpu.reciprocal %9 {approx = true} : vector<9x1x128xf32> -> vector<9x1x128xf32>
    %11 = vector.broadcast %10 : vector<9x1x128xf32> to vector<9x9x128xf32>
    %12 = arith.mulf %7, %11 : vector<9x9x128xf32>
    %c0_4 = arith.constant 0 : index
    %c0_5 = arith.constant 0 : index
    %c0_6 = arith.constant 0 : index
    %13 = vector.load %arg2[%c0_4, %c0_5, %c0_6] : memref<9x16x128xbf16, #tpu.memory_space<vmem>>, vector<9x16x128xbf16>
    %14 = arith.extf %13 : vector<9x16x128xbf16> to vector<9x16x128xf32>
    %15 = vector.extract_strided_slice %12 {offsets = [0, 0, 0], sizes = [9, 1, 128], strides = [1, 1, 1]} : vector<9x9x128xf32> to vector<9x1x128xf32>
    %16 = vector.extract_strided_slice %14 {offsets = [0, 0, 0], sizes = [1, 16, 128], strides = [1, 1, 1]} : vector<9x16x128xf32> to vector<1x16x128xf32>
    %17 = vector.broadcast %15 : vector<9x1x128xf32> to vector<9x16x128xf32>
    %18 = vector.broadcast %16 : vector<1x16x128xf32> to vector<9x16x128xf32>
    %19 = arith.mulf %17, %18 : vector<9x16x128xf32>
    %20 = vector.extract_strided_slice %12 {offsets = [0, 1, 0], sizes = [9, 1, 128], strides = [1, 1, 1]} : vector<9x9x128xf32> to vector<9x1x128xf32>
    %21 = vector.extract_strided_slice %14 {offsets = [1, 0, 0], sizes = [1, 16, 128], strides = [1, 1, 1]} : vector<9x16x128xf32> to vector<1x16x128xf32>
    %22 = vector.broadcast %20 : vector<9x1x128xf32> to vector<9x16x128xf32>
    %23 = vector.broadcast %21 : vector<1x16x128xf32> to vector<9x16x128xf32>
    %24 = arith.mulf %22, %23 : vector<9x16x128xf32>
    %25 = arith.addf %19, %24 : vector<9x16x128xf32>
    %26 = vector.extract_strided_slice %12 {offsets = [0, 2, 0], sizes = [9, 1, 128], strides = [1, 1, 1]} : vector<9x9x128xf32> to vector<9x1x128xf32>
    %27 = vector.extract_strided_slice %14 {offsets = [2, 0, 0], sizes = [1, 16, 128], strides = [1, 1, 1]} : vector<9x16x128xf32> to vector<1x16x128xf32>
    %28 = vector.broadcast %26 : vector<9x1x128xf32> to vector<9x16x128xf32>
    %29 = vector.broadcast %27 : vector<1x16x128xf32> to vector<9x16x128xf32>
    %30 = arith.mulf %28, %29 : vector<9x16x128xf32>
    %31 = arith.addf %25, %30 : vector<9x16x128xf32>
    %32 = vector.extract_strided_slice %12 {offsets = [0, 3, 0], sizes = [9, 1, 128], strides = [1, 1, 1]} : vector<9x9x128xf32> to vector<9x1x128xf32>
    %33 = vector.extract_strided_slice %14 {offsets = [3, 0, 0], sizes = [1, 16, 128], strides = [1, 1, 1]} : vector<9x16x128xf32> to vector<1x16x128xf32>
    %34 = vector.broadcast %32 : vector<9x1x128xf32> to vector<9x16x128xf32>
    %35 = vector.broadcast %33 : vector<1x16x128xf32> to vector<9x16x128xf32>
    %36 = arith.mulf %34, %35 : vector<9x16x128xf32>
    %37 = arith.addf %31, %36 : vector<9x16x128xf32>
    %38 = vector.extract_strided_slice %12 {offsets = [0, 4, 0], sizes = [9, 1, 128], strides = [1, 1, 1]} : vector<9x9x128xf32> to vector<9x1x128xf32>
    %39 = vector.extract_strided_slice %14 {offsets = [4, 0, 0], sizes = [1, 16, 128], strides = [1, 1, 1]} : vector<9x16x128xf32> to vector<1x16x128xf32>
    %40 = vector.broadcast %38 : vector<9x1x128xf32> to vector<9x16x128xf32>
    %41 = vector.broadcast %39 : vector<1x16x128xf32> to vector<9x16x128xf32>
    %42 = arith.mulf %40, %41 : vector<9x16x128xf32>
    %43 = arith.addf %37, %42 : vector<9x16x128xf32>
    %44 = vector.extract_strided_slice %12 {offsets = [0, 5, 0], sizes = [9, 1, 128], strides = [1, 1, 1]} : vector<9x9x128xf32> to vector<9x1x128xf32>
    %45 = vector.extract_strided_slice %14 {offsets = [5, 0, 0], sizes = [1, 16, 128], strides = [1, 1, 1]} : vector<9x16x128xf32> to vector<1x16x128xf32>
    %46 = vector.broadcast %44 : vector<9x1x128xf32> to vector<9x16x128xf32>
    %47 = vector.broadcast %45 : vector<1x16x128xf32> to vector<9x16x128xf32>
    %48 = arith.mulf %46, %47 : vector<9x16x128xf32>
    %49 = arith.addf %43, %48 : vector<9x16x128xf32>
    %50 = vector.extract_strided_slice %12 {offsets = [0, 6, 0], sizes = [9, 1, 128], strides = [1, 1, 1]} : vector<9x9x128xf32> to vector<9x1x128xf32>
    %51 = vector.extract_strided_slice %14 {offsets = [6, 0, 0], sizes = [1, 16, 128], strides = [1, 1, 1]} : vector<9x16x128xf32> to vector<1x16x128xf32>
    %52 = vector.broadcast %50 : vector<9x1x128xf32> to vector<9x16x128xf32>
    %53 = vector.broadcast %51 : vector<1x16x128xf32> to vector<9x16x128xf32>
    %54 = arith.mulf %52, %53 : vector<9x16x128xf32>
    %55 = arith.addf %49, %54 : vector<9x16x128xf32>
    %56 = vector.extract_strided_slice %12 {offsets = [0, 7, 0], sizes = [9, 1, 128], strides = [1, 1, 1]} : vector<9x9x128xf32> to vector<9x1x128xf32>
    %57 = vector.extract_strided_slice %14 {offsets = [7, 0, 0], sizes = [1, 16, 128], strides = [1, 1, 1]} : vector<9x16x128xf32> to vector<1x16x128xf32>
    %58 = vector.broadcast %56 : vector<9x1x128xf32> to vector<9x16x128xf32>
    %59 = vector.broadcast %57 : vector<1x16x128xf32> to vector<9x16x128xf32>
    %60 = arith.mulf %58, %59 : vector<9x16x128xf32>
    %61 = arith.addf %55, %60 : vector<9x16x128xf32>
    %62 = vector.extract_strided_slice %12 {offsets = [0, 8, 0], sizes = [9, 1, 128], strides = [1, 1, 1]} : vector<9x9x128xf32> to vector<9x1x128xf32>
    %63 = vector.extract_strided_slice %14 {offsets = [8, 0, 0], sizes = [1, 16, 128], strides = [1, 1, 1]} : vector<9x16x128xf32> to vector<1x16x128xf32>
    %64 = vector.broadcast %62 : vector<9x1x128xf32> to vector<9x16x128xf32>
    %65 = vector.broadcast %63 : vector<1x16x128xf32> to vector<9x16x128xf32>
    %66 = arith.mulf %64, %65 : vector<9x16x128xf32>
    %67 = arith.addf %61, %66 : vector<9x16x128xf32>
    %68 = arith.truncf %67 : vector<9x16x128xf32> to vector<9x16x128xbf16>
    %c0_7 = arith.constant 0 : index
    %c0_8 = arith.constant 0 : index
    %c0_9 = arith.constant 0 : index
    %69 = vector.load %arg3[%c0_7, %c0_8, %c0_9] : memref<9x16x128xbf16, #tpu.memory_space<vmem>>, vector<9x16x128xbf16>
    tpu.vector_store %arg3[%c0_7, %c0_8, %c0_9], %68 {strides = array<i32>} : memref<9x16x128xbf16, #tpu.memory_space<vmem>>, vector<9x16x128xbf16>,
    return
  }
  func.func @transform_0(%arg0: i32) -> (i32, i32, i32) {
    %c0_i32 = arith.constant 0 : i32
    %c0_i32_0 = arith.constant 0 : i32
    %c0_i32_1 = arith.constant 0 : i32
    return %c0_i32, %c0_i32_0, %arg0 : i32, i32, i32
  }
  func.func @transform_1(%arg0: i32) -> (i32, i32, i32) {
    %c0_i32 = arith.constant 0 : i32
    %c0_i32_0 = arith.constant 0 : i32
    %c0_i32_1 = arith.constant 0 : i32
    return %c0_i32, %c0_i32_0, %arg0 : i32, i32, i32
  }
  func.func @transform_2(%arg0: i32) -> (i32, i32, i32) {
    %c0_i32 = arith.constant 0 : i32
    %c0_i32_0 = arith.constant 0 : i32
    %c0_i32_1 = arith.constant 0 : i32
    return %c0_i32, %c0_i32_0, %arg0 : i32, i32, i32
  }
}

module attributes {stable_mosaic.version = 11 : i64} {
  func.func @_ln_mm_kernel(%arg0: i32, %arg1: i32, %arg2: memref<16x32xbf16, #tpu.memory_space<vmem>>, %arg3: memref<1x32xf32, #tpu.memory_space<vmem>>, %arg4: memref<1x32xf32, #tpu.memory_space<vmem>>, %arg5: memref<32x128xbf16, #tpu.memory_space<vmem>>, %arg6: memref<1x128xf32, #tpu.memory_space<vmem>>, %arg7: memref<1x128xf32, #tpu.memory_space<vmem>>, %arg8: memref<16x128xbf16, #tpu.memory_space<vmem>>) attributes {dimension_semantics = [#tpu.dimension_semantics<parallel>, #tpu.dimension_semantics<parallel>], iteration_bounds = array<i64: 2, 1>, scalar_prefetch = 0 : i64, scratch_operands = 0 : i64, tpu.core_type = #tpu.core_type<tc>, window_params = [{transform_indices = @transform_0, window_bounds = array<i64: 16, 32>}, {pipeline_mode = #tpu.pipeline_mode<synchronous>, transform_indices = @transform_1, window_bounds = array<i64: 1, 32>}, {pipeline_mode = #tpu.pipeline_mode<synchronous>, transform_indices = @transform_2, window_bounds = array<i64: 1, 32>}, {transform_indices = @transform_3, window_bounds = array<i64: 32, 128>}, {transform_indices = @transform_4, window_bounds = array<i64: 1, 128>}, {transform_indices = @transform_5, window_bounds = array<i64: 1, 128>}, {transform_indices = @transform_6, window_bounds = array<i64: 16, 128>}]} {
    %c0 = arith.constant 0 : index
    %c0_0 = arith.constant 0 : index
    %0 = vector.load %arg2[%c0, %c0_0] : memref<16x32xbf16, #tpu.memory_space<vmem>>, vector<16x32xbf16>
    %1 = arith.extf %0 : vector<16x32xbf16> to vector<16x32xf32>
    %cst = arith.constant dense<0.000000e+00> : vector<16xf32>
    %2 = vector.multi_reduction <add>, %1, %cst [1] : vector<16x32xf32> to vector<16xf32>
    %3 = vector.shape_cast %2 : vector<16xf32> to vector<16x1xf32>
    %cst_1 = arith.constant 3.200000e+01 : f32
    %4 = vector.broadcast %cst_1 : f32 to vector<16x1xf32>
    %5 = arith.divf %3, %4 : vector<16x1xf32>
    %6 = vector.broadcast %5 : vector<16x1xf32> to vector<16x32xf32>
    %7 = arith.subf %1, %6 : vector<16x32xf32>
    %8 = arith.mulf %7, %7 : vector<16x32xf32>
    %cst_2 = arith.constant dense<0.000000e+00> : vector<16xf32>
    %9 = vector.multi_reduction <add>, %8, %cst_2 [1] : vector<16x32xf32> to vector<16xf32>
    %10 = vector.shape_cast %9 : vector<16xf32> to vector<16x1xf32>
    %cst_3 = arith.constant 3.200000e+01 : f32
    %11 = vector.broadcast %cst_3 : f32 to vector<16x1xf32>
    %12 = arith.divf %10, %11 : vector<16x1xf32>
    %cst_4 = arith.constant 9.99999997E-7 : f32
    %13 = vector.broadcast %cst_4 : f32 to vector<16x1xf32>
    %14 = arith.addf %12, %13 : vector<16x1xf32>
    %15 = math.rsqrt %14 : vector<16x1xf32>
    %16 = vector.broadcast %15 : vector<16x1xf32> to vector<16x32xf32>
    %17 = arith.mulf %7, %16 : vector<16x32xf32>
    %c0_5 = arith.constant 0 : index
    %c0_6 = arith.constant 0 : index
    %18 = vector.load %arg3[%c0_5, %c0_6] : memref<1x32xf32, #tpu.memory_space<vmem>>, vector<1x32xf32>
    %19 = vector.broadcast %18 : vector<1x32xf32> to vector<16x32xf32>
    %20 = arith.mulf %17, %19 : vector<16x32xf32>
    %c0_7 = arith.constant 0 : index
    %c0_8 = arith.constant 0 : index
    %21 = vector.load %arg4[%c0_7, %c0_8] : memref<1x32xf32, #tpu.memory_space<vmem>>, vector<1x32xf32>
    %22 = vector.broadcast %21 : vector<1x32xf32> to vector<16x32xf32>
    %23 = arith.addf %20, %22 : vector<16x32xf32>
    %24 = arith.truncf %23 : vector<16x32xf32> to vector<16x32xbf16>
    %c0_9 = arith.constant 0 : index
    %c0_10 = arith.constant 0 : index
    %25 = vector.load %arg5[%c0_9, %c0_10] : memref<32x128xbf16, #tpu.memory_space<vmem>>, vector<32x128xbf16>
    %cst_11 = arith.constant dense<0.000000e+00> : vector<16x128xf32>
    %26 = tpu.matmul %24, %25, %cst_11 {dimension_numbers = #tpu.dot_dimension_numbers<[1], [0], [0], [1], [0, 0, 1, 1], [], []>} : vector<16x32xbf16>, vector<32x128xbf16>, vector<16x128xf32> -> vector<16x128xf32>
    %c0_12 = arith.constant 0 : index
    %c0_13 = arith.constant 0 : index
    %27 = vector.load %arg6[%c0_12, %c0_13] : memref<1x128xf32, #tpu.memory_space<vmem>>, vector<1x128xf32>
    %c0_14 = arith.constant 0 : index
    %c0_15 = arith.constant 0 : index
    %28 = vector.load %arg7[%c0_14, %c0_15] : memref<1x128xf32, #tpu.memory_space<vmem>>, vector<1x128xf32>
    %29 = vector.broadcast %27 : vector<1x128xf32> to vector<16x128xf32>
    %30 = arith.mulf %26, %29 : vector<16x128xf32>
    %31 = vector.broadcast %28 : vector<1x128xf32> to vector<16x128xf32>
    %32 = arith.addf %30, %31 : vector<16x128xf32>
    %cst_16 = arith.constant 5.000000e-01 : f32
    %33 = vector.broadcast %cst_16 : f32 to vector<16x128xf32>
    %34 = arith.mulf %33, %32 : vector<16x128xf32>
    %cst_17 = arith.constant 0.707106769 : f32
    %35 = vector.broadcast %cst_17 : f32 to vector<16x128xf32>
    %36 = arith.mulf %32, %35 : vector<16x128xf32>
    %37 = math.erf %36 : vector<16x128xf32>
    %cst_18 = arith.constant 1.000000e+00 : f32
    %38 = vector.broadcast %cst_18 : f32 to vector<16x128xf32>
    %39 = arith.addf %38, %37 : vector<16x128xf32>
    %40 = arith.mulf %34, %39 : vector<16x128xf32>
    %41 = arith.truncf %40 : vector<16x128xf32> to vector<16x128xbf16>
    %c0_19 = arith.constant 0 : index
    %c0_20 = arith.constant 0 : index
    %42 = vector.load %arg8[%c0_19, %c0_20] : memref<16x128xbf16, #tpu.memory_space<vmem>>, vector<16x128xbf16>
    tpu.vector_store %arg8[%c0_19, %c0_20], %41 {strides = array<i32>} : memref<16x128xbf16, #tpu.memory_space<vmem>>, vector<16x128xbf16>,
    return
  }
  func.func @transform_0(%arg0: i32, %arg1: i32) -> (i32, i32) {
    %c0_i32 = arith.constant 0 : i32
    %c0_i32_0 = arith.constant 0 : i32
    return %arg0, %c0_i32 : i32, i32
  }
  func.func @transform_1(%arg0: i32, %arg1: i32) -> (i32, i32) {
    %c0_i32 = arith.constant 0 : i32
    %c0_i32_0 = arith.constant 0 : i32
    %c0_i32_1 = arith.constant 0 : i32
    return %c0_i32, %c0_i32_0 : i32, i32
  }
  func.func @transform_2(%arg0: i32, %arg1: i32) -> (i32, i32) {
    %c0_i32 = arith.constant 0 : i32
    %c0_i32_0 = arith.constant 0 : i32
    %c0_i32_1 = arith.constant 0 : i32
    return %c0_i32, %c0_i32_0 : i32, i32
  }
  func.func @transform_3(%arg0: i32, %arg1: i32) -> (i32, i32) {
    %c0_i32 = arith.constant 0 : i32
    %c0_i32_0 = arith.constant 0 : i32
    return %c0_i32, %arg1 : i32, i32
  }
  func.func @transform_4(%arg0: i32, %arg1: i32) -> (i32, i32) {
    %c0_i32 = arith.constant 0 : i32
    %c0_i32_0 = arith.constant 0 : i32
    return %c0_i32, %arg1 : i32, i32
  }
  func.func @transform_5(%arg0: i32, %arg1: i32) -> (i32, i32) {
    %c0_i32 = arith.constant 0 : i32
    %c0_i32_0 = arith.constant 0 : i32
    return %c0_i32, %arg1 : i32, i32
  }
  func.func @transform_6(%arg0: i32, %arg1: i32) -> (i32, i32) {
    %c0_i32 = arith.constant 0 : i32
    return %arg0, %arg1 : i32, i32
  }
}

module attributes {stable_mosaic.version = 11 : i64} {
  func.func @_mm_direct_kernel(%arg0: i32, %arg1: i32, %arg2: memref<16x64xbf16, #tpu.memory_space<vmem>>, %arg3: memref<64x128xbf16, #tpu.memory_space<vmem>>, %arg4: memref<1x128xf32, #tpu.memory_space<vmem>>, %arg5: memref<1x128xf32, #tpu.memory_space<vmem>>, %arg6: memref<16x128xbf16, #tpu.memory_space<vmem>>) attributes {dimension_semantics = [#tpu.dimension_semantics<parallel>, #tpu.dimension_semantics<parallel>], iteration_bounds = array<i64: 2, 1>, scalar_prefetch = 0 : i64, scratch_operands = 0 : i64, tpu.core_type = #tpu.core_type<tc>, window_params = [{transform_indices = @transform_0, window_bounds = array<i64: 16, 64>}, {transform_indices = @transform_1, window_bounds = array<i64: 64, 128>}, {transform_indices = @transform_2, window_bounds = array<i64: 1, 128>}, {transform_indices = @transform_3, window_bounds = array<i64: 1, 128>}, {transform_indices = @transform_4, window_bounds = array<i64: 16, 128>}]} {
    %c0 = arith.constant 0 : index
    %c0_0 = arith.constant 0 : index
    %0 = vector.load %arg2[%c0, %c0_0] : memref<16x64xbf16, #tpu.memory_space<vmem>>, vector<16x64xbf16>
    %c0_1 = arith.constant 0 : index
    %c0_2 = arith.constant 0 : index
    %1 = vector.load %arg3[%c0_1, %c0_2] : memref<64x128xbf16, #tpu.memory_space<vmem>>, vector<64x128xbf16>
    %cst = arith.constant dense<0.000000e+00> : vector<16x128xf32>
    %2 = tpu.matmul %0, %1, %cst {dimension_numbers = #tpu.dot_dimension_numbers<[1], [0], [0], [1], [0, 0, 1, 1], [], []>} : vector<16x64xbf16>, vector<64x128xbf16>, vector<16x128xf32> -> vector<16x128xf32>
    %c0_3 = arith.constant 0 : index
    %c0_4 = arith.constant 0 : index
    %3 = vector.load %arg4[%c0_3, %c0_4] : memref<1x128xf32, #tpu.memory_space<vmem>>, vector<1x128xf32>
    %c0_5 = arith.constant 0 : index
    %c0_6 = arith.constant 0 : index
    %4 = vector.load %arg5[%c0_5, %c0_6] : memref<1x128xf32, #tpu.memory_space<vmem>>, vector<1x128xf32>
    %5 = vector.broadcast %3 : vector<1x128xf32> to vector<16x128xf32>
    %6 = arith.mulf %2, %5 : vector<16x128xf32>
    %7 = vector.broadcast %4 : vector<1x128xf32> to vector<16x128xf32>
    %8 = arith.addf %6, %7 : vector<16x128xf32>
    %9 = arith.truncf %8 : vector<16x128xf32> to vector<16x128xbf16>
    %c0_7 = arith.constant 0 : index
    %c0_8 = arith.constant 0 : index
    %10 = vector.load %arg6[%c0_7, %c0_8] : memref<16x128xbf16, #tpu.memory_space<vmem>>, vector<16x128xbf16>
    tpu.vector_store %arg6[%c0_7, %c0_8], %9 {strides = array<i32>} : memref<16x128xbf16, #tpu.memory_space<vmem>>, vector<16x128xbf16>,
    return
  }
  func.func @transform_0(%arg0: i32, %arg1: i32) -> (i32, i32) {
    %c0_i32 = arith.constant 0 : i32
    %c0_i32_0 = arith.constant 0 : i32
    return %arg0, %c0_i32 : i32, i32
  }
  func.func @transform_1(%arg0: i32, %arg1: i32) -> (i32, i32) {
    %c0_i32 = arith.constant 0 : i32
    %c0_i32_0 = arith.constant 0 : i32
    return %c0_i32, %arg1 : i32, i32
  }
  func.func @transform_2(%arg0: i32, %arg1: i32) -> (i32, i32) {
    %c0_i32 = arith.constant 0 : i32
    %c0_i32_0 = arith.constant 0 : i32
    return %c0_i32, %arg1 : i32, i32
  }
  func.func @transform_3(%arg0: i32, %arg1: i32) -> (i32, i32) {
    %c0_i32 = arith.constant 0 : i32
    %c0_i32_0 = arith.constant 0 : i32
    return %c0_i32, %arg1 : i32, i32
  }
  func.func @transform_4(%arg0: i32, %arg1: i32) -> (i32, i32) {
    %c0_i32 = arith.constant 0 : i32
    return %arg0, %arg1 : i32, i32
  }
}

module attributes {stable_mosaic.version = 11 : i64} {
  func.func @_mm_direct_kernel(%arg0: i32, %arg1: i32, %arg2: memref<8x128xbf16, #tpu.memory_space<vmem>>, %arg3: memref<128x128xbf16, #tpu.memory_space<vmem>>, %arg4: memref<1x128xf32, #tpu.memory_space<vmem>>, %arg5: memref<1x128xf32, #tpu.memory_space<vmem>>, %arg6: memref<8x128xbf16, #tpu.memory_space<vmem>>) attributes {dimension_semantics = [#tpu.dimension_semantics<parallel>, #tpu.dimension_semantics<parallel>], iteration_bounds = array<i64: 1, 1>, scalar_prefetch = 0 : i64, scratch_operands = 0 : i64, tpu.core_type = #tpu.core_type<tc>, window_params = [{transform_indices = @transform_0, window_bounds = array<i64: 8, 128>}, {transform_indices = @transform_1, window_bounds = array<i64: 128, 128>}, {transform_indices = @transform_2, window_bounds = array<i64: 1, 128>}, {transform_indices = @transform_3, window_bounds = array<i64: 1, 128>}, {transform_indices = @transform_4, window_bounds = array<i64: 8, 128>}]} {
    %c0 = arith.constant 0 : index
    %c0_0 = arith.constant 0 : index
    %0 = vector.load %arg2[%c0, %c0_0] : memref<8x128xbf16, #tpu.memory_space<vmem>>, vector<8x128xbf16>
    %c0_1 = arith.constant 0 : index
    %c0_2 = arith.constant 0 : index
    %1 = vector.load %arg3[%c0_1, %c0_2] : memref<128x128xbf16, #tpu.memory_space<vmem>>, vector<128x128xbf16>
    %cst = arith.constant dense<0.000000e+00> : vector<8x128xf32>
    %2 = tpu.matmul %0, %1, %cst {dimension_numbers = #tpu.dot_dimension_numbers<[1], [0], [0], [1], [0, 0, 1, 1], [], []>} : vector<8x128xbf16>, vector<128x128xbf16>, vector<8x128xf32> -> vector<8x128xf32>
    %c0_3 = arith.constant 0 : index
    %c0_4 = arith.constant 0 : index
    %3 = vector.load %arg4[%c0_3, %c0_4] : memref<1x128xf32, #tpu.memory_space<vmem>>, vector<1x128xf32>
    %c0_5 = arith.constant 0 : index
    %c0_6 = arith.constant 0 : index
    %4 = vector.load %arg5[%c0_5, %c0_6] : memref<1x128xf32, #tpu.memory_space<vmem>>, vector<1x128xf32>
    %5 = vector.broadcast %3 : vector<1x128xf32> to vector<8x128xf32>
    %6 = arith.mulf %2, %5 : vector<8x128xf32>
    %7 = vector.broadcast %4 : vector<1x128xf32> to vector<8x128xf32>
    %8 = arith.addf %6, %7 : vector<8x128xf32>
    %9 = arith.truncf %8 : vector<8x128xf32> to vector<8x128xbf16>
    %c0_7 = arith.constant 0 : index
    %c0_8 = arith.constant 0 : index
    %10 = vector.load %arg6[%c0_7, %c0_8] : memref<8x128xbf16, #tpu.memory_space<vmem>>, vector<8x128xbf16>
    tpu.vector_store %arg6[%c0_7, %c0_8], %9 {strides = array<i32>} : memref<8x128xbf16, #tpu.memory_space<vmem>>, vector<8x128xbf16>,
    return
  }
  func.func @transform_0(%arg0: i32, %arg1: i32) -> (i32, i32) {
    %c0_i32 = arith.constant 0 : i32
    %c0_i32_0 = arith.constant 0 : i32
    return %arg0, %c0_i32 : i32, i32
  }
  func.func @transform_1(%arg0: i32, %arg1: i32) -> (i32, i32) {
    %c0_i32 = arith.constant 0 : i32
    %c0_i32_0 = arith.constant 0 : i32
    return %c0_i32, %arg1 : i32, i32
  }
  func.func @transform_2(%arg0: i32, %arg1: i32) -> (i32, i32) {
    %c0_i32 = arith.constant 0 : i32
    %c0_i32_0 = arith.constant 0 : i32
    return %c0_i32, %arg1 : i32, i32
  }
  func.func @transform_3(%arg0: i32, %arg1: i32) -> (i32, i32) {
    %c0_i32 = arith.constant 0 : i32
    %c0_i32_0 = arith.constant 0 : i32
    return %c0_i32, %arg1 : i32, i32
  }
  func.func @transform_4(%arg0: i32, %arg1: i32) -> (i32, i32) {
    %c0_i32 = arith.constant 0 : i32
    return %arg0, %arg1 : i32, i32
  }
}

module attributes {stable_mosaic.version = 11 : i64} {
  func.func @_ln_mm_kernel(%arg0: i32, %arg1: i32, %arg2: memref<8x64xbf16, #tpu.memory_space<vmem>>, %arg3: memref<1x64xf32, #tpu.memory_space<vmem>>, %arg4: memref<1x64xf32, #tpu.memory_space<vmem>>, %arg5: memref<64x256xbf16, #tpu.memory_space<vmem>>, %arg6: memref<1x256xf32, #tpu.memory_space<vmem>>, %arg7: memref<1x256xf32, #tpu.memory_space<vmem>>, %arg8: memref<8x256xbf16, #tpu.memory_space<vmem>>) attributes {dimension_semantics = [#tpu.dimension_semantics<parallel>, #tpu.dimension_semantics<parallel>], iteration_bounds = array<i64: 1, 1>, scalar_prefetch = 0 : i64, scratch_operands = 0 : i64, tpu.core_type = #tpu.core_type<tc>, window_params = [{transform_indices = @transform_0, window_bounds = array<i64: 8, 64>}, {pipeline_mode = #tpu.pipeline_mode<synchronous>, transform_indices = @transform_1, window_bounds = array<i64: 1, 64>}, {pipeline_mode = #tpu.pipeline_mode<synchronous>, transform_indices = @transform_2, window_bounds = array<i64: 1, 64>}, {transform_indices = @transform_3, window_bounds = array<i64: 64, 256>}, {transform_indices = @transform_4, window_bounds = array<i64: 1, 256>}, {transform_indices = @transform_5, window_bounds = array<i64: 1, 256>}, {transform_indices = @transform_6, window_bounds = array<i64: 8, 256>}]} {
    %c0 = arith.constant 0 : index
    %c0_0 = arith.constant 0 : index
    %0 = vector.load %arg2[%c0, %c0_0] : memref<8x64xbf16, #tpu.memory_space<vmem>>, vector<8x64xbf16>
    %1 = arith.extf %0 : vector<8x64xbf16> to vector<8x64xf32>
    %cst = arith.constant dense<0.000000e+00> : vector<8xf32>
    %2 = vector.multi_reduction <add>, %1, %cst [1] : vector<8x64xf32> to vector<8xf32>
    %3 = vector.shape_cast %2 : vector<8xf32> to vector<8x1xf32>
    %cst_1 = arith.constant 6.400000e+01 : f32
    %4 = vector.broadcast %cst_1 : f32 to vector<8x1xf32>
    %5 = arith.divf %3, %4 : vector<8x1xf32>
    %6 = vector.broadcast %5 : vector<8x1xf32> to vector<8x64xf32>
    %7 = arith.subf %1, %6 : vector<8x64xf32>
    %8 = arith.mulf %7, %7 : vector<8x64xf32>
    %cst_2 = arith.constant dense<0.000000e+00> : vector<8xf32>
    %9 = vector.multi_reduction <add>, %8, %cst_2 [1] : vector<8x64xf32> to vector<8xf32>
    %10 = vector.shape_cast %9 : vector<8xf32> to vector<8x1xf32>
    %cst_3 = arith.constant 6.400000e+01 : f32
    %11 = vector.broadcast %cst_3 : f32 to vector<8x1xf32>
    %12 = arith.divf %10, %11 : vector<8x1xf32>
    %cst_4 = arith.constant 9.99999997E-7 : f32
    %13 = vector.broadcast %cst_4 : f32 to vector<8x1xf32>
    %14 = arith.addf %12, %13 : vector<8x1xf32>
    %15 = math.rsqrt %14 : vector<8x1xf32>
    %16 = vector.broadcast %15 : vector<8x1xf32> to vector<8x64xf32>
    %17 = arith.mulf %7, %16 : vector<8x64xf32>
    %c0_5 = arith.constant 0 : index
    %c0_6 = arith.constant 0 : index
    %18 = vector.load %arg3[%c0_5, %c0_6] : memref<1x64xf32, #tpu.memory_space<vmem>>, vector<1x64xf32>
    %19 = vector.broadcast %18 : vector<1x64xf32> to vector<8x64xf32>
    %20 = arith.mulf %17, %19 : vector<8x64xf32>
    %c0_7 = arith.constant 0 : index
    %c0_8 = arith.constant 0 : index
    %21 = vector.load %arg4[%c0_7, %c0_8] : memref<1x64xf32, #tpu.memory_space<vmem>>, vector<1x64xf32>
    %22 = vector.broadcast %21 : vector<1x64xf32> to vector<8x64xf32>
    %23 = arith.addf %20, %22 : vector<8x64xf32>
    %24 = arith.truncf %23 : vector<8x64xf32> to vector<8x64xbf16>
    %c0_9 = arith.constant 0 : index
    %c0_10 = arith.constant 0 : index
    %25 = vector.load %arg5[%c0_9, %c0_10] : memref<64x256xbf16, #tpu.memory_space<vmem>>, vector<64x256xbf16>
    %cst_11 = arith.constant dense<0.000000e+00> : vector<8x256xf32>
    %26 = tpu.matmul %24, %25, %cst_11 {dimension_numbers = #tpu.dot_dimension_numbers<[1], [0], [0], [1], [0, 0, 1, 1], [], []>} : vector<8x64xbf16>, vector<64x256xbf16>, vector<8x256xf32> -> vector<8x256xf32>
    %c0_12 = arith.constant 0 : index
    %c0_13 = arith.constant 0 : index
    %27 = vector.load %arg6[%c0_12, %c0_13] : memref<1x256xf32, #tpu.memory_space<vmem>>, vector<1x256xf32>
    %c0_14 = arith.constant 0 : index
    %c0_15 = arith.constant 0 : index
    %28 = vector.load %arg7[%c0_14, %c0_15] : memref<1x256xf32, #tpu.memory_space<vmem>>, vector<1x256xf32>
    %29 = vector.broadcast %27 : vector<1x256xf32> to vector<8x256xf32>
    %30 = arith.mulf %26, %29 : vector<8x256xf32>
    %31 = vector.broadcast %28 : vector<1x256xf32> to vector<8x256xf32>
    %32 = arith.addf %30, %31 : vector<8x256xf32>
    %33 = arith.truncf %32 : vector<8x256xf32> to vector<8x256xbf16>
    %c0_16 = arith.constant 0 : index
    %c0_17 = arith.constant 0 : index
    %34 = vector.load %arg8[%c0_16, %c0_17] : memref<8x256xbf16, #tpu.memory_space<vmem>>, vector<8x256xbf16>
    tpu.vector_store %arg8[%c0_16, %c0_17], %33 {strides = array<i32>} : memref<8x256xbf16, #tpu.memory_space<vmem>>, vector<8x256xbf16>,
    return
  }
  func.func @transform_0(%arg0: i32, %arg1: i32) -> (i32, i32) {
    %c0_i32 = arith.constant 0 : i32
    %c0_i32_0 = arith.constant 0 : i32
    return %arg0, %c0_i32 : i32, i32
  }
  func.func @transform_1(%arg0: i32, %arg1: i32) -> (i32, i32) {
    %c0_i32 = arith.constant 0 : i32
    %c0_i32_0 = arith.constant 0 : i32
    %c0_i32_1 = arith.constant 0 : i32
    return %c0_i32, %c0_i32_0 : i32, i32
  }
  func.func @transform_2(%arg0: i32, %arg1: i32) -> (i32, i32) {
    %c0_i32 = arith.constant 0 : i32
    %c0_i32_0 = arith.constant 0 : i32
    %c0_i32_1 = arith.constant 0 : i32
    return %c0_i32, %c0_i32_0 : i32, i32
  }
  func.func @transform_3(%arg0: i32, %arg1: i32) -> (i32, i32) {
    %c0_i32 = arith.constant 0 : i32
    %c0_i32_0 = arith.constant 0 : i32
    return %c0_i32, %arg1 : i32, i32
  }
  func.func @transform_4(%arg0: i32, %arg1: i32) -> (i32, i32) {
    %c0_i32 = arith.constant 0 : i32
    %c0_i32_0 = arith.constant 0 : i32
    return %c0_i32, %arg1 : i32, i32
  }
  func.func @transform_5(%arg0: i32, %arg1: i32) -> (i32, i32) {
    %c0_i32 = arith.constant 0 : i32
    %c0_i32_0 = arith.constant 0 : i32
    return %c0_i32, %arg1 : i32, i32
  }
  func.func @transform_6(%arg0: i32, %arg1: i32) -> (i32, i32) {
    %c0_i32 = arith.constant 0 : i32
    return %arg0, %arg1 : i32, i32
  }
}

module attributes {stable_mosaic.version = 11 : i64} {
  func.func @_attn_lane_kernel(%arg0: i32, %arg1: memref<4x16x128xbf16, #tpu.memory_space<vmem>>, %arg2: memref<4x16x128xbf16, #tpu.memory_space<vmem>>, %arg3: memref<4x16x128xbf16, #tpu.memory_space<vmem>>, %arg4: memref<4x16x128xbf16, #tpu.memory_space<vmem>>) attributes {dimension_semantics = [#tpu.dimension_semantics<parallel>], iteration_bounds = array<i64: 1>, scalar_prefetch = 0 : i64, scratch_operands = 0 : i64, tpu.core_type = #tpu.core_type<tc>, window_params = [{transform_indices = @transform_0, window_bounds = array<i64: 4, 16, 128>}, {transform_indices = @transform_1, window_bounds = array<i64: 4, 16, 128>}, {transform_indices = @transform_2, window_bounds = array<i64: 4, 16, 128>}, {transform_indices = @transform_3, window_bounds = array<i64: 4, 16, 128>}]} {
    %c0 = arith.constant 0 : index
    %c0_0 = arith.constant 0 : index
    %c0_1 = arith.constant 0 : index
    %0 = vector.load %arg1[%c0, %c0_0, %c0_1] : memref<4x16x128xbf16, #tpu.memory_space<vmem>>, vector<4x16x128xbf16>
    %1 = arith.extf %0 : vector<4x16x128xbf16> to vector<4x16x128xf32>
    %c0_2 = arith.constant 0 : index
    %c0_3 = arith.constant 0 : index
    %c0_4 = arith.constant 0 : index
    %2 = vector.load %arg2[%c0_2, %c0_3, %c0_4] : memref<4x16x128xbf16, #tpu.memory_space<vmem>>, vector<4x16x128xbf16>
    %3 = arith.extf %2 : vector<4x16x128xbf16> to vector<4x16x128xf32>
    %c0_5 = arith.constant 0 : index
    %c0_6 = arith.constant 0 : index
    %c0_7 = arith.constant 0 : index
    %4 = vector.load %arg3[%c0_5, %c0_6, %c0_7] : memref<4x16x128xbf16, #tpu.memory_space<vmem>>, vector<4x16x128xbf16>
    %5 = arith.extf %4 : vector<4x16x128xbf16> to vector<4x16x128xf32>
    %6 = vector.extract_strided_slice %1 {offsets = [0, 0, 0], sizes = [1, 16, 128], strides = [1, 1, 1]} : vector<4x16x128xf32> to vector<1x16x128xf32>
    %7 = vector.shape_cast %6 : vector<1x16x128xf32> to vector<16x128xf32>
    %8 = vector.shape_cast %7 : vector<16x128xf32> to vector<1x16x128xf32>
    %9 = vector.broadcast %8 : vector<1x16x128xf32> to vector<4x16x128xf32>
    %10 = arith.mulf %9, %3 : vector<4x16x128xf32>
    %cst = arith.constant dense<0.000000e+00> : vector<4x128xf32>
    %11 = vector.multi_reduction <add>, %10, %cst [1] : vector<4x16x128xf32> to vector<4x128xf32>
    %12 = vector.extract_strided_slice %1 {offsets = [1, 0, 0], sizes = [1, 16, 128], strides = [1, 1, 1]} : vector<4x16x128xf32> to vector<1x16x128xf32>
    %13 = vector.shape_cast %12 : vector<1x16x128xf32> to vector<16x128xf32>
    %14 = vector.shape_cast %13 : vector<16x128xf32> to vector<1x16x128xf32>
    %15 = vector.broadcast %14 : vector<1x16x128xf32> to vector<4x16x128xf32>
    %16 = arith.mulf %15, %3 : vector<4x16x128xf32>
    %cst_8 = arith.constant dense<0.000000e+00> : vector<4x128xf32>
    %17 = vector.multi_reduction <add>, %16, %cst_8 [1] : vector<4x16x128xf32> to vector<4x128xf32>
    %18 = vector.extract_strided_slice %1 {offsets = [2, 0, 0], sizes = [1, 16, 128], strides = [1, 1, 1]} : vector<4x16x128xf32> to vector<1x16x128xf32>
    %19 = vector.shape_cast %18 : vector<1x16x128xf32> to vector<16x128xf32>
    %20 = vector.shape_cast %19 : vector<16x128xf32> to vector<1x16x128xf32>
    %21 = vector.broadcast %20 : vector<1x16x128xf32> to vector<4x16x128xf32>
    %22 = arith.mulf %21, %3 : vector<4x16x128xf32>
    %cst_9 = arith.constant dense<0.000000e+00> : vector<4x128xf32>
    %23 = vector.multi_reduction <add>, %22, %cst_9 [1] : vector<4x16x128xf32> to vector<4x128xf32>
    %24 = vector.extract_strided_slice %1 {offsets = [3, 0, 0], sizes = [1, 16, 128], strides = [1, 1, 1]} : vector<4x16x128xf32> to vector<1x16x128xf32>
    %25 = vector.shape_cast %24 : vector<1x16x128xf32> to vector<16x128xf32>
    %26 = vector.shape_cast %25 : vector<16x128xf32> to vector<1x16x128xf32>
    %27 = vector.broadcast %26 : vector<1x16x128xf32> to vector<4x16x128xf32>
    %28 = arith.mulf %27, %3 : vector<4x16x128xf32>
    %cst_10 = arith.constant dense<0.000000e+00> : vector<4x128xf32>
    %29 = vector.multi_reduction <add>, %28, %cst_10 [1] : vector<4x16x128xf32> to vector<4x128xf32>
    %30 = vector.shape_cast %11 : vector<4x128xf32> to vector<1x4x128xf32>
    %31 = vector.shape_cast %17 : vector<4x128xf32> to vector<1x4x128xf32>
    %32 = vector.shape_cast %23 : vector<4x128xf32> to vector<1x4x128xf32>
    %33 = vector.shape_cast %29 : vector<4x128xf32> to vector<1x4x128xf32>
    %34 = tpu.concatenate %30, %31, %32, %33 in 0 : vector<1x4x128xf32>, vector<1x4x128xf32>, vector<1x4x128xf32>, vector<1x4x128xf32> -> vector<4x4x128xf32>
    %cst_11 = arith.constant 2.500000e-01 : f32
    %35 = vector.broadcast %cst_11 : f32 to vector<4x4x128xf32>
    %36 = arith.mulf %34, %35 : vector<4x4x128xf32>
    %cst_12 = arith.constant dense<0xFF800000> : vector<4x128xf32>
    %37 = vector.multi_reduction <maximumf>, %36, %cst_12 [1] : vector<4x4x128xf32> to vector<4x128xf32>
    %38 = vector.shape_cast %37 : vector<4x128xf32> to vector<4x1x128xf32>
    %39 = vector.broadcast %38 : vector<4x1x128xf32> to vector<4x4x128xf32>
    %40 = arith.subf %36, %39 : vector<4x4x128xf32>
    %41 = math.exp %40 : vector<4x4x128xf32>
    %cst_13 = arith.constant dense<0.000000e+00> : vector<4x128xf32>
    %42 = vector.multi_reduction <add>, %41, %cst_13 [1] : vector<4x4x128xf32> to vector<4x128xf32>
    %43 = vector.shape_cast %42 : vector<4x128xf32> to vector<4x1x128xf32>
    %44 = tpu.reciprocal %43 {approx = true} : vector<4x1x128xf32> -> vector<4x1x128xf32>
    %45 = vector.broadcast %44 : vector<4x1x128xf32> to vector<4x4x128xf32>
    %46 = arith.mulf %41, %45 : vector<4x4x128xf32>
    %47 = vector.extract_strided_slice %46 {offsets = [0, 0, 0], sizes = [1, 1, 128], strides = [1, 1, 1]} : vector<4x4x128xf32> to vector<1x1x128xf32>
    %48 = vector.shape_cast %47 : vector<1x1x128xf32> to vector<1x128xf32>
    %49 = vector.extract_strided_slice %5 {offsets = [0, 0, 0], sizes = [1, 16, 128], strides = [1, 1, 1]} : vector<4x16x128xf32> to vector<1x16x128xf32>
    %50 = vector.shape_cast %49 : vector<1x16x128xf32> to vector<16x128xf32>
    %51 = vector.broadcast %48 : vector<1x128xf32> to vector<16x128xf32>
    %52 = arith.mulf %51, %50 : vector<16x128xf32>
    %53 = vector.extract_strided_slice %46 {offsets = [0, 1, 0], sizes = [1, 1, 128], strides = [1, 1, 1]} : vector<4x4x128xf32> to vector<1x1x128xf32>
    %54 = vector.shape_cast %53 : vector<1x1x128xf32> to vector<1x128xf32>
    %55 = vector.extract_strided_slice %5 {offsets = [1, 0, 0], sizes = [1, 16, 128], strides = [1, 1, 1]} : vector<4x16x128xf32> to vector<1x16x128xf32>
    %56 = vector.shape_cast %55 : vector<1x16x128xf32> to vector<16x128xf32>
    %57 = vector.broadcast %54 : vector<1x128xf32> to vector<16x128xf32>
    %58 = arith.mulf %57, %56 : vector<16x128xf32>
    %59 = arith.addf %52, %58 : vector<16x128xf32>
    %60 = vector.extract_strided_slice %46 {offsets = [0, 2, 0], sizes = [1, 1, 128], strides = [1, 1, 1]} : vector<4x4x128xf32> to vector<1x1x128xf32>
    %61 = vector.shape_cast %60 : vector<1x1x128xf32> to vector<1x128xf32>
    %62 = vector.extract_strided_slice %5 {offsets = [2, 0, 0], sizes = [1, 16, 128], strides = [1, 1, 1]} : vector<4x16x128xf32> to vector<1x16x128xf32>
    %63 = vector.shape_cast %62 : vector<1x16x128xf32> to vector<16x128xf32>
    %64 = vector.broadcast %61 : vector<1x128xf32> to vector<16x128xf32>
    %65 = arith.mulf %64, %63 : vector<16x128xf32>
    %66 = arith.addf %59, %65 : vector<16x128xf32>
    %67 = vector.extract_strided_slice %46 {offsets = [0, 3, 0], sizes = [1, 1, 128], strides = [1, 1, 1]} : vector<4x4x128xf32> to vector<1x1x128xf32>
    %68 = vector.shape_cast %67 : vector<1x1x128xf32> to vector<1x128xf32>
    %69 = vector.extract_strided_slice %5 {offsets = [3, 0, 0], sizes = [1, 16, 128], strides = [1, 1, 1]} : vector<4x16x128xf32> to vector<1x16x128xf32>
    %70 = vector.shape_cast %69 : vector<1x16x128xf32> to vector<16x128xf32>
    %71 = vector.broadcast %68 : vector<1x128xf32> to vector<16x128xf32>
    %72 = arith.mulf %71, %70 : vector<16x128xf32>
    %73 = arith.addf %66, %72 : vector<16x128xf32>
    %74 = vector.extract_strided_slice %46 {offsets = [1, 0, 0], sizes = [1, 1, 128], strides = [1, 1, 1]} : vector<4x4x128xf32> to vector<1x1x128xf32>
    %75 = vector.shape_cast %74 : vector<1x1x128xf32> to vector<1x128xf32>
    %76 = vector.extract_strided_slice %5 {offsets = [0, 0, 0], sizes = [1, 16, 128], strides = [1, 1, 1]} : vector<4x16x128xf32> to vector<1x16x128xf32>
    %77 = vector.shape_cast %76 : vector<1x16x128xf32> to vector<16x128xf32>
    %78 = vector.broadcast %75 : vector<1x128xf32> to vector<16x128xf32>
    %79 = arith.mulf %78, %77 : vector<16x128xf32>
    %80 = vector.extract_strided_slice %46 {offsets = [1, 1, 0], sizes = [1, 1, 128], strides = [1, 1, 1]} : vector<4x4x128xf32> to vector<1x1x128xf32>
    %81 = vector.shape_cast %80 : vector<1x1x128xf32> to vector<1x128xf32>
    %82 = vector.extract_strided_slice %5 {offsets = [1, 0, 0], sizes = [1, 16, 128], strides = [1, 1, 1]} : vector<4x16x128xf32> to vector<1x16x128xf32>
    %83 = vector.shape_cast %82 : vector<1x16x128xf32> to vector<16x128xf32>
    %84 = vector.broadcast %81 : vector<1x128xf32> to vector<16x128xf32>
    %85 = arith.mulf %84, %83 : vector<16x128xf32>
    %86 = arith.addf %79, %85 : vector<16x128xf32>
    %87 = vector.extract_strided_slice %46 {offsets = [1, 2, 0], sizes = [1, 1, 128], strides = [1, 1, 1]} : vector<4x4x128xf32> to vector<1x1x128xf32>
    %88 = vector.shape_cast %87 : vector<1x1x128xf32> to vector<1x128xf32>
    %89 = vector.extract_strided_slice %5 {offsets = [2, 0, 0], sizes = [1, 16, 128], strides = [1, 1, 1]} : vector<4x16x128xf32> to vector<1x16x128xf32>
    %90 = vector.shape_cast %89 : vector<1x16x128xf32> to vector<16x128xf32>
    %91 = vector.broadcast %88 : vector<1x128xf32> to vector<16x128xf32>
    %92 = arith.mulf %91, %90 : vector<16x128xf32>
    %93 = arith.addf %86, %92 : vector<16x128xf32>
    %94 = vector.extract_strided_slice %46 {offsets = [1, 3, 0], sizes = [1, 1, 128], strides = [1, 1, 1]} : vector<4x4x128xf32> to vector<1x1x128xf32>
    %95 = vector.shape_cast %94 : vector<1x1x128xf32> to vector<1x128xf32>
    %96 = vector.extract_strided_slice %5 {offsets = [3, 0, 0], sizes = [1, 16, 128], strides = [1, 1, 1]} : vector<4x16x128xf32> to vector<1x16x128xf32>
    %97 = vector.shape_cast %96 : vector<1x16x128xf32> to vector<16x128xf32>
    %98 = vector.broadcast %95 : vector<1x128xf32> to vector<16x128xf32>
    %99 = arith.mulf %98, %97 : vector<16x128xf32>
    %100 = arith.addf %93, %99 : vector<16x128xf32>
    %101 = vector.extract_strided_slice %46 {offsets = [2, 0, 0], sizes = [1, 1, 128], strides = [1, 1, 1]} : vector<4x4x128xf32> to vector<1x1x128xf32>
    %102 = vector.shape_cast %101 : vector<1x1x128xf32> to vector<1x128xf32>
    %103 = vector.extract_strided_slice %5 {offsets = [0, 0, 0], sizes = [1, 16, 128], strides = [1, 1, 1]} : vector<4x16x128xf32> to vector<1x16x128xf32>
    %104 = vector.shape_cast %103 : vector<1x16x128xf32> to vector<16x128xf32>
    %105 = vector.broadcast %102 : vector<1x128xf32> to vector<16x128xf32>
    %106 = arith.mulf %105, %104 : vector<16x128xf32>
    %107 = vector.extract_strided_slice %46 {offsets = [2, 1, 0], sizes = [1, 1, 128], strides = [1, 1, 1]} : vector<4x4x128xf32> to vector<1x1x128xf32>
    %108 = vector.shape_cast %107 : vector<1x1x128xf32> to vector<1x128xf32>
    %109 = vector.extract_strided_slice %5 {offsets = [1, 0, 0], sizes = [1, 16, 128], strides = [1, 1, 1]} : vector<4x16x128xf32> to vector<1x16x128xf32>
    %110 = vector.shape_cast %109 : vector<1x16x128xf32> to vector<16x128xf32>
    %111 = vector.broadcast %108 : vector<1x128xf32> to vector<16x128xf32>
    %112 = arith.mulf %111, %110 : vector<16x128xf32>
    %113 = arith.addf %106, %112 : vector<16x128xf32>
    %114 = vector.extract_strided_slice %46 {offsets = [2, 2, 0], sizes = [1, 1, 128], strides = [1, 1, 1]} : vector<4x4x128xf32> to vector<1x1x128xf32>
    %115 = vector.shape_cast %114 : vector<1x1x128xf32> to vector<1x128xf32>
    %116 = vector.extract_strided_slice %5 {offsets = [2, 0, 0], sizes = [1, 16, 128], strides = [1, 1, 1]} : vector<4x16x128xf32> to vector<1x16x128xf32>
    %117 = vector.shape_cast %116 : vector<1x16x128xf32> to vector<16x128xf32>
    %118 = vector.broadcast %115 : vector<1x128xf32> to vector<16x128xf32>
    %119 = arith.mulf %118, %117 : vector<16x128xf32>
    %120 = arith.addf %113, %119 : vector<16x128xf32>
    %121 = vector.extract_strided_slice %46 {offsets = [2, 3, 0], sizes = [1, 1, 128], strides = [1, 1, 1]} : vector<4x4x128xf32> to vector<1x1x128xf32>
    %122 = vector.shape_cast %121 : vector<1x1x128xf32> to vector<1x128xf32>
    %123 = vector.extract_strided_slice %5 {offsets = [3, 0, 0], sizes = [1, 16, 128], strides = [1, 1, 1]} : vector<4x16x128xf32> to vector<1x16x128xf32>
    %124 = vector.shape_cast %123 : vector<1x16x128xf32> to vector<16x128xf32>
    %125 = vector.broadcast %122 : vector<1x128xf32> to vector<16x128xf32>
    %126 = arith.mulf %125, %124 : vector<16x128xf32>
    %127 = arith.addf %120, %126 : vector<16x128xf32>
    %128 = vector.extract_strided_slice %46 {offsets = [3, 0, 0], sizes = [1, 1, 128], strides = [1, 1, 1]} : vector<4x4x128xf32> to vector<1x1x128xf32>
    %129 = vector.shape_cast %128 : vector<1x1x128xf32> to vector<1x128xf32>
    %130 = vector.extract_strided_slice %5 {offsets = [0, 0, 0], sizes = [1, 16, 128], strides = [1, 1, 1]} : vector<4x16x128xf32> to vector<1x16x128xf32>
    %131 = vector.shape_cast %130 : vector<1x16x128xf32> to vector<16x128xf32>
    %132 = vector.broadcast %129 : vector<1x128xf32> to vector<16x128xf32>
    %133 = arith.mulf %132, %131 : vector<16x128xf32>
    %134 = vector.extract_strided_slice %46 {offsets = [3, 1, 0], sizes = [1, 1, 128], strides = [1, 1, 1]} : vector<4x4x128xf32> to vector<1x1x128xf32>
    %135 = vector.shape_cast %134 : vector<1x1x128xf32> to vector<1x128xf32>
    %136 = vector.extract_strided_slice %5 {offsets = [1, 0, 0], sizes = [1, 16, 128], strides = [1, 1, 1]} : vector<4x16x128xf32> to vector<1x16x128xf32>
    %137 = vector.shape_cast %136 : vector<1x16x128xf32> to vector<16x128xf32>
    %138 = vector.broadcast %135 : vector<1x128xf32> to vector<16x128xf32>
    %139 = arith.mulf %138, %137 : vector<16x128xf32>
    %140 = arith.addf %133, %139 : vector<16x128xf32>
    %141 = vector.extract_strided_slice %46 {offsets = [3, 2, 0], sizes = [1, 1, 128], strides = [1, 1, 1]} : vector<4x4x128xf32> to vector<1x1x128xf32>
    %142 = vector.shape_cast %141 : vector<1x1x128xf32> to vector<1x128xf32>
    %143 = vector.extract_strided_slice %5 {offsets = [2, 0, 0], sizes = [1, 16, 128], strides = [1, 1, 1]} : vector<4x16x128xf32> to vector<1x16x128xf32>
    %144 = vector.shape_cast %143 : vector<1x16x128xf32> to vector<16x128xf32>
    %145 = vector.broadcast %142 : vector<1x128xf32> to vector<16x128xf32>
    %146 = arith.mulf %145, %144 : vector<16x128xf32>
    %147 = arith.addf %140, %146 : vector<16x128xf32>
    %148 = vector.extract_strided_slice %46 {offsets = [3, 3, 0], sizes = [1, 1, 128], strides = [1, 1, 1]} : vector<4x4x128xf32> to vector<1x1x128xf32>
    %149 = vector.shape_cast %148 : vector<1x1x128xf32> to vector<1x128xf32>
    %150 = vector.extract_strided_slice %5 {offsets = [3, 0, 0], sizes = [1, 16, 128], strides = [1, 1, 1]} : vector<4x16x128xf32> to vector<1x16x128xf32>
    %151 = vector.shape_cast %150 : vector<1x16x128xf32> to vector<16x128xf32>
    %152 = vector.broadcast %149 : vector<1x128xf32> to vector<16x128xf32>
    %153 = arith.mulf %152, %151 : vector<16x128xf32>
    %154 = arith.addf %147, %153 : vector<16x128xf32>
    %155 = vector.shape_cast %73 : vector<16x128xf32> to vector<1x16x128xf32>
    %156 = vector.shape_cast %100 : vector<16x128xf32> to vector<1x16x128xf32>
    %157 = vector.shape_cast %127 : vector<16x128xf32> to vector<1x16x128xf32>
    %158 = vector.shape_cast %154 : vector<16x128xf32> to vector<1x16x128xf32>
    %159 = tpu.concatenate %155, %156, %157, %158 in 0 : vector<1x16x128xf32>, vector<1x16x128xf32>, vector<1x16x128xf32>, vector<1x16x128xf32> -> vector<4x16x128xf32>
    %160 = arith.truncf %159 : vector<4x16x128xf32> to vector<4x16x128xbf16>
    %c0_14 = arith.constant 0 : index
    %c0_15 = arith.constant 0 : index
    %c0_16 = arith.constant 0 : index
    %161 = vector.load %arg4[%c0_14, %c0_15, %c0_16] : memref<4x16x128xbf16, #tpu.memory_space<vmem>>, vector<4x16x128xbf16>
    tpu.vector_store %arg4[%c0_14, %c0_15, %c0_16], %160 {strides = array<i32>} : memref<4x16x128xbf16, #tpu.memory_space<vmem>>, vector<4x16x128xbf16>,
    return
  }
  func.func @transform_0(%arg0: i32) -> (i32, i32, i32) {
    %c0_i32 = arith.constant 0 : i32
    %c0_i32_0 = arith.constant 0 : i32
    %c0_i32_1 = arith.constant 0 : i32
    return %c0_i32, %c0_i32_0, %arg0 : i32, i32, i32
  }
  func.func @transform_1(%arg0: i32) -> (i32, i32, i32) {
    %c0_i32 = arith.constant 0 : i32
    %c0_i32_0 = arith.constant 0 : i32
    %c0_i32_1 = arith.constant 0 : i32
    return %c0_i32, %c0_i32_0, %arg0 : i32, i32, i32
  }
  func.func @transform_2(%arg0: i32) -> (i32, i32, i32) {
    %c0_i32 = arith.constant 0 : i32
    %c0_i32_0 = arith.constant 0 : i32
    %c0_i32_1 = arith.constant 0 : i32
    return %c0_i32, %c0_i32_0, %arg0 : i32, i32, i32
  }
  func.func @transform_3(%arg0: i32) -> (i32, i32, i32) {
    %c0_i32 = arith.constant 0 : i32
    %c0_i32_0 = arith.constant 0 : i32
    %c0_i32_1 = arith.constant 0 : i32
    return %c0_i32, %c0_i32_0, %arg0 : i32, i32, i32
  }
}

module attributes {stable_mosaic.version = 11 : i64} {
  func.func @_mm_direct_kernel(%arg0: i32, %arg1: i32, %arg2: memref<8x64xbf16, #tpu.memory_space<vmem>>, %arg3: memref<64x128xbf16, #tpu.memory_space<vmem>>, %arg4: memref<1x128xf32, #tpu.memory_space<vmem>>, %arg5: memref<1x128xf32, #tpu.memory_space<vmem>>, %arg6: memref<8x128xbf16, #tpu.memory_space<vmem>>) attributes {dimension_semantics = [#tpu.dimension_semantics<parallel>, #tpu.dimension_semantics<parallel>], iteration_bounds = array<i64: 1, 1>, scalar_prefetch = 0 : i64, scratch_operands = 0 : i64, tpu.core_type = #tpu.core_type<tc>, window_params = [{transform_indices = @transform_0, window_bounds = array<i64: 8, 64>}, {transform_indices = @transform_1, window_bounds = array<i64: 64, 128>}, {transform_indices = @transform_2, window_bounds = array<i64: 1, 128>}, {transform_indices = @transform_3, window_bounds = array<i64: 1, 128>}, {transform_indices = @transform_4, window_bounds = array<i64: 8, 128>}]} {
    %c0 = arith.constant 0 : index
    %c0_0 = arith.constant 0 : index
    %0 = vector.load %arg2[%c0, %c0_0] : memref<8x64xbf16, #tpu.memory_space<vmem>>, vector<8x64xbf16>
    %c0_1 = arith.constant 0 : index
    %c0_2 = arith.constant 0 : index
    %1 = vector.load %arg3[%c0_1, %c0_2] : memref<64x128xbf16, #tpu.memory_space<vmem>>, vector<64x128xbf16>
    %cst = arith.constant dense<0.000000e+00> : vector<8x128xf32>
    %2 = tpu.matmul %0, %1, %cst {dimension_numbers = #tpu.dot_dimension_numbers<[1], [0], [0], [1], [0, 0, 1, 1], [], []>} : vector<8x64xbf16>, vector<64x128xbf16>, vector<8x128xf32> -> vector<8x128xf32>
    %c0_3 = arith.constant 0 : index
    %c0_4 = arith.constant 0 : index
    %3 = vector.load %arg4[%c0_3, %c0_4] : memref<1x128xf32, #tpu.memory_space<vmem>>, vector<1x128xf32>
    %c0_5 = arith.constant 0 : index
    %c0_6 = arith.constant 0 : index
    %4 = vector.load %arg5[%c0_5, %c0_6] : memref<1x128xf32, #tpu.memory_space<vmem>>, vector<1x128xf32>
    %5 = vector.broadcast %3 : vector<1x128xf32> to vector<8x128xf32>
    %6 = arith.mulf %2, %5 : vector<8x128xf32>
    %7 = vector.broadcast %4 : vector<1x128xf32> to vector<8x128xf32>
    %8 = arith.addf %6, %7 : vector<8x128xf32>
    %9 = arith.truncf %8 : vector<8x128xf32> to vector<8x128xbf16>
    %c0_7 = arith.constant 0 : index
    %c0_8 = arith.constant 0 : index
    %10 = vector.load %arg6[%c0_7, %c0_8] : memref<8x128xbf16, #tpu.memory_space<vmem>>, vector<8x128xbf16>
    tpu.vector_store %arg6[%c0_7, %c0_8], %9 {strides = array<i32>} : memref<8x128xbf16, #tpu.memory_space<vmem>>, vector<8x128xbf16>,
    return
  }
  func.func @transform_0(%arg0: i32, %arg1: i32) -> (i32, i32) {
    %c0_i32 = arith.constant 0 : i32
    %c0_i32_0 = arith.constant 0 : i32
    return %arg0, %c0_i32 : i32, i32
  }
  func.func @transform_1(%arg0: i32, %arg1: i32) -> (i32, i32) {
    %c0_i32 = arith.constant 0 : i32
    %c0_i32_0 = arith.constant 0 : i32
    return %c0_i32, %arg1 : i32, i32
  }
  func.func @transform_2(%arg0: i32, %arg1: i32) -> (i32, i32) {
    %c0_i32 = arith.constant 0 : i32
    %c0_i32_0 = arith.constant 0 : i32
    return %c0_i32, %arg1 : i32, i32
  }
  func.func @transform_3(%arg0: i32, %arg1: i32) -> (i32, i32) {
    %c0_i32 = arith.constant 0 : i32
    %c0_i32_0 = arith.constant 0 : i32
    return %c0_i32, %arg1 : i32, i32
  }
  func.func @transform_4(%arg0: i32, %arg1: i32) -> (i32, i32) {
    %c0_i32 = arith.constant 0 : i32
    return %arg0, %arg1 : i32, i32
  }
}

module attributes {stable_mosaic.version = 11 : i64} {
  func.func @_ln_mm_kernel(%arg0: i32, %arg1: i32, %arg2: memref<8x64xbf16, #tpu.memory_space<vmem>>, %arg3: memref<1x64xf32, #tpu.memory_space<vmem>>, %arg4: memref<1x64xf32, #tpu.memory_space<vmem>>, %arg5: memref<64x128xbf16, #tpu.memory_space<vmem>>, %arg6: memref<1x128xf32, #tpu.memory_space<vmem>>, %arg7: memref<1x128xf32, #tpu.memory_space<vmem>>, %arg8: memref<8x128xbf16, #tpu.memory_space<vmem>>) attributes {dimension_semantics = [#tpu.dimension_semantics<parallel>, #tpu.dimension_semantics<parallel>], iteration_bounds = array<i64: 1, 1>, scalar_prefetch = 0 : i64, scratch_operands = 0 : i64, tpu.core_type = #tpu.core_type<tc>, window_params = [{transform_indices = @transform_0, window_bounds = array<i64: 8, 64>}, {pipeline_mode = #tpu.pipeline_mode<synchronous>, transform_indices = @transform_1, window_bounds = array<i64: 1, 64>}, {pipeline_mode = #tpu.pipeline_mode<synchronous>, transform_indices = @transform_2, window_bounds = array<i64: 1, 64>}, {transform_indices = @transform_3, window_bounds = array<i64: 64, 128>}, {transform_indices = @transform_4, window_bounds = array<i64: 1, 128>}, {transform_indices = @transform_5, window_bounds = array<i64: 1, 128>}, {transform_indices = @transform_6, window_bounds = array<i64: 8, 128>}]} {
    %c0 = arith.constant 0 : index
    %c0_0 = arith.constant 0 : index
    %0 = vector.load %arg2[%c0, %c0_0] : memref<8x64xbf16, #tpu.memory_space<vmem>>, vector<8x64xbf16>
    %1 = arith.extf %0 : vector<8x64xbf16> to vector<8x64xf32>
    %cst = arith.constant dense<0.000000e+00> : vector<8xf32>
    %2 = vector.multi_reduction <add>, %1, %cst [1] : vector<8x64xf32> to vector<8xf32>
    %3 = vector.shape_cast %2 : vector<8xf32> to vector<8x1xf32>
    %cst_1 = arith.constant 6.400000e+01 : f32
    %4 = vector.broadcast %cst_1 : f32 to vector<8x1xf32>
    %5 = arith.divf %3, %4 : vector<8x1xf32>
    %6 = vector.broadcast %5 : vector<8x1xf32> to vector<8x64xf32>
    %7 = arith.subf %1, %6 : vector<8x64xf32>
    %8 = arith.mulf %7, %7 : vector<8x64xf32>
    %cst_2 = arith.constant dense<0.000000e+00> : vector<8xf32>
    %9 = vector.multi_reduction <add>, %8, %cst_2 [1] : vector<8x64xf32> to vector<8xf32>
    %10 = vector.shape_cast %9 : vector<8xf32> to vector<8x1xf32>
    %cst_3 = arith.constant 6.400000e+01 : f32
    %11 = vector.broadcast %cst_3 : f32 to vector<8x1xf32>
    %12 = arith.divf %10, %11 : vector<8x1xf32>
    %cst_4 = arith.constant 9.99999997E-7 : f32
    %13 = vector.broadcast %cst_4 : f32 to vector<8x1xf32>
    %14 = arith.addf %12, %13 : vector<8x1xf32>
    %15 = math.rsqrt %14 : vector<8x1xf32>
    %16 = vector.broadcast %15 : vector<8x1xf32> to vector<8x64xf32>
    %17 = arith.mulf %7, %16 : vector<8x64xf32>
    %c0_5 = arith.constant 0 : index
    %c0_6 = arith.constant 0 : index
    %18 = vector.load %arg3[%c0_5, %c0_6] : memref<1x64xf32, #tpu.memory_space<vmem>>, vector<1x64xf32>
    %19 = vector.broadcast %18 : vector<1x64xf32> to vector<8x64xf32>
    %20 = arith.mulf %17, %19 : vector<8x64xf32>
    %c0_7 = arith.constant 0 : index
    %c0_8 = arith.constant 0 : index
    %21 = vector.load %arg4[%c0_7, %c0_8] : memref<1x64xf32, #tpu.memory_space<vmem>>, vector<1x64xf32>
    %22 = vector.broadcast %21 : vector<1x64xf32> to vector<8x64xf32>
    %23 = arith.addf %20, %22 : vector<8x64xf32>
    %24 = arith.truncf %23 : vector<8x64xf32> to vector<8x64xbf16>
    %c0_9 = arith.constant 0 : index
    %c0_10 = arith.constant 0 : index
    %25 = vector.load %arg5[%c0_9, %c0_10] : memref<64x128xbf16, #tpu.memory_space<vmem>>, vector<64x128xbf16>
    %cst_11 = arith.constant dense<0.000000e+00> : vector<8x128xf32>
    %26 = tpu.matmul %24, %25, %cst_11 {dimension_numbers = #tpu.dot_dimension_numbers<[1], [0], [0], [1], [0, 0, 1, 1], [], []>} : vector<8x64xbf16>, vector<64x128xbf16>, vector<8x128xf32> -> vector<8x128xf32>
    %c0_12 = arith.constant 0 : index
    %c0_13 = arith.constant 0 : index
    %27 = vector.load %arg6[%c0_12, %c0_13] : memref<1x128xf32, #tpu.memory_space<vmem>>, vector<1x128xf32>
    %c0_14 = arith.constant 0 : index
    %c0_15 = arith.constant 0 : index
    %28 = vector.load %arg7[%c0_14, %c0_15] : memref<1x128xf32, #tpu.memory_space<vmem>>, vector<1x128xf32>
    %29 = vector.broadcast %27 : vector<1x128xf32> to vector<8x128xf32>
    %30 = arith.mulf %26, %29 : vector<8x128xf32>
    %31 = vector.broadcast %28 : vector<1x128xf32> to vector<8x128xf32>
    %32 = arith.addf %30, %31 : vector<8x128xf32>
    %cst_16 = arith.constant 5.000000e-01 : f32
    %33 = vector.broadcast %cst_16 : f32 to vector<8x128xf32>
    %34 = arith.mulf %33, %32 : vector<8x128xf32>
    %cst_17 = arith.constant 0.707106769 : f32
    %35 = vector.broadcast %cst_17 : f32 to vector<8x128xf32>
    %36 = arith.mulf %32, %35 : vector<8x128xf32>
    %37 = math.erf %36 : vector<8x128xf32>
    %cst_18 = arith.constant 1.000000e+00 : f32
    %38 = vector.broadcast %cst_18 : f32 to vector<8x128xf32>
    %39 = arith.addf %38, %37 : vector<8x128xf32>
    %40 = arith.mulf %34, %39 : vector<8x128xf32>
    %41 = arith.truncf %40 : vector<8x128xf32> to vector<8x128xbf16>
    %c0_19 = arith.constant 0 : index
    %c0_20 = arith.constant 0 : index
    %42 = vector.load %arg8[%c0_19, %c0_20] : memref<8x128xbf16, #tpu.memory_space<vmem>>, vector<8x128xbf16>
    tpu.vector_store %arg8[%c0_19, %c0_20], %41 {strides = array<i32>} : memref<8x128xbf16, #tpu.memory_space<vmem>>, vector<8x128xbf16>,
    return
  }
  func.func @transform_0(%arg0: i32, %arg1: i32) -> (i32, i32) {
    %c0_i32 = arith.constant 0 : i32
    %c0_i32_0 = arith.constant 0 : i32
    return %arg0, %c0_i32 : i32, i32
  }
  func.func @transform_1(%arg0: i32, %arg1: i32) -> (i32, i32) {
    %c0_i32 = arith.constant 0 : i32
    %c0_i32_0 = arith.constant 0 : i32
    %c0_i32_1 = arith.constant 0 : i32
    return %c0_i32, %c0_i32_0 : i32, i32
  }
  func.func @transform_2(%arg0: i32, %arg1: i32) -> (i32, i32) {
    %c0_i32 = arith.constant 0 : i32
    %c0_i32_0 = arith.constant 0 : i32
    %c0_i32_1 = arith.constant 0 : i32
    return %c0_i32, %c0_i32_0 : i32, i32
  }
  func.func @transform_3(%arg0: i32, %arg1: i32) -> (i32, i32) {
    %c0_i32 = arith.constant 0 : i32
    %c0_i32_0 = arith.constant 0 : i32
    return %c0_i32, %arg1 : i32, i32
  }
  func.func @transform_4(%arg0: i32, %arg1: i32) -> (i32, i32) {
    %c0_i32 = arith.constant 0 : i32
    %c0_i32_0 = arith.constant 0 : i32
    return %c0_i32, %arg1 : i32, i32
  }
  func.func @transform_5(%arg0: i32, %arg1: i32) -> (i32, i32) {
    %c0_i32 = arith.constant 0 : i32
    %c0_i32_0 = arith.constant 0 : i32
    return %c0_i32, %arg1 : i32, i32
  }
  func.func @transform_6(%arg0: i32, %arg1: i32) -> (i32, i32) {
    %c0_i32 = arith.constant 0 : i32
    return %arg0, %arg1 : i32, i32
  }
}

module attributes {stable_mosaic.version = 11 : i64} {
  func.func @_mm_direct_kernel(%arg0: i32, %arg1: i32, %arg2: memref<8x64xbf16, #tpu.memory_space<vmem>>, %arg3: memref<64x128xbf16, #tpu.memory_space<vmem>>, %arg4: memref<1x128xf32, #tpu.memory_space<vmem>>, %arg5: memref<1x128xf32, #tpu.memory_space<vmem>>, %arg6: memref<8x128xf32, #tpu.memory_space<vmem>>) attributes {dimension_semantics = [#tpu.dimension_semantics<parallel>, #tpu.dimension_semantics<parallel>], iteration_bounds = array<i64: 1, 1>, scalar_prefetch = 0 : i64, scratch_operands = 0 : i64, tpu.core_type = #tpu.core_type<tc>, window_params = [{transform_indices = @transform_0, window_bounds = array<i64: 8, 64>}, {transform_indices = @transform_1, window_bounds = array<i64: 64, 128>}, {transform_indices = @transform_2, window_bounds = array<i64: 1, 128>}, {transform_indices = @transform_3, window_bounds = array<i64: 1, 128>}, {transform_indices = @transform_4, window_bounds = array<i64: 8, 128>}]} {
    %c0 = arith.constant 0 : index
    %c0_0 = arith.constant 0 : index
    %0 = vector.load %arg2[%c0, %c0_0] : memref<8x64xbf16, #tpu.memory_space<vmem>>, vector<8x64xbf16>
    %c0_1 = arith.constant 0 : index
    %c0_2 = arith.constant 0 : index
    %1 = vector.load %arg3[%c0_1, %c0_2] : memref<64x128xbf16, #tpu.memory_space<vmem>>, vector<64x128xbf16>
    %cst = arith.constant dense<0.000000e+00> : vector<8x128xf32>
    %2 = tpu.matmul %0, %1, %cst {dimension_numbers = #tpu.dot_dimension_numbers<[1], [0], [0], [1], [0, 0, 1, 1], [], []>} : vector<8x64xbf16>, vector<64x128xbf16>, vector<8x128xf32> -> vector<8x128xf32>
    %c0_3 = arith.constant 0 : index
    %c0_4 = arith.constant 0 : index
    %3 = vector.load %arg4[%c0_3, %c0_4] : memref<1x128xf32, #tpu.memory_space<vmem>>, vector<1x128xf32>
    %c0_5 = arith.constant 0 : index
    %c0_6 = arith.constant 0 : index
    %4 = vector.load %arg5[%c0_5, %c0_6] : memref<1x128xf32, #tpu.memory_space<vmem>>, vector<1x128xf32>
    %5 = vector.broadcast %3 : vector<1x128xf32> to vector<8x128xf32>
    %6 = arith.mulf %2, %5 : vector<8x128xf32>
    %7 = vector.broadcast %4 : vector<1x128xf32> to vector<8x128xf32>
    %8 = arith.addf %6, %7 : vector<8x128xf32>
    %c0_7 = arith.constant 0 : index
    %c0_8 = arith.constant 0 : index
    %9 = vector.load %arg6[%c0_7, %c0_8] : memref<8x128xf32, #tpu.memory_space<vmem>>, vector<8x128xf32>
    tpu.vector_store %arg6[%c0_7, %c0_8], %8 {strides = array<i32>} : memref<8x128xf32, #tpu.memory_space<vmem>>, vector<8x128xf32>,
    return
  }
  func.func @transform_0(%arg0: i32, %arg1: i32) -> (i32, i32) {
    %c0_i32 = arith.constant 0 : i32
    %c0_i32_0 = arith.constant 0 : i32
    return %arg0, %c0_i32 : i32, i32
  }
  func.func @transform_1(%arg0: i32, %arg1: i32) -> (i32, i32) {
    %c0_i32 = arith.constant 0 : i32
    %c0_i32_0 = arith.constant 0 : i32
    return %c0_i32, %arg1 : i32, i32
  }
  func.func @transform_2(%arg0: i32, %arg1: i32) -> (i32, i32) {
    %c0_i32 = arith.constant 0 : i32
    %c0_i32_0 = arith.constant 0 : i32
    return %c0_i32, %arg1 : i32, i32
  }
  func.func @transform_3(%arg0: i32, %arg1: i32) -> (i32, i32) {
    %c0_i32 = arith.constant 0 : i32
    %c0_i32_0 = arith.constant 0 : i32
    return %c0_i32, %arg1 : i32, i32
  }
  func.func @transform_4(%arg0: i32, %arg1: i32) -> (i32, i32) {
    %c0_i32 = arith.constant 0 : i32
    return %arg0, %arg1 : i32, i32
  }
}

module attributes {stable_mosaic.version = 11 : i64} {
  func.func @_ln_mm_kernel(%arg0: i32, %arg1: i32, %arg2: memref<8x64xbf16, #tpu.memory_space<vmem>>, %arg3: memref<1x64xf32, #tpu.memory_space<vmem>>, %arg4: memref<1x64xf32, #tpu.memory_space<vmem>>, %arg5: memref<64x128xbf16, #tpu.memory_space<vmem>>, %arg6: memref<1x128xf32, #tpu.memory_space<vmem>>, %arg7: memref<1x128xf32, #tpu.memory_space<vmem>>, %arg8: memref<8x128xbf16, #tpu.memory_space<vmem>>) attributes {dimension_semantics = [#tpu.dimension_semantics<parallel>, #tpu.dimension_semantics<parallel>], iteration_bounds = array<i64: 1, 1>, scalar_prefetch = 0 : i64, scratch_operands = 0 : i64, tpu.core_type = #tpu.core_type<tc>, window_params = [{transform_indices = @transform_0, window_bounds = array<i64: 8, 64>}, {pipeline_mode = #tpu.pipeline_mode<synchronous>, transform_indices = @transform_1, window_bounds = array<i64: 1, 64>}, {pipeline_mode = #tpu.pipeline_mode<synchronous>, transform_indices = @transform_2, window_bounds = array<i64: 1, 64>}, {transform_indices = @transform_3, window_bounds = array<i64: 64, 128>}, {transform_indices = @transform_4, window_bounds = array<i64: 1, 128>}, {transform_indices = @transform_5, window_bounds = array<i64: 1, 128>}, {transform_indices = @transform_6, window_bounds = array<i64: 8, 128>}]} {
    %c0 = arith.constant 0 : index
    %c0_0 = arith.constant 0 : index
    %0 = vector.load %arg2[%c0, %c0_0] : memref<8x64xbf16, #tpu.memory_space<vmem>>, vector<8x64xbf16>
    %1 = arith.extf %0 : vector<8x64xbf16> to vector<8x64xf32>
    %cst = arith.constant dense<0.000000e+00> : vector<8xf32>
    %2 = vector.multi_reduction <add>, %1, %cst [1] : vector<8x64xf32> to vector<8xf32>
    %3 = vector.shape_cast %2 : vector<8xf32> to vector<8x1xf32>
    %cst_1 = arith.constant 6.400000e+01 : f32
    %4 = vector.broadcast %cst_1 : f32 to vector<8x1xf32>
    %5 = arith.divf %3, %4 : vector<8x1xf32>
    %6 = vector.broadcast %5 : vector<8x1xf32> to vector<8x64xf32>
    %7 = arith.subf %1, %6 : vector<8x64xf32>
    %8 = arith.mulf %7, %7 : vector<8x64xf32>
    %cst_2 = arith.constant dense<0.000000e+00> : vector<8xf32>
    %9 = vector.multi_reduction <add>, %8, %cst_2 [1] : vector<8x64xf32> to vector<8xf32>
    %10 = vector.shape_cast %9 : vector<8xf32> to vector<8x1xf32>
    %cst_3 = arith.constant 6.400000e+01 : f32
    %11 = vector.broadcast %cst_3 : f32 to vector<8x1xf32>
    %12 = arith.divf %10, %11 : vector<8x1xf32>
    %cst_4 = arith.constant 9.99999997E-7 : f32
    %13 = vector.broadcast %cst_4 : f32 to vector<8x1xf32>
    %14 = arith.addf %12, %13 : vector<8x1xf32>
    %15 = math.rsqrt %14 : vector<8x1xf32>
    %16 = vector.broadcast %15 : vector<8x1xf32> to vector<8x64xf32>
    %17 = arith.mulf %7, %16 : vector<8x64xf32>
    %c0_5 = arith.constant 0 : index
    %c0_6 = arith.constant 0 : index
    %18 = vector.load %arg3[%c0_5, %c0_6] : memref<1x64xf32, #tpu.memory_space<vmem>>, vector<1x64xf32>
    %19 = vector.broadcast %18 : vector<1x64xf32> to vector<8x64xf32>
    %20 = arith.mulf %17, %19 : vector<8x64xf32>
    %c0_7 = arith.constant 0 : index
    %c0_8 = arith.constant 0 : index
    %21 = vector.load %arg4[%c0_7, %c0_8] : memref<1x64xf32, #tpu.memory_space<vmem>>, vector<1x64xf32>
    %22 = vector.broadcast %21 : vector<1x64xf32> to vector<8x64xf32>
    %23 = arith.addf %20, %22 : vector<8x64xf32>
    %24 = arith.truncf %23 : vector<8x64xf32> to vector<8x64xbf16>
    %c0_9 = arith.constant 0 : index
    %c0_10 = arith.constant 0 : index
    %25 = vector.load %arg5[%c0_9, %c0_10] : memref<64x128xbf16, #tpu.memory_space<vmem>>, vector<64x128xbf16>
    %cst_11 = arith.constant dense<0.000000e+00> : vector<8x128xf32>
    %26 = tpu.matmul %24, %25, %cst_11 {dimension_numbers = #tpu.dot_dimension_numbers<[1], [0], [0], [1], [0, 0, 1, 1], [], []>} : vector<8x64xbf16>, vector<64x128xbf16>, vector<8x128xf32> -> vector<8x128xf32>
    %c0_12 = arith.constant 0 : index
    %c0_13 = arith.constant 0 : index
    %27 = vector.load %arg6[%c0_12, %c0_13] : memref<1x128xf32, #tpu.memory_space<vmem>>, vector<1x128xf32>
    %c0_14 = arith.constant 0 : index
    %c0_15 = arith.constant 0 : index
    %28 = vector.load %arg7[%c0_14, %c0_15] : memref<1x128xf32, #tpu.memory_space<vmem>>, vector<1x128xf32>
    %29 = vector.broadcast %27 : vector<1x128xf32> to vector<8x128xf32>
    %30 = arith.mulf %26, %29 : vector<8x128xf32>
    %31 = vector.broadcast %28 : vector<1x128xf32> to vector<8x128xf32>
    %32 = arith.addf %30, %31 : vector<8x128xf32>
    %33 = arith.truncf %32 : vector<8x128xf32> to vector<8x128xbf16>
    %c0_16 = arith.constant 0 : index
    %c0_17 = arith.constant 0 : index
    %34 = vector.load %arg8[%c0_16, %c0_17] : memref<8x128xbf16, #tpu.memory_space<vmem>>, vector<8x128xbf16>
    tpu.vector_store %arg8[%c0_16, %c0_17], %33 {strides = array<i32>} : memref<8x128xbf16, #tpu.memory_space<vmem>>, vector<8x128xbf16>,
    return
  }
  func.func @transform_0(%arg0: i32, %arg1: i32) -> (i32, i32) {
    %c0_i32 = arith.constant 0 : i32
    %c0_i32_0 = arith.constant 0 : i32
    return %arg0, %c0_i32 : i32, i32
  }
  func.func @transform_1(%arg0: i32, %arg1: i32) -> (i32, i32) {
    %c0_i32 = arith.constant 0 : i32
    %c0_i32_0 = arith.constant 0 : i32
    %c0_i32_1 = arith.constant 0 : i32
    return %c0_i32, %c0_i32_0 : i32, i32
  }
  func.func @transform_2(%arg0: i32, %arg1: i32) -> (i32, i32) {
    %c0_i32 = arith.constant 0 : i32
    %c0_i32_0 = arith.constant 0 : i32
    %c0_i32_1 = arith.constant 0 : i32
    return %c0_i32, %c0_i32_0 : i32, i32
  }
  func.func @transform_3(%arg0: i32, %arg1: i32) -> (i32, i32) {
    %c0_i32 = arith.constant 0 : i32
    %c0_i32_0 = arith.constant 0 : i32
    return %c0_i32, %arg1 : i32, i32
  }
  func.func @transform_4(%arg0: i32, %arg1: i32) -> (i32, i32) {
    %c0_i32 = arith.constant 0 : i32
    %c0_i32_0 = arith.constant 0 : i32
    return %c0_i32, %arg1 : i32, i32
  }
  func.func @transform_5(%arg0: i32, %arg1: i32) -> (i32, i32) {
    %c0_i32 = arith.constant 0 : i32
    %c0_i32_0 = arith.constant 0 : i32
    return %c0_i32, %arg1 : i32, i32
  }
  func.func @transform_6(%arg0: i32, %arg1: i32) -> (i32, i32) {
    %c0_i32 = arith.constant 0 : i32
    return %arg0, %arg1 : i32, i32
  }
}

module attributes {stable_mosaic.version = 11 : i64} {
  func.func @_attn_lane_kernel(%arg0: i32, %arg1: memref<1x16x128xbf16, #tpu.memory_space<vmem>>, %arg2: memref<4x16x128xbf16, #tpu.memory_space<vmem>>, %arg3: memref<4x16x128xbf16, #tpu.memory_space<vmem>>, %arg4: memref<1x16x128xbf16, #tpu.memory_space<vmem>>) attributes {dimension_semantics = [#tpu.dimension_semantics<parallel>], iteration_bounds = array<i64: 1>, scalar_prefetch = 0 : i64, scratch_operands = 0 : i64, tpu.core_type = #tpu.core_type<tc>, window_params = [{transform_indices = @transform_0, window_bounds = array<i64: 1, 16, 128>}, {transform_indices = @transform_1, window_bounds = array<i64: 4, 16, 128>}, {transform_indices = @transform_2, window_bounds = array<i64: 4, 16, 128>}, {transform_indices = @transform_3, window_bounds = array<i64: 1, 16, 128>}]} {
    %c0 = arith.constant 0 : index
    %c0_0 = arith.constant 0 : index
    %c0_1 = arith.constant 0 : index
    %0 = vector.load %arg1[%c0, %c0_0, %c0_1] : memref<1x16x128xbf16, #tpu.memory_space<vmem>>, vector<1x16x128xbf16>
    %1 = arith.extf %0 : vector<1x16x128xbf16> to vector<1x16x128xf32>
    %c0_2 = arith.constant 0 : index
    %c0_3 = arith.constant 0 : index
    %c0_4 = arith.constant 0 : index
    %2 = vector.load %arg2[%c0_2, %c0_3, %c0_4] : memref<4x16x128xbf16, #tpu.memory_space<vmem>>, vector<4x16x128xbf16>
    %3 = arith.extf %2 : vector<4x16x128xbf16> to vector<4x16x128xf32>
    %c0_5 = arith.constant 0 : index
    %c0_6 = arith.constant 0 : index
    %c0_7 = arith.constant 0 : index
    %4 = vector.load %arg3[%c0_5, %c0_6, %c0_7] : memref<4x16x128xbf16, #tpu.memory_space<vmem>>, vector<4x16x128xbf16>
    %5 = arith.extf %4 : vector<4x16x128xbf16> to vector<4x16x128xf32>
    %6 = vector.shape_cast %1 : vector<1x16x128xf32> to vector<16x128xf32>
    %7 = vector.shape_cast %6 : vector<16x128xf32> to vector<1x16x128xf32>
    %8 = vector.broadcast %7 : vector<1x16x128xf32> to vector<4x16x128xf32>
    %9 = arith.mulf %8, %3 : vector<4x16x128xf32>
    %cst = arith.constant dense<0.000000e+00> : vector<4x128xf32>
    %10 = vector.multi_reduction <add>, %9, %cst [1] : vector<4x16x128xf32> to vector<4x128xf32>
    %11 = vector.shape_cast %10 : vector<4x128xf32> to vector<1x4x128xf32>
    %cst_8 = arith.constant 2.500000e-01 : f32
    %12 = vector.broadcast %cst_8 : f32 to vector<1x4x128xf32>
    %13 = arith.mulf %11, %12 : vector<1x4x128xf32>
    %cst_9 = arith.constant dense<0xFF800000> : vector<1x128xf32>
    %14 = vector.multi_reduction <maximumf>, %13, %cst_9 [1] : vector<1x4x128xf32> to vector<1x128xf32>
    %15 = vector.shape_cast %14 : vector<1x128xf32> to vector<1x1x128xf32>
    %16 = vector.broadcast %15 : vector<1x1x128xf32> to vector<1x4x128xf32>
    %17 = arith.subf %13, %16 : vector<1x4x128xf32>
    %18 = math.exp %17 : vector<1x4x128xf32>
    %cst_10 = arith.constant dense<0.000000e+00> : vector<1x128xf32>
    %19 = vector.multi_reduction <add>, %18, %cst_10 [1] : vector<1x4x128xf32> to vector<1x128xf32>
    %20 = vector.shape_cast %19 : vector<1x128xf32> to vector<1x1x128xf32>
    %21 = tpu.reciprocal %20 {approx = true} : vector<1x1x128xf32> -> vector<1x1x128xf32>
    %22 = vector.broadcast %21 : vector<1x1x128xf32> to vector<1x4x128xf32>
    %23 = arith.mulf %18, %22 : vector<1x4x128xf32>
    %24 = vector.extract_strided_slice %23 {offsets = [0, 0, 0], sizes = [1, 1, 128], strides = [1, 1, 1]} : vector<1x4x128xf32> to vector<1x1x128xf32>
    %25 = vector.shape_cast %24 : vector<1x1x128xf32> to vector<1x128xf32>
    %26 = vector.extract_strided_slice %5 {offsets = [0, 0, 0], sizes = [1, 16, 128], strides = [1, 1, 1]} : vector<4x16x128xf32> to vector<1x16x128xf32>
    %27 = vector.shape_cast %26 : vector<1x16x128xf32> to vector<16x128xf32>
    %28 = vector.broadcast %25 : vector<1x128xf32> to vector<16x128xf32>
    %29 = arith.mulf %28, %27 : vector<16x128xf32>
    %30 = vector.extract_strided_slice %23 {offsets = [0, 1, 0], sizes = [1, 1, 128], strides = [1, 1, 1]} : vector<1x4x128xf32> to vector<1x1x128xf32>
    %31 = vector.shape_cast %30 : vector<1x1x128xf32> to vector<1x128xf32>
    %32 = vector.extract_strided_slice %5 {offsets = [1, 0, 0], sizes = [1, 16, 128], strides = [1, 1, 1]} : vector<4x16x128xf32> to vector<1x16x128xf32>
    %33 = vector.shape_cast %32 : vector<1x16x128xf32> to vector<16x128xf32>
    %34 = vector.broadcast %31 : vector<1x128xf32> to vector<16x128xf32>
    %35 = arith.mulf %34, %33 : vector<16x128xf32>
    %36 = arith.addf %29, %35 : vector<16x128xf32>
    %37 = vector.extract_strided_slice %23 {offsets = [0, 2, 0], sizes = [1, 1, 128], strides = [1, 1, 1]} : vector<1x4x128xf32> to vector<1x1x128xf32>
    %38 = vector.shape_cast %37 : vector<1x1x128xf32> to vector<1x128xf32>
    %39 = vector.extract_strided_slice %5 {offsets = [2, 0, 0], sizes = [1, 16, 128], strides = [1, 1, 1]} : vector<4x16x128xf32> to vector<1x16x128xf32>
    %40 = vector.shape_cast %39 : vector<1x16x128xf32> to vector<16x128xf32>
    %41 = vector.broadcast %38 : vector<1x128xf32> to vector<16x128xf32>
    %42 = arith.mulf %41, %40 : vector<16x128xf32>
    %43 = arith.addf %36, %42 : vector<16x128xf32>
    %44 = vector.extract_strided_slice %23 {offsets = [0, 3, 0], sizes = [1, 1, 128], strides = [1, 1, 1]} : vector<1x4x128xf32> to vector<1x1x128xf32>
    %45 = vector.shape_cast %44 : vector<1x1x128xf32> to vector<1x128xf32>
    %46 = vector.extract_strided_slice %5 {offsets = [3, 0, 0], sizes = [1, 16, 128], strides = [1, 1, 1]} : vector<4x16x128xf32> to vector<1x16x128xf32>
    %47 = vector.shape_cast %46 : vector<1x16x128xf32> to vector<16x128xf32>
    %48 = vector.broadcast %45 : vector<1x128xf32> to vector<16x128xf32>
    %49 = arith.mulf %48, %47 : vector<16x128xf32>
    %50 = arith.addf %43, %49 : vector<16x128xf32>
    %51 = vector.shape_cast %50 : vector<16x128xf32> to vector<1x16x128xf32>
    %52 = arith.truncf %51 : vector<1x16x128xf32> to vector<1x16x128xbf16>
    %c0_11 = arith.constant 0 : index
    %c0_12 = arith.constant 0 : index
    %c0_13 = arith.constant 0 : index
    %53 = vector.load %arg4[%c0_11, %c0_12, %c0_13] : memref<1x16x128xbf16, #tpu.memory_space<vmem>>, vector<1x16x128xbf16>
    tpu.vector_store %arg4[%c0_11, %c0_12, %c0_13], %52 {strides = array<i32>} : memref<1x16x128xbf16, #tpu.memory_space<vmem>>, vector<1x16x128xbf16>,
    return
  }
  func.func @transform_0(%arg0: i32) -> (i32, i32, i32) {
    %c0_i32 = arith.constant 0 : i32
    %c0_i32_0 = arith.constant 0 : i32
    %c0_i32_1 = arith.constant 0 : i32
    return %c0_i32, %c0_i32_0, %arg0 : i32, i32, i32
  }
  func.func @transform_1(%arg0: i32) -> (i32, i32, i32) {
    %c0_i32 = arith.constant 0 : i32
    %c0_i32_0 = arith.constant 0 : i32
    %c0_i32_1 = arith.constant 0 : i32
    return %c0_i32, %c0_i32_0, %arg0 : i32, i32, i32
  }
  func.func @transform_2(%arg0: i32) -> (i32, i32, i32) {
    %c0_i32 = arith.constant 0 : i32
    %c0_i32_0 = arith.constant 0 : i32
    %c0_i32_1 = arith.constant 0 : i32
    return %c0_i32, %c0_i32_0, %arg0 : i32, i32, i32
  }
  func.func @transform_3(%arg0: i32) -> (i32, i32, i32) {
    %c0_i32 = arith.constant 0 : i32
    %c0_i32_0 = arith.constant 0 : i32
    %c0_i32_1 = arith.constant 0 : i32
    return %c0_i32, %c0_i32_0, %arg0 : i32, i32, i32
  }
}

module attributes {stable_mosaic.version = 11 : i64} {
  func.func @_ln_mm_kernel(%arg0: i32, %arg1: i32, %arg2: memref<8x64xbf16, #tpu.memory_space<vmem>>, %arg3: memref<1x64xf32, #tpu.memory_space<vmem>>, %arg4: memref<1x64xf32, #tpu.memory_space<vmem>>, %arg5: memref<64x128xbf16, #tpu.memory_space<vmem>>, %arg6: memref<1x128xf32, #tpu.memory_space<vmem>>, %arg7: memref<1x128xf32, #tpu.memory_space<vmem>>, %arg8: memref<8x128xf32, #tpu.memory_space<vmem>>) attributes {dimension_semantics = [#tpu.dimension_semantics<parallel>, #tpu.dimension_semantics<parallel>], iteration_bounds = array<i64: 1, 1>, scalar_prefetch = 0 : i64, scratch_operands = 0 : i64, tpu.core_type = #tpu.core_type<tc>, window_params = [{transform_indices = @transform_0, window_bounds = array<i64: 8, 64>}, {pipeline_mode = #tpu.pipeline_mode<synchronous>, transform_indices = @transform_1, window_bounds = array<i64: 1, 64>}, {pipeline_mode = #tpu.pipeline_mode<synchronous>, transform_indices = @transform_2, window_bounds = array<i64: 1, 64>}, {transform_indices = @transform_3, window_bounds = array<i64: 64, 128>}, {transform_indices = @transform_4, window_bounds = array<i64: 1, 128>}, {transform_indices = @transform_5, window_bounds = array<i64: 1, 128>}, {transform_indices = @transform_6, window_bounds = array<i64: 8, 128>}]} {
    %c0 = arith.constant 0 : index
    %c0_0 = arith.constant 0 : index
    %0 = vector.load %arg2[%c0, %c0_0] : memref<8x64xbf16, #tpu.memory_space<vmem>>, vector<8x64xbf16>
    %1 = arith.extf %0 : vector<8x64xbf16> to vector<8x64xf32>
    %cst = arith.constant dense<0.000000e+00> : vector<8xf32>
    %2 = vector.multi_reduction <add>, %1, %cst [1] : vector<8x64xf32> to vector<8xf32>
    %3 = vector.shape_cast %2 : vector<8xf32> to vector<8x1xf32>
    %cst_1 = arith.constant 6.400000e+01 : f32
    %4 = vector.broadcast %cst_1 : f32 to vector<8x1xf32>
    %5 = arith.divf %3, %4 : vector<8x1xf32>
    %6 = vector.broadcast %5 : vector<8x1xf32> to vector<8x64xf32>
    %7 = arith.subf %1, %6 : vector<8x64xf32>
    %8 = arith.mulf %7, %7 : vector<8x64xf32>
    %cst_2 = arith.constant dense<0.000000e+00> : vector<8xf32>
    %9 = vector.multi_reduction <add>, %8, %cst_2 [1] : vector<8x64xf32> to vector<8xf32>
    %10 = vector.shape_cast %9 : vector<8xf32> to vector<8x1xf32>
    %cst_3 = arith.constant 6.400000e+01 : f32
    %11 = vector.broadcast %cst_3 : f32 to vector<8x1xf32>
    %12 = arith.divf %10, %11 : vector<8x1xf32>
    %cst_4 = arith.constant 9.99999974E-6 : f32
    %13 = vector.broadcast %cst_4 : f32 to vector<8x1xf32>
    %14 = arith.addf %12, %13 : vector<8x1xf32>
    %15 = math.rsqrt %14 : vector<8x1xf32>
    %16 = vector.broadcast %15 : vector<8x1xf32> to vector<8x64xf32>
    %17 = arith.mulf %7, %16 : vector<8x64xf32>
    %c0_5 = arith.constant 0 : index
    %c0_6 = arith.constant 0 : index
    %18 = vector.load %arg3[%c0_5, %c0_6] : memref<1x64xf32, #tpu.memory_space<vmem>>, vector<1x64xf32>
    %19 = vector.broadcast %18 : vector<1x64xf32> to vector<8x64xf32>
    %20 = arith.mulf %17, %19 : vector<8x64xf32>
    %c0_7 = arith.constant 0 : index
    %c0_8 = arith.constant 0 : index
    %21 = vector.load %arg4[%c0_7, %c0_8] : memref<1x64xf32, #tpu.memory_space<vmem>>, vector<1x64xf32>
    %22 = vector.broadcast %21 : vector<1x64xf32> to vector<8x64xf32>
    %23 = arith.addf %20, %22 : vector<8x64xf32>
    %24 = arith.truncf %23 : vector<8x64xf32> to vector<8x64xbf16>
    %c0_9 = arith.constant 0 : index
    %c0_10 = arith.constant 0 : index
    %25 = vector.load %arg5[%c0_9, %c0_10] : memref<64x128xbf16, #tpu.memory_space<vmem>>, vector<64x128xbf16>
    %cst_11 = arith.constant dense<0.000000e+00> : vector<8x128xf32>
    %26 = tpu.matmul %24, %25, %cst_11 {dimension_numbers = #tpu.dot_dimension_numbers<[1], [0], [0], [1], [0, 0, 1, 1], [], []>} : vector<8x64xbf16>, vector<64x128xbf16>, vector<8x128xf32> -> vector<8x128xf32>
    %c0_12 = arith.constant 0 : index
    %c0_13 = arith.constant 0 : index
    %27 = vector.load %arg6[%c0_12, %c0_13] : memref<1x128xf32, #tpu.memory_space<vmem>>, vector<1x128xf32>
    %c0_14 = arith.constant 0 : index
    %c0_15 = arith.constant 0 : index
    %28 = vector.load %arg7[%c0_14, %c0_15] : memref<1x128xf32, #tpu.memory_space<vmem>>, vector<1x128xf32>
    %29 = vector.broadcast %27 : vector<1x128xf32> to vector<8x128xf32>
    %30 = arith.mulf %26, %29 : vector<8x128xf32>
    %31 = vector.broadcast %28 : vector<1x128xf32> to vector<8x128xf32>
    %32 = arith.addf %30, %31 : vector<8x128xf32>
    %c0_16 = arith.constant 0 : index
    %c0_17 = arith.constant 0 : index
    %33 = vector.load %arg8[%c0_16, %c0_17] : memref<8x128xf32, #tpu.memory_space<vmem>>, vector<8x128xf32>
    tpu.vector_store %arg8[%c0_16, %c0_17], %32 {strides = array<i32>} : memref<8x128xf32, #tpu.memory_space<vmem>>, vector<8x128xf32>,
    return
  }
  func.func @transform_0(%arg0: i32, %arg1: i32) -> (i32, i32) {
    %c0_i32 = arith.constant 0 : i32
    %c0_i32_0 = arith.constant 0 : i32
    return %arg0, %c0_i32 : i32, i32
  }
  func.func @transform_1(%arg0: i32, %arg1: i32) -> (i32, i32) {
    %c0_i32 = arith.constant 0 : i32
    %c0_i32_0 = arith.constant 0 : i32
    %c0_i32_1 = arith.constant 0 : i32
    return %c0_i32, %c0_i32_0 : i32, i32
  }
  func.func @transform_2(%arg0: i32, %arg1: i32) -> (i32, i32) {
    %c0_i32 = arith.constant 0 : i32
    %c0_i32_0 = arith.constant 0 : i32
    %c0_i32_1 = arith.constant 0 : i32
    return %c0_i32, %c0_i32_0 : i32, i32
  }
  func.func @transform_3(%arg0: i32, %arg1: i32) -> (i32, i32) {
    %c0_i32 = arith.constant 0 : i32
    %c0_i32_0 = arith.constant 0 : i32
    return %c0_i32, %arg1 : i32, i32
  }
  func.func @transform_4(%arg0: i32, %arg1: i32) -> (i32, i32) {
    %c0_i32 = arith.constant 0 : i32
    %c0_i32_0 = arith.constant 0 : i32
    return %c0_i32, %arg1 : i32, i32
  }
  func.func @transform_5(%arg0: i32, %arg1: i32) -> (i32, i32) {
    %c0_i32 = arith.constant 0 : i32
    %c0_i32_0 = arith.constant 0 : i32
    return %c0_i32, %arg1 : i32, i32
  }
  func.func @transform_6(%arg0: i32, %arg1: i32) -> (i32, i32) {
    %c0_i32 = arith.constant 0 : i32
    return %arg0, %arg1 : i32, i32
  }
}

</mosaic_0001>

<bundles_post_ra>
// kernel: volo_forward.31
= control target key start
LH: loop header
LB: loop body
LE: loop exit
PB: predicated region body
PF: predicated region fallthrough
CT: control target
= control target key end

     0   :  { %s1513_s15 = smov 0   ;;  %s1515_s16 = smov 0   ;;  %s1722_s0 = inlined_call_operand.vmem [shape: bf16[512,147], index: 0, kind: input, shape index: {}]   ;;  %s1723_s1 = inlined_call_operand.vmem [shape: bf16[147,128], index: 1, kind: input, shape index: {}]   ;;  %s1724_s2 = inlined_call_operand.vmem [shape: f32[1,128], index: 2, kind: input, shape index: {}]   ;;  %s1725_s3 = inlined_call_operand.vmem [shape: f32[1,128], index: 3, kind: input, shape index: {}]   ;;  %s1726_s4 = inlined_call_operand.vmem [shape: bf16[512,128], index: 4, kind: output, shape index: {}]  }
   0x1   :  { %s1517_s17 = smov 0  }
   0x2 LB: > { %s26_s18 = sadd.s32 1, %s1480_s16  ;;  %p1130_p0 = scmp.ge.s32.totalorder %s1484_s17, 1  ;;  %s1484_s17 = sphi %s1517_s17, %s14_s17   ;;  %s1480_s16 = sphi %s1515_s16, %s1728_s16   ;;  %s1476_s15 = sphi %s1513_s15, %s1727_s15  }
   0x3   : > { %p28_p1 = scmp.ge.s32.totalorder %s26_s18, 2  ;;  %p203_p2 = scmp.lt.s32.totalorder %s1484_s17, 3 }
   0x5   : > { %s1730_s18 = smov (%p28_p1, %s26_s18), 0  ;;  %p204_p3 = pnand %p1130_p0, %p203_p2 }
   0x6   : > { %v1404_v0 = vld [vmem:[%s1723_s1] sm:$0xff] (!%p204_p3)   ;;  %v1486_v1 = vmov (!%p204_p3), 0   ;;  %v1405_v2 = vld [vmem:[%s1723_s1 + $0x8] sm:$0xff] (!%p204_p3)   ;;  %v1406_v3 = vld [vmem:[%s1723_s1 + $0x10] sm:$0xff] (!%p204_p3)   ;;  %s1131_s25 = sshll.u32 (!%p204_p3), %s1476_s15, 5  ;;  %vm522_vm0 = vcmask (!%p204_p3), 154624  }
   0x7   : > { %207 = sbr.rel (%p204_p3) target bundleno = 327 (0x147), region = 36  ;;  %578 = vmatprep.subr.bf16.mxu0 (!%p204_p3), %v1486_v1  ;;  %1358 = vmatprep.subr.bf16.mxu1 (!%p204_p3), %v1486_v1  ;;  %p244_p4 = scmp.lt.s32.totalorder (!%p204_p3), %s1131_s25, 63  ;;  %v1407_v4 = vld [vmem:[%s1723_s1 + $0x18] sm:$0xff] (!%p204_p3)   ;;  %v1408_v5 = vld [vmem:[%s1723_s1 + $0x20] sm:$0xff] (!%p204_p3)   ;;  %v1409_v8 = vld [vmem:[%s1723_s1 + $0x28] sm:$0xff] (!%p204_p3)   ;;  %vm571_vm1 = vcmask (!%p204_p3), 1040384  }
   0x8   : > { %579 = vmatpush1.bf16.msra.mxu0 (!%p204_p3), %v1404_v0  ;;  %1368 = vmatpush1.bf16.msra.mxu1 (!%p204_p3), %v1404_v0  ;;  %v1410_v9 = vld [vmem:[%s1723_s1 + $0x30] sm:$0xff] (!%p204_p3)   ;;  %v1411_v10 = vld [vmem:[%s1723_s1 + $0x38] sm:$0xff] (!%p204_p3)   ;;  %vm572_vm2 = vcmask (!%p204_p3), 1041408   ;;  %v1487_v11 = vmov (!%p204_p3), 65535   ;;  %v1412_v13 = vld [vmem:[%s1723_s1 + $0x40] sm:$0xff] (!%p204_p3)  }
   0x9   : > { %580 = vmatprep.subr.bf16.mxu0 (!%p204_p3), %v1486_v1  ;;  %1359 = vmatprep.subr.bf16.mxu1 (!%p204_p3), %v1486_v1  ;;  %v573_v12 = vsel (!%p204_p3), %vm571_vm1, 4294967295, %v1487_v11  ;;  %v1413_v14 = vld [vmem:[%s1723_s1 + $0x48] ss:$0 sps:$4 sm:$0x33] (!%p204_p3)   ;;  %v1620_v47 = vld [vmem:[%s1724_s2] ss:$0 sm:$0xff] (!%p204_p3) }
   0xa   : > { %v574_v15 = vsel (!%p204_p3), %vm572_vm2, %v573_v12, 0  ;;  %v1625_v49 = vld [vmem:[%s1725_s3] ss:$0 sm:$0xff] (!%p204_p3) }
   0xb   : > { %v576_v16 = vand.u32 (!%p204_p3), %v1413_v14, %v574_v15 }
   0xc   : > { %581 = vmatpush1.bf16.msra.mxu0 (!%p204_p3), %v1405_v2  ;;  %1369 = vmatpush1.bf16.msra.mxu1 (!%p204_p3), %v1405_v2 }
   0xd   : > { %582 = vmatprep.subr.bf16.mxu0 (!%p204_p3), %v1486_v1  ;;  %1360 = vmatprep.subr.bf16.mxu1 (!%p204_p3), %v1486_v1 }
   0xe   : > { %s1732_s25 = smov (!%p244_p4, %s1131_s25), 63 }
   0xf   : > { %s1230_s28 = sshll.u32 %s1732_s25, 3  ;;  %s1135_s26 = sshll.u32 %s1732_s25, 2 }
  0x10   : > { %583 = vmatpush1.bf16.msra.mxu0 %v1406_v3  ;;  %1370 = vmatpush1.bf16.msra.mxu1 %v1406_v3  ;;  %s1549_s5 = scalar_lea.vmem %s1722_s0, %s1230_s28  ;;  %s1639_s29 = scalar_lea.vmem %s1726_s4, %s1135_s26 }
  0x11   : > { %584 = vmatprep.subr.bf16.mxu0 %v1486_v1  ;;  %1361 = vmatprep.subr.bf16.mxu1 %v1486_v1  ;;  %v1416_v6 = vld [vmem:[%s1549_s5 + $0x4] ss:$8 sps:$4 sm:$0xff]   ;;  %v1414_v17 = vld [vmem:[%s1549_s5] ss:$8 sps:$4 sm:$0xff]   ;;  %v1420_v19 = vld [vmem:[%s1549_s5 + $0x14] ss:$8 sps:$4 sm:$0xff]  }
  0x12   : > { %v1419_v7 = vld [vmem:[%s1549_s5 + $0x84] ss:$8 sps:$4 sm:$0xff]   ;;  %1178 = vmatprep.mubr.msk.bf16.mxu0 %vm522_vm0, %v1416_v6  ;;  %v1417_v18 = vld [vmem:[%s1549_s5 + $0x80] ss:$8 sps:$4 sm:$0xff]   ;;  %v1422_v20 = vld [vmem:[%s1549_s5 + $0x94] ss:$8 sps:$4 sm:$0xff]  }
  0x13   : > { %1186 = vmatprep.mubr.msk.bf16.mxu1 %vm522_vm0, %v1419_v7  ;;  %v1424_v21 = vld [vmem:[%s1549_s5 + $0x10] ss:$8 sps:$4 sm:$0xff]   ;;  %v1426_v23 = vld [vmem:[%s1549_s5 + $0x24] ss:$8 sps:$4 sm:$0xff]   ;;  %v1430_v25 = vld [vmem:[%s1549_s5 + $0x20] ss:$8 sps:$4 sm:$0xff]  }
  0x14   : > { %585 = vmatpush1.bf16.msra.mxu0 %v1407_v4  ;;  %1371 = vmatpush1.bf16.msra.mxu1 %v1407_v4  ;;  %v1425_v22 = vld [vmem:[%s1549_s5 + $0x90] ss:$8 sps:$4 sm:$0xff]   ;;  %v1428_v24 = vld [vmem:[%s1549_s5 + $0xa4] ss:$8 sps:$4 sm:$0xff]   ;;  %v1431_v26 = vld [vmem:[%s1549_s5 + $0xa0] ss:$8 sps:$4 sm:$0xff]  }
  0x15   : > { %586 = vmatprep.subr.bf16.mxu0 %v1486_v1  ;;  %1362 = vmatprep.subr.bf16.mxu1 %v1486_v1  ;;  %v1432_v27 = vld [vmem:[%s1549_s5 + $0x34] ss:$8 sps:$4 sm:$0xff]   ;;  %v1436_v29 = vld [vmem:[%s1549_s5 + $0x30] ss:$8 sps:$4 sm:$0xff]   ;;  %v1438_v31 = vld [vmem:[%s1549_s5 + $0x44] ss:$8 sps:$4 sm:$0xff]  }
  0x16   : > { %v1434_v28 = vld [vmem:[%s1549_s5 + $0xb4] ss:$8 sps:$4 sm:$0xff]   ;;  %v1437_v30 = vld [vmem:[%s1549_s5 + $0xb0] ss:$8 sps:$4 sm:$0xff]   ;;  %v1440_v32 = vld [vmem:[%s1549_s5 + $0xc4] ss:$8 sps:$4 sm:$0xff]  }
  0x17   : > { %v1442_v33 = vld [vmem:[%s1549_s5 + $0x40] ss:$8 sps:$4 sm:$0xff]   ;;  %v1444_v35 = vld [vmem:[%s1549_s5 + $0x54] ss:$8 sps:$4 sm:$0xff]   ;;  %v1448_v37 = vld [vmem:[%s1549_s5 + $0x50] ss:$8 sps:$4 sm:$0xff]  }
  0x18   : > { %587 = vmatpush1.bf16.msra.mxu0 %v1408_v5  ;;  %1372 = vmatpush1.bf16.msra.mxu1 %v1408_v5  ;;  %v1443_v34 = vld [vmem:[%s1549_s5 + $0xc0] ss:$8 sps:$4 sm:$0xff]   ;;  %v1446_v36 = vld [vmem:[%s1549_s5 + $0xd4] ss:$8 sps:$4 sm:$0xff]   ;;  %v1449_v38 = vld [vmem:[%s1549_s5 + $0xd0] ss:$8 sps:$4 sm:$0xff]  }
  0x19   : > { %588 = vmatprep.subr.bf16.mxu0 %v1486_v1  ;;  %1363 = vmatprep.subr.bf16.mxu1 %v1486_v1  ;;  %v1450_v39 = vld [vmem:[%s1549_s5 + $0x64] ss:$8 sps:$4 sm:$0xff]   ;;  %v1454_v41 = vld [vmem:[%s1549_s5 + $0x60] ss:$8 sps:$4 sm:$0xff]   ;;  %v1456_v43 = vld [vmem:[%s1549_s5 + $0x74] ss:$8 sps:$4 sm:$0xff]  }
  0x1a   : > { %v1452_v40 = vld [vmem:[%s1549_s5 + $0xe4] ss:$8 sps:$4 sm:$0xff]   ;;  %v1455_v42 = vld [vmem:[%s1549_s5 + $0xe0] ss:$8 sps:$4 sm:$0xff]   ;;  %v1458_v44 = vld [vmem:[%s1549_s5 + $0xf4] ss:$8 sps:$4 sm:$0xff]  }
  0x1b   : > { %v1460_v45 = vld [vmem:[%s1549_s5 + $0x70] ss:$8 sps:$4 sm:$0xff]  }
  0x1c   : > { %589 = vmatpush1.bf16.msra.mxu0 %v1409_v8  ;;  %1373 = vmatpush1.bf16.msra.mxu1 %v1409_v8  ;;  %v1461_v46 = vld [vmem:[%s1549_s5 + $0xf0] ss:$8 sps:$4 sm:$0xff]  }
  0x1d   : > { %590 = vmatprep.subr.bf16.mxu0 %v1486_v1  ;;  %1364 = vmatprep.subr.bf16.mxu1 %v1486_v1 }
  0x20   : > { %591 = vmatpush1.bf16.msra.mxu0 %v1410_v9  ;;  %1374 = vmatpush1.bf16.msra.mxu1 %v1410_v9 }
  0x21   : > { %592 = vmatprep.subr.bf16.mxu0 %v1486_v1  ;;  %1365 = vmatprep.subr.bf16.mxu1 %v1486_v1 }
  0x24   : > { %593 = vmatpush1.bf16.msra.mxu0 %v1411_v10  ;;  %1375 = vmatpush1.bf16.msra.mxu1 %v1411_v10 }
  0x25   : > { %594 = vmatprep.subr.bf16.mxu0 %v1486_v1  ;;  %1366 = vmatprep.subr.bf16.mxu1 %v1486_v1 }
  0x28   : > { %595 = vmatpush1.bf16.msra.mxu0 %v1412_v13  ;;  %1376 = vmatpush1.bf16.msra.mxu1 %v1412_v13 }
  0x29   : > { %596 = vmatprep.subr.bf16.mxu0 %v1486_v1  ;;  %1367 = vmatprep.subr.bf16.mxu1 %v1486_v1 }
  0x2c   : > { %597 = vmatpush1.bf16.msra.mxu0 %v576_v16  ;;  %1377 = vmatpush1.bf16.msra.mxu1 %v576_v16 }
  0x2f   : > { %611 = vmatmul.mubr.bf16.vlgmr.msra.gmra.mrb[0].mxu0 %v1414_v17  ;;  %675 = vmatmul.mubr.bf16.vlgmr.msra.gmra.mrb[0].mxu1 %v1417_v18 }
  0x30   : > { %1179 = vmatprep.mubr.msk.bf16.mxu0 %vm522_vm0, %v1420_v19  ;;  %1187 = vmatprep.mubr.msk.bf16.mxu1 %vm522_vm0, %v1422_v20 }
  0x37   : > { %619 = vmatmul.mubr.bf16.gmra.mrb[4].mxu0 %v1424_v21  ;;  %683 = vmatmul.mubr.bf16.gmra.mrb[4].mxu1 %v1425_v22 }
  0x38   : > { %1180 = vmatprep.mubr.msk.bf16.mxu0 %vm522_vm0, %v1426_v23  ;;  %1188 = vmatprep.mubr.msk.bf16.mxu1 %vm522_vm0, %v1428_v24 }
  0x3f   : > { %627 = vmatmul.mubr.bf16.gmra.mrb[8].mxu0 %v1430_v25  ;;  %691 = vmatmul.mubr.bf16.gmra.mrb[8].mxu1 %v1431_v26 }
  0x40   : > { %1181 = vmatprep.mubr.msk.bf16.mxu0 %vm522_vm0, %v1432_v27  ;;  %1189 = vmatprep.mubr.msk.bf16.mxu1 %vm522_vm0, %v1434_v28 }
  0x47   : > { %635 = vmatmul.mubr.bf16.gmra.mrb[12].mxu0 %v1436_v29  ;;  %699 = vmatmul.mubr.bf16.gmra.mrb[12].mxu1 %v1437_v30 }
  0x48   : > { %1182 = vmatprep.mubr.msk.bf16.mxu0 %vm522_vm0, %v1438_v31  ;;  %1190 = vmatprep.mubr.msk.bf16.mxu1 %vm522_vm0, %v1440_v32 }
  0x4f   : > { %643 = vmatmul.mubr.bf16.gmra.mrb[16].mxu0 %v1442_v33  ;;  %707 = vmatmul.mubr.bf16.gmra.mrb[16].mxu1 %v1443_v34 }
  0x50   : > { %1183 = vmatprep.mubr.msk.bf16.mxu0 %vm522_vm0, %v1444_v35  ;;  %1191 = vmatprep.mubr.msk.bf16.mxu1 %vm522_vm0, %v1446_v36 }
  0x57   : > { %651 = vmatmul.mubr.bf16.gmra.mrb[20].mxu0 %v1448_v37  ;;  %715 = vmatmul.mubr.bf16.gmra.mrb[20].mxu1 %v1449_v38 }
  0x58   : > { %1184 = vmatprep.mubr.msk.bf16.mxu0 %vm522_vm0, %v1450_v39  ;;  %1192 = vmatprep.mubr.msk.bf16.mxu1 %vm522_vm0, %v1452_v40 }
  0x5f   : > { %659 = vmatmul.mubr.bf16.gmra.mrb[24].mxu0 %v1454_v41  ;;  %723 = vmatmul.mubr.bf16.gmra.mrb[24].mxu1 %v1455_v42 }
  0x60   : > { %1185 = vmatprep.mubr.msk.bf16.mxu0 %vm522_vm0, %v1456_v43  ;;  %1193 = vmatprep.mubr.msk.bf16.mxu1 %vm522_vm0, %v1458_v44 }
  0x67   : > { %667 = vmatmul.mubr.bf16.gmra.mrb[28].mxu0 %v1460_v45  ;;  %731 = vmatmul.mubr.bf16.gmra.mrb[28].mxu1 %v1461_v46 }
 0x102   : > { %v612_v48 = vpop.f32.mrb[0].mxu0  ;;  %v676_v50 = vpop.f32.mrb[0].mxu1 }
 0x103   : > { %v747_v51 = vmul.f32 %v1620_v47, %v612_v48  ;;  %v763_v52 = vmul.f32 %v1620_v47, %v676_v50  ;;  %v614_v53 = vpop.f32.mrb[1].mxu0  ;;  %v678_v54 = vpop.f32.mrb[1].mxu1 }
 0x104   : > { %v615_v55 = vpop.f32.mrb[2].mxu0  ;;  %v679_v56 = vpop.f32.mrb[2].mxu1 }
 0x105   : > { %v785_v57 = vadd.f32 %v1625_v49, %v747_v51  ;;  %v801_v58 = vadd.f32 %v1625_v49, %v763_v52  ;;  %v748_v59 = vmul.f32 %v1620_v47, %v615_v55  ;;  %v764_v60 = vmul.f32 %v1620_v47, %v679_v56  ;;  %v617_v61 = vpop.f32.mrb[3].mxu0  ;;  %v681_v62 = vpop.f32.mrb[3].mxu1 }
 0x107   : > { %v786_v63 = vadd.f32 %v1625_v49, %v748_v59  ;;  %v802_v0 = vadd.f32 %v1625_v49, %v764_v60  ;;  %v817_v1 = vmax.f32 %v785_v57, 0.0  ;;  %v833_v2 = vmax.f32 %v801_v58, 0.0 }
 0x109   : > { %v818_v3 = vmax.f32 %v786_v63, 0.0  ;;  %v834_v4 = vmax.f32 %v802_v0, 0.0 }
 0x10a   : > { %v620_v5 = vpop.f32.mrb[4].mxu0  ;;  %v684_v6 = vpop.f32.mrb[4].mxu1 }
 0x10b   : > { %v1266_v7 = vpack.c.bf16 %v818_v3, %v817_v1  ;;  %v1306_v8 = vpack.c.bf16 %v834_v4, %v833_v2  ;;  %v749_v9 = vmul.f32 %v1620_v47, %v620_v5  ;;  %v765_v10 = vmul.f32 %v1620_v47, %v684_v6  ;;  %v622_v11 = vpop.f32.mrb[5].mxu0  ;;  %v686_v12 = vpop.f32.mrb[5].mxu1 }
 0x10c   : > { %v623_v13 = vpop.f32.mrb[6].mxu0  ;;  %v687_v14 = vpop.f32.mrb[6].mxu1 }
 0x10d   : > { %1267 = vst [vmem:[%s1639_s29] sm:$0xff] %v1266_v7   ;;  %1350 = vst [vmem:[%s1639_s29 + $0x40] sm:$0xff] %v1306_v8   ;;  %v787_v15 = vadd.f32 %v1625_v49, %v749_v9  ;;  %v803_v16 = vadd.f32 %v1625_v49, %v765_v10  ;;  %v750_v17 = vmul.f32 %v1620_v47, %v623_v13  ;;  %v625_v19 = vpop.f32.mrb[7].mxu0  ;;  %v689_v20 = vpop.f32.mrb[7].mxu1 }
 0x10e   : > { %v766_v18 = vmul.f32 %v1620_v47, %v687_v14 }
 0x10f   : > { %v788_v21 = vadd.f32 %v1625_v49, %v750_v17  ;;  %v819_v23 = vmax.f32 %v787_v15, 0.0  ;;  %v835_v24 = vmax.f32 %v803_v16, 0.0 }
 0x110   : > { %v804_v22 = vadd.f32 %v1625_v49, %v766_v18 }
 0x111   : > { %v820_v25 = vmax.f32 %v788_v21, 0.0 }
 0x112   : > { %v836_v26 = vmax.f32 %v804_v22, 0.0  ;;  %v628_v27 = vpop.f32.mrb[8].mxu0  ;;  %v692_v28 = vpop.f32.mrb[8].mxu1 }
 0x113   : > { %v1271_v29 = vpack.c.bf16 %v820_v25, %v819_v23  ;;  %v751_v31 = vmul.f32 %v1620_v47, %v628_v27  ;;  %v767_v32 = vmul.f32 %v1620_v47, %v692_v28  ;;  %v630_v33 = vpop.f32.mrb[9].mxu0  ;;  %v694_v34 = vpop.f32.mrb[9].mxu1 }
 0x114   : > { %v1311_v30 = vpack.c.bf16 %v836_v26, %v835_v24  ;;  %v631_v35 = vpop.f32.mrb[10].mxu0  ;;  %v695_v36 = vpop.f32.mrb[10].mxu1 }
 0x115   : > { %1343 = vst [vmem:[%s1639_s29 + $0x8] sm:$0xff] %v1271_v29   ;;  %v789_v37 = vadd.f32 %v1625_v49, %v751_v31  ;;  %v805_v38 = vadd.f32 %v1625_v49, %v767_v32  ;;  %v752_v39 = vmul.f32 %v1620_v47, %v631_v35  ;;  %v768_v40 = vmul.f32 %v1620_v47, %v695_v36  ;;  %v633_v41 = vpop.f32.mrb[11].mxu0  ;;  %v697_v42 = vpop.f32.mrb[11].mxu1 }
 0x116   : > { %1351 = vst [vmem:[%s1639_s29 + $0x48] sm:$0xff] %v1311_v30  }
 0x117   : > { %v790_v43 = vadd.f32 %v1625_v49, %v752_v39  ;;  %v806_v44 = vadd.f32 %v1625_v49, %v768_v40  ;;  %v821_v45 = vmax.f32 %v789_v37, 0.0  ;;  %v837_v46 = vmax.f32 %v805_v38, 0.0 }
 0x119   : > { %v822_v48 = vmax.f32 %v790_v43, 0.0  ;;  %v838_v50 = vmax.f32 %v806_v44, 0.0 }
 0x11a   : > { %v636_v51 = vpop.f32.mrb[12].mxu0  ;;  %v700_v52 = vpop.f32.mrb[12].mxu1 }
 0x11b   : > { %v1276_v53 = vpack.c.bf16 %v822_v48, %v821_v45  ;;  %v1316_v54 = vpack.c.bf16 %v838_v50, %v837_v46  ;;  %v753_v55 = vmul.f32 %v1620_v47, %v636_v51  ;;  %v769_v56 = vmul.f32 %v1620_v47, %v700_v52  ;;  %v638_v57 = vpop.f32.mrb[13].mxu0  ;;  %v702_v58 = vpop.f32.mrb[13].mxu1 }
 0x11c   : > { %v639_v59 = vpop.f32.mrb[14].mxu0  ;;  %v703_v60 = vpop.f32.mrb[14].mxu1 }
 0x11d   : > { %1344 = vst [vmem:[%s1639_s29 + $0x10] sm:$0xff] %v1276_v53   ;;  %1352 = vst [vmem:[%s1639_s29 + $0x50] sm:$0xff] %v1316_v54   ;;  %v791_v61 = vadd.f32 %v1625_v49, %v753_v55  ;;  %v807_v62 = vadd.f32 %v1625_v49, %v769_v56  ;;  %v754_v63 = vmul.f32 %v1620_v47, %v639_v59  ;;  %v641_v1 = vpop.f32.mrb[15].mxu0  ;;  %v705_v2 = vpop.f32.mrb[15].mxu1 }
 0x11e   : > { %v770_v0 = vmul.f32 %v1620_v47, %v703_v60 }
 0x11f   : > { %v792_v3 = vadd.f32 %v1625_v49, %v754_v63  ;;  %v823_v5 = vmax.f32 %v791_v61, 0.0  ;;  %v839_v6 = vmax.f32 %v807_v62, 0.0 }
 0x120   : > { %v808_v4 = vadd.f32 %v1625_v49, %v770_v0 }
 0x121   : > { %v824_v7 = vmax.f32 %v792_v3, 0.0 }
 0x122   : > { %v840_v8 = vmax.f32 %v808_v4, 0.0  ;;  %v644_v9 = vpop.f32.mrb[16].mxu0  ;;  %v708_v10 = vpop.f32.mrb[16].mxu1 }
 0x123   : > { %v1281_v11 = vpack.c.bf16 %v824_v7, %v823_v5  ;;  %v755_v13 = vmul.f32 %v1620_v47, %v644_v9  ;;  %v771_v14 = vmul.f32 %v1620_v47, %v708_v10  ;;  %v646_v15 = vpop.f32.mrb[17].mxu0  ;;  %v710_v16 = vpop.f32.mrb[17].mxu1 }
 0x124   : > { %v1321_v12 = vpack.c.bf16 %v840_v8, %v839_v6  ;;  %v647_v17 = vpop.f32.mrb[18].mxu0  ;;  %v711_v18 = vpop.f32.mrb[18].mxu1 }
 0x125   : > { %1345 = vst [vmem:[%s1639_s29 + $0x18] sm:$0xff] %v1281_v11   ;;  %v793_v19 = vadd.f32 %v1625_v49, %v755_v13  ;;  %v809_v20 = vadd.f32 %v1625_v49, %v771_v14  ;;  %v756_v21 = vmul.f32 %v1620_v47, %v647_v17  ;;  %v772_v22 = vmul.f32 %v1620_v47, %v711_v18  ;;  %v649_v23 = vpop.f32.mrb[19].mxu0  ;;  %v713_v24 = vpop.f32.mrb[19].mxu1 }
 0x126   : > { %1353 = vst [vmem:[%s1639_s29 + $0x58] sm:$0xff] %v1321_v12  }
 0x127   : > { %v794_v25 = vadd.f32 %v1625_v49, %v756_v21  ;;  %v810_v26 = vadd.f32 %v1625_v49, %v772_v22  ;;  %v825_v27 = vmax.f32 %v793_v19, 0.0  ;;  %v841_v28 = vmax.f32 %v809_v20, 0.0 }
 0x129   : > { %v826_v29 = vmax.f32 %v794_v25, 0.0  ;;  %v842_v30 = vmax.f32 %v810_v26, 0.0 }
 0x12a   : > { %v652_v31 = vpop.f32.mrb[20].mxu0  ;;  %v716_v32 = vpop.f32.mrb[20].mxu1 }
 0x12b   : > { %v1286_v33 = vpack.c.bf16 %v826_v29, %v825_v27  ;;  %v1326_v34 = vpack.c.bf16 %v842_v30, %v841_v28  ;;  %v757_v35 = vmul.f32 %v1620_v47, %v652_v31  ;;  %v773_v36 = vmul.f32 %v1620_v47, %v716_v32  ;;  %v654_v37 = vpop.f32.mrb[21].mxu0  ;;  %v718_v38 = vpop.f32.mrb[21].mxu1 }
 0x12c   : > { %v655_v39 = vpop.f32.mrb[22].mxu0  ;;  %v719_v40 = vpop.f32.mrb[22].mxu1 }
 0x12d   : > { %1346 = vst [vmem:[%s1639_s29 + $0x20] sm:$0xff] %v1286_v33   ;;  %1354 = vst [vmem:[%s1639_s29 + $0x60] sm:$0xff] %v1326_v34   ;;  %v795_v41 = vadd.f32 %v1625_v49, %v757_v35  ;;  %v811_v42 = vadd.f32 %v1625_v49, %v773_v36  ;;  %v758_v43 = vmul.f32 %v1620_v47, %v655_v39  ;;  %v657_v45 = vpop.f32.mrb[23].mxu0  ;;  %v721_v46 = vpop.f32.mrb[23].mxu1 }
 0x12e   : > { %v774_v44 = vmul.f32 %v1620_v47, %v719_v40 }
 0x12f   : > { %v796_v48 = vadd.f32 %v1625_v49, %v758_v43  ;;  %v827_v51 = vmax.f32 %v795_v41, 0.0  ;;  %v843_v52 = vmax.f32 %v811_v42, 0.0 }
 0x130   : > { %v812_v50 = vadd.f32 %v1625_v49, %v774_v44 }
 0x131   : > { %v828_v53 = vmax.f32 %v796_v48, 0.0 }
 0x132   : > { %v844_v54 = vmax.f32 %v812_v50, 0.0  ;;  %v660_v55 = vpop.f32.mrb[24].mxu0  ;;  %v724_v56 = vpop.f32.mrb[24].mxu1 }
 0x133   : > { %v1291_v57 = vpack.c.bf16 %v828_v53, %v827_v51  ;;  %v759_v59 = vmul.f32 %v1620_v47, %v660_v55  ;;  %v775_v60 = vmul.f32 %v1620_v47, %v724_v56  ;;  %v662_v61 = vpop.f32.mrb[25].mxu0  ;;  %v726_v62 = vpop.f32.mrb[25].mxu1 }
 0x134   : > { %v1331_v58 = vpack.c.bf16 %v844_v54, %v843_v52  ;;  %v663_v63 = vpop.f32.mrb[26].mxu0  ;;  %v727_v0 = vpop.f32.mrb[26].mxu1 }
 0x135   : > { %1347 = vst [vmem:[%s1639_s29 + $0x28] sm:$0xff] %v1291_v57   ;;  %v797_v1 = vadd.f32 %v1625_v49, %v759_v59  ;;  %v813_v2 = vadd.f32 %v1625_v49, %v775_v60  ;;  %v760_v3 = vmul.f32 %v1620_v47, %v663_v63  ;;  %v776_v4 = vmul.f32 %v1620_v47, %v727_v0  ;;  %v665_v5 = vpop.f32.mrb[27].mxu0  ;;  %v729_v6 = vpop.f32.mrb[27].mxu1 }
 0x136   : > { %1355 = vst [vmem:[%s1639_s29 + $0x68] sm:$0xff] %v1331_v58  }
 0x137   : > { %v798_v7 = vadd.f32 %v1625_v49, %v760_v3  ;;  %v814_v8 = vadd.f32 %v1625_v49, %v776_v4  ;;  %v829_v9 = vmax.f32 %v797_v1, 0.0  ;;  %v845_v10 = vmax.f32 %v813_v2, 0.0 }
 0x139   : > { %v830_v11 = vmax.f32 %v798_v7, 0.0  ;;  %v846_v12 = vmax.f32 %v814_v8, 0.0 }
 0x13a   : > { %v668_v13 = vpop.f32.mrb[28].mxu0  ;;  %v732_v14 = vpop.f32.mrb[28].mxu1 }
 0x13b   : > { %v1296_v15 = vpack.c.bf16 %v830_v11, %v829_v9  ;;  %v1336_v16 = vpack.c.bf16 %v846_v12, %v845_v10  ;;  %v761_v17 = vmul.f32 %v1620_v47, %v668_v13  ;;  %v777_v18 = vmul.f32 %v1620_v47, %v732_v14  ;;  %v670_v19 = vpop.f32.mrb[29].mxu0  ;;  %v734_v20 = vpop.f32.mrb[29].mxu1 }
 0x13c   : > { %v671_v21 = vpop.f32.mrb[30].mxu0  ;;  %v735_v22 = vpop.f32.mrb[30].mxu1 }
 0x13d   : > { %1348 = vst [vmem:[%s1639_s29 + $0x30] sm:$0xff] %v1296_v15   ;;  %1356 = vst [vmem:[%s1639_s29 + $0x70] sm:$0xff] %v1336_v16   ;;  %v799_v23 = vadd.f32 %v1625_v49, %v761_v17  ;;  %v815_v24 = vadd.f32 %v1625_v49, %v777_v18  ;;  %v762_v25 = vmul.f32 %v1620_v47, %v671_v21  ;;  %v673_v27 = vpop.f32.mrb[31].mxu0  ;;  %v737_v28 = vpop.f32.mrb[31].mxu1 }
 0x13e   : > { %v778_v26 = vmul.f32 %v1620_v47, %v735_v22 }
 0x13f   : > { %v800_v29 = vadd.f32 %v1625_v49, %v762_v25  ;;  %v831_v31 = vmax.f32 %v799_v23, 0.0  ;;  %v847_v32 = vmax.f32 %v815_v24, 0.0 }
 0x140   : > { %v816_v30 = vadd.f32 %v1625_v49, %v778_v26 }
 0x141   : > { %v832_v33 = vmax.f32 %v800_v29, 0.0 }
 0x142   : > { %v848_v34 = vmax.f32 %v816_v30, 0.0 }
 0x143   : > { %v1301_v35 = vpack.c.bf16 %v832_v33, %v831_v31 }
 0x144   : > { %v1341_v36 = vpack.c.bf16 %v848_v34, %v847_v32 }
 0x145   : > { %1349 = vst [vmem:[%s1639_s29 + $0x38] sm:$0xff] %v1301_v35  }
 0x146   : > { %1357 = vst [vmem:[%s1639_s29 + $0x78] sm:$0xff] %v1341_v36  }
 0x147 PF: > { %s14_s17 = sadd.s32 1, %s1484_s17   ;;  %s1727_s15 = smov %s1480_s16 }
 0x148   : > { %p11_p5 = scmp.ge.s32.totalorder %s14_s17, 4   ;;  %s1728_s16 = smov %s1730_s18 }
 0x14a   :  { %13 = sbr.rel (!%p11_p5) target bundleno = 2 (0x2), region = 75 }

// kernel: volo_forward.32
= control target key start
LH: loop header
LB: loop body
LE: loop exit
PB: predicated region body
PF: predicated region fallthrough
CT: control target
= control target key end

     0   :  { %s1496_s15 = smov 0   ;;  %s1498_s16 = smov 0   ;;  %s1702_s0 = inlined_call_operand.vmem [shape: bf16[512,144], index: 0, kind: input, shape index: {}]   ;;  %s1703_s1 = inlined_call_operand.vmem [shape: bf16[144,128], index: 1, kind: input, shape index: {}]   ;;  %s1704_s2 = inlined_call_operand.vmem [shape: f32[1,128], index: 2, kind: input, shape index: {}]   ;;  %s1705_s3 = inlined_call_operand.vmem [shape: f32[1,128], index: 3, kind: input, shape index: {}]   ;;  %s1706_s4 = inlined_call_operand.vmem [shape: bf16[512,128], index: 4, kind: output, shape index: {}]  }
   0x1   :  { %s1500_s17 = smov 0  }
   0x2 LB: > { %s26_s18 = sadd.s32 1, %s1464_s16  ;;  %p1119_p0 = scmp.ge.s32.totalorder %s1468_s17, 1  ;;  %s1468_s17 = sphi %s1500_s17, %s14_s17   ;;  %s1464_s16 = sphi %s1498_s16, %s1708_s16   ;;  %s1460_s15 = sphi %s1496_s15, %s1707_s15  }
   0x3   : > { %p28_p1 = scmp.ge.s32.totalorder %s26_s18, 2  ;;  %p203_p2 = scmp.lt.s32.totalorder %s1468_s17, 3 }
   0x5   : > { %s1710_s18 = smov (%p28_p1, %s26_s18), 0  ;;  %p204_p3 = pnand %p1119_p0, %p203_p2 }
   0x6   : > { %v1389_v0 = vld [vmem:[%s1703_s1] sm:$0xff] (!%p204_p3)   ;;  %v1470_v1 = vmov (!%p204_p3), 0   ;;  %s1120_s21 = sshll.u32 (!%p204_p3), %s1460_s15, 5  ;;  %v1390_v2 = vld [vmem:[%s1703_s1 + $0x8] sm:$0xff] (!%p204_p3)   ;;  %v1391_v3 = vld [vmem:[%s1703_s1 + $0x10] sm:$0xff] (!%p204_p3)   ;;  %vm518_vm0 = vcmask (!%p204_p3), 130048  }
   0x7   : > { %207 = sbr.rel (%p204_p3) target bundleno = 323 (0x143), region = 36  ;;  %567 = vmatprep.subr.bf16.mxu0 (!%p204_p3), %v1470_v1  ;;  %1346 = vmatprep.subr.bf16.mxu1 (!%p204_p3), %v1470_v1  ;;  %p244_p4 = scmp.lt.s32.totalorder (!%p204_p3), %s1120_s21, 63  ;;  %v1392_v4 = vld [vmem:[%s1703_s1 + $0x18] sm:$0xff] (!%p204_p3)   ;;  %v1393_v7 = vld [vmem:[%s1703_s1 + $0x20] sm:$0xff] (!%p204_p3)   ;;  %v1394_v8 = vld [vmem:[%s1703_s1 + $0x28] sm:$0xff] (!%p204_p3)  }
   0x8   : > { %568 = vmatpush1.bf16.msra.mxu0 (!%p204_p3), %v1389_v0  ;;  %1355 = vmatpush1.bf16.msra.mxu1 (!%p204_p3), %v1389_v0  ;;  %v1395_v9 = vld [vmem:[%s1703_s1 + $0x30] sm:$0xff] (!%p204_p3)   ;;  %v1396_v10 = vld [vmem:[%s1703_s1 + $0x38] sm:$0xff] (!%p204_p3)   ;;  %v1397_v11 = vld [vmem:[%s1703_s1 + $0x40] sm:$0xff] (!%p204_p3)  }
   0x9   : > { %569 = vmatprep.subr.bf16.mxu0 (!%p204_p3), %v1470_v1  ;;  %1347 = vmatprep.subr.bf16.mxu1 (!%p204_p3), %v1470_v1  ;;  %v1600_v42 = vld [vmem:[%s1704_s2] ss:$0 sm:$0xff] (!%p204_p3) }
   0xa   : > { %v1605_v44 = vld [vmem:[%s1705_s3] ss:$0 sm:$0xff] (!%p204_p3) }
   0xc   : > { %570 = vmatpush1.bf16.msra.mxu0 (!%p204_p3), %v1390_v2  ;;  %1356 = vmatpush1.bf16.msra.mxu1 (!%p204_p3), %v1390_v2 }
   0xd   : > { %571 = vmatprep.subr.bf16.mxu0 (!%p204_p3), %v1470_v1  ;;  %1348 = vmatprep.subr.bf16.mxu1 (!%p204_p3), %v1470_v1 }
   0xe   : > { %s1712_s21 = smov (!%p244_p4, %s1120_s21), 63 }
   0xf   : > { %s1218_s26 = sshll.u32 %s1712_s21, 3  ;;  %s1124_s24 = sshll.u32 %s1712_s21, 2 }
  0x10   : > { %s1529_s29 = scalar_lea.vmem %s1702_s0, %s1218_s26  ;;  %572 = vmatpush1.bf16.msra.mxu0 %v1391_v3  ;;  %1357 = vmatpush1.bf16.msra.mxu1 %v1391_v3  ;;  %s1619_s27 = scalar_lea.vmem %s1706_s4, %s1124_s24 }
  0x11   : > { %v1400_v5 = vld [vmem:[%s1529_s29 + $0x4] ss:$8 sps:$4 sm:$0xff]   ;;  %573 = vmatprep.subr.bf16.mxu0 %v1470_v1  ;;  %1349 = vmatprep.subr.bf16.mxu1 %v1470_v1  ;;  %v1398_v12 = vld [vmem:[%s1529_s29] ss:$8 sps:$4 sm:$0xff]   ;;  %v1404_v14 = vld [vmem:[%s1529_s29 + $0x14] ss:$8 sps:$4 sm:$0xff]  }
  0x12   : > { %v1403_v6 = vld [vmem:[%s1529_s29 + $0x84] ss:$8 sps:$4 sm:$0xff]   ;;  %1166 = vmatprep.mubr.msk.bf16.mxu0 %vm518_vm0, %v1400_v5  ;;  %v1401_v13 = vld [vmem:[%s1529_s29 + $0x80] ss:$8 sps:$4 sm:$0xff]   ;;  %v1406_v15 = vld [vmem:[%s1529_s29 + $0x94] ss:$8 sps:$4 sm:$0xff]  }
  0x13   : > { %1174 = vmatprep.mubr.msk.bf16.mxu1 %vm518_vm0, %v1403_v6  ;;  %v1408_v16 = vld [vmem:[%s1529_s29 + $0x10] ss:$8 sps:$4 sm:$0xff]   ;;  %v1410_v18 = vld [vmem:[%s1529_s29 + $0x24] ss:$8 sps:$4 sm:$0xff]   ;;  %v1414_v20 = vld [vmem:[%s1529_s29 + $0x20] ss:$8 sps:$4 sm:$0xff]  }
  0x14   : > { %574 = vmatpush1.bf16.msra.mxu0 %v1392_v4  ;;  %1358 = vmatpush1.bf16.msra.mxu1 %v1392_v4  ;;  %v1409_v17 = vld [vmem:[%s1529_s29 + $0x90] ss:$8 sps:$4 sm:$0xff]   ;;  %v1412_v19 = vld [vmem:[%s1529_s29 + $0xa4] ss:$8 sps:$4 sm:$0xff]   ;;  %v1415_v21 = vld [vmem:[%s1529_s29 + $0xa0] ss:$8 sps:$4 sm:$0xff]  }
  0x15   : > { %575 = vmatprep.subr.bf16.mxu0 %v1470_v1  ;;  %1350 = vmatprep.subr.bf16.mxu1 %v1470_v1  ;;  %v1416_v22 = vld [vmem:[%s1529_s29 + $0x34] ss:$8 sps:$4 sm:$0xff]   ;;  %v1420_v24 = vld [vmem:[%s1529_s29 + $0x30] ss:$8 sps:$4 sm:$0xff]   ;;  %v1422_v26 = vld [vmem:[%s1529_s29 + $0x44] ss:$8 sps:$4 sm:$0xff]  }
  0x16   : > { %v1418_v23 = vld [vmem:[%s1529_s29 + $0xb4] ss:$8 sps:$4 sm:$0xff]   ;;  %v1421_v25 = vld [vmem:[%s1529_s29 + $0xb0] ss:$8 sps:$4 sm:$0xff]   ;;  %v1424_v27 = vld [vmem:[%s1529_s29 + $0xc4] ss:$8 sps:$4 sm:$0xff]  }
  0x17   : > { %v1426_v28 = vld [vmem:[%s1529_s29 + $0x40] ss:$8 sps:$4 sm:$0xff]   ;;  %v1428_v30 = vld [vmem:[%s1529_s29 + $0x54] ss:$8 sps:$4 sm:$0xff]   ;;  %v1432_v32 = vld [vmem:[%s1529_s29 + $0x50] ss:$8 sps:$4 sm:$0xff]  }
  0x18   : > { %576 = vmatpush1.bf16.msra.mxu0 %v1393_v7  ;;  %1359 = vmatpush1.bf16.msra.mxu1 %v1393_v7  ;;  %v1427_v29 = vld [vmem:[%s1529_s29 + $0xc0] ss:$8 sps:$4 sm:$0xff]   ;;  %v1430_v31 = vld [vmem:[%s1529_s29 + $0xd4] ss:$8 sps:$4 sm:$0xff]   ;;  %v1433_v33 = vld [vmem:[%s1529_s29 + $0xd0] ss:$8 sps:$4 sm:$0xff]  }
  0x19   : > { %577 = vmatprep.subr.bf16.mxu0 %v1470_v1  ;;  %1351 = vmatprep.subr.bf16.mxu1 %v1470_v1  ;;  %v1434_v34 = vld [vmem:[%s1529_s29 + $0x64] ss:$8 sps:$4 sm:$0xff]   ;;  %v1438_v36 = vld [vmem:[%s1529_s29 + $0x60] ss:$8 sps:$4 sm:$0xff]   ;;  %v1440_v38 = vld [vmem:[%s1529_s29 + $0x74] ss:$8 sps:$4 sm:$0xff]  }
  0x1a   : > { %v1436_v35 = vld [vmem:[%s1529_s29 + $0xe4] ss:$8 sps:$4 sm:$0xff]   ;;  %v1439_v37 = vld [vmem:[%s1529_s29 + $0xe0] ss:$8 sps:$4 sm:$0xff]   ;;  %v1442_v39 = vld [vmem:[%s1529_s29 + $0xf4] ss:$8 sps:$4 sm:$0xff]  }
  0x1b   : > { %v1444_v40 = vld [vmem:[%s1529_s29 + $0x70] ss:$8 sps:$4 sm:$0xff]  }
  0x1c   : > { %578 = vmatpush1.bf16.msra.mxu0 %v1394_v8  ;;  %1360 = vmatpush1.bf16.msra.mxu1 %v1394_v8  ;;  %v1445_v41 = vld [vmem:[%s1529_s29 + $0xf0] ss:$8 sps:$4 sm:$0xff]  }
  0x1d   : > { %579 = vmatprep.subr.bf16.mxu0 %v1470_v1  ;;  %1352 = vmatprep.subr.bf16.mxu1 %v1470_v1 }
  0x20   : > { %580 = vmatpush1.bf16.msra.mxu0 %v1395_v9  ;;  %1361 = vmatpush1.bf16.msra.mxu1 %v1395_v9 }
  0x21   : > { %581 = vmatprep.subr.bf16.mxu0 %v1470_v1  ;;  %1353 = vmatprep.subr.bf16.mxu1 %v1470_v1 }
  0x24   : > { %582 = vmatpush1.bf16.msra.mxu0 %v1396_v10  ;;  %1362 = vmatpush1.bf16.msra.mxu1 %v1396_v10 }
  0x25   : > { %583 = vmatprep.subr.bf16.mxu0 %v1470_v1  ;;  %1354 = vmatprep.subr.bf16.mxu1 %v1470_v1 }
  0x28   : > { %584 = vmatpush1.bf16.msra.mxu0 %v1397_v11  ;;  %1363 = vmatpush1.bf16.msra.mxu1 %v1397_v11 }
  0x2b   : > { %600 = vmatmul.mubr.bf16.vlgmr.msra.gmra.mrb[0].mxu0 %v1398_v12  ;;  %664 = vmatmul.mubr.bf16.vlgmr.msra.gmra.mrb[0].mxu1 %v1401_v13 }
  0x2c   : > { %1167 = vmatprep.mubr.msk.bf16.mxu0 %vm518_vm0, %v1404_v14  ;;  %1175 = vmatprep.mubr.msk.bf16.mxu1 %vm518_vm0, %v1406_v15 }
  0x33   : > { %608 = vmatmul.mubr.bf16.gmra.mrb[4].mxu0 %v1408_v16  ;;  %672 = vmatmul.mubr.bf16.gmra.mrb[4].mxu1 %v1409_v17 }
  0x34   : > { %1168 = vmatprep.mubr.msk.bf16.mxu0 %vm518_vm0, %v1410_v18  ;;  %1176 = vmatprep.mubr.msk.bf16.mxu1 %vm518_vm0, %v1412_v19 }
  0x3b   : > { %616 = vmatmul.mubr.bf16.gmra.mrb[8].mxu0 %v1414_v20  ;;  %680 = vmatmul.mubr.bf16.gmra.mrb[8].mxu1 %v1415_v21 }
  0x3c   : > { %1169 = vmatprep.mubr.msk.bf16.mxu0 %vm518_vm0, %v1416_v22  ;;  %1177 = vmatprep.mubr.msk.bf16.mxu1 %vm518_vm0, %v1418_v23 }
  0x43   : > { %624 = vmatmul.mubr.bf16.gmra.mrb[12].mxu0 %v1420_v24  ;;  %688 = vmatmul.mubr.bf16.gmra.mrb[12].mxu1 %v1421_v25 }
  0x44   : > { %1170 = vmatprep.mubr.msk.bf16.mxu0 %vm518_vm0, %v1422_v26  ;;  %1178 = vmatprep.mubr.msk.bf16.mxu1 %vm518_vm0, %v1424_v27 }
  0x4b   : > { %632 = vmatmul.mubr.bf16.gmra.mrb[16].mxu0 %v1426_v28  ;;  %696 = vmatmul.mubr.bf16.gmra.mrb[16].mxu1 %v1427_v29 }
  0x4c   : > { %1171 = vmatprep.mubr.msk.bf16.mxu0 %vm518_vm0, %v1428_v30  ;;  %1179 = vmatprep.mubr.msk.bf16.mxu1 %vm518_vm0, %v1430_v31 }
  0x53   : > { %640 = vmatmul.mubr.bf16.gmra.mrb[20].mxu0 %v1432_v32  ;;  %704 = vmatmul.mubr.bf16.gmra.mrb[20].mxu1 %v1433_v33 }
  0x54   : > { %1172 = vmatprep.mubr.msk.bf16.mxu0 %vm518_vm0, %v1434_v34  ;;  %1180 = vmatprep.mubr.msk.bf16.mxu1 %vm518_vm0, %v1436_v35 }
  0x5b   : > { %648 = vmatmul.mubr.bf16.gmra.mrb[24].mxu0 %v1438_v36  ;;  %712 = vmatmul.mubr.bf16.gmra.mrb[24].mxu1 %v1439_v37 }
  0x5c   : > { %1173 = vmatprep.mubr.msk.bf16.mxu0 %vm518_vm0, %v1440_v38  ;;  %1181 = vmatprep.mubr.msk.bf16.mxu1 %vm518_vm0, %v1442_v39 }
  0x63   : > { %656 = vmatmul.mubr.bf16.gmra.mrb[28].mxu0 %v1444_v40  ;;  %720 = vmatmul.mubr.bf16.gmra.mrb[28].mxu1 %v1445_v41 }
  0xfe   : > { %v601_v43 = vpop.f32.mrb[0].mxu0  ;;  %v665_v45 = vpop.f32.mrb[0].mxu1 }
  0xff   : > { %v736_v46 = vmul.f32 %v1600_v42, %v601_v43  ;;  %v752_v47 = vmul.f32 %v1600_v42, %v665_v45  ;;  %v603_v48 = vpop.f32.mrb[1].mxu0  ;;  %v667_v49 = vpop.f32.mrb[1].mxu1 }
 0x100   : > { %v604_v50 = vpop.f32.mrb[2].mxu0  ;;  %v668_v51 = vpop.f32.mrb[2].mxu1 }
 0x101   : > { %v774_v52 = vadd.f32 %v1605_v44, %v736_v46  ;;  %v790_v53 = vadd.f32 %v1605_v44, %v752_v47  ;;  %v737_v54 = vmul.f32 %v1600_v42, %v604_v50  ;;  %v753_v55 = vmul.f32 %v1600_v42, %v668_v51  ;;  %v606_v56 = vpop.f32.mrb[3].mxu0  ;;  %v670_v57 = vpop.f32.mrb[3].mxu1 }
 0x103   : > { %v775_v58 = vadd.f32 %v1605_v44, %v737_v54  ;;  %v791_v59 = vadd.f32 %v1605_v44, %v753_v55  ;;  %v806_v60 = vmax.f32 %v774_v52, 0.0  ;;  %v822_v61 = vmax.f32 %v790_v53, 0.0 }
 0x105   : > { %v807_v62 = vmax.f32 %v775_v58, 0.0  ;;  %v823_v63 = vmax.f32 %v791_v59, 0.0 }
 0x106   : > { %v609_v0 = vpop.f32.mrb[4].mxu0  ;;  %v673_v1 = vpop.f32.mrb[4].mxu1 }
 0x107   : > { %v1254_v2 = vpack.c.bf16 %v807_v62, %v806_v60  ;;  %v1294_v3 = vpack.c.bf16 %v823_v63, %v822_v61  ;;  %v738_v4 = vmul.f32 %v1600_v42, %v609_v0  ;;  %v754_v5 = vmul.f32 %v1600_v42, %v673_v1  ;;  %v611_v6 = vpop.f32.mrb[5].mxu0  ;;  %v675_v7 = vpop.f32.mrb[5].mxu1 }
 0x108   : > { %v612_v8 = vpop.f32.mrb[6].mxu0  ;;  %v676_v9 = vpop.f32.mrb[6].mxu1 }
 0x109   : > { %1255 = vst [vmem:[%s1619_s27] sm:$0xff] %v1254_v2   ;;  %1338 = vst [vmem:[%s1619_s27 + $0x40] sm:$0xff] %v1294_v3   ;;  %v776_v10 = vadd.f32 %v1605_v44, %v738_v4  ;;  %v792_v11 = vadd.f32 %v1605_v44, %v754_v5  ;;  %v739_v12 = vmul.f32 %v1600_v42, %v612_v8  ;;  %v614_v14 = vpop.f32.mrb[7].mxu0  ;;  %v678_v15 = vpop.f32.mrb[7].mxu1 }
 0x10a   : > { %v755_v13 = vmul.f32 %v1600_v42, %v676_v9 }
 0x10b   : > { %v777_v16 = vadd.f32 %v1605_v44, %v739_v12  ;;  %v808_v18 = vmax.f32 %v776_v10, 0.0  ;;  %v824_v19 = vmax.f32 %v792_v11, 0.0 }
 0x10c   : > { %v793_v17 = vadd.f32 %v1605_v44, %v755_v13 }
 0x10d   : > { %v809_v20 = vmax.f32 %v777_v16, 0.0 }
 0x10e   : > { %v825_v21 = vmax.f32 %v793_v17, 0.0  ;;  %v617_v22 = vpop.f32.mrb[8].mxu0  ;;  %v681_v23 = vpop.f32.mrb[8].mxu1 }
 0x10f   : > { %v1259_v24 = vpack.c.bf16 %v809_v20, %v808_v18  ;;  %v740_v26 = vmul.f32 %v1600_v42, %v617_v22  ;;  %v756_v27 = vmul.f32 %v1600_v42, %v681_v23  ;;  %v619_v28 = vpop.f32.mrb[9].mxu0  ;;  %v683_v29 = vpop.f32.mrb[9].mxu1 }
 0x110   : > { %v1299_v25 = vpack.c.bf16 %v825_v21, %v824_v19  ;;  %v620_v30 = vpop.f32.mrb[10].mxu0  ;;  %v684_v31 = vpop.f32.mrb[10].mxu1 }
 0x111   : > { %1331 = vst [vmem:[%s1619_s27 + $0x8] sm:$0xff] %v1259_v24   ;;  %v778_v32 = vadd.f32 %v1605_v44, %v740_v26  ;;  %v794_v33 = vadd.f32 %v1605_v44, %v756_v27  ;;  %v741_v34 = vmul.f32 %v1600_v42, %v620_v30  ;;  %v757_v35 = vmul.f32 %v1600_v42, %v684_v31  ;;  %v622_v36 = vpop.f32.mrb[11].mxu0  ;;  %v686_v37 = vpop.f32.mrb[11].mxu1 }
 0x112   : > { %1339 = vst [vmem:[%s1619_s27 + $0x48] sm:$0xff] %v1299_v25  }
 0x113   : > { %v779_v38 = vadd.f32 %v1605_v44, %v741_v34  ;;  %v795_v39 = vadd.f32 %v1605_v44, %v757_v35  ;;  %v810_v40 = vmax.f32 %v778_v32, 0.0  ;;  %v826_v41 = vmax.f32 %v794_v33, 0.0 }
 0x115   : > { %v811_v43 = vmax.f32 %v779_v38, 0.0  ;;  %v827_v45 = vmax.f32 %v795_v39, 0.0 }
 0x116   : > { %v625_v46 = vpop.f32.mrb[12].mxu0  ;;  %v689_v47 = vpop.f32.mrb[12].mxu1 }
 0x117   : > { %v1264_v48 = vpack.c.bf16 %v811_v43, %v810_v40  ;;  %v1304_v49 = vpack.c.bf16 %v827_v45, %v826_v41  ;;  %v742_v50 = vmul.f32 %v1600_v42, %v625_v46  ;;  %v758_v51 = vmul.f32 %v1600_v42, %v689_v47  ;;  %v627_v52 = vpop.f32.mrb[13].mxu0  ;;  %v691_v53 = vpop.f32.mrb[13].mxu1 }
 0x118   : > { %v628_v54 = vpop.f32.mrb[14].mxu0  ;;  %v692_v55 = vpop.f32.mrb[14].mxu1 }
 0x119   : > { %1332 = vst [vmem:[%s1619_s27 + $0x10] sm:$0xff] %v1264_v48   ;;  %1340 = vst [vmem:[%s1619_s27 + $0x50] sm:$0xff] %v1304_v49   ;;  %v780_v56 = vadd.f32 %v1605_v44, %v742_v50  ;;  %v796_v57 = vadd.f32 %v1605_v44, %v758_v51  ;;  %v743_v58 = vmul.f32 %v1600_v42, %v628_v54  ;;  %v630_v60 = vpop.f32.mrb[15].mxu0  ;;  %v694_v61 = vpop.f32.mrb[15].mxu1 }
 0x11a   : > { %v759_v59 = vmul.f32 %v1600_v42, %v692_v55 }
 0x11b   : > { %v781_v62 = vadd.f32 %v1605_v44, %v743_v58  ;;  %v812_v0 = vmax.f32 %v780_v56, 0.0  ;;  %v828_v1 = vmax.f32 %v796_v57, 0.0 }
 0x11c   : > { %v797_v63 = vadd.f32 %v1605_v44, %v759_v59 }
 0x11d   : > { %v813_v2 = vmax.f32 %v781_v62, 0.0 }
 0x11e   : > { %v829_v3 = vmax.f32 %v797_v63, 0.0  ;;  %v633_v4 = vpop.f32.mrb[16].mxu0  ;;  %v697_v5 = vpop.f32.mrb[16].mxu1 }
 0x11f   : > { %v1269_v6 = vpack.c.bf16 %v813_v2, %v812_v0  ;;  %v744_v8 = vmul.f32 %v1600_v42, %v633_v4  ;;  %v760_v9 = vmul.f32 %v1600_v42, %v697_v5  ;;  %v635_v10 = vpop.f32.mrb[17].mxu0  ;;  %v699_v11 = vpop.f32.mrb[17].mxu1 }
 0x120   : > { %v1309_v7 = vpack.c.bf16 %v829_v3, %v828_v1  ;;  %v636_v12 = vpop.f32.mrb[18].mxu0  ;;  %v700_v13 = vpop.f32.mrb[18].mxu1 }
 0x121   : > { %1333 = vst [vmem:[%s1619_s27 + $0x18] sm:$0xff] %v1269_v6   ;;  %v782_v14 = vadd.f32 %v1605_v44, %v744_v8  ;;  %v798_v15 = vadd.f32 %v1605_v44, %v760_v9  ;;  %v745_v16 = vmul.f32 %v1600_v42, %v636_v12  ;;  %v761_v17 = vmul.f32 %v1600_v42, %v700_v13  ;;  %v638_v18 = vpop.f32.mrb[19].mxu0  ;;  %v702_v19 = vpop.f32.mrb[19].mxu1 }
 0x122   : > { %1341 = vst [vmem:[%s1619_s27 + $0x58] sm:$0xff] %v1309_v7  }
 0x123   : > { %v783_v20 = vadd.f32 %v1605_v44, %v745_v16  ;;  %v799_v21 = vadd.f32 %v1605_v44, %v761_v17  ;;  %v814_v22 = vmax.f32 %v782_v14, 0.0  ;;  %v830_v23 = vmax.f32 %v798_v15, 0.0 }
 0x125   : > { %v815_v24 = vmax.f32 %v783_v20, 0.0  ;;  %v831_v25 = vmax.f32 %v799_v21, 0.0 }
 0x126   : > { %v641_v26 = vpop.f32.mrb[20].mxu0  ;;  %v705_v27 = vpop.f32.mrb[20].mxu1 }
 0x127   : > { %v1274_v28 = vpack.c.bf16 %v815_v24, %v814_v22  ;;  %v1314_v29 = vpack.c.bf16 %v831_v25, %v830_v23  ;;  %v746_v30 = vmul.f32 %v1600_v42, %v641_v26  ;;  %v762_v31 = vmul.f32 %v1600_v42, %v705_v27  ;;  %v643_v32 = vpop.f32.mrb[21].mxu0  ;;  %v707_v33 = vpop.f32.mrb[21].mxu1 }
 0x128   : > { %v644_v34 = vpop.f32.mrb[22].mxu0  ;;  %v708_v35 = vpop.f32.mrb[22].mxu1 }
 0x129   : > { %1334 = vst [vmem:[%s1619_s27 + $0x20] sm:$0xff] %v1274_v28   ;;  %1342 = vst [vmem:[%s1619_s27 + $0x60] sm:$0xff] %v1314_v29   ;;  %v784_v36 = vadd.f32 %v1605_v44, %v746_v30  ;;  %v800_v37 = vadd.f32 %v1605_v44, %v762_v31  ;;  %v747_v38 = vmul.f32 %v1600_v42, %v644_v34  ;;  %v646_v40 = vpop.f32.mrb[23].mxu0  ;;  %v710_v41 = vpop.f32.mrb[23].mxu1 }
 0x12a   : > { %v763_v39 = vmul.f32 %v1600_v42, %v708_v35 }
 0x12b   : > { %v785_v43 = vadd.f32 %v1605_v44, %v747_v38  ;;  %v816_v46 = vmax.f32 %v784_v36, 0.0  ;;  %v832_v47 = vmax.f32 %v800_v37, 0.0 }
 0x12c   : > { %v801_v45 = vadd.f32 %v1605_v44, %v763_v39 }
 0x12d   : > { %v817_v48 = vmax.f32 %v785_v43, 0.0 }
 0x12e   : > { %v833_v49 = vmax.f32 %v801_v45, 0.0  ;;  %v649_v50 = vpop.f32.mrb[24].mxu0  ;;  %v713_v51 = vpop.f32.mrb[24].mxu1 }
 0x12f   : > { %v1279_v52 = vpack.c.bf16 %v817_v48, %v816_v46  ;;  %v748_v54 = vmul.f32 %v1600_v42, %v649_v50  ;;  %v764_v55 = vmul.f32 %v1600_v42, %v713_v51  ;;  %v651_v56 = vpop.f32.mrb[25].mxu0  ;;  %v715_v57 = vpop.f32.mrb[25].mxu1 }
 0x130   : > { %v1319_v53 = vpack.c.bf16 %v833_v49, %v832_v47  ;;  %v652_v58 = vpop.f32.mrb[26].mxu0  ;;  %v716_v59 = vpop.f32.mrb[26].mxu1 }
 0x131   : > { %1335 = vst [vmem:[%s1619_s27 + $0x28] sm:$0xff] %v1279_v52   ;;  %v786_v60 = vadd.f32 %v1605_v44, %v748_v54  ;;  %v802_v61 = vadd.f32 %v1605_v44, %v764_v55  ;;  %v749_v62 = vmul.f32 %v1600_v42, %v652_v58  ;;  %v765_v63 = vmul.f32 %v1600_v42, %v716_v59  ;;  %v654_v0 = vpop.f32.mrb[27].mxu0  ;;  %v718_v1 = vpop.f32.mrb[27].mxu1 }
 0x132   : > { %1343 = vst [vmem:[%s1619_s27 + $0x68] sm:$0xff] %v1319_v53  }
 0x133   : > { %v787_v2 = vadd.f32 %v1605_v44, %v749_v62  ;;  %v803_v3 = vadd.f32 %v1605_v44, %v765_v63  ;;  %v818_v4 = vmax.f32 %v786_v60, 0.0  ;;  %v834_v5 = vmax.f32 %v802_v61, 0.0 }
 0x135   : > { %v819_v6 = vmax.f32 %v787_v2, 0.0  ;;  %v835_v7 = vmax.f32 %v803_v3, 0.0 }
 0x136   : > { %v657_v8 = vpop.f32.mrb[28].mxu0  ;;  %v721_v9 = vpop.f32.mrb[28].mxu1 }
 0x137   : > { %v1284_v10 = vpack.c.bf16 %v819_v6, %v818_v4  ;;  %v1324_v11 = vpack.c.bf16 %v835_v7, %v834_v5  ;;  %v750_v12 = vmul.f32 %v1600_v42, %v657_v8  ;;  %v766_v13 = vmul.f32 %v1600_v42, %v721_v9  ;;  %v659_v14 = vpop.f32.mrb[29].mxu0  ;;  %v723_v15 = vpop.f32.mrb[29].mxu1 }
 0x138   : > { %v660_v16 = vpop.f32.mrb[30].mxu0  ;;  %v724_v17 = vpop.f32.mrb[30].mxu1 }
 0x139   : > { %1336 = vst [vmem:[%s1619_s27 + $0x30] sm:$0xff] %v1284_v10   ;;  %1344 = vst [vmem:[%s1619_s27 + $0x70] sm:$0xff] %v1324_v11   ;;  %v788_v18 = vadd.f32 %v1605_v44, %v750_v12  ;;  %v804_v19 = vadd.f32 %v1605_v44, %v766_v13  ;;  %v751_v20 = vmul.f32 %v1600_v42, %v660_v16  ;;  %v662_v22 = vpop.f32.mrb[31].mxu0  ;;  %v726_v23 = vpop.f32.mrb[31].mxu1 }
 0x13a   : > { %v767_v21 = vmul.f32 %v1600_v42, %v724_v17 }
 0x13b   : > { %v789_v24 = vadd.f32 %v1605_v44, %v751_v20  ;;  %v820_v26 = vmax.f32 %v788_v18, 0.0  ;;  %v836_v27 = vmax.f32 %v804_v19, 0.0 }
 0x13c   : > { %v805_v25 = vadd.f32 %v1605_v44, %v767_v21 }
 0x13d   : > { %v821_v28 = vmax.f32 %v789_v24, 0.0 }
 0x13e   : > { %v837_v29 = vmax.f32 %v805_v25, 0.0 }
 0x13f   : > { %v1289_v30 = vpack.c.bf16 %v821_v28, %v820_v26 }
 0x140   : > { %v1329_v31 = vpack.c.bf16 %v837_v29, %v836_v27 }
 0x141   : > { %1337 = vst [vmem:[%s1619_s27 + $0x38] sm:$0xff] %v1289_v30  }
 0x142   : > { %1345 = vst [vmem:[%s1619_s27 + $0x78] sm:$0xff] %v1329_v31  }
 0x143 PF: > { %s14_s17 = sadd.s32 1, %s1468_s17   ;;  %s1707_s15 = smov %s1464_s16 }
 0x144   : > { %p11_p5 = scmp.ge.s32.totalorder %s14_s17, 4   ;;  %s1708_s16 = smov %s1710_s18 }
 0x146   :  { %13 = sbr.rel (!%p11_p5) target bundleno = 2 (0x2), region = 75 }

// kernel: volo_forward.34
= control target key start
LH: loop header
LB: loop body
LE: loop exit
PB: predicated region body
PF: predicated region fallthrough
CT: control target
= control target key end

     0   :  { %s752_s15 = smov 0   ;;  %s754_s16 = smov 0   ;;  %s843_s0 = inlined_call_operand.vmem [shape: bf16[32,256], index: 0, kind: input, shape index: {}]   ;;  %s844_s1 = inlined_call_operand.vmem [shape: bf16[256,128], index: 1, kind: input, shape index: {}]   ;;  %s845_s2 = inlined_call_operand.vmem [shape: f32[1,128], index: 2, kind: input, shape index: {}]   ;;  %s846_s3 = inlined_call_operand.vmem [shape: f32[1,128], index: 3, kind: input, shape index: {}]   ;;  %s847_s4 = inlined_call_operand.vmem [shape: bf16[32,128], index: 4, kind: output, shape index: {}]  }
   0x1   :  { %s756_s17 = smov 0  }
   0x2 LB: > { %s26_s18 = sadd.s32 1, %s721_s16  ;;  %p600_p0 = scmp.ge.s32.totalorder %s725_s17, 1  ;;  %s725_s17 = sphi %s756_s17, %s14_s17   ;;  %s721_s16 = sphi %s754_s16, %s849_s16   ;;  %s717_s15 = sphi %s752_s15, %s848_s15  }
   0x3   : > { %p28_p1 = scmp.ge.s32.totalorder %s26_s18, 2  ;;  %p203_p2 = scmp.lt.s32.totalorder %s725_s17, 3 }
   0x5   : > { %s851_s18 = smov (%p28_p1, %s26_s18), 0  ;;  %p204_p3 = pnand %p600_p0, %p203_p2 }
   0x6   : > { %v684_v0 = vld [vmem:[%s844_s1 + $0x40] sm:$0xff] (!%p204_p3)   ;;  %s601_s21 = sshll.u32 (!%p204_p3), %s717_s15, 1  ;;  %v686_v2 = vld [vmem:[%s844_s1 + $0x48] sm:$0xff] (!%p204_p3)   ;;  %v688_v4 = vld [vmem:[%s844_s1 + $0x50] sm:$0xff] (!%p204_p3)  }
   0x7   : > { %207 = sbr.rel (%p204_p3) target bundleno = 263 (0x107), region = 36  ;;  %v685_v1 = vld [vmem:[%s844_s1] sm:$0xff] (!%p204_p3)   ;;  %638 = vmatprep.subr.bf16.mxu0 (!%p204_p3), %v684_v0  ;;  %v687_v3 = vld [vmem:[%s844_s1 + $0x8] sm:$0xff] (!%p204_p3)   ;;  %p244_p4 = scmp.lt.s32.totalorder (!%p204_p3), %s601_s21, 3  ;;  %v689_v5 = vld [vmem:[%s844_s1 + $0x10] sm:$0xff] (!%p204_p3)  }
   0x8   : > { %639 = vmatpush3.bf16.msra.mxu0 (!%p204_p3), %v685_v1  ;;  %v690_v6 = vld [vmem:[%s844_s1 + $0x58] sm:$0xff] (!%p204_p3)   ;;  %v692_v8 = vld [vmem:[%s844_s1 + $0x60] sm:$0xff] (!%p204_p3)   ;;  %v694_v10 = vld [vmem:[%s844_s1 + $0x68] sm:$0xff] (!%p204_p3)  }
   0x9   : > { %640 = vmatprep.subr.bf16.mxu0 (!%p204_p3), %v686_v2  ;;  %v691_v7 = vld [vmem:[%s844_s1 + $0x18] sm:$0xff] (!%p204_p3)   ;;  %v693_v9 = vld [vmem:[%s844_s1 + $0x20] sm:$0xff] (!%p204_p3)   ;;  %v695_v12 = vld [vmem:[%s844_s1 + $0x28] sm:$0xff] (!%p204_p3)  }
   0xa   : > { %v696_v13 = vld [vmem:[%s844_s1 + $0x70] sm:$0xff] (!%p204_p3)   ;;  %v698_v15 = vld [vmem:[%s844_s1 + $0x78] sm:$0xff] (!%p204_p3)   ;;  %v624_v20 = vld [vmem:[%s845_s2] ss:$0 sm:$0xff] (!%p204_p3) }
   0xb   : > { %v697_v14 = vld [vmem:[%s844_s1 + $0x30] sm:$0xff] (!%p204_p3)   ;;  %v699_v16 = vld [vmem:[%s844_s1 + $0x38] sm:$0xff] (!%p204_p3)   ;;  %v625_v26 = vld [vmem:[%s846_s3] ss:$0 sm:$0xff] (!%p204_p3) }
   0xc   : > { %641 = vmatpush3.bf16.msra.mxu0 (!%p204_p3), %v687_v3 }
   0xd   : > { %642 = vmatprep.subr.bf16.mxu0 (!%p204_p3), %v688_v4 }
   0xe   : > { %s853_s21 = smov (!%p244_p4, %s601_s21), 3 }
   0xf   : > { %s630_s10 = sshll.u32 %s853_s21, 3  ;;  %s605_s12 = sshll.u32 %s853_s21, 2 }
  0x10   : > { %643 = vmatpush3.bf16.msra.mxu0 %v689_v5  ;;  %s248_s15 = scalar_lea.vmem %s843_s0, %s630_s10 }
  0x11   : > { %644 = vmatprep.subr.bf16.mxu0 %v690_v6  ;;  %v702_v11 = vld [vmem:[%s248_s15 + $0x4] ss:$8 sps:$4 sm:$0xff]   ;;  %v700_v17 = vld [vmem:[%s248_s15] ss:$8 sps:$4 sm:$0xff]   ;;  %s267_s15 = scalar_lea.vmem %s847_s4, %s605_s12 }
  0x12   : > { %442 = vmatprep.mubr.bf16.mxu0 %v702_v11 }
  0x14   : > { %645 = vmatpush3.bf16.msra.mxu0 %v691_v7 }
  0x15   : > { %646 = vmatprep.subr.bf16.mxu0 %v692_v8 }
  0x18   : > { %647 = vmatpush3.bf16.msra.mxu0 %v693_v9 }
  0x19   : > { %648 = vmatprep.subr.bf16.mxu0 %v694_v10 }
  0x1c   : > { %649 = vmatpush3.bf16.msra.mxu0 %v695_v12 }
  0x1d   : > { %650 = vmatprep.subr.bf16.mxu0 %v696_v13 }
  0x20   : > { %651 = vmatpush3.bf16.msra.mxu0 %v697_v14 }
  0x21   : > { %652 = vmatprep.subr.bf16.mxu0 %v698_v15 }
  0x24   : > { %653 = vmatpush3.bf16.msra.mxu0 %v699_v16 }
  0x27   : > { %443 = vmatmul.mubr.bf16.vlgmr.msra.gmra.mrb[0].mxu0 %v700_v17 }
  0xfa   : > { %v654_v18 = vpop.f32.mrb[0].mxu0 }
  0xfb   : > { %v655_v19 = vpop.f32.mrb[1].mxu0 }
  0xfc   : > { %v656_v21 = vadd.f32 %v655_v19, %v654_v18  ;;  %v657_v22 = vpop.f32.mrb[2].mxu0 }
  0xfd   : > { %v658_v23 = vpop.f32.mrb[3].mxu0 }
  0xfe   : > { %v459_v24 = vmul.f32 %v656_v21, %v624_v20  ;;  %v659_v25 = vadd.f32 %v658_v23, %v657_v22 }
 0x100   : > { %v460_v27 = vmul.f32 %v659_v25, %v624_v20  ;;  %v467_v28 = vadd.f32 %v625_v26, %v459_v24 }
 0x102   : > { %v468_v29 = vadd.f32 %v625_v26, %v460_v27 }
 0x104   : > { %v636_v30 = vpack.c.bf16 %v468_v29, %v467_v28 }
 0x106   : > { %637 = vst [vmem:[%s267_s15] sm:$0xff] %v636_v30  }
 0x107 PF: > { %s14_s17 = sadd.s32 1, %s725_s17   ;;  %s848_s15 = smov %s721_s16 }
 0x108   : > { %p11_p5 = scmp.ge.s32.totalorder %s14_s17, 4   ;;  %s849_s16 = smov %s851_s18 }
 0x10a   :  { %13 = sbr.rel (!%p11_p5) target bundleno = 2 (0x2), region = 75 }

// kernel: volo_forward.36
= control target key start
LH: loop header
LB: loop body
LE: loop exit
PB: predicated region body
PF: predicated region fallthrough
CT: control target
= control target key end

     0   :  { %s597_s15 = smov 0   ;;  %s599_s16 = smov 0   ;;  %s642_s0 = inlined_call_operand.vmem [shape: bf16[32,32], index: 0, kind: input, shape index: {}]   ;;  %s643_s1 = inlined_call_operand.vmem [shape: bf16[32,128], index: 1, kind: input, shape index: {}]   ;;  %s644_s2 = inlined_call_operand.vmem [shape: f32[1,128], index: 2, kind: input, shape index: {}]   ;;  %s645_s3 = inlined_call_operand.vmem [shape: f32[1,128], index: 3, kind: input, shape index: {}]   ;;  %s646_s4 = inlined_call_operand.vmem [shape: bf16[32,128], index: 4, kind: output, shape index: {}]  }
   0x1   :  { %s601_s17 = smov 0  }
   0x2 LB: > { %s26_s18 = sadd.s32 1, %s564_s16  ;;  %p484_p0 = scmp.ge.s32.totalorder %s568_s17, 1  ;;  %s568_s17 = sphi %s601_s17, %s14_s17   ;;  %s564_s16 = sphi %s599_s16, %s648_s16   ;;  %s560_s15 = sphi %s597_s15, %s647_s15  }
   0x3   : > { %p28_p1 = scmp.ge.s32.totalorder %s26_s18, 2  ;;  %p202_p2 = scmp.lt.s32.totalorder %s568_s17, 3 }
   0x5   : > { %s650_s18 = smov (%p28_p1, %s26_s18), 0  ;;  %p203_p3 = pnand %p484_p0, %p202_p2 }
   0x6   : > { %v543_v0 = vld [vmem:[%s643_s1] sm:$0xff] (!%p203_p3)   ;;  %v570_v1 = vmov (!%p203_p3), 0.0   ;;  %v544_v2 = vld [vmem:[%s643_s1 + $0x8] sm:$0xff] (!%p203_p3)   ;;  %vm571_vm0 = vmmov (!%p203_p3), 0   ;;  %s485_s23 = sshll.u32 (!%p203_p3), %s560_s15, 1  ;;  %vm290_vm1 = vcmask (!%p203_p3), 261120  }
   0x7   : > { %206 = sbr.rel (%p203_p3) target bundleno = 239 (0xef), region = 36  ;;  %509 = vmatprep.subr.bf16.mxu0 (!%p203_p3), %v570_v1  ;;  %513 = vmatprep.mubr.msk.bf16.mxu0 (!%p203_p3), %vm571_vm0, %v570_v1  ;;  %p242_p4 = scmp.lt.s32.totalorder (!%p203_p3), %s485_s23, 3  ;;  %v493_v4 = vld [vmem:[%s644_s2] ss:$0 sm:$0xff] (!%p203_p3) }
   0x8   : > { %510 = vmatpush3.bf16.msra.mxu0 (!%p203_p3), %v543_v0  ;;  %v494_v8 = vld [vmem:[%s645_s3] ss:$0 sm:$0xff] (!%p203_p3) }
   0x9   : > { %511 = vmatprep.subr.bf16.mxu0 (!%p203_p3), %v570_v1 }
   0xc   : > { %512 = vmatpush3.bf16.msra.mxu0 (!%p203_p3), %v544_v2 }
   0xe   : > { %s652_s23 = smov (!%p242_p4, %s485_s23), 3 }
   0xf   : > { %s486_s24 = sshll.u32 %s652_s23, 2 }
  0x10   : > { %s245_s27 = scalar_lea.vmem %s642_s0, %s486_s24  ;;  %s264_s8 = scalar_lea.vmem %s646_s4, %s486_s24 }
  0x11   : > { %v545_v3 = vld [vmem:[%s245_s27] sm:$0xff]  }
  0x12   : > { %514 = vmatmul.mubr.msk.bf16.vlgmr.msra.gmra.mrb[0].mxu0 %vm290_vm1, %v545_v3 }
  0xe5   : > { %v328_v5 = vpop.f32.mrb[0].mxu0 }
  0xe6   : > { %v343_v6 = vmul.f32 %v493_v4, %v328_v5  ;;  %v515_v7 = vpop.f32.mrb[1].mxu0 }
  0xe7   : > { %v331_v9 = vpop.f32.mrb[2].mxu0 }
  0xe8   : > { %v344_v10 = vmul.f32 %v493_v4, %v331_v9  ;;  %v516_v11 = vpop.f32.mrb[3].mxu0  ;;  %v351_v12 = vadd.f32 %v494_v8, %v343_v6 }
  0xea   : > { %v352_v13 = vadd.f32 %v494_v8, %v344_v10 }
  0xec   : > { %v504_v14 = vpack.c.bf16 %v352_v13, %v351_v12 }
  0xee   : > { %505 = vst [vmem:[%s264_s8] sm:$0xff] %v504_v14  }
  0xef PF: > { %s14_s17 = sadd.s32 1, %s568_s17   ;;  %s647_s15 = smov %s564_s16 }
  0xf0   : > { %p11_p5 = scmp.ge.s32.totalorder %s14_s17, 4   ;;  %s648_s16 = smov %s650_s18 }
  0xf2   :  { %13 = sbr.rel (!%p11_p5) target bundleno = 2 (0x2), region = 75 }

// kernel: volo_forward.35
= control target key start
LH: loop header
LB: loop body
LE: loop exit
PB: predicated region body
PF: predicated region fallthrough
CT: control target
= control target key end

     0   :  { %s352_s12 = smov 0   ;;  %s386_s0 = inlined_call_operand.vmem [shape: bf16[32,32], index: 0, kind: input, shape index: {}]   ;;  %s387_s1 = inlined_call_operand.vmem [shape: f32[1,32], index: 1, kind: input, shape index: {}]   ;;  %s388_s2 = inlined_call_operand.vmem [shape: f32[1,32], index: 2, kind: input, shape index: {}]   ;;  %s389_s3 = inlined_call_operand.vmem [shape: bf16[32,32], index: 3, kind: output, shape index: {}]  }
   0x1 LB: > { %s291_s13 = sadd.s32 4294967295, %s330_s12   ;;  %p295_p0 = scmp.ge.s32.totalorder %s330_s12, 1  ;;  %s330_s12 = sphi %s352_s12, %s13_s12  }
   0x2   : > { %p138_p1 = scmp.lt.s32.totalorder %s330_s12, 3 }
   0x4   : > { %p139_p2 = pnand %p295_p0, %p138_p1 }
   0x5   : > { %s296_s14 = sshll.u32 (!%p139_p2), %s291_s13, 1  ;;  %vm178_vm0 = vcmask (!%p139_p2), 261120   ;;  %v300_v22 = vld [vmem:[%s387_s1] ss:$0 sm:$0xff] (!%p139_p2)  ;;  %vm232_vm1 = vcmask (!%p139_p2), 257024  }
   0x6   : > { %142 = sbr.rel (%p139_p2) target bundleno = 339 (0x153), region = 32  ;;  %p163_p3 = scmp.lt.s32.totalorder (!%p139_p2), %s296_s14, 3  ;;  %v301_v24 = vld [vmem:[%s388_s2] ss:$0 sm:$0xff] (!%p139_p2) }
   0xd   : > { %s391_s14 = smov (!%p163_p3, %s296_s14), 3 }
   0xe   : > { %s297_s15 = sshll.u32 %s391_s14, 2 }
   0xf   : > { %s166_s18 = scalar_lea.vmem %s386_s0, %s297_s15  ;;  %s172_s25 = scalar_lea.vmem %s389_s3, %s297_s15 }
  0x10   : > { %v309_v0 = vld [vmem:[%s166_s18] sm:$0xff]  }
  0x11   : > { %v310_v1 = vunpack.c.l.bf16 %v309_v0  ;;  %v311_v2 = vunpack.c.h.bf16 %v309_v0 }
  0x13   : > { %v179_v3 = vsel %vm178_vm0, %v310_v1, 0.0  ;;  %v182_v4 = vsel %vm178_vm0, %v311_v2, 0.0 }
  0x14   : > { %180 = vadd.xlane.f32.xlu0 %v179_v3 }
  0x18   : > { %183 = vadd.xlane.f32.xlu0 %v182_v4 }
  0xa1   : > { %v181_v5 = vpop.xlane.xlu0 %180 }
  0xa2   : > { %v186_v6 = vmul.f32 0.03125, %v181_v5 }
  0xa4   : > { %v188_v7 = vsub.f32 %v310_v1, %v186_v6 }
  0xa5   : > { %v184_v8 = vpop.xlane.xlu0 %183 }
  0xa6   : > { %v187_v9 = vmul.f32 0.03125, %v184_v8  ;;  %v190_v10 = vmul.f32 %v188_v7, %v188_v7 }
  0xa8   : > { %v189_v11 = vsub.f32 %v311_v2, %v187_v9  ;;  %v192_v12 = vsel %vm178_vm0, %v190_v10, 0.0 }
  0xa9   : > { %193 = vadd.xlane.f32.xlu1 %v192_v12 }
  0xaa   : > { %v191_v13 = vmul.f32 %v189_v11, %v189_v11 }
  0xac   : > { %v195_v14 = vsel %vm178_vm0, %v191_v13, 0.0 }
  0xad   : > { %196 = vadd.xlane.f32.xlu1 %v195_v14 }
 0x136   : > { %v194_v15 = vpop.xlane.xlu1 %193 }
 0x137   : > { %v198_v16 = vmul.f32 0.03125, %v194_v15 }
 0x139   : > { %v200_v17 = vadd.f32 1e-06, %v198_v16 }
 0x13a   : > { %v197_v18 = vpop.xlane.xlu1 %196 }
 0x13b   : > { %320 = vrsqrt.f32 %v200_v17  ;;  %v199_v19 = vmul.f32 0.03125, %v197_v18 }
 0x13d   : > { %v201_v20 = vadd.f32 1e-06, %v199_v19 }
 0x13f   : > { %322 = vrsqrt.f32 %v201_v20 }
 0x145   : > { %v321_v21 = vpop.eup %320 }
 0x146   : > { %v204_v23 = vmul.f32 %v321_v21, %v188_v7 }
 0x148   : > { %v213_v25 = vmul.f32 %v300_v22, %v204_v23 }
 0x149   : > { %v323_v26 = vpop.eup %322 }
 0x14a   : > { %v222_v27 = vadd.f32 %v301_v24, %v213_v25  ;;  %v205_v28 = vmul.f32 %v323_v26, %v189_v11 }
 0x14c   : > { %v306_v29 = vpack.c.bf16 %v222_v27, %v222_v27  ;;  %v214_v30 = vmul.f32 %v300_v22, %v205_v28 }
 0x14e   : > { %233 = vst.msk [vmem:[%s172_s25] sm:$0xf] %vm232_vm1, %v306_v29  ;;  %v223_v31 = vadd.f32 %v301_v24, %v214_v30 }
 0x150   : > { %v307_v32 = vpack.c.bf16 %v223_v31, %v223_v31 }
 0x152   : > { %234 = vst.msk [vmem:[%s172_s25 + $0x4] sm:$0xf] %vm232_vm1, %v307_v32 }
 0x153 PF: > { %s13_s12 = sadd.s32 1, %s330_s12  }
 0x154   : > { %p10_p4 = scmp.ge.s32.totalorder %s13_s12, 4  }
 0x156   :  { %12 = sbr.rel (!%p10_p4) target bundleno = 1 (0x1), region = 62 }

// kernel: volo_forward.37
= control target key start
LH: loop header
LB: loop body
LE: loop exit
PB: predicated region body
PF: predicated region fallthrough
CT: control target
= control target key end

     0   :  { %s652_s15 = smov 0   ;;  %s654_s16 = smov 0   ;;  %s727_s0 = inlined_call_operand.vmem [shape: bf16[8,32], index: 0, kind: input, shape index: {}]   ;;  %s728_s1 = inlined_call_operand.vmem [shape: bf16[32,256], index: 1, kind: input, shape index: {}]   ;;  %s729_s2 = inlined_call_operand.vmem [shape: f32[1,256], index: 2, kind: input, shape index: {}]   ;;  %s730_s3 = inlined_call_operand.vmem [shape: f32[1,256], index: 3, kind: input, shape index: {}]   ;;  %s731_s4 = inlined_call_operand.vmem [shape: bf16[8,256], index: 4, kind: output, shape index: {}]  }
   0x1   :  { %s656_s17 = smov 0   ;;  %s658_s18 = smov 0  }
   0x2   :  { %s660_s19 = smov 0  }
   0x3 LB: > { %s23_s20 = sadd.s32 1, %s619_s18  ;;  %p66_p1 = scmp.ne.s32.totalorder %s611_s16, %s607_s15  ;;  %s623_s19 = sphi %s660_s19, %s14_s19   ;;  %s619_s18 = sphi %s658_s18, %s735_s18   ;;  %s615_s17 = sphi %s656_s17, %s734_s17   ;;  %s611_s16 = sphi %s654_s16, %s733_s16   ;;  %s607_s15 = sphi %s652_s15, %s732_s15  }
   0x4   : > { %p24_p0 = scmp.ge.s32.totalorder %s23_s20, 2  ;;  %p67_p2 = scmp.eq.s32.totalorder %s623_s19, 0 }
   0x5   : > { %s59_s22 = sadd.s32 1, %s611_s16  ;;  %p517_p5 = scmp.ge.s32.totalorder %s623_s19, 2 }
   0x6   : > { %s737_s20 = smov (%p24_p0, %s23_s20), 0  ;;  %p68_p3 = por %p67_p2, %p66_p1 }
   0x7   : > { %s56_s21 = ssub.s32 %s619_s18, %s737_s20  ;;  %179 = sbr.rel (%p517_p5) target bundleno = 21 (0x15), region = 20 }
   0x8   : > { %p57_p4 = scmp.eq.s32.totalorder %s56_s21, 0 }
   0xa   : > { %s687_s23 = scalar_select %p57_p4, %s611_s16, %s59_s22  }
   0xe   : > { %182 = sbr.rel (!%p68_p3) target bundleno = 21 (0x15), region = 24  ;;  %s184_s24 = sand.u32 (%p68_p3), 1, %s611_s16  }
   0xf   : > { %s519_s25 = sshll.u32 (%p68_p3), %s619_s18, 2  ;;  %s518_s26 = sshll.u32 (%p68_p3), %s184_s24, 4 }
  0x10   : > { %s188_s29 = scalar_lea.vmem (%p68_p3), %s728_s1, %s519_s25  ;;  %s186_s30 = scalar_lea.vmem (%p68_p3), [#allocation2], %s518_s26 }
  0x11   : > { %v204_v0 = vld [vmem:[%s188_s29] sm:$0xf] (%p68_p3)  ;;  %v206_v1 = vld [vmem:[%s188_s29 + $0x8] sm:$0xf] (%p68_p3)  ;;  %v208_v2 = vld [vmem:[%s188_s29 + $0x10] sm:$0xf] (%p68_p3) }
  0x12   : > { %205 = vst [vmem:[%s186_s30] sm:$0xf] (%p68_p3), %v204_v0  ;;  %207 = vst [vmem:[%s186_s30 + $0x4] sm:$0xf] (%p68_p3), %v206_v1  ;;  %v210_v3 = vld [vmem:[%s188_s29 + $0x18] sm:$0xf] (%p68_p3) }
  0x13   : > { %209 = vst [vmem:[%s186_s30 + $0x8] sm:$0xf] (%p68_p3), %v208_v2  ;;  %211 = vst [vmem:[%s186_s30 + $0xc] sm:$0xf] (%p68_p3), %v210_v3 }
  0x15 PF: > { %p520_p6 = scmp.ge.s32.totalorder %s623_s19, 1  ;;  %p253_p7 = scmp.lt.s32.totalorder %s623_s19, 3 }
  0x17   : > { %p254_p8 = pnand %p520_p6, %p253_p7 }
  0x18   : > { %s260_s5 = sand.u32 (!%p254_p8), 1, %s607_s15   ;;  %v625_v4 = vmov (!%p254_p8), 0.0   ;;  %vm626_vm0 = vmmov (!%p254_p8), 0   ;;  %v317_v7 = vld [vmem:[%s727_s0] sm:$0xf] (!%p254_p8)  ;;  %vm334_vm1 = vcmask (!%p254_p8), 261120  }
  0x19   : > { %257 = sbr.rel (%p254_p8) target bundleno = 254 (0xfe), region = 73  ;;  %533 = vmatprep.subr.bf16.mxu0 (!%p254_p8), %v625_v4  ;;  %s521_s6 = sshll.u32 (!%p254_p8), %s260_s5, 4  ;;  %537 = vmatprep.mubr.msk.bf16.mxu0 (!%p254_p8), %vm626_vm0, %v625_v4 }
  0x1a   : > { %s262_s7 = scalar_lea.vmem (!%p254_p8), [#allocation2], %s521_s6  ;;  %p302_p9 = scmp.lt.s32.totalorder (!%p254_p8), %s615_s17, 1 }
  0x1b   : > { %v583_v5 = vld [vmem:[%s262_s7] sm:$0xff] (!%p254_p8)   ;;  %v584_v6 = vld [vmem:[%s262_s7 + $0x8] sm:$0xff] (!%p254_p8)  }
  0x1c   : > { %534 = vmatpush3.bf16.msra.mxu0 (!%p254_p8), %v583_v5 }
  0x1d   : > { %535 = vmatprep.subr.bf16.mxu0 (!%p254_p8), %v625_v4 }
  0x20   : > { %536 = vmatpush3.bf16.msra.mxu0 %v584_v6  ;;  %s739_s17 = smov (!%p302_p9, %s615_s17), 1 }
  0x21   : > { %s304_s12 = scalar_lea.vmem %s729_s2, %s739_s17  ;;  %s307_s15 = scalar_lea.vmem %s730_s3, %s739_s17 }
  0x22   : > { %v526_v8 = vld [vmem:[%s304_s12] ss:$0 sm:$0xff]  ;;  %s522_s21 = sshll.u32 %s739_s17, 2 }
  0x23   : > { %538 = vmatmul.mubr.msk.bf16.vlgmr.msra.gmra.mrb[0].mxu0 %vm334_vm1, %v317_v7  ;;  %v527_v10 = vld [vmem:[%s307_s15] ss:$0 sm:$0xff]  ;;  %s315_s25 = scalar_lea.vmem %s731_s4, %s522_s21 }
  0xf6   : > { %v372_v9 = vpop.f32.mrb[0].mxu0 }
  0xf7   : > { %v386_v11 = vmul.f32 %v526_v8, %v372_v9  ;;  %v539_v12 = vpop.f32.mrb[1].mxu0 }
  0xf8   : > { %v375_v13 = vpop.f32.mrb[2].mxu0 }
  0xf9   : > { %v393_v14 = vadd.f32 %v527_v10, %v386_v11  ;;  %v540_v15 = vpop.f32.mrb[3].mxu0 }
  0xfb   : > { %v394_v16 = vpack.c.bf16 %v393_v14, %v393_v14 }
  0xfd   : > { %395 = vst [vmem:[%s315_s25] sm:$0xf] %v394_v16 }
  0xfe PF: > { %s14_s19 = sadd.s32 1, %s623_s19   ;;  %s732_s15 = smov %s611_s16 }
  0xff   : > { %p11_p10 = scmp.ge.s32.totalorder %s14_s19, 4   ;;  %s733_s16 = smov %s687_s23 }
 0x100   : > { %s734_s17 = smov %s619_s18  ;;  %s735_s18 = smov %s737_s20 }
 0x101   :  { %13 = sbr.rel (!%p11_p10) target bundleno = 3 (0x3), region = 121 }

// kernel: volo_forward.38
= control target key start
LH: loop header
LB: loop body
LE: loop exit
PB: predicated region body
PF: predicated region fallthrough
CT: control target
= control target key end

     0   :  { %vm47_vm0 = vcmask 1040384   ;;  %s1924_s0 = inlined_call_operand.vmem [shape: f32[9,9,128], index: 0, kind: input, shape index: {}]   ;;  %s1925_s1 = inlined_call_operand.vmem [shape: bf16[9,16,128], index: 1, kind: input, shape index: {}]   ;;  %s1926_s2 = inlined_call_operand.vmem [shape: bf16[9,16,128], index: 2, kind: output, shape index: {}]  }
   0x1   :  { %v11_v0 = vld [vmem:[%s1924_s0] sm:$0xff]  ;;  %v12_v1 = vld [vmem:[%s1924_s0 + $0x8] sm:$0x1]  ;;  %v13_v2 = vld [vmem:[%s1924_s0 + $0x10] sm:$0xff] }
   0x2   :  { %v14_v3 = vld [vmem:[%s1924_s0 + $0x18] sm:$0x1]  ;;  %v15_v4 = vld [vmem:[%s1924_s0 + $0x20] sm:$0xff]  ;;  %v16_v5 = vld [vmem:[%s1924_s0 + $0x28] sm:$0x1]  ;;  %v1262_v9 = vmul.f32 0.25, %v11_v0 }
   0x3   :  { %v17_v6 = vld [vmem:[%s1924_s0 + $0x30] sm:$0xff]  ;;  %v18_v7 = vld [vmem:[%s1924_s0 + $0x38] sm:$0x1]  ;;  %v19_v8 = vld [vmem:[%s1924_s0 + $0x40] sm:$0xff]  ;;  %v1273_v13 = vmul.f32 0.25, %v12_v1  ;;  %v1284_v17 = vmul.f32 0.25, %v13_v2 }
   0x4   :  { %v20_v10 = vld [vmem:[%s1924_s0 + $0x48] sm:$0x1]  ;;  %v21_v11 = vld [vmem:[%s1924_s0 + $0x50] sm:$0xff]  ;;  %v22_v12 = vld [vmem:[%s1924_s0 + $0x58] sm:$0x1]  ;;  %v1286_v18 = vmul.f32 0.25, %v14_v3 }
   0x5   :  { %v23_v14 = vld [vmem:[%s1924_s0 + $0x60] sm:$0xff]  ;;  %v24_v15 = vld [vmem:[%s1924_s0 + $0x68] sm:$0x1]  ;;  %v25_v16 = vld [vmem:[%s1924_s0 + $0x70] sm:$0xff]  ;;  %v1294_v21 = vmul.f32 0.25, %v15_v4  ;;  %v1296_v22 = vmul.f32 0.25, %v16_v5 }
   0x6   :  { %v26_v19 = vld [vmem:[%s1924_s0 + $0x78] sm:$0x1]  ;;  %v28_v20 = vld [vmem:[%s1924_s0 + $0x88] sm:$0x1]  ;;  %v1298_v23 = vmul.f32 0.25, %v17_v6  ;;  %v1300_v24 = vmul.f32 0.25, %v18_v7 }
   0x7   :  { %v1302_v25 = vmul.f32 0.25, %v19_v8  ;;  %v1304_v26 = vmul.f32 0.25, %v20_v10  ;;  %v1306_v27 = vmul.f32 0.25, %v21_v11  ;;  %v1308_v28 = vmul.f32 0.25, %v22_v12  ;;  %v27_v3 = vld [vmem:[%s1924_s0 + $0x80] sm:$0xff] }
   0x8   :  { %v1310_v29 = vmul.f32 0.25, %v23_v14  ;;  %v1312_v30 = vmul.f32 0.25, %v24_v15  ;;  %v1314_v31 = vmul.f32 0.25, %v25_v16  ;;  %v1316_v32 = vmul.f32 0.25, %v26_v19 }
   0x9   :  { %v1318_v33 = vmul.f32 0.25, %v28_v20  ;;  %v48_v34 = vsel %vm47_vm0, %v1273_v13, -inf  ;;  %v56_v36 = vsel %vm47_vm0, %v1286_v18, -inf  ;;  %v64_v37 = vsel %vm47_vm0, %v1296_v22, -inf }
   0xa   :  { %v49_v35 = vmax.f32 %v1262_v9, %v48_v34  ;;  %v72_v38 = vsel %vm47_vm0, %v1300_v24, -inf  ;;  %v57_v39 = vmax.f32 %v1284_v17, %v56_v36  ;;  %v65_v40 = vmax.f32 %v1294_v21, %v64_v37 }
   0xb   :  { %v73_v41 = vmax.f32 %v1298_v23, %v72_v38  ;;  %v80_v42 = vsel %vm47_vm0, %v1304_v26, -inf  ;;  %v88_v45 = vsel %vm47_vm0, %v1308_v28, -inf  ;;  %v96_v46 = vsel %vm47_vm0, %v1312_v30, -inf }
   0xc   :  { %v50_v43 = vrot.slane %v49_v35, 4  ;;  %v81_v44 = vmax.f32 %v1302_v25, %v80_v42  ;;  %v58_v47 = vrot.slane %v57_v39, 4  ;;  %v66_v48 = vrot.slane %v65_v40, 4 }
   0xd   :  { %v74_v49 = vrot.slane %v73_v41, 4  ;;  %v89_v50 = vmax.f32 %v1306_v27, %v88_v45  ;;  %v97_v53 = vmax.f32 %v1310_v29, %v96_v46  ;;  %v104_v54 = vsel %vm47_vm0, %v1316_v32, -inf }
   0xe   :  { %v51_v51 = vmax.f32 %v49_v35, %v50_v43  ;;  %v82_v52 = vrot.slane %v81_v44, 4  ;;  %v59_v55 = vmax.f32 %v57_v39, %v58_v47  ;;  %v67_v56 = vmax.f32 %v65_v40, %v66_v48 }
   0xf   :  { %v75_v57 = vmax.f32 %v73_v41, %v74_v49  ;;  %v90_v58 = vrot.slane %v89_v50, 4  ;;  %v98_v61 = vrot.slane %v97_v53, 4  ;;  %v105_v62 = vmax.f32 %v1314_v31, %v104_v54 }
  0x10   :  { %v52_v59 = vrot.slane %v51_v51, 2  ;;  %v83_v60 = vmax.f32 %v81_v44, %v82_v52  ;;  %v60_v63 = vrot.slane %v59_v55, 2  ;;  %v68_v0 = vrot.slane %v67_v56, 2 }
  0x11   :  { %v76_v1 = vrot.slane %v75_v57, 2  ;;  %v91_v2 = vmax.f32 %v89_v50, %v90_v58  ;;  %v99_v6 = vmax.f32 %v97_v53, %v98_v61  ;;  %v106_v7 = vrot.slane %v105_v62, 4 }
  0x12   :  { %v53_v4 = vmax.f32 %v51_v51, %v52_v59  ;;  %v84_v5 = vrot.slane %v83_v60, 2  ;;  %v61_v8 = vmax.f32 %v59_v55, %v60_v63  ;;  %v69_v10 = vmax.f32 %v67_v56, %v68_v0 }
  0x13   :  { %v77_v11 = vmax.f32 %v75_v57, %v76_v1  ;;  %v92_v12 = vrot.slane %v91_v2, 2  ;;  %v100_v16 = vrot.slane %v99_v6, 2  ;;  %v107_v19 = vmax.f32 %v105_v62, %v106_v7 }
  0x14   :  { %v54_v14 = vrot.slane %v53_v4, 1  ;;  %v85_v15 = vmax.f32 %v83_v60, %v84_v5  ;;  %v1347_v20 = vmul.f32 0.25, %v27_v3  ;;  %v62_v34 = vrot.slane %v61_v8, 1 }
  0x15   :  { %v70_v35 = vrot.slane %v69_v10, 1  ;;  %v93_v36 = vmax.f32 %v91_v2, %v92_v12  ;;  %v78_v38 = vrot.slane %v77_v11, 1  ;;  %v101_v39 = vmax.f32 %v99_v6, %v100_v16 }
  0x16   :  { %v55_v37 = vmax.f32 %v53_v4, %v54_v14  ;;  %v108_v40 = vrot.slane %v107_v19, 2  ;;  %v63_v41 = vmax.f32 %v61_v8, %v62_v34  ;;  %v86_v43 = vrot.slane %v85_v15, 1 }
  0x17   :  { %v71_v42 = vmax.f32 %v69_v10, %v70_v35  ;;  %v112_v44 = vsel %vm47_vm0, %v1318_v33, -inf  ;;  %v94_v45 = vrot.slane %v93_v36, 1  ;;  %v79_v47 = vmax.f32 %v77_v11, %v78_v38 }
  0x18   :  { %v113_v46 = vmax.f32 %v1347_v20, %v112_v44  ;;  %v102_v48 = vrot.slane %v101_v39, 1  ;;  %v109_v49 = vmax.f32 %v107_v19, %v108_v40  ;;  %v120_v50 = vsub.f32 %v1262_v9, %v55_v37 }
  0x19   :  { %v121_v52 = vsub.f32 %v1273_v13, %v55_v37  ;;  %v122_v53 = vsub.f32 %v1284_v17, %v63_v41  ;;  %v87_v54 = vmax.f32 %v85_v15, %v86_v43  ;;  %v123_v55 = vsub.f32 %v1286_v18, %v63_v41 }
  0x1a   :  { %v114_v51 = vrot.slane %v113_v46, 4  ;;  %v124_v56 = vsub.f32 %v1294_v21, %v71_v42  ;;  %v95_v57 = vmax.f32 %v93_v36, %v94_v45  ;;  %v125_v59 = vsub.f32 %v1296_v22, %v71_v42  ;;  %v1150_v45 = vld [vmem:[%s1925_s1 + $0x8] sm:$0xff]  }
  0x1b   :  { %v103_v60 = vmax.f32 %v101_v39, %v102_v48  ;;  %v110_v61 = vrot.slane %v109_v49, 1  ;;  %v126_v62 = vsub.f32 %v1298_v23, %v79_v47  ;;  %v138_v63 = vmul.f32 1.442695, %v120_v50  ;;  %v1070_v39 = vld [vmem:[%s1925_s1] sm:$0xff]  }
  0x1c   :  { %v115_v58 = vmax.f32 %v113_v46, %v114_v51  ;;  %v127_v0 = vsub.f32 %v1300_v24, %v79_v47  ;;  %v140_v13 = vmul.f32 1.442695, %v121_v52  ;;  %v142_v1 = vmul.f32 1.442695, %v122_v53  ;;  %v1151_v46 = vld [vmem:[%s1925_s1 + $0x10] sm:$0xff]  }
  0x1d   :  { %v128_v17 = vsub.f32 %v1302_v25, %v87_v54  ;;  %1166 = vpow2.f32 %v138_v63  ;;  %v144_v18 = vmul.f32 1.442695, %v123_v55  ;;  %v146_v2 = vmul.f32 1.442695, %v124_v56  ;;  %v1152_v56 = vld [vmem:[%s1925_s1 + $0x18] sm:$0xff]  }
  0x1e   :  { %v116_v9 = vrot.slane %v115_v58, 2  ;;  %v129_v3 = vsub.f32 %v1304_v26, %v87_v54  ;;  %1168 = vpow2.f32 %v140_v13  ;;  %v148_v22 = vmul.f32 1.442695, %v125_v59 }
  0x1f   :  { %v111_v4 = vmax.f32 %v109_v49, %v110_v61  ;;  %v130_v5 = vsub.f32 %v1306_v27, %v95_v57  ;;  %1170 = vpow2.f32 %v142_v1  ;;  %v150_v23 = vmul.f32 1.442695, %v126_v62  ;;  %v1153_v1 = vld [vmem:[%s1925_s1 + $0x20] sm:$0xff]  }
  0x20   :  { %v117_v21 = vmax.f32 %v115_v58, %v116_v9  ;;  %v131_v24 = vsub.f32 %v1308_v28, %v95_v57  ;;  %1172 = vpow2.f32 %v144_v18  ;;  %v152_v7 = vmul.f32 1.442695, %v127_v0 }
  0x21   :  { %v132_v25 = vsub.f32 %v1310_v29, %v103_v60  ;;  %1174 = vpow2.f32 %v146_v2  ;;  %v154_v8 = vmul.f32 1.442695, %v128_v17  ;;  %v133_v11 = vsub.f32 %v1312_v30, %v103_v60 }
  0x22   :  { %v118_v6 = vrot.slane %v117_v21, 1  ;;  %1176 = vpow2.f32 %v148_v22  ;;  %v156_v26 = vmul.f32 1.442695, %v129_v3  ;;  %v134_v12 = vsub.f32 %v1314_v31, %v111_v4 }
  0x23   :  { %1178 = vpow2.f32 %v150_v23  ;;  %v158_v27 = vmul.f32 1.442695, %v130_v5  ;;  %v135_v14 = vsub.f32 %v1316_v32, %v111_v4  ;;  %v160_v15 = vmul.f32 1.442695, %v131_v24  ;;  %v1154_v24 = vld [vmem:[%s1925_s1 + $0x28] sm:$0xff]  }
  0x24   :  { %v119_v10 = vmax.f32 %v117_v21, %v118_v6  ;;  %1180 = vpow2.f32 %v152_v7  ;;  %v162_v16 = vmul.f32 1.442695, %v132_v25  ;;  %v164_v19 = vmul.f32 1.442695, %v133_v11 }
  0x25   :  { %1182 = vpow2.f32 %v154_v8  ;;  %v166_v30 = vmul.f32 1.442695, %v134_v12  ;;  %v168_v31 = vmul.f32 1.442695, %v135_v14  ;;  %v309_v47 = vlaneseq }
  0x26   :  { %v136_v28 = vsub.f32 %v1347_v20, %v119_v10  ;;  %v137_v29 = vsub.f32 %v1318_v33, %v119_v10  ;;  %1184 = vpow2.f32 %v156_v26  ;;  %v1401_v50 = vunpack.c.l.bf16 %v1070_v39 }
  0x27   :  { %v1370_v34 = vpop.eup %1166  ;;  %1186 = vpow2.f32 %v158_v27  ;;  %v1403_v51 = vunpack.c.h.bf16 %v1070_v39  ;;  %v1415_v59 = vunpack.c.l.bf16 %v1150_v45  ;;  %v1417_v60 = vunpack.c.h.bf16 %v1150_v45 }
  0x28   :  { %v1372_v35 = vpop.eup %1168  ;;  %1188 = vpow2.f32 %v160_v15  ;;  %v170_v32 = vmul.f32 1.442695, %v136_v28  ;;  %v172_v33 = vmul.f32 1.442695, %v137_v29  ;;  %v1419_v61 = vunpack.c.l.bf16 %v1151_v46 }
  0x29   :  { %v1374_v36 = vpop.eup %1170  ;;  %1190 = vpow2.f32 %v162_v16  ;;  %v174_v20 = vsel %vm47_vm0, %v1372_v35, 0.0  ;;  %v1431_v2 = vunpack.c.h.bf16 %v1151_v46  ;;  %v1433_v21 = vunpack.c.l.bf16 %v1152_v56 }
  0x2a   :  { %v1378_v37 = vpop.eup %1172  ;;  %1192 = vpow2.f32 %v164_v19  ;;  %v175_v38 = vadd.f32 %v1370_v34, %v174_v20  ;;  %1952 = vst [vmem:[#allocation2_spill] sm:$0xff] %v1419_v61  ;;  %v1435_v3 = vunpack.c.h.bf16 %v1152_v56  ;;  %v1447_v10 = vunpack.c.l.bf16 %v1153_v1 }
  0x2b   :  { %v1384_v40 = vpop.eup %1174  ;;  %1194 = vpow2.f32 %v166_v30  ;;  %v182_v41 = vsel %vm47_vm0, %v1378_v37, 0.0  ;;  %1953 = vst [vmem:[#allocation3_spill] sm:$0xff] %v1431_v2  ;;  %1954 = vst [vmem:[#allocation4_spill] sm:$0xff] %v1433_v21  ;;  %v1449_v11 = vunpack.c.h.bf16 %v1153_v1  ;;  %v1458_v30 = vunpack.c.l.bf16 %v1154_v24 }
  0x2c   :  { %v1388_v42 = vpop.eup %1176  ;;  %1196 = vpow2.f32 %v168_v31  ;;  %v176_v43 = vrot.slane %v175_v38, 4  ;;  %v183_v44 = vadd.f32 %v1374_v36, %v182_v41  ;;  %1955 = vst [vmem:[#allocation5_spill] sm:$0xff] %v1435_v3  ;;  %1956 = vst [vmem:[#allocation6_spill] sm:$0xff] %v1447_v10 }
  0x2d   :  { %v1397_v48 = vpop.eup %1178  ;;  %1198 = vpow2.f32 %v170_v32  ;;  %v190_v49 = vsel %vm47_vm0, %v1388_v42, 0.0  ;;  %1957 = vst [vmem:[#allocation7_spill] sm:$0xff] %v1449_v11  ;;  %1958 = vst [vmem:[#allocation8_spill] sm:$0xff] %v1458_v30 }
  0x2e   :  { %v1405_v52 = vpop.eup %1180  ;;  %1200 = vpow2.f32 %v172_v33  ;;  %v177_v53 = vadd.f32 %v176_v43, %v175_v38  ;;  %v184_v54 = vrot.slane %v183_v44, 4  ;;  %v191_v55 = vadd.f32 %v1384_v40, %v190_v49 }
  0x2f   :  { %v1411_v57 = vpop.eup %1182  ;;  %v198_v58 = vsel %vm47_vm0, %v1405_v52, 0.0 }
  0x30   :  { %v1421_v62 = vpop.eup %1184  ;;  %v178_v63 = vrot.slane %v177_v53, 2  ;;  %v185_v9 = vadd.f32 %v184_v54, %v183_v44  ;;  %v192_v0 = vrot.slane %v191_v55, 4  ;;  %v199_v13 = vadd.f32 %v1397_v48, %v198_v58 }
  0x31   :  { %v1427_v17 = vpop.eup %1186  ;;  %v206_v18 = vsel %vm47_vm0, %v1421_v62, 0.0 }
  0x32   :  { %v1437_v22 = vpop.eup %1188  ;;  %v179_v4 = vadd.f32 %v178_v63, %v177_v53  ;;  %v186_v5 = vrot.slane %v185_v9, 2  ;;  %v193_v23 = vadd.f32 %v192_v0, %v191_v55  ;;  %v200_v6 = vrot.slane %v199_v13, 4 }
  0x33   :  { %v1442_v7 = vpop.eup %1190  ;;  %v207_v25 = vadd.f32 %v1411_v57, %v206_v18  ;;  %v214_v8 = vsel %vm47_vm0, %v1437_v22, 0.0 }
  0x34   :  { %v1451_v26 = vpop.eup %1192  ;;  %v180_v12 = vrot.slane %v179_v4, 1  ;;  %v187_v27 = vadd.f32 %v186_v5, %v185_v9  ;;  %v194_v14 = vrot.slane %v193_v23, 2  ;;  %v201_v15 = vadd.f32 %v200_v6, %v199_v13 }
  0x35   :  { %v1453_v28 = vpop.eup %1194  ;;  %v208_v16 = vrot.slane %v207_v25, 4  ;;  %v215_v29 = vadd.f32 %v1427_v17, %v214_v8  ;;  %v222_v19 = vsel %vm47_vm0, %v1451_v26, 0.0 }
  0x36   :  { %v1460_v31 = vpop.eup %1196  ;;  %v181_v32 = vadd.f32 %v180_v12, %v179_v4  ;;  %v188_v20 = vrot.slane %v187_v27, 1  ;;  %v195_v33 = vadd.f32 %v194_v14, %v193_v23  ;;  %v202_v38 = vrot.slane %v201_v15, 2 }
  0x37   :  { %v1462_v39 = vpop.eup %1198  ;;  %v209_v41 = vadd.f32 %v208_v16, %v207_v25  ;;  %v216_v43 = vrot.slane %v215_v29, 4  ;;  %v223_v44 = vadd.f32 %v1442_v7, %v222_v19  ;;  %v230_v45 = vsel %vm47_vm0, %v1460_v31, 0.0 }
  0x38   :  { %v1467_v46 = vpop.eup %1200  ;;  %v189_v49 = vadd.f32 %v188_v20, %v187_v27  ;;  %v196_v53 = vrot.slane %v195_v33, 1  ;;  %v203_v54 = vadd.f32 %v202_v38, %v201_v15  ;;  %v231_v55 = vadd.f32 %v1453_v28, %v230_v45  ;;  %v1155_v15 = vld [vmem:[%s1925_s1 + $0x30] sm:$0xff]  }
  0x39   :  { %v210_v56 = vrot.slane %v209_v41, 2  ;;  %v217_v58 = vadd.f32 %v216_v43, %v215_v29  ;;  %v224_v63 = vrot.slane %v223_v44, 4  ;;  %v238_v9 = vsel %vm47_vm0, %v1467_v46, 0.0 }
  0x3a   :  { %v197_v0 = vadd.f32 %v196_v53, %v195_v33  ;;  %v204_v13 = vrot.slane %v203_v54, 1  ;;  %v232_v1 = vrot.slane %v231_v55, 4  ;;  %v239_v18 = vadd.f32 %v1462_v39, %v238_v9 }
  0x3b   :  { %v211_v4 = vadd.f32 %v210_v56, %v209_v41  ;;  %v218_v5 = vrot.slane %v217_v58, 2  ;;  %v225_v23 = vadd.f32 %v224_v63, %v223_v44  ;;  %1202 = vrcp.f32 %v181_v32  ;;  %v1156_v32 = vld [vmem:[%s1925_s1 + $0x38] sm:$0xff]   ;;  %v1157_v41 = vld [vmem:[%s1925_s1 + $0x40] sm:$0xff]  }
  0x3c   :  { %v205_v6 = vadd.f32 %v204_v13, %v203_v54  ;;  %v233_v25 = vadd.f32 %v232_v1, %v231_v55  ;;  %v240_v8 = vrot.slane %v239_v18, 4  ;;  %1204 = vrcp.f32 %v189_v49 }
  0x3d   :  { %v212_v12 = vrot.slane %v211_v4, 1  ;;  %v219_v27 = vadd.f32 %v218_v5, %v217_v58  ;;  %v226_v14 = vrot.slane %v225_v23, 2  ;;  %1206 = vrcp.f32 %v197_v0 }
  0x3e   :  { %v234_v16 = vrot.slane %v233_v25, 2  ;;  %v241_v29 = vadd.f32 %v240_v8, %v239_v18  ;;  %1208 = vrcp.f32 %v205_v6  ;;  %v1476_v19 = vunpack.c.h.bf16 %v1154_v24 }
  0x3f   :  { %v213_v20 = vadd.f32 %v212_v12, %v211_v4  ;;  %v220_v33 = vrot.slane %v219_v27, 1  ;;  %v227_v38 = vadd.f32 %v226_v14, %v225_v23  ;;  %v310_v43 = vshrl.u32 %v309_v47, 7 }
  0x40   :  { %1959 = vst [vmem:[#allocation9_spill] sm:$0xff] %v1476_v19  ;;  %v235_v44 = vadd.f32 %v234_v16, %v233_v25  ;;  %v242_v45 = vrot.slane %v241_v29, 2  ;;  %v1485_v49 = vunpack.c.l.bf16 %v1155_v15  ;;  %v1487_v53 = vunpack.c.h.bf16 %v1155_v15 }
  0x41   :  { %v221_v24 = vadd.f32 %v220_v33, %v219_v27  ;;  %v228_v54 = vrot.slane %v227_v38, 1  ;;  %1210 = vrcp.f32 %v213_v20  ;;  %v1489_v55 = vunpack.c.l.bf16 %v1156_v32 }
  0x42   :  { %1960 = vst [vmem:[#allocation10_spill] sm:$0xff] %v1485_v49  ;;  %1961 = vst [vmem:[#allocation11_spill] sm:$0xff] %v1487_v53  ;;  %v236_v56 = vrot.slane %v235_v44, 1  ;;  %v243_v58 = vadd.f32 %v242_v45, %v241_v29  ;;  %v1491_v63 = vunpack.c.h.bf16 %v1156_v32  ;;  %v1493_v9 = vunpack.c.l.bf16 %v1157_v41 }
  0x43   :  { %1962 = vst [vmem:[#allocation12_spill] sm:$0xff] %v1489_v55  ;;  %v229_v0 = vadd.f32 %v228_v54, %v227_v38  ;;  %1212 = vrcp.f32 %v221_v24  ;;  %v1495_v47 = vunpack.c.h.bf16 %v1157_v41  ;;  %v1497_v13 = vsub.s32 0, %v310_v43 }
  0x44   :  { %1963 = vst [vmem:[#allocation13_spill] sm:$0xff] %v1491_v63  ;;  %1964 = vst [vmem:[#allocation14_spill] sm:$0xff] %v1493_v9  ;;  %v237_v1 = vadd.f32 %v236_v56, %v235_v44  ;;  %v244_v18 = vrot.slane %v243_v58, 1  ;;  %v1499_v4 = vsub.s32 1, %v310_v43  ;;  %v1501_v5 = vsub.s32 2, %v310_v43 }
  0x45   :  { %1965 = vst [vmem:[#allocation15_spill] sm:$0xff] %v1495_v47  ;;  %1966 = vst [vmem:[#allocation16_spill] sm:$0xff] %v1497_v13  ;;  %v1203_v23 = vpop.eup %1202  ;;  %1214 = vrcp.f32 %v229_v0  ;;  %v1503_v6 = vsub.s32 3, %v310_v43  ;;  %v1505_v25 = vsub.s32 4, %v310_v43  ;;  %v1507_v8 = vsub.s32 5, %v310_v43 }
  0x46   :  { %v1205_v12 = vpop.eup %1204  ;;  %v245_v27 = vadd.f32 %v244_v18, %v243_v58  ;;  %1216 = vrcp.f32 %v237_v1  ;;  %v1510_v14 = vmul.f32 %v1203_v23, %v1370_v34  ;;  %v1512_v15 = vsub.s32 6, %v310_v43 }
  0x47   :  { %1967 = vst [vmem:[#allocation17_spill] sm:$0xff] %v1503_v6  ;;  %1968 = vst [vmem:[#allocation18_spill] sm:$0xff] %v1505_v25  ;;  %v1207_v16 = vpop.eup %1206  ;;  %v1515_v29 = vmul.f32 %v1203_v23, %v1372_v35  ;;  %v1518_v32 = vmul.f32 %v1205_v12, %v1374_v36  ;;  %v1521_v20 = vmul.f32 %v1205_v12, %v1378_v37  ;;  %v1523_v33 = vsub.s32 7, %v310_v43 }
  0x48   :  { %1969 = vst [vmem:[#allocation19_spill] sm:$0xff] %v1507_v8  ;;  %1970 = vst [vmem:[#allocation20_spill] sm:$0xff] %v1512_v15  ;;  %v1209_v38 = vpop.eup %1208  ;;  %1218 = vrcp.f32 %v245_v27  ;;  %v1526_v41 = vmul.f32 %v1207_v16, %v1384_v40  ;;  %v1529_v34 = vmul.f32 %v1207_v16, %v1388_v42  ;;  %v312_v35 = vrot.slane %v1510_v14, %v1497_v13 }
  0x49   :  { %1971 = vst [vmem:[#allocation21_spill] sm:$0xff] %v1515_v29  ;;  %1972 = vst [vmem:[#allocation22_spill] sm:$0xff] %v1521_v20  ;;  %v1534_v44 = vmul.f32 %v1209_v38, %v1397_v48  ;;  %v1537_v36 = vmul.f32 %v1209_v38, %v1405_v52  ;;  %v316_v37 = vrot.slane %v1518_v32, %v1497_v13 }
  0x4a   :  { %1973 = vst [vmem:[#allocation23_spill] sm:$0xff] %v1523_v33  ;;  %1974 = vst [vmem:[#allocation24_spill] sm:$0xff] %v1529_v34  ;;  %v366_v43 = vrot.slane %v1510_v14, %v1499_v4  ;;  %v320_v40 = vrot.slane %v1526_v41, %v1497_v13  ;;  %v1546_v42 = vmul.f32 %v1401_v50, %v312_v35 }
  0x4b   :  { %1975 = vst [vmem:[#allocation25_spill] sm:$0xff] %v1537_v36  ;;  %v1549_v45 = vmul.f32 %v1403_v51, %v312_v35  ;;  %v370_v48 = vrot.slane %v1518_v32, %v1499_v4  ;;  %v1211_v52 = vpop.eup %1210  ;;  %v324_v24 = vrot.slane %v1534_v44, %v1497_v13  ;;  %v347_v54 = vmul.f32 %v1401_v50, %v316_v37 }
  0x4c   :  { %v348_v56 = vmul.f32 %v1403_v51, %v316_v37  ;;  %v374_v58 = vrot.slane %v1526_v41, %v1499_v4  ;;  %v1560_v0 = vmul.f32 %v1211_v52, %v1411_v57  ;;  %v1563_v1 = vmul.f32 %v1211_v52, %v1421_v62 }
  0x4d   :  { %v349_v18 = vmul.f32 %v1401_v50, %v320_v40  ;;  %v350_v23 = vmul.f32 %v1403_v51, %v320_v40  ;;  %v1213_v12 = vpop.eup %1212  ;;  %v351_v27 = vmul.f32 %v1401_v50, %v324_v24  ;;  %v352_v16 = vmul.f32 %v1403_v51, %v324_v24 }
  0x4e   :  { %1976 = vst [vmem:[#allocation26_spill] sm:$0xff] %v1563_v1  ;;  %v378_v38 = vrot.slane %v1534_v44, %v1499_v4  ;;  %v399_v35 = vmul.f32 %v1415_v59, %v366_v43  ;;  %v1573_v57 = vmul.f32 %v1213_v12, %v1427_v17  ;;  %v1576_v62 = vmul.f32 %v1213_v12, %v1437_v22 }
  0x4f   :  { %v328_v37 = vrot.slane %v1560_v0, %v1497_v13  ;;  %v382_v40 = vrot.slane %v1560_v0, %v1499_v4  ;;  %v1215_v52 = vpop.eup %1214  ;;  %v400_v24 = vmul.f32 %v1417_v60, %v366_v43  ;;  %v401_v47 = vmul.f32 %v1415_v59, %v370_v48 }
  0x50   :  { %1977 = vst [vmem:[#allocation27_spill] sm:$0xff] %v1576_v62  ;;  %v402_v9 = vmul.f32 %v1417_v60, %v370_v48  ;;  %v403_v1 = vmul.f32 %v1415_v59, %v374_v58  ;;  %v1217_v17 = vpop.eup %1216  ;;  %v1587_v36 = vmul.f32 %v1215_v52, %v1442_v7  ;;  %v1590_v22 = vmul.f32 %v1215_v52, %v1451_v26 }
  0x51   :  { %v332_v12 = vrot.slane %v1573_v57, %v1497_v13  ;;  %v353_v62 = vmul.f32 %v1401_v50, %v328_v37  ;;  %v1596_v43 = vmul.f32 %v1217_v17, %v1453_v28  ;;  %v1599_v34 = vmul.f32 %v1217_v17, %v1460_v31 }
  0x52   :  { %1978 = vst [vmem:[#allocation28_spill] sm:$0xff] %v1590_v22  ;;  %v354_v48 = vmul.f32 %v1403_v51, %v328_v37  ;;  %v386_v7 = vrot.slane %v1573_v57, %v1499_v4  ;;  %v1219_v20 = vpop.eup %1218  ;;  %v336_v26 = vrot.slane %v1587_v36, %v1497_v13  ;;  %v390_v28 = vrot.slane %v1587_v36, %v1499_v4 }
  0x53   :  { %1979 = vst [vmem:[#allocation29_spill] sm:$0xff] %v1596_v43  ;;  %1980 = vst [vmem:[#allocation30_spill] sm:$0xff] %v1599_v34  ;;  %v355_v52 = vmul.f32 %v1401_v50, %v332_v12  ;;  %v356_v22 = vmul.f32 %v1403_v51, %v332_v12  ;;  %v1611_v29 = vmul.f32 %v1219_v20, %v1462_v39 }
  0x54   :  { %v1614_v31 = vmul.f32 %v1219_v20, %v1467_v46  ;;  %v340_v37 = vrot.slane %v1596_v43, %v1497_v13  ;;  %v394_v17 = vrot.slane %v1596_v43, %v1499_v4  ;;  %v357_v34 = vmul.f32 %v1401_v50, %v336_v26 }
  0x55   :  { %1981 = vst [vmem:[#allocation31_spill] sm:$0xff] %v1611_v29  ;;  %v358_v63 = vmul.f32 %v1403_v51, %v336_v26  ;;  %v404_v12 = vmul.f32 %v1417_v60, %v374_v58  ;;  %v405_v55 = vmul.f32 %v1415_v59, %v378_v38  ;;  %v344_v39 = vrot.slane %v1611_v29, %v1497_v13 }
  0x56   :  { %1982 = vst [vmem:[#allocation32_spill] sm:$0xff] %v1614_v31  ;;  %v359_v46 = vmul.f32 %v1401_v50, %v340_v37  ;;  %v360_v20 = vmul.f32 %v1403_v51, %v340_v37  ;;  %v398_v31 = vrot.slane %v1611_v29, %v1499_v4  ;;  %v406_v33 = vmul.f32 %v1417_v60, %v378_v38 }
  0x57   :  { %v407_v53 = vmul.f32 %v1415_v59, %v382_v40  ;;  %v408_v26 = vmul.f32 %v1417_v60, %v382_v40  ;;  %v409_v58 = vmul.f32 %v1415_v59, %v386_v7  ;;  %v361_v49 = vmul.f32 %v1401_v50, %v344_v39 }
  0x58   :  { %v362_v15 = vmul.f32 %v1403_v51, %v344_v39  ;;  %v410_v13 = vmul.f32 %v1417_v60, %v386_v7  ;;  %v411_v19 = vmul.f32 %v1415_v59, %v390_v28  ;;  %v412_v37 = vmul.f32 %v1417_v60, %v390_v28 }
  0x59   :  { %v413_v4 = vmul.f32 %v1415_v59, %v394_v17  ;;  %v414_v38 = vmul.f32 %v1417_v60, %v394_v17  ;;  %v415_v30 = vmul.f32 %v1415_v59, %v398_v31  ;;  %v416_v40 = vmul.f32 %v1417_v60, %v398_v31 }
  0x5a   :  { %v417_v8 = vadd.f32 %v399_v35, %v1546_v42  ;;  %v418_v50 = vadd.f32 %v400_v24, %v1549_v45  ;;  %v419_v11 = vadd.f32 %v401_v47, %v347_v54  ;;  %v420_v51 = vadd.f32 %v402_v9, %v348_v56 }
  0x5b   :  { %v421_v39 = vadd.f32 %v403_v1, %v349_v18  ;;  %v422_v7 = vadd.f32 %v404_v12, %v350_v23  ;;  %v423_v10 = vadd.f32 %v405_v55, %v351_v27  ;;  %v424_v25 = vadd.f32 %v406_v33, %v352_v16 }
  0x5c   :  { %v425_v3 = vadd.f32 %v407_v53, %v353_v62  ;;  %v426_v28 = vadd.f32 %v408_v26, %v354_v48  ;;  %v427_v21 = vadd.f32 %v409_v58, %v355_v52  ;;  %v428_v6 = vadd.f32 %v410_v13, %v356_v22  ;;  %v1983_v47 = vld [vmem:[#allocation31_spill] sm:$0xff] }
  0x5d   :  { %v429_v2 = vadd.f32 %v411_v19, %v357_v34  ;;  %v430_v17 = vadd.f32 %v412_v37, %v358_v63  ;;  %v431_v61 = vadd.f32 %v413_v4, %v359_v46  ;;  %v432_v59 = vadd.f32 %v414_v38, %v360_v20  ;;  %v1985_v34 = vld [vmem:[#allocation3_spill] sm:$0xff] }
  0x5e   :  { %v433_v29 = vadd.f32 %v415_v30, %v361_v49  ;;  %v434_v60 = vadd.f32 %v416_v40, %v362_v15  ;;  %v438_v42 = vrot.slane %v1510_v14, %v1501_v5  ;;  %v442_v9 = vrot.slane %v1518_v32, %v1501_v5  ;;  %v1984_v15 = vld [vmem:[#allocation2_spill] sm:$0xff] }
  0x5f   :  { %v446_v55 = vrot.slane %v1526_v41, %v1501_v5  ;;  %v450_v53 = vrot.slane %v1534_v44, %v1501_v5  ;;  %v454_v19 = vrot.slane %v1560_v0, %v1501_v5  ;;  %v458_v63 = vrot.slane %v1573_v57, %v1501_v5 }
  0x60   :  { %v462_v30 = vrot.slane %v1587_v36, %v1501_v5  ;;  %v466_v49 = vrot.slane %v1596_v43, %v1501_v5  ;;  %v470_v13 = vrot.slane %v1983_v47, %v1501_v5  ;;  %v471_v33 = vmul.f32 %v1984_v15, %v438_v42  ;;  %v1986_v43 = vld [vmem:[#allocation17_spill] sm:$0xff] }
  0x61   :  { %v472_v45 = vmul.f32 %v1985_v34, %v438_v42  ;;  %v473_v54 = vmul.f32 %v1984_v15, %v442_v9  ;;  %v474_v56 = vmul.f32 %v1985_v34, %v442_v9  ;;  %v475_v1 = vmul.f32 %v1984_v15, %v446_v55 }
  0x62   :  { %v476_v18 = vmul.f32 %v1985_v34, %v446_v55  ;;  %v477_v23 = vmul.f32 %v1984_v15, %v450_v53  ;;  %v478_v27 = vmul.f32 %v1985_v34, %v450_v53  ;;  %v479_v16 = vmul.f32 %v1984_v15, %v454_v19 }
  0x63   :  { %v480_v5 = vmul.f32 %v1985_v34, %v454_v19  ;;  %v481_v35 = vmul.f32 %v1984_v15, %v458_v63  ;;  %v482_v62 = vmul.f32 %v1985_v34, %v458_v63  ;;  %v483_v24 = vmul.f32 %v1984_v15, %v462_v30 }
  0x64   :  { %v484_v22 = vmul.f32 %v1985_v34, %v462_v30  ;;  %v485_v48 = vmul.f32 %v1984_v15, %v466_v49  ;;  %v486_v52 = vmul.f32 %v1985_v34, %v466_v49  ;;  %v487_v31 = vmul.f32 %v1984_v15, %v470_v13 }
  0x65   :  { %v488_v12 = vmul.f32 %v1985_v34, %v470_v13  ;;  %v489_v46 = vadd.f32 %v471_v33, %v417_v8  ;;  %v490_v20 = vadd.f32 %v472_v45, %v418_v50  ;;  %v491_v26 = vadd.f32 %v473_v54, %v419_v11 }
  0x66   :  { %v492_v58 = vadd.f32 %v474_v56, %v420_v51  ;;  %v493_v37 = vadd.f32 %v475_v1, %v421_v39  ;;  %v494_v4 = vadd.f32 %v476_v18, %v422_v7  ;;  %v495_v38 = vadd.f32 %v477_v23, %v423_v10  ;;  %v1989_v51 = vld [vmem:[#allocation4_spill] sm:$0xff]  ;;  %v1990_v7 = vld [vmem:[#allocation5_spill] sm:$0xff] }
  0x67   :  { %v496_v40 = vadd.f32 %v478_v27, %v424_v25  ;;  %v497_v42 = vadd.f32 %v479_v16, %v425_v3  ;;  %v498_v9 = vadd.f32 %v480_v5, %v426_v28  ;;  %v499_v55 = vadd.f32 %v481_v35, %v427_v21 }
  0x68   :  { %v500_v53 = vadd.f32 %v482_v62, %v428_v6  ;;  %v501_v19 = vadd.f32 %v483_v24, %v429_v2  ;;  %v502_v63 = vadd.f32 %v484_v22, %v430_v17  ;;  %v503_v30 = vadd.f32 %v485_v48, %v431_v61  ;;  %v1987_v6 = vld [vmem:[#allocation29_spill] sm:$0xff] }
  0x69   :  { %v504_v49 = vadd.f32 %v486_v52, %v432_v59  ;;  %v505_v47 = vadd.f32 %v487_v31, %v433_v29  ;;  %v506_v15 = vadd.f32 %v488_v12, %v434_v60  ;;  %v510_v8 = vrot.slane %v1510_v14, %v1986_v43  ;;  %v1988_v29 = vld [vmem:[#allocation31_spill] sm:$0xff] }
  0x6a   :  { %v514_v11 = vrot.slane %v1518_v32, %v1986_v43  ;;  %v518_v10 = vrot.slane %v1526_v41, %v1986_v43  ;;  %v522_v3 = vrot.slane %v1534_v44, %v1986_v43  ;;  %v526_v2 = vrot.slane %v1560_v0, %v1986_v43 }
  0x6b   :  { %v530_v61 = vrot.slane %v1573_v57, %v1986_v43  ;;  %v534_v21 = vrot.slane %v1587_v36, %v1986_v43  ;;  %v538_v25 = vrot.slane %v1987_v6, %v1986_v43  ;;  %v542_v50 = vrot.slane %v1988_v29, %v1986_v43  ;;  %v1991_v6 = vld [vmem:[#allocation18_spill] sm:$0xff] }
  0x6c   :  { %v543_v39 = vmul.f32 %v1989_v51, %v510_v8  ;;  %v544_v28 = vmul.f32 %v1990_v7, %v510_v8  ;;  %v545_v17 = vmul.f32 %v1989_v51, %v514_v11  ;;  %v546_v59 = vmul.f32 %v1990_v7, %v514_v11 }
  0x6d   :  { %v547_v60 = vmul.f32 %v1989_v51, %v518_v10  ;;  %v548_v13 = vmul.f32 %v1990_v7, %v518_v10  ;;  %v549_v33 = vmul.f32 %v1989_v51, %v522_v3  ;;  %v550_v34 = vmul.f32 %v1990_v7, %v522_v3 }
  0x6e   :  { %v551_v45 = vmul.f32 %v1989_v51, %v526_v2  ;;  %v552_v43 = vmul.f32 %v1990_v7, %v526_v2  ;;  %v553_v54 = vmul.f32 %v1989_v51, %v530_v61  ;;  %v554_v56 = vmul.f32 %v1990_v7, %v530_v61 }
  0x6f   :  { %v555_v1 = vmul.f32 %v1989_v51, %v534_v21  ;;  %v556_v18 = vmul.f32 %v1990_v7, %v534_v21  ;;  %v557_v23 = vmul.f32 %v1989_v51, %v538_v25  ;;  %v558_v27 = vmul.f32 %v1990_v7, %v538_v25 }
  0x70   :  { %v559_v16 = vmul.f32 %v1989_v51, %v542_v50  ;;  %v560_v5 = vmul.f32 %v1990_v7, %v542_v50  ;;  %v561_v35 = vadd.f32 %v543_v39, %v489_v46  ;;  %v562_v62 = vadd.f32 %v544_v28, %v490_v20 }
  0x71   :  { %v563_v24 = vadd.f32 %v545_v17, %v491_v26  ;;  %v564_v22 = vadd.f32 %v546_v59, %v492_v58  ;;  %v565_v48 = vadd.f32 %v547_v60, %v493_v37  ;;  %v566_v52 = vadd.f32 %v548_v13, %v494_v4 }
  0x72   :  { %v567_v31 = vadd.f32 %v549_v33, %v495_v38  ;;  %v568_v12 = vadd.f32 %v550_v34, %v496_v40  ;;  %v569_v8 = vadd.f32 %v551_v45, %v497_v42  ;;  %v570_v11 = vadd.f32 %v552_v43, %v498_v9  ;;  %v1992_v38 = vld [vmem:[#allocation29_spill] sm:$0xff]  ;;  %v1993_v42 = vld [vmem:[#allocation31_spill] sm:$0xff] }
  0x73   :  { %v571_v10 = vadd.f32 %v553_v54, %v499_v55  ;;  %v572_v3 = vadd.f32 %v554_v56, %v500_v53  ;;  %v573_v2 = vadd.f32 %v555_v1, %v501_v19  ;;  %v574_v61 = vadd.f32 %v556_v18, %v502_v63  ;;  %v1994_v55 = vld [vmem:[#allocation6_spill] sm:$0xff]  ;;  %v1995_v19 = vld [vmem:[#allocation7_spill] sm:$0xff] }
  0x74   :  { %v575_v21 = vadd.f32 %v557_v23, %v503_v30  ;;  %v576_v25 = vadd.f32 %v558_v27, %v504_v49  ;;  %v577_v29 = vadd.f32 %v559_v16, %v505_v47  ;;  %v578_v51 = vadd.f32 %v560_v5, %v506_v15 }
  0x75   :  { %v582_v46 = vrot.slane %v1510_v14, %v1991_v6  ;;  %v586_v20 = vrot.slane %v1518_v32, %v1991_v6  ;;  %v590_v26 = vrot.slane %v1526_v41, %v1991_v6  ;;  %v594_v58 = vrot.slane %v1534_v44, %v1991_v6 }
  0x76   :  { %v598_v37 = vrot.slane %v1560_v0, %v1991_v6  ;;  %v602_v4 = vrot.slane %v1573_v57, %v1991_v6  ;;  %v606_v47 = vrot.slane %v1587_v36, %v1991_v6  ;;  %v610_v40 = vrot.slane %v1992_v38, %v1991_v6  ;;  %v1996_v38 = vld [vmem:[#allocation19_spill] sm:$0xff] }
  0x77   :  { %v614_v9 = vrot.slane %v1993_v42, %v1991_v6  ;;  %v615_v53 = vmul.f32 %v1994_v55, %v582_v46  ;;  %v616_v63 = vmul.f32 %v1995_v19, %v582_v46  ;;  %v617_v30 = vmul.f32 %v1994_v55, %v586_v20 }
  0x78   :  { %v618_v49 = vmul.f32 %v1995_v19, %v586_v20  ;;  %v619_v15 = vmul.f32 %v1994_v55, %v590_v26  ;;  %v620_v50 = vmul.f32 %v1995_v19, %v590_v26  ;;  %v621_v39 = vmul.f32 %v1994_v55, %v594_v58 }
  0x79   :  { %v622_v7 = vmul.f32 %v1995_v19, %v594_v58  ;;  %v623_v28 = vmul.f32 %v1994_v55, %v598_v37  ;;  %v624_v6 = vmul.f32 %v1995_v19, %v598_v37  ;;  %v625_v17 = vmul.f32 %v1994_v55, %v602_v4 }
  0x7a   :  { %v626_v59 = vmul.f32 %v1995_v19, %v602_v4  ;;  %v627_v60 = vmul.f32 %v1994_v55, %v606_v47  ;;  %v628_v13 = vmul.f32 %v1995_v19, %v606_v47  ;;  %v629_v33 = vmul.f32 %v1994_v55, %v610_v40 }
  0x7b   :  { %v630_v34 = vmul.f32 %v1995_v19, %v610_v40  ;;  %v631_v45 = vmul.f32 %v1994_v55, %v614_v9  ;;  %v632_v43 = vmul.f32 %v1995_v19, %v614_v9  ;;  %v633_v54 = vadd.f32 %v615_v53, %v561_v35 }
  0x7c   :  { %v634_v56 = vadd.f32 %v616_v63, %v562_v62  ;;  %v635_v1 = vadd.f32 %v617_v30, %v563_v24  ;;  %v636_v18 = vadd.f32 %v618_v49, %v564_v22  ;;  %v637_v23 = vadd.f32 %v619_v15, %v565_v48 }
  0x7d   :  { %v638_v27 = vadd.f32 %v620_v50, %v566_v52  ;;  %v639_v16 = vadd.f32 %v621_v39, %v567_v31  ;;  %v640_v5 = vadd.f32 %v622_v7, %v568_v12  ;;  %v641_v46 = vadd.f32 %v623_v28, %v569_v8  ;;  %v1997_v31 = vld [vmem:[#allocation29_spill] sm:$0xff]  ;;  %v1998_v8 = vld [vmem:[#allocation31_spill] sm:$0xff] }
  0x7e   :  { %v642_v20 = vadd.f32 %v624_v6, %v570_v11  ;;  %v643_v26 = vadd.f32 %v625_v17, %v571_v10  ;;  %v644_v58 = vadd.f32 %v626_v59, %v572_v3  ;;  %v645_v37 = vadd.f32 %v627_v60, %v573_v2  ;;  %v1999_v10 = vld [vmem:[#allocation8_spill] sm:$0xff]  ;;  %v2000_v2 = vld [vmem:[#allocation9_spill] sm:$0xff] }
  0x7f   :  { %v646_v4 = vadd.f32 %v628_v13, %v574_v61  ;;  %v647_v47 = vadd.f32 %v629_v33, %v575_v21  ;;  %v648_v40 = vadd.f32 %v630_v34, %v576_v25  ;;  %v649_v42 = vadd.f32 %v631_v45, %v577_v29 }
  0x80   :  { %v650_v55 = vadd.f32 %v632_v43, %v578_v51  ;;  %v654_v35 = vrot.slane %v1510_v14, %v1996_v38  ;;  %v658_v62 = vrot.slane %v1518_v32, %v1996_v38  ;;  %v662_v24 = vrot.slane %v1526_v41, %v1996_v38 }
  0x81   :  { %v666_v22 = vrot.slane %v1534_v44, %v1996_v38  ;;  %v670_v48 = vrot.slane %v1560_v0, %v1996_v38  ;;  %v674_v52 = vrot.slane %v1573_v57, %v1996_v38  ;;  %v678_v29 = vrot.slane %v1587_v36, %v1996_v38 }
  0x82   :  { %v682_v12 = vrot.slane %v1997_v31, %v1996_v38  ;;  %v686_v11 = vrot.slane %v1998_v8, %v1996_v38  ;;  %v687_v3 = vmul.f32 %v1999_v10, %v654_v35  ;;  %v688_v61 = vmul.f32 %v2000_v2, %v654_v35  ;;  %v2001_v31 = vld [vmem:[#allocation20_spill] sm:$0xff] }
  0x83   :  { %v689_v21 = vmul.f32 %v1999_v10, %v658_v62  ;;  %v690_v25 = vmul.f32 %v2000_v2, %v658_v62  ;;  %v691_v51 = vmul.f32 %v1999_v10, %v662_v24  ;;  %v692_v9 = vmul.f32 %v2000_v2, %v662_v24 }
  0x84   :  { %v693_v53 = vmul.f32 %v1999_v10, %v666_v22  ;;  %v694_v19 = vmul.f32 %v2000_v2, %v666_v22  ;;  %v695_v63 = vmul.f32 %v1999_v10, %v670_v48  ;;  %v696_v38 = vmul.f32 %v2000_v2, %v670_v48 }
  0x85   :  { %v697_v30 = vmul.f32 %v1999_v10, %v674_v52  ;;  %v698_v49 = vmul.f32 %v2000_v2, %v674_v52  ;;  %v699_v15 = vmul.f32 %v1999_v10, %v678_v29  ;;  %v700_v50 = vmul.f32 %v2000_v2, %v678_v29 }
  0x86   :  { %v701_v39 = vmul.f32 %v1999_v10, %v682_v12  ;;  %v702_v7 = vmul.f32 %v2000_v2, %v682_v12  ;;  %v703_v28 = vmul.f32 %v1999_v10, %v686_v11  ;;  %v704_v6 = vmul.f32 %v2000_v2, %v686_v11 }
  0x87   :  { %v705_v17 = vadd.f32 %v687_v3, %v633_v54  ;;  %v706_v59 = vadd.f32 %v688_v61, %v634_v56  ;;  %v707_v60 = vadd.f32 %v689_v21, %v635_v1  ;;  %v708_v13 = vadd.f32 %v690_v25, %v636_v18 }
  0x88   :  { %v709_v33 = vadd.f32 %v691_v51, %v637_v23  ;;  %v710_v34 = vadd.f32 %v692_v9, %v638_v27  ;;  %v711_v45 = vadd.f32 %v693_v53, %v639_v16  ;;  %v712_v43 = vadd.f32 %v694_v19, %v640_v5  ;;  %v2002_v16 = vld [vmem:[#allocation29_spill] sm:$0xff] }
  0x89   :  { %v713_v35 = vadd.f32 %v695_v63, %v641_v46  ;;  %v714_v62 = vadd.f32 %v696_v38, %v642_v20  ;;  %v715_v24 = vadd.f32 %v697_v30, %v643_v26  ;;  %v716_v22 = vadd.f32 %v698_v49, %v644_v58  ;;  %v2003_v46 = vld [vmem:[#allocation31_spill] sm:$0xff]  ;;  %v2004_v26 = vld [vmem:[#allocation10_spill] sm:$0xff] }
  0x8a   :  { %v717_v48 = vadd.f32 %v699_v15, %v645_v37  ;;  %v718_v52 = vadd.f32 %v700_v50, %v646_v4  ;;  %v719_v29 = vadd.f32 %v701_v39, %v647_v47  ;;  %v720_v12 = vadd.f32 %v702_v7, %v648_v40  ;;  %v2005_v37 = vld [vmem:[#allocation11_spill] sm:$0xff] }
  0x8b   :  { %v721_v8 = vadd.f32 %v703_v28, %v649_v42  ;;  %v722_v10 = vadd.f32 %v704_v6, %v650_v55  ;;  %v726_v54 = vrot.slane %v1510_v14, %v2001_v31  ;;  %v730_v56 = vrot.slane %v1518_v32, %v2001_v31 }
  0x8c   :  { %v734_v1 = vrot.slane %v1526_v41, %v2001_v31  ;;  %v738_v18 = vrot.slane %v1534_v44, %v2001_v31  ;;  %v742_v23 = vrot.slane %v1560_v0, %v2001_v31  ;;  %v746_v27 = vrot.slane %v1573_v57, %v2001_v31 }
  0x8d   :  { %v750_v42 = vrot.slane %v1587_v36, %v2001_v31  ;;  %v754_v5 = vrot.slane %v2002_v16, %v2001_v31  ;;  %v758_v20 = vrot.slane %v2003_v46, %v2001_v31  ;;  %v759_v58 = vmul.f32 %v2004_v26, %v726_v54  ;;  %v2006_v16 = vld [vmem:[#allocation23_spill] sm:$0xff] }
  0x8e   :  { %v760_v4 = vmul.f32 %v2005_v37, %v726_v54  ;;  %v761_v47 = vmul.f32 %v2004_v26, %v730_v56  ;;  %v762_v40 = vmul.f32 %v2005_v37, %v730_v56  ;;  %v763_v55 = vmul.f32 %v2004_v26, %v734_v1 }
  0x8f   :  { %v764_v11 = vmul.f32 %v2005_v37, %v734_v1  ;;  %v765_v3 = vmul.f32 %v2004_v26, %v738_v18  ;;  %v766_v2 = vmul.f32 %v2005_v37, %v738_v18  ;;  %v767_v61 = vmul.f32 %v2004_v26, %v742_v23 }
  0x90   :  { %v768_v31 = vmul.f32 %v2005_v37, %v742_v23  ;;  %v769_v21 = vmul.f32 %v2004_v26, %v746_v27  ;;  %v770_v25 = vmul.f32 %v2005_v37, %v746_v27  ;;  %v771_v51 = vmul.f32 %v2004_v26, %v750_v42 }
  0x91   :  { %v772_v9 = vmul.f32 %v2005_v37, %v750_v42  ;;  %v773_v53 = vmul.f32 %v2004_v26, %v754_v5  ;;  %v774_v19 = vmul.f32 %v2005_v37, %v754_v5  ;;  %v775_v63 = vmul.f32 %v2004_v26, %v758_v20 }
  0x92   :  { %v776_v38 = vmul.f32 %v2005_v37, %v758_v20  ;;  %v777_v30 = vadd.f32 %v759_v58, %v705_v17  ;;  %v778_v49 = vadd.f32 %v760_v4, %v706_v59  ;;  %v779_v15 = vadd.f32 %v761_v47, %v707_v60 }
  0x93   :  { %v780_v50 = vadd.f32 %v762_v40, %v708_v13  ;;  %v781_v39 = vadd.f32 %v763_v55, %v709_v33  ;;  %v782_v7 = vadd.f32 %v764_v11, %v710_v34  ;;  %v783_v28 = vadd.f32 %v765_v3, %v711_v45 }
  0x94   :  { %v784_v6 = vadd.f32 %v766_v2, %v712_v43  ;;  %v785_v54 = vadd.f32 %v767_v61, %v713_v35  ;;  %v786_v56 = vadd.f32 %v768_v31, %v714_v62  ;;  %v787_v1 = vadd.f32 %v769_v21, %v715_v24  ;;  %v2009_v35 = vld [vmem:[#allocation12_spill] sm:$0xff]  ;;  %v2010_v62 = vld [vmem:[#allocation13_spill] sm:$0xff] }
  0x95   :  { %v788_v18 = vadd.f32 %v770_v25, %v716_v22  ;;  %v789_v23 = vadd.f32 %v771_v51, %v717_v48  ;;  %v790_v27 = vadd.f32 %v772_v9, %v718_v52  ;;  %v791_v42 = vadd.f32 %v773_v53, %v719_v29 }
  0x96   :  { %v792_v5 = vadd.f32 %v774_v19, %v720_v12  ;;  %v793_v46 = vadd.f32 %v775_v63, %v721_v8  ;;  %v794_v26 = vadd.f32 %v776_v38, %v722_v10  ;;  %v798_v17 = vrot.slane %v1510_v14, %v2006_v16  ;;  %v2007_v14 = vld [vmem:[#allocation29_spill] sm:$0xff] }
  0x97   :  { %v802_v59 = vrot.slane %v1518_v32, %v2006_v16  ;;  %v806_v60 = vrot.slane %v1526_v41, %v2006_v16  ;;  %v810_v13 = vrot.slane %v1534_v44, %v2006_v16  ;;  %v814_v33 = vrot.slane %v1560_v0, %v2006_v16  ;;  %v2008_v32 = vld [vmem:[#allocation31_spill] sm:$0xff] }
  0x98   :  { %v818_v34 = vrot.slane %v1573_v57, %v2006_v16  ;;  %v822_v8 = vrot.slane %v1587_v36, %v2006_v16  ;;  %v826_v45 = vrot.slane %v2007_v14, %v2006_v16  ;;  %v830_v43 = vrot.slane %v2008_v32, %v2006_v16 }
  0x99   :  { %v831_v41 = vmul.f32 %v2009_v35, %v798_v17  ;;  %v832_v24 = vmul.f32 %v2010_v62, %v798_v17  ;;  %v833_v44 = vmul.f32 %v2009_v35, %v802_v59  ;;  %v834_v0 = vmul.f32 %v2010_v62, %v802_v59 }
  0x9a   :  { %v835_v22 = vmul.f32 %v2009_v35, %v806_v60  ;;  %v836_v57 = vmul.f32 %v2010_v62, %v806_v60  ;;  %v837_v36 = vmul.f32 %v2009_v35, %v810_v13  ;;  %v838_v48 = vmul.f32 %v2010_v62, %v810_v13  ;;  %v2011_v13 = vld [vmem:[#allocation16_spill] sm:$0xff] }
  0x9b   :  { %v839_v52 = vmul.f32 %v2009_v35, %v814_v33  ;;  %v840_v29 = vmul.f32 %v2010_v62, %v814_v33  ;;  %v841_v12 = vmul.f32 %v2009_v35, %v818_v34  ;;  %v842_v10 = vmul.f32 %v2010_v62, %v818_v34  ;;  %v2012_v33 = vld [vmem:[#allocation21_spill] sm:$0xff] }
  0x9c   :  { %v843_v16 = vmul.f32 %v2009_v35, %v822_v8  ;;  %v844_v20 = vmul.f32 %v2010_v62, %v822_v8  ;;  %v845_v58 = vmul.f32 %v2009_v35, %v826_v45  ;;  %v846_v37 = vmul.f32 %v2010_v62, %v826_v45  ;;  %v2022_v8 = vld [vmem:[#allocation15_spill] sm:$0xff] }
  0x9d   :  { %v847_v4 = vmul.f32 %v2009_v35, %v830_v43  ;;  %v848_v47 = vmul.f32 %v2010_v62, %v830_v43  ;;  %v849_v40 = vadd.f32 %v831_v41, %v777_v30  ;;  %v850_v55 = vadd.f32 %v832_v24, %v778_v49  ;;  %v2013_v49 = vld [vmem:[#allocation22_spill] sm:$0xff] }
  0x9e   :  { %v851_v11 = vadd.f32 %v833_v44, %v779_v15  ;;  %v852_v3 = vadd.f32 %v834_v0, %v780_v50  ;;  %v853_v2 = vadd.f32 %v835_v22, %v781_v39  ;;  %v854_v61 = vadd.f32 %v836_v57, %v782_v7  ;;  %v2014_v50 = vld [vmem:[#allocation24_spill] sm:$0xff]  ;;  %v2015_v7 = vld [vmem:[#allocation25_spill] sm:$0xff] }
  0x9f   :  { %v855_v31 = vadd.f32 %v837_v36, %v783_v28  ;;  %v856_v21 = vadd.f32 %v838_v48, %v784_v6  ;;  %v857_v25 = vadd.f32 %v839_v52, %v785_v54  ;;  %v858_v51 = vadd.f32 %v840_v29, %v786_v56  ;;  %v2016_v6 = vld [vmem:[#allocation26_spill] sm:$0xff]  ;;  %v2017_v56 = vld [vmem:[#allocation27_spill] sm:$0xff] }
  0xa0   :  { %v859_v9 = vadd.f32 %v841_v12, %v787_v1  ;;  %v860_v53 = vadd.f32 %v842_v10, %v788_v18  ;;  %v861_v19 = vadd.f32 %v843_v16, %v789_v23  ;;  %v862_v63 = vadd.f32 %v844_v20, %v790_v27  ;;  %v2019_v23 = vld [vmem:[#allocation30_spill] sm:$0xff] }
  0xa1   :  { %v863_v38 = vadd.f32 %v845_v58, %v791_v42  ;;  %v864_v17 = vadd.f32 %v846_v37, %v792_v5  ;;  %v865_v59 = vadd.f32 %v847_v4, %v793_v46  ;;  %v866_v60 = vadd.f32 %v848_v47, %v794_v26  ;;  %v2018_v46 = vld [vmem:[#allocation28_spill] sm:$0xff]  ;;  %v2021_v26 = vld [vmem:[#allocation14_spill] sm:$0xff] }
  0xa2   :  { %v870_v30 = vrot.slane %v2012_v33, %v2011_v13  ;;  %v874_v15 = vrot.slane %v2013_v49, %v2011_v13  ;;  %v878_v39 = vrot.slane %v2014_v50, %v2011_v13  ;;  %v882_v28 = vrot.slane %v2015_v7, %v2011_v13  ;;  %v2020_v42 = vld [vmem:[#allocation32_spill] sm:$0xff] }
  0xa3   :  { %v886_v54 = vrot.slane %v2016_v6, %v2011_v13  ;;  %v890_v1 = vrot.slane %v2017_v56, %v2011_v13  ;;  %v894_v18 = vrot.slane %v2018_v46, %v2011_v13  ;;  %v898_v27 = vrot.slane %v2019_v23, %v2011_v13 }
  0xa4   :  { %v902_v5 = vrot.slane %v2020_v42, %v2011_v13  ;;  %v903_v34 = vmul.f32 %v2021_v26, %v870_v30  ;;  %v904_v14 = vmul.f32 %v2022_v8, %v870_v30  ;;  %v905_v45 = vmul.f32 %v2021_v26, %v874_v15 }
  0xa5   :  { %v906_v32 = vmul.f32 %v2022_v8, %v874_v15  ;;  %v907_v43 = vmul.f32 %v2021_v26, %v878_v39  ;;  %v908_v35 = vmul.f32 %v2022_v8, %v878_v39  ;;  %v909_v41 = vmul.f32 %v2021_v26, %v882_v28 }
  0xa6   :  { %v910_v62 = vmul.f32 %v2022_v8, %v882_v28  ;;  %v911_v24 = vmul.f32 %v2021_v26, %v886_v54  ;;  %v912_v44 = vmul.f32 %v2022_v8, %v886_v54  ;;  %v913_v0 = vmul.f32 %v2021_v26, %v890_v1 }
  0xa7   :  { %v914_v22 = vmul.f32 %v2022_v8, %v890_v1  ;;  %v915_v57 = vmul.f32 %v2021_v26, %v894_v18  ;;  %v916_v36 = vmul.f32 %v2022_v8, %v894_v18  ;;  %v917_v48 = vmul.f32 %v2021_v26, %v898_v27 }
  0xa8   :  { %v918_v52 = vmul.f32 %v2022_v8, %v898_v27  ;;  %v919_v29 = vmul.f32 %v2021_v26, %v902_v5  ;;  %v920_v12 = vmul.f32 %v2022_v8, %v902_v5  ;;  %v921_v10 = vadd.f32 %v903_v34, %v849_v40 }
  0xa9   :  { %v922_v16 = vadd.f32 %v904_v14, %v850_v55  ;;  %v923_v20 = vadd.f32 %v905_v45, %v851_v11  ;;  %v924_v58 = vadd.f32 %v906_v32, %v852_v3  ;;  %v925_v37 = vadd.f32 %v907_v43, %v853_v2 }
  0xaa   :  { %v926_v4 = vadd.f32 %v908_v35, %v854_v61  ;;  %v927_v47 = vadd.f32 %v909_v41, %v855_v31  ;;  %v928_v13 = vadd.f32 %v910_v62, %v856_v21  ;;  %v929_v33 = vadd.f32 %v911_v24, %v857_v25 }
  0xab   :  { %v930_v30 = vadd.f32 %v912_v44, %v858_v51  ;;  %v931_v49 = vadd.f32 %v913_v0, %v859_v9  ;;  %v932_v15 = vadd.f32 %v914_v22, %v860_v53  ;;  %v933_v50 = vadd.f32 %v915_v57, %v861_v19 }
  0xac   :  { %v934_v39 = vadd.f32 %v916_v36, %v862_v63  ;;  %v935_v7 = vadd.f32 %v917_v48, %v863_v38  ;;  %v936_v28 = vadd.f32 %v918_v52, %v864_v17  ;;  %v937_v6 = vadd.f32 %v919_v29, %v865_v59 }
  0xad   :  { %v938_v54 = vadd.f32 %v920_v12, %v866_v60  ;;  %v1108_v56 = vpack.c.bf16 %v922_v16, %v921_v10  ;;  %v1113_v1 = vpack.c.bf16 %v924_v58, %v923_v20  ;;  %v1118_v40 = vpack.c.bf16 %v926_v4, %v925_v37 }
  0xae   :  { %v1123_v55 = vpack.c.bf16 %v928_v13, %v927_v47  ;;  %v1128_v11 = vpack.c.bf16 %v930_v30, %v929_v33  ;;  %v1133_v3 = vpack.c.bf16 %v932_v15, %v931_v49  ;;  %v1138_v2 = vpack.c.bf16 %v934_v39, %v933_v50 }
  0xaf   :  { %1109 = vst [vmem:[%s1926_s2] sm:$0xff] %v1108_v56   ;;  %1158 = vst [vmem:[%s1926_s2 + $0x8] sm:$0xff] %v1113_v1   ;;  %v1143_v61 = vpack.c.bf16 %v936_v28, %v935_v7  ;;  %v1148_v31 = vpack.c.bf16 %v938_v54, %v937_v6 }
  0xb0   :  { %1159 = vst [vmem:[%s1926_s2 + $0x10] sm:$0xff] %v1118_v40   ;;  %1160 = vst [vmem:[%s1926_s2 + $0x18] sm:$0xff] %v1123_v55  }
  0xb1   :  { %1161 = vst [vmem:[%s1926_s2 + $0x20] sm:$0xff] %v1128_v11   ;;  %1162 = vst [vmem:[%s1926_s2 + $0x28] sm:$0xff] %v1133_v3  }
  0xb2   :  { %1163 = vst [vmem:[%s1926_s2 + $0x30] sm:$0xff] %v1138_v2   ;;  %1164 = vst [vmem:[%s1926_s2 + $0x38] sm:$0xff] %v1143_v61  }
  0xb3   :  { %1165 = vst [vmem:[%s1926_s2 + $0x40] sm:$0xff] %v1148_v31  }

// kernel: volo_forward.40
= control target key start
LH: loop header
LB: loop body
LE: loop exit
PB: predicated region body
PF: predicated region fallthrough
CT: control target
= control target key end

     0   :  { %s726_s21 = smov 0   ;;  %s728_s22 = smov 0   ;;  %s789_s0 = inlined_call_operand.vmem [shape: bf16[32,32], index: 0, kind: input, shape index: {}]   ;;  %s790_s1 = inlined_call_operand.vmem [shape: f32[1,32], index: 1, kind: input, shape index: {}]   ;;  %s791_s2 = inlined_call_operand.vmem [shape: f32[1,32], index: 2, kind: input, shape index: {}]   ;;  %s792_s3 = inlined_call_operand.vmem [shape: bf16[32,128], index: 3, kind: input, shape index: {}]   ;;  %s793_s4 = inlined_call_operand.vmem [shape: f32[1,128], index: 4, kind: input, shape index: {}]   ;;  %s794_s5 = inlined_call_operand.vmem [shape: f32[1,128], index: 5, kind: input, shape index: {}]   ;;  %s795_s6 = inlined_call_operand.vmem [shape: bf16[32,128], index: 6, kind: output, shape index: {}]  }
   0x1   :  { %s730_s23 = smov 0  }
   0x2 LB: > { %s28_s24 = sadd.s32 1, %s683_s22  ;;  %p591_p0 = scmp.ge.s32.totalorder %s687_s23, 1  ;;  %s687_s23 = sphi %s730_s23, %s16_s23   ;;  %s683_s22 = sphi %s728_s22, %s797_s22   ;;  %s679_s21 = sphi %s726_s21, %s796_s21  }
   0x3   : > { %p30_p1 = scmp.ge.s32.totalorder %s28_s24, 2  ;;  %p252_p2 = scmp.lt.s32.totalorder %s687_s23, 3 }
   0x5   : > { %s799_s24 = smov (%p30_p1, %s28_s24), 0  ;;  %p253_p3 = pnand %p591_p0, %p252_p2 }
   0x6   : > { %s592_s25 = sshll.u32 (!%p253_p3), %s679_s21, 1  ;;  %vm325_vm0 = vcmask (!%p253_p3), 261120   ;;  %v655_v15 = vld [vmem:[%s792_s3] sm:$0xff] (!%p253_p3)   ;;  %v689_v16 = vmov (!%p253_p3), 0.0   ;;  %v656_v17 = vld [vmem:[%s792_s3 + $0x8] sm:$0xff] (!%p253_p3)   ;;  %vm690_vm1 = vmmov (!%p253_p3), 0  }
   0x7   : > { %256 = sbr.rel (%p253_p3) target bundleno = 577 (0x241), region = 44  ;;  %p296_p4 = scmp.lt.s32.totalorder (!%p253_p3), %s592_s25, 3  ;;  %621 = vmatprep.subr.bf16.mxu0 (!%p253_p3), %v689_v16  ;;  %625 = vmatprep.mubr.msk.bf16.mxu0 (!%p253_p3), %vm690_vm1, %v689_v16  ;;  %v596_v26 = vld [vmem:[%s790_s1] ss:$0 sm:$0xff] (!%p253_p3) }
   0x8   : > { %622 = vmatpush3.bf16.msra.mxu0 (!%p253_p3), %v655_v15  ;;  %v597_v30 = vld [vmem:[%s791_s2] ss:$0 sm:$0xff] (!%p253_p3) }
   0x9   : > { %623 = vmatprep.subr.bf16.mxu0 (!%p253_p3), %v689_v16  ;;  %v601_v35 = vld [vmem:[%s793_s4] ss:$0 sm:$0xff] (!%p253_p3) }
   0xa   : > { %v602_v37 = vld [vmem:[%s794_s5] ss:$0 sm:$0xff] (!%p253_p3) }
   0xc   : > { %624 = vmatpush3.bf16.msra.mxu0 (!%p253_p3), %v656_v17 }
   0xe   : > { %s801_s25 = smov (!%p296_p4, %s592_s25), 3 }
   0xf   : > { %s593_s26 = sshll.u32 %s801_s25, 2 }
  0x10   : > { %s299_s29 = scalar_lea.vmem %s789_s0, %s593_s26  ;;  %s318_s20 = scalar_lea.vmem %s795_s6, %s593_s26 }
  0x11   : > { %v610_v0 = vld [vmem:[%s299_s29] sm:$0xff]  }
  0x12   : > { %v611_v1 = vunpack.c.l.bf16 %v610_v0  ;;  %v612_v2 = vunpack.c.h.bf16 %v610_v0 }
  0x14   : > { %v326_v3 = vsel %vm325_vm0, %v611_v1, 0.0  ;;  %v329_v4 = vsel %vm325_vm0, %v612_v2, 0.0 }
  0x15   : > { %327 = vadd.xlane.f32.xlu0 %v326_v3 }
  0x19   : > { %330 = vadd.xlane.f32.xlu0 %v329_v4 }
  0xa2   : > { %v328_v5 = vpop.xlane.xlu0 %327 }
  0xa3   : > { %v333_v6 = vmul.f32 0.03125, %v328_v5 }
  0xa5   : > { %v335_v7 = vsub.f32 %v611_v1, %v333_v6 }
  0xa6   : > { %v331_v8 = vpop.xlane.xlu0 %330 }
  0xa7   : > { %v334_v9 = vmul.f32 0.03125, %v331_v8  ;;  %v337_v10 = vmul.f32 %v335_v7, %v335_v7 }
  0xa9   : > { %v336_v11 = vsub.f32 %v612_v2, %v334_v9  ;;  %v339_v12 = vsel %vm325_vm0, %v337_v10, 0.0 }
  0xaa   : > { %340 = vadd.xlane.f32.xlu1 %v339_v12 }
  0xab   : > { %v338_v13 = vmul.f32 %v336_v11, %v336_v11 }
  0xad   : > { %v342_v14 = vsel %vm325_vm0, %v338_v13, 0.0 }
  0xae   : > { %343 = vadd.xlane.f32.xlu1 %v342_v14 }
 0x137   : > { %v341_v18 = vpop.xlane.xlu1 %340 }
 0x138   : > { %v345_v19 = vmul.f32 0.03125, %v341_v18 }
 0x13a   : > { %v347_v20 = vadd.f32 1e-06, %v345_v19 }
 0x13b   : > { %v344_v21 = vpop.xlane.xlu1 %343 }
 0x13c   : > { %657 = vrsqrt.f32 %v347_v20  ;;  %v346_v22 = vmul.f32 0.03125, %v344_v21 }
 0x13e   : > { %v348_v23 = vadd.f32 1e-06, %v346_v22 }
 0x140   : > { %659 = vrsqrt.f32 %v348_v23 }
 0x146   : > { %v658_v24 = vpop.eup %657 }
 0x147   : > { %v351_v25 = vmul.f32 %v658_v24, %v335_v7 }
 0x149   : > { %v360_v29 = vmul.f32 %v596_v26, %v351_v25 }
 0x14a   : > { %v660_v27 = vpop.eup %659 }
 0x14b   : > { %v352_v28 = vmul.f32 %v660_v27, %v336_v11  ;;  %v369_v32 = vadd.f32 %v597_v30, %v360_v29 }
 0x14d   : > { %v361_v31 = vmul.f32 %v596_v26, %v352_v28 }
 0x14f   : > { %v370_v33 = vadd.f32 %v597_v30, %v361_v31 }
 0x151   : > { %v371_v34 = vpack.c.bf16 %v370_v33, %v369_v32 }
 0x153   : > { %626 = vmatmul.mubr.msk.bf16.vlgmr.msra.gmra.mrb[0].mxu0 %vm325_vm0, %v371_v34 }
 0x226   : > { %v425_v36 = vpop.f32.mrb[0].mxu0 }
 0x227   : > { %v440_v38 = vmul.f32 %v601_v35, %v425_v36  ;;  %v627_v39 = vpop.f32.mrb[1].mxu0 }
 0x228   : > { %v428_v40 = vpop.f32.mrb[2].mxu0 }
 0x229   : > { %v448_v41 = vadd.f32 %v602_v37, %v440_v38  ;;  %v441_v42 = vmul.f32 %v601_v35, %v428_v40  ;;  %v628_v43 = vpop.f32.mrb[3].mxu0 }
 0x22b   : > { %v452_v44 = vmul.f32 0.70710677, %v448_v41  ;;  %v449_v45 = vadd.f32 %v602_v37, %v441_v42  ;;  %v450_v50 = vmul.f32 0.5, %v448_v41 }
 0x22d   : > { %661 = verf.f32 %v452_v44  ;;  %v453_v46 = vmul.f32 0.70710677, %v449_v45  ;;  %v451_v51 = vmul.f32 0.5, %v449_v45 }
 0x22f   : > { %663 = verf.f32 %v453_v46 }
 0x237   : > { %v662_v47 = vpop.eup %661 }
 0x238   : > { %v456_v48 = vadd.f32 1.0, %v662_v47 }
 0x239   : > { %v664_v49 = vpop.eup %663 }
 0x23a   : > { %v457_v52 = vadd.f32 1.0, %v664_v49  ;;  %v458_v53 = vmul.f32 %v456_v48, %v450_v50 }
 0x23c   : > { %v459_v54 = vmul.f32 %v457_v52, %v451_v51 }
 0x23e   : > { %v616_v55 = vpack.c.bf16 %v459_v54, %v458_v53 }
 0x240   : > { %617 = vst [vmem:[%s318_s20] sm:$0xff] %v616_v55  }
 0x241 PF: > { %s16_s23 = sadd.s32 1, %s687_s23   ;;  %s796_s21 = smov %s683_s22 }
 0x242   : > { %p13_p5 = scmp.ge.s32.totalorder %s16_s23, 4   ;;  %s797_s22 = smov %s799_s24 }
 0x244   :  { %15 = sbr.rel (!%p13_p5) target bundleno = 2 (0x2), region = 83 }

// kernel: volo_forward.41
= control target key start
LH: loop header
LB: loop body
LE: loop exit
PB: predicated region body
PF: predicated region fallthrough
CT: control target
= control target key end

     0   :  { %s623_s15 = smov 0   ;;  %s625_s16 = smov 0   ;;  %s674_s0 = inlined_call_operand.vmem [shape: bf16[32,64], index: 0, kind: input, shape index: {}]   ;;  %s675_s1 = inlined_call_operand.vmem [shape: bf16[64,128], index: 1, kind: input, shape index: {}]   ;;  %s676_s2 = inlined_call_operand.vmem [shape: f32[1,128], index: 2, kind: input, shape index: {}]   ;;  %s677_s3 = inlined_call_operand.vmem [shape: f32[1,128], index: 3, kind: input, shape index: {}]   ;;  %s678_s4 = inlined_call_operand.vmem [shape: bf16[32,128], index: 4, kind: output, shape index: {}]  }
   0x1   :  { %s627_s17 = smov 0  }
   0x2 LB: > { %s26_s18 = sadd.s32 1, %s590_s16  ;;  %p500_p0 = scmp.ge.s32.totalorder %s594_s17, 1  ;;  %s594_s17 = sphi %s627_s17, %s14_s17   ;;  %s590_s16 = sphi %s625_s16, %s680_s16   ;;  %s586_s15 = sphi %s623_s15, %s679_s15  }
   0x3   : > { %p28_p1 = scmp.ge.s32.totalorder %s26_s18, 2  ;;  %p202_p2 = scmp.lt.s32.totalorder %s594_s17, 3 }
   0x5   : > { %s682_s18 = smov (%p28_p1, %s26_s18), 0  ;;  %p203_p3 = pnand %p500_p0, %p202_p2 }
   0x6   : > { %v567_v0 = vld [vmem:[%s675_s1] sm:$0xff] (!%p203_p3)   ;;  %v596_v1 = vmov (!%p203_p3), 0.0   ;;  %v568_v2 = vld [vmem:[%s675_s1 + $0x8] sm:$0xff] (!%p203_p3)   ;;  %vm597_vm0 = vmmov (!%p203_p3), 0   ;;  %s501_s23 = sshll.u32 (!%p203_p3), %s586_s15, 1  ;;  %v569_v3 = vld [vmem:[%s675_s1 + $0x10] sm:$0xff] (!%p203_p3)  }
   0x7   : > { %206 = sbr.rel (%p203_p3) target bundleno = 244 (0xf4), region = 36  ;;  %529 = vmatprep.subr.bf16.mxu0 (!%p203_p3), %v596_v1  ;;  %537 = vmatprep.mubr.msk.bf16.mxu0 (!%p203_p3), %vm597_vm0, %v596_v1  ;;  %p242_p4 = scmp.lt.s32.totalorder (!%p203_p3), %s501_s23, 3  ;;  %v570_v4 = vld [vmem:[%s675_s1 + $0x18] sm:$0xff] (!%p203_p3)   ;;  %vm306_vm1 = vcmask (!%p203_p3), 523264   ;;  %v511_v6 = vld [vmem:[%s676_s2] ss:$0 sm:$0xff] (!%p203_p3) }
   0x8   : > { %530 = vmatpush3.bf16.msra.mxu0 (!%p203_p3), %v567_v0  ;;  %v512_v10 = vld [vmem:[%s677_s3] ss:$0 sm:$0xff] (!%p203_p3) }
   0x9   : > { %531 = vmatprep.subr.bf16.mxu0 (!%p203_p3), %v596_v1 }
   0xc   : > { %532 = vmatpush3.bf16.msra.mxu0 (!%p203_p3), %v568_v2 }
   0xd   : > { %533 = vmatprep.subr.bf16.mxu0 (!%p203_p3), %v596_v1 }
   0xe   : > { %s684_s23 = smov (!%p242_p4, %s501_s23), 3 }
   0xf   : > { %s502_s26 = sshll.u32 %s684_s23, 2 }
  0x10   : > { %s245_s29 = scalar_lea.vmem %s674_s0, %s502_s26  ;;  %534 = vmatpush3.bf16.msra.mxu0 %v569_v3  ;;  %s264_s12 = scalar_lea.vmem %s678_s4, %s502_s26 }
  0x11   : > { %535 = vmatprep.subr.bf16.mxu0 %v596_v1  ;;  %v571_v5 = vld [vmem:[%s245_s29] sm:$0xff]  }
  0x14   : > { %536 = vmatpush3.bf16.msra.mxu0 %v570_v4 }
  0x17   : > { %538 = vmatmul.mubr.msk.bf16.vlgmr.msra.gmra.mrb[0].mxu0 %vm306_vm1, %v571_v5 }
  0xea   : > { %v344_v7 = vpop.f32.mrb[0].mxu0 }
  0xeb   : > { %v359_v8 = vmul.f32 %v511_v6, %v344_v7  ;;  %v539_v9 = vpop.f32.mrb[1].mxu0 }
  0xec   : > { %v347_v11 = vpop.f32.mrb[2].mxu0 }
  0xed   : > { %v360_v12 = vmul.f32 %v511_v6, %v347_v11  ;;  %v540_v13 = vpop.f32.mrb[3].mxu0  ;;  %v367_v14 = vadd.f32 %v512_v10, %v359_v8 }
  0xef   : > { %v368_v15 = vadd.f32 %v512_v10, %v360_v12 }
  0xf1   : > { %v522_v16 = vpack.c.bf16 %v368_v15, %v367_v14 }
  0xf3   : > { %523 = vst [vmem:[%s264_s12] sm:$0xff] %v522_v16  }
  0xf4 PF: > { %s14_s17 = sadd.s32 1, %s594_s17   ;;  %s679_s15 = smov %s590_s16 }
  0xf5   : > { %p11_p5 = scmp.ge.s32.totalorder %s14_s17, 4   ;;  %s680_s16 = smov %s682_s18 }
  0xf7   :  { %13 = sbr.rel (!%p11_p5) target bundleno = 2 (0x2), region = 75 }

// kernel: volo_forward.42
= control target key start
LH: loop header
LB: loop body
LE: loop exit
PB: predicated region body
PF: predicated region fallthrough
CT: control target
= control target key end

     0   :  { %v194_v0 = vmov 0.0   ;;  %vm195_vm0 = vmmov 0   ;;  %s257_s1 = inlined_call_operand.vmem [shape: bf16[128,128], index: 1, kind: input, shape index: {}]   ;;  %s258_s0 = inlined_call_operand.vmem [shape: bf16[8,128], index: 0, kind: input, shape index: {}]   ;;  %s259_s2 = inlined_call_operand.vmem [shape: f32[1,128], index: 2, kind: input, shape index: {}]   ;;  %s260_s3 = inlined_call_operand.vmem [shape: f32[1,128], index: 3, kind: input, shape index: {}]   ;;  %s261_s4 = inlined_call_operand.vmem [shape: bf16[8,128], index: 4, kind: output, shape index: {}]  }
   0x1   :  { %164 = vmatprep.subr.bf16.mxu0 %v194_v0  ;;  %v186_v1 = vld [vmem:[%s257_s1] sm:$0xff]   ;;  %180 = vmatprep.mubr.msk.bf16.mxu0 %vm195_vm0, %v194_v0  ;;  %v187_v2 = vld [vmem:[%s257_s1 + $0x8] sm:$0xff]   ;;  %v188_v3 = vld [vmem:[%s257_s1 + $0x10] sm:$0xff]  }
   0x2   :  { %165 = vmatpush3.bf16.msra.mxu0 %v186_v1  ;;  %v189_v4 = vld [vmem:[%s257_s1 + $0x18] sm:$0xff]   ;;  %v190_v5 = vld [vmem:[%s257_s1 + $0x20] sm:$0xff]   ;;  %v191_v6 = vld [vmem:[%s257_s1 + $0x28] sm:$0xff]  }
   0x3   :  { %166 = vmatprep.subr.bf16.mxu0 %v194_v0  ;;  %v192_v7 = vld [vmem:[%s257_s1 + $0x30] sm:$0xff]   ;;  %v193_v8 = vld [vmem:[%s257_s1 + $0x38] sm:$0xff]   ;;  %v18_v9 = vld [vmem:[%s258_s0] sm:$0xf] }
   0x4   :  { %v153_v10 = vld [vmem:[%s259_s2] ss:$0 sm:$0xff] }
   0x5   :  { %v154_v12 = vld [vmem:[%s260_s3] ss:$0 sm:$0xff] }
   0x6   :  { %167 = vmatpush3.bf16.msra.mxu0 %v187_v2 }
   0x7   :  { %168 = vmatprep.subr.bf16.mxu0 %v194_v0 }
   0xa   :  { %169 = vmatpush3.bf16.msra.mxu0 %v188_v3 }
   0xb   :  { %170 = vmatprep.subr.bf16.mxu0 %v194_v0 }
   0xe   :  { %171 = vmatpush3.bf16.msra.mxu0 %v189_v4 }
   0xf   :  { %172 = vmatprep.subr.bf16.mxu0 %v194_v0 }
  0x12   :  { %173 = vmatpush3.bf16.msra.mxu0 %v190_v5 }
  0x13   :  { %174 = vmatprep.subr.bf16.mxu0 %v194_v0 }
  0x16   :  { %175 = vmatpush3.bf16.msra.mxu0 %v191_v6 }
  0x17   :  { %176 = vmatprep.subr.bf16.mxu0 %v194_v0 }
  0x1a   :  { %177 = vmatpush3.bf16.msra.mxu0 %v192_v7 }
  0x1b   :  { %178 = vmatprep.subr.bf16.mxu0 %v194_v0 }
  0x1e   :  { %179 = vmatpush3.bf16.msra.mxu0 %v193_v8 }
  0x21   :  { %181 = vmatmul.mubr.bf16.vlgmr.msra.gmra.mrb[0].mxu0 %v18_v9 }
  0xf4   :  { %v117_v11 = vpop.f32.mrb[0].mxu0 }
  0xf5   :  { %v131_v13 = vmul.f32 %v153_v10, %v117_v11  ;;  %v182_v14 = vpop.f32.mrb[1].mxu0 }
  0xf6   :  { %v120_v15 = vpop.f32.mrb[2].mxu0 }
  0xf7   :  { %v138_v16 = vadd.f32 %v154_v12, %v131_v13  ;;  %v183_v17 = vpop.f32.mrb[3].mxu0 }
  0xf9   :  { %v139_v18 = vpack.c.bf16 %v138_v16, %v138_v16 }
  0xfb   :  { %140 = vst [vmem:[%s261_s4] sm:$0xf] %v139_v18 }

// kernel: volo_forward.43
= control target key start
LH: loop header
LB: loop body
LE: loop exit
PB: predicated region body
PF: predicated region fallthrough
CT: control target
= control target key end

     0   :  { %vm26_vm0 = vcmask 523264   ;;  %v219_v16 = vmov 0   ;;  %v153_v27 = vlaneseq  ;;  %s300_s0 = inlined_call_operand.vmem [shape: bf16[8,64], index: 0, kind: input, shape index: {}]   ;;  %s301_s3 = inlined_call_operand.vmem [shape: bf16[64,256], index: 3, kind: input, shape index: {}]   ;;  %s302_s1 = inlined_call_operand.vmem [shape: f32[1,64], index: 1, kind: input, shape index: {}]   ;;  %s303_s2 = inlined_call_operand.vmem [shape: f32[1,64], index: 2, kind: input, shape index: {}]   ;;  %s304_s4 = inlined_call_operand.vmem [shape: f32[1,256], index: 4, kind: input, shape index: {}]   ;;  %s305_s5 = inlined_call_operand.vmem [shape: f32[1,256], index: 5, kind: input, shape index: {}]   ;;  %s306_s6 = inlined_call_operand.vmem [shape: bf16[8,256], index: 6, kind: output, shape index: {}]  }
   0x1   :  { %v24_v0 = vld [vmem:[%s300_s0] sm:$0xf]  ;;  %v205_v8 = vld [vmem:[%s301_s3 + $0x4] ss:$8 sps:$4 sm:$0xff]   ;;  %v208_v10 = vld [vmem:[%s301_s3 + $0x14] ss:$8 sps:$4 sm:$0xff]   ;;  %141 = vmatprep.mubr.bf16.mxu0 %v219_v16 }
   0x2   :  { %v25_v1 = vunpack.c.l.bf16 %v24_v0  ;;  %v207_v9 = vld [vmem:[%s301_s3] ss:$8 sps:$4 sm:$0xff]   ;;  %109 = vmatprep.subr.bf16.mxu0 %v205_v8  ;;  %v210_v11 = vld [vmem:[%s301_s3 + $0x10] ss:$8 sps:$4 sm:$0xff]   ;;  %v211_v12 = vld [vmem:[%s301_s3 + $0x24] ss:$8 sps:$4 sm:$0xff]  }
   0x3   :  { %110 = vmatpush1.bf16.msra.mxu0 %v207_v9  ;;  %v213_v13 = vld [vmem:[%s301_s3 + $0x20] ss:$8 sps:$4 sm:$0xff]   ;;  %v214_v14 = vld [vmem:[%s301_s3 + $0x34] ss:$8 sps:$4 sm:$0xff]   ;;  %v216_v15 = vld [vmem:[%s301_s3 + $0x30] ss:$8 sps:$4 sm:$0xff]  }
   0x4   :  { %v27_v2 = vsel %vm26_vm0, %v25_v1, 0.0  ;;  %111 = vmatprep.subr.bf16.mxu0 %v208_v10  ;;  %v191_v21 = vld [vmem:[%s302_s1] ss:$0 sm:$0xff]  ;;  %v154_v28 = vshrl.u32 %v153_v27, 7 }
   0x5   :  { %28 = vadd.xlane.f32.xlu0 %v27_v2  ;;  %v192_v23 = vld [vmem:[%s303_s2] ss:$0 sm:$0xff] }
   0x6   :  { %v155_v29 = vsub.s32 0, %v154_v28  ;;  %v150_v30 = vld [vmem:[%s304_s4] sm:$0x3]  ;;  %v159_v31 = vsub.s32 1, %v154_v28 }
   0x7   :  { %112 = vmatpush1.bf16.msra.mxu0 %v210_v11  ;;  %v151_v32 = vld [vmem:[%s305_s5] sm:$0x3] }
   0x8   :  { %113 = vmatprep.subr.bf16.mxu0 %v211_v12  ;;  %v156_v33 = vrot.slane %v150_v30, %v155_v29  ;;  %v160_v34 = vrot.slane %v150_v30, %v159_v31  ;;  %v169_v35 = vrot.slane %v151_v32, %v155_v29  ;;  %v173_v37 = vrot.slane %v151_v32, %v159_v31 }
   0xb   :  { %114 = vmatpush1.bf16.msra.mxu0 %v213_v13 }
   0xc   :  { %115 = vmatprep.subr.bf16.mxu0 %v214_v14 }
   0xf   :  { %116 = vmatpush1.bf16.msra.mxu0 %v216_v15 }
  0x92   :  { %v29_v3 = vpop.xlane.xlu0 %28 }
  0x93   :  { %v31_v4 = vmul.f32 0.015625, %v29_v3 }
  0x95   :  { %v32_v5 = vsub.f32 %v25_v1, %v31_v4 }
  0x97   :  { %v33_v6 = vmul.f32 %v32_v5, %v32_v5 }
  0x99   :  { %v34_v7 = vsel %vm26_vm0, %v33_v6, 0.0 }
  0x9a   :  { %35 = vadd.xlane.f32.xlu0 %v34_v7 }
 0x127   :  { %v36_v17 = vpop.xlane.xlu0 %35 }
 0x128   :  { %v37_v18 = vmul.f32 0.015625, %v36_v17 }
 0x12a   :  { %v38_v19 = vadd.f32 1e-06, %v37_v18 }
 0x12c   :  { %217 = vrsqrt.f32 %v38_v19 }
 0x136   :  { %v218_v20 = vpop.eup %217 }
 0x137   :  { %v40_v22 = vmul.f32 %v218_v20, %v32_v5 }
 0x139   :  { %v48_v24 = vmul.f32 %v191_v21, %v40_v22 }
 0x13b   :  { %v56_v25 = vadd.f32 %v192_v23, %v48_v24 }
 0x13d   :  { %v57_v26 = vpack.c.bf16 %v56_v25, %v56_v25 }
 0x13f   :  { %201 = vmatmul.mubr.msk.bf16.vlgmr.msra.gmra.mrb[0].mxu0 %vm26_vm0, %v57_v26 }
 0x212   :  { %v143_v36 = vpop.f32.mrb[0].mxu0 }
 0x213   :  { %v163_v38 = vmul.f32 %v156_v33, %v143_v36  ;;  %v145_v39 = vpop.f32.mrb[1].mxu0 }
 0x214   :  { %v164_v40 = vmul.f32 %v160_v34, %v145_v39  ;;  %v147_v41 = vpop.f32.mrb[2].mxu0 }
 0x215   :  { %v176_v42 = vadd.f32 %v169_v35, %v163_v38  ;;  %v148_v43 = vpop.f32.mrb[3].mxu0 }
 0x216   :  { %v177_v44 = vadd.f32 %v173_v37, %v164_v40 }
 0x218   :  { %v203_v45 = vpack.c.bf16 %v177_v44, %v176_v42 }
 0x21a   :  { %186 = vst [vmem:[%s306_s6] sm:$0xff] %v203_v45 }

// kernel: volo_forward.45
= control target key start
LH: loop header
LB: loop body
LE: loop exit
PB: predicated region body
PF: predicated region fallthrough
CT: control target
= control target key end

     0   :  { %v147_v0 = vmov 0.0   ;;  %vm148_vm0 = vmmov 0   ;;  %vm51_vm1 = vcmask 523264   ;;  %s198_s1 = inlined_call_operand.vmem [shape: bf16[64,128], index: 1, kind: input, shape index: {}]   ;;  %s199_s0 = inlined_call_operand.vmem [shape: bf16[8,64], index: 0, kind: input, shape index: {}]   ;;  %s200_s2 = inlined_call_operand.vmem [shape: f32[1,128], index: 2, kind: input, shape index: {}]   ;;  %s201_s3 = inlined_call_operand.vmem [shape: f32[1,128], index: 3, kind: input, shape index: {}]   ;;  %s202_s4 = inlined_call_operand.vmem [shape: bf16[8,128], index: 4, kind: output, shape index: {}]  }
   0x1   :  { %129 = vmatprep.subr.bf16.mxu0 %v147_v0  ;;  %v143_v1 = vld [vmem:[%s198_s1] sm:$0xff]   ;;  %137 = vmatprep.mubr.msk.bf16.mxu0 %vm148_vm0, %v147_v0  ;;  %v144_v2 = vld [vmem:[%s198_s1 + $0x8] sm:$0xff]   ;;  %v145_v3 = vld [vmem:[%s198_s1 + $0x10] sm:$0xff]  }
   0x2   :  { %130 = vmatpush3.bf16.msra.mxu0 %v143_v1  ;;  %v146_v4 = vld [vmem:[%s198_s1 + $0x18] sm:$0xff]   ;;  %v18_v5 = vld [vmem:[%s199_s0] sm:$0xf] }
   0x3   :  { %131 = vmatprep.subr.bf16.mxu0 %v147_v0  ;;  %v122_v6 = vld [vmem:[%s200_s2] ss:$0 sm:$0xff] }
   0x4   :  { %v123_v8 = vld [vmem:[%s201_s3] ss:$0 sm:$0xff] }
   0x6   :  { %132 = vmatpush3.bf16.msra.mxu0 %v144_v2 }
   0x7   :  { %133 = vmatprep.subr.bf16.mxu0 %v147_v0 }
   0xa   :  { %134 = vmatpush3.bf16.msra.mxu0 %v145_v3 }
   0xb   :  { %135 = vmatprep.subr.bf16.mxu0 %v147_v0 }
   0xe   :  { %136 = vmatpush3.bf16.msra.mxu0 %v146_v4 }
  0x11   :  { %138 = vmatmul.mubr.msk.bf16.vlgmr.msra.gmra.mrb[0].mxu0 %vm51_vm1, %v18_v5 }
  0xe4   :  { %v89_v7 = vpop.f32.mrb[0].mxu0 }
  0xe5   :  { %v103_v9 = vmul.f32 %v122_v6, %v89_v7  ;;  %v139_v10 = vpop.f32.mrb[1].mxu0 }
  0xe6   :  { %v92_v11 = vpop.f32.mrb[2].mxu0 }
  0xe7   :  { %v110_v12 = vadd.f32 %v123_v8, %v103_v9  ;;  %v140_v13 = vpop.f32.mrb[3].mxu0 }
  0xe9   :  { %v111_v14 = vpack.c.bf16 %v110_v12, %v110_v12 }
  0xeb   :  { %112 = vst [vmem:[%s202_s4] sm:$0xf] %v111_v14 }

// kernel: volo_forward.44
= control target key start
LH: loop header
LB: loop body
LE: loop exit
PB: predicated region body
PF: predicated region fallthrough
CT: control target
= control target key end

     0   :  { %vm222_vm0 = vcmask 1040384   ;;  %vm332_vm1 = vcmask 1041409   ;;  %vm335_vm2 = vcmask 1042434   ;;  %vm338_vm3 = vcmask 1043459   ;;  %s1093_s0 = inlined_call_operand.vmem [shape: bf16[4,16,128], index: 0, kind: input, shape index: {}]   ;;  %s1094_s1 = inlined_call_operand.vmem [shape: bf16[4,16,128], index: 1, kind: input, shape index: {}]   ;;  %s1095_s2 = inlined_call_operand.vmem [shape: bf16[4,16,128], index: 2, kind: input, shape index: {}]   ;;  %s1096_s3 = inlined_call_operand.vmem [shape: bf16[4,16,128], index: 3, kind: output, shape index: {}]  }
   0x1   :  { %v608_v0 = vld [vmem:[%s1093_s0] sm:$0xff]   ;;  %v678_v2 = vld [vmem:[%s1094_s1 + $0x8] sm:$0xff]   ;;  %v679_v6 = vld [vmem:[%s1094_s1 + $0x10] sm:$0xff]   ;;  %vm362_vm4 = vcmask 1043456  }
   0x2   :  { %v624_v1 = vld [vmem:[%s1094_s1] sm:$0xff]   ;;  %v609_v3 = vunpack.c.l.bf16 %v608_v0  ;;  %v610_v4 = vunpack.c.h.bf16 %v608_v0  ;;  %v675_v5 = vld [vmem:[%s1093_s0 + $0x8] sm:$0xff]   ;;  %v680_v7 = vld [vmem:[%s1094_s1 + $0x18] sm:$0xff]   ;;  %v772_v11 = vunpack.c.l.bf16 %v678_v2  ;;  %v774_v12 = vunpack.c.h.bf16 %v678_v2 }
   0x3   :  { %v676_v8 = vld [vmem:[%s1093_s0 + $0x10] sm:$0xff]   ;;  %v768_v9 = vunpack.c.l.bf16 %v624_v1  ;;  %v770_v10 = vunpack.c.h.bf16 %v624_v1  ;;  %v776_v13 = vunpack.c.l.bf16 %v679_v6  ;;  %v778_v14 = vunpack.c.h.bf16 %v679_v6  ;;  %v677_v1 = vld [vmem:[%s1093_s0 + $0x18] sm:$0xff]  }
   0x4   :  { %v780_v15 = vunpack.c.l.bf16 %v680_v7  ;;  %v782_v16 = vunpack.c.h.bf16 %v680_v7  ;;  %v613_v17 = vunpack.c.l.bf16 %v675_v5  ;;  %v614_v18 = vunpack.c.h.bf16 %v675_v5 }
   0x5   :  { %v784_v19 = vunpack.c.l.bf16 %v676_v8  ;;  %v786_v20 = vunpack.c.h.bf16 %v676_v8  ;;  %v62_v21 = vmul.f32 %v768_v9, %v609_v3  ;;  %v63_v22 = vmul.f32 %v770_v10, %v610_v4 }
   0x6   :  { %v64_v23 = vmul.f32 %v772_v11, %v609_v3  ;;  %v65_v24 = vmul.f32 %v774_v12, %v610_v4  ;;  %v66_v25 = vmul.f32 %v776_v13, %v609_v3  ;;  %v67_v26 = vmul.f32 %v778_v14, %v610_v4 }
   0x7   :  { %v68_v27 = vmul.f32 %v780_v15, %v609_v3  ;;  %v69_v28 = vmul.f32 %v782_v16, %v610_v4  ;;  %v70_v29 = vadd.f32 %v63_v22, %v62_v21  ;;  %v98_v31 = vmul.f32 %v768_v9, %v613_v17 }
   0x8   :  { %v77_v30 = vadd.f32 %v65_v24, %v64_v23  ;;  %v99_v32 = vmul.f32 %v770_v10, %v614_v18  ;;  %v84_v33 = vadd.f32 %v67_v26, %v66_v25  ;;  %v100_v35 = vmul.f32 %v772_v11, %v613_v17 }
   0x9   :  { %v91_v34 = vadd.f32 %v69_v28, %v68_v27  ;;  %v101_v36 = vmul.f32 %v774_v12, %v614_v18  ;;  %v71_v37 = vrot.slane %v70_v29, 4  ;;  %v102_v39 = vmul.f32 %v776_v13, %v613_v17 }
   0xa   :  { %v78_v38 = vrot.slane %v77_v30, 4  ;;  %v103_v40 = vmul.f32 %v778_v14, %v614_v18  ;;  %v85_v41 = vrot.slane %v84_v33, 4  ;;  %v104_v43 = vmul.f32 %v780_v15, %v613_v17 }
   0xb   :  { %v92_v42 = vrot.slane %v91_v34, 4  ;;  %v105_v44 = vmul.f32 %v782_v16, %v614_v18  ;;  %v72_v45 = vadd.f32 %v71_v37, %v70_v29  ;;  %v106_v47 = vadd.f32 %v99_v32, %v98_v31 }
   0xc   :  { %v79_v46 = vadd.f32 %v78_v38, %v77_v30  ;;  %v113_v48 = vadd.f32 %v101_v36, %v100_v35  ;;  %v86_v49 = vadd.f32 %v85_v41, %v84_v33  ;;  %v120_v51 = vadd.f32 %v103_v40, %v102_v39 }
   0xd   :  { %v93_v50 = vadd.f32 %v92_v42, %v91_v34  ;;  %v127_v52 = vadd.f32 %v105_v44, %v104_v43  ;;  %v73_v53 = vrot.slane %v72_v45, 2  ;;  %v107_v55 = vrot.slane %v106_v47, 4 }
   0xe   :  { %v80_v54 = vrot.slane %v79_v46, 2  ;;  %v114_v56 = vrot.slane %v113_v48, 4  ;;  %v87_v57 = vrot.slane %v86_v49, 2  ;;  %v121_v59 = vrot.slane %v120_v51, 4 }
   0xf   :  { %v94_v58 = vrot.slane %v93_v50, 2  ;;  %v128_v60 = vrot.slane %v127_v52, 4  ;;  %v74_v61 = vadd.f32 %v73_v53, %v72_v45  ;;  %v108_v63 = vadd.f32 %v107_v55, %v106_v47 }
  0x10   :  { %v81_v62 = vadd.f32 %v80_v54, %v79_v46  ;;  %v115_v0 = vadd.f32 %v114_v56, %v113_v48  ;;  %v88_v2 = vadd.f32 %v87_v57, %v86_v49  ;;  %v122_v4 = vadd.f32 %v121_v59, %v120_v51 }
  0x11   :  { %v95_v3 = vadd.f32 %v94_v58, %v93_v50  ;;  %v129_v5 = vadd.f32 %v128_v60, %v127_v52  ;;  %v75_v6 = vrot.slane %v74_v61, 1  ;;  %v109_v8 = vrot.slane %v108_v63, 2 }
  0x12   :  { %v82_v7 = vrot.slane %v81_v62, 1  ;;  %v116_v17 = vrot.slane %v115_v0, 2  ;;  %v89_v18 = vrot.slane %v88_v2, 1  ;;  %v123_v22 = vrot.slane %v122_v4, 2 }
  0x13   :  { %v96_v21 = vrot.slane %v95_v3, 1  ;;  %v130_v23 = vrot.slane %v129_v5, 2  ;;  %v621_v24 = vunpack.c.l.bf16 %v677_v1  ;;  %v110_v25 = vadd.f32 %v109_v8, %v108_v63 }
  0x14   :  { %v807_v26 = vadd.f32 %v116_v17, %v115_v0  ;;  %v251_v27 = vlaneseq  ;;  %v622_v28 = vunpack.c.h.bf16 %v677_v1  ;;  %v809_v29 = vadd.f32 %v75_v6, %v74_v61 }
  0x15   :  { %v811_v30 = vadd.f32 %v123_v22, %v122_v4  ;;  %v813_v31 = vadd.f32 %v130_v23, %v129_v5  ;;  %v815_v32 = vadd.f32 %v82_v7, %v81_v62  ;;  %v111_v33 = vrot.slane %v110_v25, 1 }
  0x16   :  { %v134_v34 = vmul.f32 %v768_v9, %v784_v19  ;;  %v135_v35 = vmul.f32 %v770_v10, %v786_v20  ;;  %v821_v36 = vadd.f32 %v89_v18, %v88_v2  ;;  %v823_v37 = vadd.f32 %v96_v21, %v95_v3 }
  0x17   :  { %v136_v38 = vmul.f32 %v772_v11, %v784_v19  ;;  %v137_v39 = vmul.f32 %v774_v12, %v786_v20  ;;  %v118_v40 = vrot.slane %v807_v26, 1  ;;  %v125_v41 = vrot.slane %v811_v30, 1 }
  0x18   :  { %v138_v42 = vmul.f32 %v776_v13, %v784_v19  ;;  %v139_v43 = vmul.f32 %v778_v14, %v786_v20  ;;  %v835_v44 = vadd.f32 %v111_v33, %v110_v25  ;;  %v132_v45 = vrot.slane %v813_v31, 1 }
  0x19   :  { %v140_v46 = vmul.f32 %v780_v15, %v784_v19  ;;  %v141_v47 = vmul.f32 %v782_v16, %v786_v20  ;;  %v142_v48 = vadd.f32 %v135_v35, %v134_v34  ;;  %v149_v49 = vadd.f32 %v137_v39, %v136_v38 }
  0x1a   :  { %v156_v50 = vadd.f32 %v139_v43, %v138_v42  ;;  %v170_v51 = vmul.f32 %v768_v9, %v621_v24  ;;  %v171_v53 = vmul.f32 %v770_v10, %v622_v28  ;;  %v172_v54 = vmul.f32 %v772_v11, %v621_v24 }
  0x1b   :  { %v163_v52 = vadd.f32 %v141_v47, %v140_v46  ;;  %v173_v55 = vmul.f32 %v774_v12, %v622_v28  ;;  %v143_v56 = vrot.slane %v142_v48, 4  ;;  %v150_v57 = vrot.slane %v149_v49, 4 }
  0x1c   :  { %v157_v58 = vrot.slane %v156_v50, 4  ;;  %v174_v19 = vmul.f32 %v776_v13, %v621_v24  ;;  %v175_v20 = vmul.f32 %v778_v14, %v622_v28  ;;  %v176_v60 = vmul.f32 %v780_v15, %v621_v24 }
  0x1d   :  { %v164_v59 = vrot.slane %v163_v52, 4  ;;  %v177_v61 = vmul.f32 %v782_v16, %v622_v28  ;;  %v144_v9 = vadd.f32 %v143_v56, %v142_v48  ;;  %v151_v62 = vadd.f32 %v150_v57, %v149_v49 }
  0x1e   :  { %v158_v63 = vadd.f32 %v157_v58, %v156_v50  ;;  %v178_v10 = vadd.f32 %v171_v53, %v170_v51  ;;  %v185_v11 = vadd.f32 %v173_v55, %v172_v54  ;;  %v192_v1 = vadd.f32 %v175_v20, %v174_v19 }
  0x1f   :  { %v165_v0 = vadd.f32 %v164_v59, %v163_v52  ;;  %v199_v12 = vadd.f32 %v177_v61, %v176_v60  ;;  %v145_v2 = vrot.slane %v144_v9, 2  ;;  %v152_v3 = vrot.slane %v151_v62, 2 }
  0x20   :  { %v159_v4 = vrot.slane %v158_v63, 2  ;;  %v179_v5 = vrot.slane %v178_v10, 4  ;;  %v186_v6 = vrot.slane %v185_v11, 4  ;;  %v193_v7 = vrot.slane %v192_v1, 4 }
  0x21   :  { %v166_v13 = vrot.slane %v165_v0, 2  ;;  %v200_v14 = vrot.slane %v199_v12, 4  ;;  %v146_v8 = vadd.f32 %v145_v2, %v144_v9  ;;  %v153_v15 = vadd.f32 %v152_v3, %v151_v62 }
  0x22   :  { %v160_v17 = vadd.f32 %v159_v4, %v158_v63  ;;  %v180_v16 = vadd.f32 %v179_v5, %v178_v10  ;;  %v187_v21 = vadd.f32 %v186_v6, %v185_v11  ;;  %v194_v22 = vadd.f32 %v193_v7, %v192_v1 }
  0x23   :  { %v167_v18 = vadd.f32 %v166_v13, %v165_v0  ;;  %v201_v23 = vadd.f32 %v200_v14, %v199_v12  ;;  %v147_v24 = vrot.slane %v146_v8, 1  ;;  %v154_v25 = vrot.slane %v153_v15, 1 }
  0x24   :  { %v161_v28 = vrot.slane %v160_v17, 1  ;;  %v181_v33 = vrot.slane %v180_v16, 2  ;;  %v188_v35 = vrot.slane %v187_v21, 2  ;;  %v195_v38 = vrot.slane %v194_v22, 2 }
  0x25   :  { %v168_v34 = vrot.slane %v167_v18, 1  ;;  %v202_v39 = vrot.slane %v201_v23, 2  ;;  %v119_v42 = vadd.f32 %v118_v40, %v807_v26  ;;  %v126_v43 = vadd.f32 %v125_v41, %v811_v30 }
  0x26   :  { %v133_v46 = vadd.f32 %v132_v45, %v813_v31  ;;  %v182_v47 = vadd.f32 %v181_v33, %v180_v16  ;;  %v148_v48 = vadd.f32 %v147_v24, %v146_v8  ;;  %v189_v49 = vadd.f32 %v188_v35, %v187_v21 }
  0x27   :  { %v196_v50 = vadd.f32 %v195_v38, %v194_v22  ;;  %v203_v51 = vadd.f32 %v202_v39, %v201_v23  ;;  %v155_v52 = vadd.f32 %v154_v25, %v153_v15  ;;  %v162_v53 = vadd.f32 %v161_v28, %v160_v17 }
  0x28   :  { %v169_v54 = vadd.f32 %v168_v34, %v167_v18  ;;  %v183_v55 = vrot.slane %v182_v47, 1  ;;  %v190_v56 = vrot.slane %v189_v49, 1  ;;  %v206_v19 = vmul.f32 0.25, %v809_v29 }
  0x29   :  { %v197_v57 = vrot.slane %v196_v50, 1  ;;  %v204_v58 = vrot.slane %v203_v51, 1  ;;  %v207_v26 = vmul.f32 0.25, %v815_v32  ;;  %v208_v30 = vmul.f32 0.25, %v821_v36 }
  0x2a   :  { %v184_v59 = vadd.f32 %v183_v55, %v182_v47  ;;  %v209_v31 = vmul.f32 0.25, %v823_v37  ;;  %v191_v40 = vadd.f32 %v190_v56, %v189_v49  ;;  %v210_v41 = vmul.f32 0.25, %v835_v44 }
  0x2b   :  { %v858_v45 = vmul.f32 0.25, %v119_v42  ;;  %v860_v20 = vmul.f32 0.25, %v126_v43  ;;  %v198_v60 = vadd.f32 %v197_v57, %v196_v50  ;;  %v205_v61 = vadd.f32 %v204_v58, %v203_v51 }
  0x2c   :  { %v862_v9 = vmul.f32 0.25, %v148_v48  ;;  %v864_v62 = vmul.f32 0.25, %v155_v52  ;;  %v866_v29 = vmul.f32 0.25, %v133_v46  ;;  %v868_v32 = vmul.f32 0.25, %v162_v53 }
  0x2d   :  { %v870_v36 = vmul.f32 0.25, %v169_v54  ;;  %v872_v37 = vmul.f32 0.25, %v184_v59  ;;  %v874_v63 = vmul.f32 0.25, %v191_v40  ;;  %v223_v44 = vsel %vm222_vm0, %v206_v19, -inf }
  0x2e   :  { %v224_v10 = vsel %vm222_vm0, %v207_v26, -inf  ;;  %v226_v0 = vsel %vm222_vm0, %v208_v30, -inf  ;;  %v230_v1 = vsel %vm222_vm0, %v210_v41, -inf  ;;  %v231_v12 = vsel %vm222_vm0, %v858_v45, -inf }
  0x2f   :  { %v225_v11 = vmax.f32 %v223_v44, %v224_v10  ;;  %v233_v2 = vsel %vm222_vm0, %v860_v20, -inf  ;;  %v884_v3 = vmul.f32 0.25, %v198_v60  ;;  %v232_v4 = vmax.f32 %v230_v1, %v231_v12 }
  0x30   :  { %v237_v5 = vsel %vm222_vm0, %v862_v9, -inf  ;;  %v238_v13 = vsel %vm222_vm0, %v864_v62, -inf  ;;  %v228_v7 = vsel %vm222_vm0, %v209_v31, -inf  ;;  %v235_v14 = vsel %vm222_vm0, %v866_v29, -inf }
  0x31   :  { %v227_v6 = vmax.f32 %v225_v11, %v226_v0  ;;  %v239_v8 = vmax.f32 %v237_v5, %v238_v13  ;;  %v234_v15 = vmax.f32 %v232_v4, %v233_v2  ;;  %v240_v17 = vsel %vm222_vm0, %v868_v32, -inf }
  0x32   :  { %v244_v16 = vsel %vm222_vm0, %v872_v37, -inf  ;;  %v245_v18 = vsel %vm222_vm0, %v874_v63, -inf  ;;  %v252_v22 = vshrl.u32 %v251_v27, 7  ;;  %v221_v28 = vmul.f32 0.25, %v205_v61 }
  0x33   :  { %v229_v21 = vmax.f32 %v227_v6, %v228_v7  ;;  %v236_v23 = vmax.f32 %v234_v15, %v235_v14  ;;  %v241_v24 = vmax.f32 %v239_v8, %v240_v17  ;;  %v246_v25 = vmax.f32 %v244_v16, %v245_v18 }
  0x34   :  { %v242_v33 = vsel %vm222_vm0, %v870_v36, -inf  ;;  %v247_v34 = vsel %vm222_vm0, %v884_v3, -inf  ;;  %v904_v35 = vsub.s32 0, %v252_v22  ;;  %v249_v27 = vsel %vm222_vm0, %v221_v28, -inf }
  0x35   :  { %v243_v39 = vmax.f32 %v241_v24, %v242_v33  ;;  %v248_v42 = vmax.f32 %v246_v25, %v247_v34 }
  0x36   :  { %v254_v38 = vrot.slane %v229_v21, %v904_v35  ;;  %v258_v43 = vrot.slane %v236_v23, %v904_v35 }
  0x37   :  { %v250_v51 = vmax.f32 %v248_v42, %v249_v27  ;;  %v262_v52 = vrot.slane %v243_v39, %v904_v35 }
  0x38   :  { %v267_v46 = vsub.f32 %v206_v19, %v254_v38  ;;  %v268_v47 = vsub.f32 %v207_v26, %v254_v38  ;;  %v269_v48 = vsub.f32 %v208_v30, %v254_v38  ;;  %v270_v49 = vsub.f32 %v209_v31, %v254_v38 }
  0x39   :  { %v271_v50 = vsub.f32 %v210_v41, %v258_v43  ;;  %v272_v53 = vsub.f32 %v858_v45, %v258_v43  ;;  %v273_v54 = vsub.f32 %v860_v20, %v258_v43  ;;  %v274_v58 = vsub.f32 %v866_v29, %v258_v43 }
  0x3a   :  { %v283_v55 = vmul.f32 1.442695, %v267_v46  ;;  %v285_v56 = vmul.f32 1.442695, %v268_v47  ;;  %v287_v57 = vmul.f32 1.442695, %v269_v48  ;;  %v275_v40 = vsub.f32 %v862_v9, %v262_v52 }
  0x3b   :  { %v289_v59 = vmul.f32 1.442695, %v270_v49  ;;  %v291_v19 = vmul.f32 1.442695, %v271_v50  ;;  %v266_v26 = vrot.slane %v250_v51, %v904_v35  ;;  %v276_v30 = vsub.f32 %v864_v62, %v262_v52 }
  0x3c   :  { %687 = vpow2.f32 %v283_v55  ;;  %v293_v31 = vmul.f32 1.442695, %v272_v53  ;;  %v277_v41 = vsub.f32 %v868_v32, %v262_v52  ;;  %v295_v45 = vmul.f32 1.442695, %v273_v54 }
  0x3d   :  { %689 = vpow2.f32 %v285_v56  ;;  %v278_v20 = vsub.f32 %v870_v36, %v262_v52  ;;  %v297_v60 = vmul.f32 1.442695, %v274_v58  ;;  %v279_v61 = vsub.f32 %v872_v37, %v266_v26 }
  0x3e   :  { %691 = vpow2.f32 %v287_v57  ;;  %v299_v9 = vmul.f32 1.442695, %v275_v40  ;;  %v280_v29 = vsub.f32 %v874_v63, %v266_v26  ;;  %v301_v44 = vmul.f32 1.442695, %v276_v30 }
  0x3f   :  { %693 = vpow2.f32 %v289_v59  ;;  %v281_v62 = vsub.f32 %v884_v3, %v266_v26  ;;  %v303_v10 = vmul.f32 1.442695, %v277_v41  ;;  %v282_v0 = vsub.f32 %v221_v28, %v266_v26 }
  0x40   :  { %695 = vpow2.f32 %v291_v19  ;;  %v305_v32 = vmul.f32 1.442695, %v278_v20  ;;  %v307_v11 = vmul.f32 1.442695, %v279_v61  ;;  %v309_v36 = vmul.f32 1.442695, %v280_v29 }
  0x41   :  { %697 = vpow2.f32 %v293_v31  ;;  %v311_v37 = vmul.f32 1.442695, %v281_v62  ;;  %v313_v63 = vmul.f32 1.442695, %v282_v0 }
  0x42   :  { %699 = vpow2.f32 %v295_v45 }
  0x43   :  { %701 = vpow2.f32 %v297_v60 }
  0x44   :  { %703 = vpow2.f32 %v299_v9 }
  0x45   :  { %705 = vpow2.f32 %v301_v44 }
  0x46   :  { %v921_v1 = vpop.eup %687  ;;  %707 = vpow2.f32 %v303_v10 }
  0x47   :  { %v923_v12 = vpop.eup %689  ;;  %709 = vpow2.f32 %v305_v32 }
  0x48   :  { %v925_v2 = vpop.eup %691  ;;  %711 = vpow2.f32 %v307_v11  ;;  %v331_v3 = vrot.slane %v923_v12, 7 }
  0x49   :  { %v928_v4 = vpop.eup %693  ;;  %713 = vpow2.f32 %v309_v36  ;;  %v334_v5 = vrot.slane %v925_v2, 6 }
  0x4a   :  { %v931_v13 = vpop.eup %695  ;;  %715 = vpow2.f32 %v311_v37  ;;  %v333_v6 = vsel %vm332_vm1, %v331_v3, %v921_v1  ;;  %v337_v7 = vrot.slane %v928_v4, 5 }
  0x4b   :  { %v936_v14 = vpop.eup %697  ;;  %717 = vpow2.f32 %v313_v63  ;;  %v336_v8 = vsel %vm335_vm2, %v334_v5, %v333_v6 }
  0x4c   :  { %v939_v15 = vpop.eup %699  ;;  %v339_v17 = vsel %vm338_vm3, %v337_v7, %v336_v8  ;;  %v340_v16 = vrot.slane %v936_v14, 7  ;;  %v640_v8 = vld [vmem:[%s1095_s2] sm:$0xff]  }
  0x4d   :  { %v943_v18 = vpop.eup %701  ;;  %v342_v21 = vrot.slane %v939_v15, 6  ;;  %v363_v22 = vsel %vm362_vm4, %v339_v17, 0.0  ;;  %v681_v17 = vld [vmem:[%s1095_s2 + $0x8] sm:$0xff]  }
  0x4e   :  { %v947_v23 = vpop.eup %703  ;;  %v341_v24 = vsel %vm332_vm1, %v340_v16, %v931_v13  ;;  %v344_v25 = vrot.slane %v943_v18, 5  ;;  %v364_v28 = vrot.slane %v363_v22, 4 }
  0x4f   :  { %v952_v33 = vpop.eup %705  ;;  %v343_v34 = vsel %vm335_vm2, %v342_v21, %v341_v24  ;;  %v683_v24 = vld [vmem:[%s1095_s2 + $0x18] sm:$0xff]  }
  0x50   :  { %v955_v38 = vpop.eup %707  ;;  %v345_v39 = vsel %vm338_vm3, %v344_v25, %v343_v34  ;;  %v346_v42 = vrot.slane %v952_v33, 7  ;;  %v365_v43 = vadd.f32 %v364_v28, %v363_v22  ;;  %v682_v22 = vld [vmem:[%s1095_s2 + $0x10] sm:$0xff]   ;;  %v998_v28 = vunpack.c.l.bf16 %v640_v8 }
  0x51   :  { %v959_v27 = vpop.eup %709  ;;  %v348_v46 = vrot.slane %v955_v38, 6  ;;  %v370_v47 = vsel %vm362_vm4, %v345_v39, 0.0  ;;  %v1000_v34 = vunpack.c.h.bf16 %v640_v8  ;;  %v1002_v39 = vunpack.c.l.bf16 %v681_v17 }
  0x52   :  { %v963_v48 = vpop.eup %711  ;;  %v347_v49 = vsel %vm332_vm1, %v346_v42, %v947_v23  ;;  %v350_v50 = vrot.slane %v959_v27, 5  ;;  %v366_v51 = vrot.slane %v365_v43, 2  ;;  %v371_v52 = vrot.slane %v370_v47, 4 }
  0x53   :  { %v968_v53 = vpop.eup %713  ;;  %v349_v54 = vsel %vm335_vm2, %v348_v46, %v347_v49 }
  0x54   :  { %v971_v55 = vpop.eup %715  ;;  %v351_v56 = vsel %vm338_vm3, %v350_v50, %v349_v54  ;;  %v352_v57 = vrot.slane %v968_v53, 7  ;;  %v367_v58 = vadd.f32 %v366_v51, %v365_v43  ;;  %v372_v59 = vadd.f32 %v371_v52, %v370_v47 }
  0x55   :  { %v975_v40 = vpop.eup %717  ;;  %v354_v19 = vrot.slane %v971_v55, 6  ;;  %v377_v26 = vsel %vm362_vm4, %v351_v56, 0.0  ;;  %v1008_v50 = vunpack.c.h.bf16 %v681_v17  ;;  %v1010_v51 = vunpack.c.l.bf16 %v682_v22 }
  0x56   :  { %v353_v30 = vsel %vm332_vm1, %v352_v57, %v963_v48  ;;  %v356_v31 = vrot.slane %v975_v40, 5  ;;  %v368_v41 = vrot.slane %v367_v58, 1  ;;  %v373_v45 = vrot.slane %v372_v59, 2 }
  0x57   :  { %v355_v20 = vsel %vm335_vm2, %v354_v19, %v353_v30  ;;  %v378_v60 = vrot.slane %v377_v26, 4  ;;  %v1012_v52 = vunpack.c.h.bf16 %v682_v22  ;;  %v1014_v54 = vunpack.c.l.bf16 %v683_v24 }
  0x58   :  { %v357_v61 = vsel %vm338_vm3, %v356_v31, %v355_v20  ;;  %v369_v9 = vadd.f32 %v368_v41, %v367_v58  ;;  %v374_v29 = vadd.f32 %v373_v45, %v372_v59 }
  0x59   :  { %v379_v44 = vadd.f32 %v378_v60, %v377_v26  ;;  %v384_v62 = vsel %vm362_vm4, %v357_v61, 0.0 }
  0x5a   :  { %v375_v10 = vrot.slane %v374_v29, 1  ;;  %v385_v0 = vrot.slane %v384_v62, 4  ;;  %719 = vrcp.f32 %v369_v9 }
  0x5b   :  { %v380_v32 = vrot.slane %v379_v44, 2 }
  0x5c   :  { %v376_v11 = vadd.f32 %v375_v10, %v374_v29  ;;  %v386_v36 = vadd.f32 %v385_v0, %v384_v62 }
  0x5d   :  { %v381_v37 = vadd.f32 %v380_v32, %v379_v44 }
  0x5e   :  { %v387_v63 = vrot.slane %v386_v36, 2  ;;  %721 = vrcp.f32 %v376_v11 }
  0x5f   :  { %v382_v3 = vrot.slane %v381_v37, 1 }
  0x60   :  { %v388_v5 = vadd.f32 %v387_v63, %v386_v36 }
  0x61   :  { %v383_v6 = vadd.f32 %v382_v3, %v381_v37 }
  0x62   :  { %v389_v7 = vrot.slane %v388_v5, 1 }
  0x63   :  { %723 = vrcp.f32 %v383_v6 }
  0x64   :  { %v720_v16 = vpop.eup %719  ;;  %v390_v21 = vadd.f32 %v389_v7, %v388_v5 }
  0x65   :  { %v398_v25 = vrot.slane %v720_v16, %v904_v35 }
  0x66   :  { %725 = vrcp.f32 %v390_v21 }
  0x67   :  { %v411_v42 = vmul.f32 %v921_v1, %v398_v25  ;;  %v412_v43 = vmul.f32 %v923_v12, %v398_v25  ;;  %v413_v46 = vmul.f32 %v925_v2, %v398_v25  ;;  %v414_v47 = vmul.f32 %v928_v4, %v398_v25 }
  0x68   :  { %v722_v49 = vpop.eup %721  ;;  %v1020_v2 = vunpack.c.h.bf16 %v683_v24 }
  0x69   :  { %v402_v56 = vrot.slane %v722_v49, %v904_v35  ;;  %v430_v57 = vrot.slane %v411_v42, %v904_v35  ;;  %v436_v1 = vrot.slane %v412_v43, %v904_v35  ;;  %v444_v12 = vrot.slane %v413_v46, %v904_v35 }
  0x6a   :  { %v452_v4 = vrot.slane %v414_v47, %v904_v35 }
  0x6b   :  { %v415_v58 = vmul.f32 %v931_v13, %v402_v56  ;;  %v416_v59 = vmul.f32 %v936_v14, %v402_v56  ;;  %v417_v19 = vmul.f32 %v939_v15, %v402_v56  ;;  %v418_v26 = vmul.f32 %v943_v18, %v402_v56 }
  0x6c   :  { %v431_v30 = vmul.f32 %v998_v28, %v430_v57  ;;  %v432_v31 = vmul.f32 %v1000_v34, %v430_v57  ;;  %v437_v41 = vmul.f32 %v1002_v39, %v436_v1  ;;  %v438_v45 = vmul.f32 %v1008_v50, %v436_v1 }
  0x6d   :  { %v724_v20 = vpop.eup %723  ;;  %v445_v60 = vmul.f32 %v1010_v51, %v444_v12  ;;  %v446_v61 = vmul.f32 %v1012_v52, %v444_v12  ;;  %v453_v13 = vmul.f32 %v1014_v54, %v452_v4  ;;  %v460_v18 = vrot.slane %v415_v58, %v904_v35 }
  0x6e   :  { %v406_v14 = vrot.slane %v724_v20, %v904_v35  ;;  %v439_v15 = vadd.f32 %v437_v41, %v431_v30  ;;  %v440_v9 = vadd.f32 %v438_v45, %v432_v31  ;;  %v454_v29 = vmul.f32 %v1020_v2, %v452_v4 }
  0x6f   :  { %v466_v44 = vrot.slane %v416_v59, %v904_v35  ;;  %v474_v62 = vrot.slane %v417_v19, %v904_v35  ;;  %v482_v10 = vrot.slane %v418_v26, %v904_v35  ;;  %v461_v6 = vmul.f32 %v998_v28, %v460_v18 }
  0x70   :  { %v726_v0 = vpop.eup %725  ;;  %v419_v32 = vmul.f32 %v947_v23, %v406_v14  ;;  %v420_v11 = vmul.f32 %v952_v33, %v406_v14  ;;  %v421_v36 = vmul.f32 %v955_v38, %v406_v14  ;;  %v422_v37 = vmul.f32 %v959_v27, %v406_v14 }
  0x71   :  { %v410_v63 = vrot.slane %v726_v0, %v904_v35  ;;  %v447_v3 = vadd.f32 %v445_v60, %v439_v15  ;;  %v448_v5 = vadd.f32 %v446_v61, %v440_v9  ;;  %v462_v7 = vmul.f32 %v1000_v34, %v460_v18 }
  0x72   :  { %v467_v8 = vmul.f32 %v1002_v39, %v466_v44  ;;  %v468_v17 = vmul.f32 %v1008_v50, %v466_v44  ;;  %v475_v23 = vmul.f32 %v1010_v51, %v474_v62  ;;  %v476_v42 = vmul.f32 %v1012_v52, %v474_v62 }
  0x73   :  { %v423_v33 = vmul.f32 %v963_v48, %v410_v63  ;;  %v424_v38 = vmul.f32 %v968_v53, %v410_v63  ;;  %v425_v27 = vmul.f32 %v971_v55, %v410_v63  ;;  %v426_v16 = vmul.f32 %v975_v40, %v410_v63 }
  0x74   :  { %v455_v21 = vadd.f32 %v453_v13, %v447_v3  ;;  %v456_v22 = vadd.f32 %v454_v29, %v448_v5  ;;  %v469_v24 = vadd.f32 %v467_v8, %v461_v6  ;;  %v470_v25 = vadd.f32 %v468_v17, %v462_v7 }
  0x75   :  { %v483_v43 = vmul.f32 %v1014_v54, %v482_v10  ;;  %v484_v46 = vmul.f32 %v1020_v2, %v482_v10  ;;  %v490_v47 = vrot.slane %v419_v32, %v904_v35  ;;  %v496_v48 = vrot.slane %v420_v11, %v904_v35 }
  0x76   :  { %v477_v49 = vadd.f32 %v475_v23, %v469_v24  ;;  %v504_v53 = vrot.slane %v421_v36, %v904_v35  ;;  %v512_v55 = vrot.slane %v422_v37, %v904_v35  ;;  %v478_v40 = vadd.f32 %v476_v42, %v470_v25 }
  0x77   :  { %v491_v56 = vmul.f32 %v998_v28, %v490_v47  ;;  %v492_v57 = vmul.f32 %v1000_v34, %v490_v47  ;;  %v520_v1 = vrot.slane %v423_v33, %v904_v35  ;;  %v497_v4 = vmul.f32 %v1002_v39, %v496_v48 }
  0x78   :  { %v485_v12 = vadd.f32 %v483_v43, %v477_v49  ;;  %v498_v58 = vmul.f32 %v1008_v50, %v496_v48  ;;  %v505_v59 = vmul.f32 %v1010_v51, %v504_v53  ;;  %v486_v19 = vadd.f32 %v484_v46, %v478_v40 }
  0x79   :  { %v506_v26 = vmul.f32 %v1012_v52, %v504_v53  ;;  %v513_v30 = vmul.f32 %v1014_v54, %v512_v55  ;;  %v514_v31 = vmul.f32 %v1020_v2, %v512_v55  ;;  %v499_v41 = vadd.f32 %v497_v4, %v491_v56 }
  0x7a   :  { %v500_v45 = vadd.f32 %v498_v58, %v492_v57  ;;  %v521_v20 = vmul.f32 %v998_v28, %v520_v1  ;;  %v522_v60 = vmul.f32 %v1000_v34, %v520_v1  ;;  %v526_v61 = vrot.slane %v424_v38, %v904_v35 }
  0x7b   :  { %v534_v13 = vrot.slane %v425_v27, %v904_v35  ;;  %v542_v14 = vrot.slane %v426_v16, %v904_v35  ;;  %v658_v15 = vpack.c.bf16 %v456_v22, %v455_v21  ;;  %v507_v9 = vadd.f32 %v505_v59, %v499_v41 }
  0x7c   :  { %v508_v18 = vadd.f32 %v506_v26, %v500_v45  ;;  %v663_v29 = vpack.c.bf16 %v486_v19, %v485_v12  ;;  %v527_v44 = vmul.f32 %v1002_v39, %v526_v61  ;;  %v528_v62 = vmul.f32 %v1008_v50, %v526_v61 }
  0x7d   :  { %v535_v10 = vmul.f32 %v1010_v51, %v534_v13  ;;  %v536_v28 = vmul.f32 %v1012_v52, %v534_v13  ;;  %659 = vst [vmem:[%s1096_s3] sm:$0xff] %v658_v15   ;;  %v515_v34 = vadd.f32 %v513_v30, %v507_v9  ;;  %v543_v39 = vmul.f32 %v1014_v54, %v542_v14 }
  0x7e   :  { %v516_v0 = vadd.f32 %v514_v31, %v508_v18  ;;  %684 = vst [vmem:[%s1096_s3 + $0x8] sm:$0xff] %v663_v29   ;;  %v529_v35 = vadd.f32 %v527_v44, %v521_v20  ;;  %v530_v32 = vadd.f32 %v528_v62, %v522_v60  ;;  %v544_v50 = vmul.f32 %v1020_v2, %v542_v14 }
  0x80   :  { %v668_v11 = vpack.c.bf16 %v516_v0, %v515_v34  ;;  %v537_v51 = vadd.f32 %v535_v10, %v529_v35  ;;  %v538_v36 = vadd.f32 %v536_v28, %v530_v32 }
  0x82   :  { %685 = vst [vmem:[%s1096_s3 + $0x10] sm:$0xff] %v668_v11   ;;  %v545_v52 = vadd.f32 %v543_v39, %v537_v51  ;;  %v546_v37 = vadd.f32 %v544_v50, %v538_v36 }
  0x84   :  { %v673_v63 = vpack.c.bf16 %v546_v37, %v545_v52 }
  0x86   :  { %686 = vst [vmem:[%s1096_s3 + $0x18] sm:$0xff] %v673_v63  }

// kernel: volo_forward.46
= control target key start
LH: loop header
LB: loop body
LE: loop exit
PB: predicated region body
PF: predicated region fallthrough
CT: control target
= control target key end

     0   :  { %vm26_vm0 = vcmask 523264   ;;  %v196_v9 = vmov 0.0   ;;  %vm197_vm1 = vmmov 0   ;;  %s266_s0 = inlined_call_operand.vmem [shape: bf16[8,64], index: 0, kind: input, shape index: {}]   ;;  %s267_s3 = inlined_call_operand.vmem [shape: bf16[64,128], index: 3, kind: input, shape index: {}]   ;;  %s268_s1 = inlined_call_operand.vmem [shape: f32[1,64], index: 1, kind: input, shape index: {}]   ;;  %s269_s2 = inlined_call_operand.vmem [shape: f32[1,64], index: 2, kind: input, shape index: {}]   ;;  %s270_s4 = inlined_call_operand.vmem [shape: f32[1,128], index: 4, kind: input, shape index: {}]   ;;  %s271_s5 = inlined_call_operand.vmem [shape: f32[1,128], index: 5, kind: input, shape index: {}]   ;;  %s272_s6 = inlined_call_operand.vmem [shape: bf16[8,128], index: 6, kind: output, shape index: {}]  }
   0x1   :  { %v24_v0 = vld [vmem:[%s266_s0] sm:$0xf]  ;;  %174 = vmatprep.subr.bf16.mxu0 %v196_v9  ;;  %v189_v10 = vld [vmem:[%s267_s3 + $0x8] sm:$0xff]   ;;  %v190_v11 = vld [vmem:[%s267_s3 + $0x10] sm:$0xff]   ;;  %182 = vmatprep.mubr.msk.bf16.mxu0 %vm197_vm1, %v196_v9 }
   0x2   :  { %v25_v1 = vunpack.c.l.bf16 %v24_v0  ;;  %v188_v8 = vld [vmem:[%s267_s3] sm:$0xff]   ;;  %v191_v12 = vld [vmem:[%s267_s3 + $0x18] sm:$0xff]  }
   0x3   :  { %175 = vmatpush3.bf16.msra.mxu0 %v188_v8  ;;  %v160_v17 = vld [vmem:[%s268_s1] ss:$0 sm:$0xff] }
   0x4   :  { %v27_v2 = vsel %vm26_vm0, %v25_v1, 0.0  ;;  %176 = vmatprep.subr.bf16.mxu0 %v196_v9  ;;  %v161_v19 = vld [vmem:[%s269_s2] ss:$0 sm:$0xff] }
   0x5   :  { %28 = vadd.xlane.f32.xlu0 %v27_v2  ;;  %v167_v23 = vld [vmem:[%s270_s4] ss:$0 sm:$0xff] }
   0x6   :  { %v168_v25 = vld [vmem:[%s271_s5] ss:$0 sm:$0xff] }
   0x7   :  { %177 = vmatpush3.bf16.msra.mxu0 %v189_v10 }
   0x8   :  { %178 = vmatprep.subr.bf16.mxu0 %v196_v9 }
   0xb   :  { %179 = vmatpush3.bf16.msra.mxu0 %v190_v11 }
   0xc   :  { %180 = vmatprep.subr.bf16.mxu0 %v196_v9 }
   0xf   :  { %181 = vmatpush3.bf16.msra.mxu0 %v191_v12 }
  0x92   :  { %v29_v3 = vpop.xlane.xlu0 %28 }
  0x93   :  { %v31_v4 = vmul.f32 0.015625, %v29_v3 }
  0x95   :  { %v32_v5 = vsub.f32 %v25_v1, %v31_v4 }
  0x97   :  { %v33_v6 = vmul.f32 %v32_v5, %v32_v5 }
  0x99   :  { %v34_v7 = vsel %vm26_vm0, %v33_v6, 0.0 }
  0x9a   :  { %35 = vadd.xlane.f32.xlu0 %v34_v7 }
 0x127   :  { %v36_v13 = vpop.xlane.xlu0 %35 }
 0x128   :  { %v37_v14 = vmul.f32 0.015625, %v36_v13 }
 0x12a   :  { %v38_v15 = vadd.f32 1e-06, %v37_v14 }
 0x12c   :  { %192 = vrsqrt.f32 %v38_v15 }
 0x136   :  { %v193_v16 = vpop.eup %192 }
 0x137   :  { %v40_v18 = vmul.f32 %v193_v16, %v32_v5 }
 0x139   :  { %v48_v20 = vmul.f32 %v160_v17, %v40_v18 }
 0x13b   :  { %v56_v21 = vadd.f32 %v161_v19, %v48_v20 }
 0x13d   :  { %v57_v22 = vpack.c.bf16 %v56_v21, %v56_v21 }
 0x13f   :  { %183 = vmatmul.mubr.msk.bf16.vlgmr.msra.gmra.mrb[0].mxu0 %vm26_vm0, %v57_v22 }
 0x212   :  { %v127_v24 = vpop.f32.mrb[0].mxu0 }
 0x213   :  { %v141_v26 = vmul.f32 %v167_v23, %v127_v24  ;;  %v184_v27 = vpop.f32.mrb[1].mxu0 }
 0x214   :  { %v130_v28 = vpop.f32.mrb[2].mxu0 }
 0x215   :  { %v148_v29 = vadd.f32 %v168_v25, %v141_v26  ;;  %v185_v30 = vpop.f32.mrb[3].mxu0 }
 0x217   :  { %v150_v31 = vmul.f32 0.70710677, %v148_v29  ;;  %v149_v33 = vmul.f32 0.5, %v148_v29 }
 0x219   :  { %194 = verf.f32 %v150_v31 }
 0x223   :  { %v195_v32 = vpop.eup %194 }
 0x224   :  { %v152_v34 = vadd.f32 1.0, %v195_v32 }
 0x226   :  { %v153_v35 = vmul.f32 %v152_v34, %v149_v33 }
 0x228   :  { %v154_v36 = vpack.c.bf16 %v153_v35, %v153_v35 }
 0x22a   :  { %155 = vst [vmem:[%s272_s6] sm:$0xf] %v154_v36 }

// kernel: volo_forward.61
= control target key start
LH: loop header
LB: loop body
LE: loop exit
PB: predicated region body
PF: predicated region fallthrough
CT: control target
= control target key end

     0   :  { %v146_v0 = vmov 0.0   ;;  %vm147_vm0 = vmmov 0   ;;  %vm51_vm1 = vcmask 523264   ;;  %s197_s1 = inlined_call_operand.vmem [shape: bf16[64,128], index: 1, kind: input, shape index: {}]   ;;  %s198_s0 = inlined_call_operand.vmem [shape: bf16[8,64], index: 0, kind: input, shape index: {}]   ;;  %s199_s2 = inlined_call_operand.vmem [shape: f32[1,128], index: 2, kind: input, shape index: {}]   ;;  %s200_s3 = inlined_call_operand.vmem [shape: f32[1,128], index: 3, kind: input, shape index: {}]   ;;  %s201_s4 = inlined_call_operand.vmem [shape: f32[8,128], index: 4, kind: output, shape index: {}]  }
   0x1   :  { %128 = vmatprep.subr.bf16.mxu0 %v146_v0  ;;  %v142_v1 = vld [vmem:[%s197_s1] sm:$0xff]   ;;  %136 = vmatprep.mubr.msk.bf16.mxu0 %vm147_vm0, %v146_v0  ;;  %v143_v2 = vld [vmem:[%s197_s1 + $0x8] sm:$0xff]   ;;  %v144_v3 = vld [vmem:[%s197_s1 + $0x10] sm:$0xff]  }
   0x2   :  { %129 = vmatpush3.bf16.msra.mxu0 %v142_v1  ;;  %v145_v4 = vld [vmem:[%s197_s1 + $0x18] sm:$0xff]   ;;  %v18_v5 = vld [vmem:[%s198_s0] sm:$0xf] }
   0x3   :  { %130 = vmatprep.subr.bf16.mxu0 %v146_v0  ;;  %v121_v6 = vld [vmem:[%s199_s2] ss:$0 sm:$0xff] }
   0x4   :  { %v122_v8 = vld [vmem:[%s200_s3] ss:$0 sm:$0xff] }
   0x6   :  { %131 = vmatpush3.bf16.msra.mxu0 %v143_v2 }
   0x7   :  { %132 = vmatprep.subr.bf16.mxu0 %v146_v0 }
   0xa   :  { %133 = vmatpush3.bf16.msra.mxu0 %v144_v3 }
   0xb   :  { %134 = vmatprep.subr.bf16.mxu0 %v146_v0 }
   0xe   :  { %135 = vmatpush3.bf16.msra.mxu0 %v145_v4 }
  0x11   :  { %137 = vmatmul.mubr.msk.bf16.vlgmr.msra.gmra.mrb[0].mxu0 %vm51_vm1, %v18_v5 }
  0xe4   :  { %v89_v7 = vpop.f32.mrb[0].mxu0 }
  0xe5   :  { %v103_v9 = vmul.f32 %v121_v6, %v89_v7  ;;  %v138_v10 = vpop.f32.mrb[1].mxu0 }
  0xe6   :  { %v92_v11 = vpop.f32.mrb[2].mxu0 }
  0xe7   :  { %v110_v12 = vadd.f32 %v122_v8, %v103_v9  ;;  %v139_v13 = vpop.f32.mrb[3].mxu0 }
  0xe9   :  { %111 = vst [vmem:[%s201_s4] sm:$0xff] %v110_v12 }

// kernel: volo_forward.55
= control target key start
LH: loop header
LB: loop body
LE: loop exit
PB: predicated region body
PF: predicated region fallthrough
CT: control target
= control target key end

     0   :  { %vm26_vm0 = vcmask 523264   ;;  %v189_v9 = vmov 0.0   ;;  %vm190_vm1 = vmmov 0   ;;  %s259_s0 = inlined_call_operand.vmem [shape: bf16[8,64], index: 0, kind: input, shape index: {}]   ;;  %s260_s3 = inlined_call_operand.vmem [shape: bf16[64,128], index: 3, kind: input, shape index: {}]   ;;  %s261_s1 = inlined_call_operand.vmem [shape: f32[1,64], index: 1, kind: input, shape index: {}]   ;;  %s262_s2 = inlined_call_operand.vmem [shape: f32[1,64], index: 2, kind: input, shape index: {}]   ;;  %s263_s4 = inlined_call_operand.vmem [shape: f32[1,128], index: 4, kind: input, shape index: {}]   ;;  %s264_s5 = inlined_call_operand.vmem [shape: f32[1,128], index: 5, kind: input, shape index: {}]   ;;  %s265_s6 = inlined_call_operand.vmem [shape: bf16[8,128], index: 6, kind: output, shape index: {}]  }
   0x1   :  { %v24_v0 = vld [vmem:[%s259_s0] sm:$0xf]  ;;  %169 = vmatprep.subr.bf16.mxu0 %v189_v9  ;;  %v184_v10 = vld [vmem:[%s260_s3 + $0x8] sm:$0xff]   ;;  %v185_v11 = vld [vmem:[%s260_s3 + $0x10] sm:$0xff]   ;;  %177 = vmatprep.mubr.msk.bf16.mxu0 %vm190_vm1, %v189_v9 }
   0x2   :  { %v25_v1 = vunpack.c.l.bf16 %v24_v0  ;;  %v183_v8 = vld [vmem:[%s260_s3] sm:$0xff]   ;;  %v186_v12 = vld [vmem:[%s260_s3 + $0x18] sm:$0xff]  }
   0x3   :  { %170 = vmatpush3.bf16.msra.mxu0 %v183_v8  ;;  %v155_v17 = vld [vmem:[%s261_s1] ss:$0 sm:$0xff] }
   0x4   :  { %v27_v2 = vsel %vm26_vm0, %v25_v1, 0.0  ;;  %171 = vmatprep.subr.bf16.mxu0 %v189_v9  ;;  %v156_v19 = vld [vmem:[%s262_s2] ss:$0 sm:$0xff] }
   0x5   :  { %28 = vadd.xlane.f32.xlu0 %v27_v2  ;;  %v162_v23 = vld [vmem:[%s263_s4] ss:$0 sm:$0xff] }
   0x6   :  { %v163_v25 = vld [vmem:[%s264_s5] ss:$0 sm:$0xff] }
   0x7   :  { %172 = vmatpush3.bf16.msra.mxu0 %v184_v10 }
   0x8   :  { %173 = vmatprep.subr.bf16.mxu0 %v189_v9 }
   0xb   :  { %174 = vmatpush3.bf16.msra.mxu0 %v185_v11 }
   0xc   :  { %175 = vmatprep.subr.bf16.mxu0 %v189_v9 }
   0xf   :  { %176 = vmatpush3.bf16.msra.mxu0 %v186_v12 }
  0x92   :  { %v29_v3 = vpop.xlane.xlu0 %28 }
  0x93   :  { %v31_v4 = vmul.f32 0.015625, %v29_v3 }
  0x95   :  { %v32_v5 = vsub.f32 %v25_v1, %v31_v4 }
  0x97   :  { %v33_v6 = vmul.f32 %v32_v5, %v32_v5 }
  0x99   :  { %v34_v7 = vsel %vm26_vm0, %v33_v6, 0.0 }
  0x9a   :  { %35 = vadd.xlane.f32.xlu0 %v34_v7 }
 0x127   :  { %v36_v13 = vpop.xlane.xlu0 %35 }
 0x128   :  { %v37_v14 = vmul.f32 0.015625, %v36_v13 }
 0x12a   :  { %v38_v15 = vadd.f32 1e-06, %v37_v14 }
 0x12c   :  { %187 = vrsqrt.f32 %v38_v15 }
 0x136   :  { %v188_v16 = vpop.eup %187 }
 0x137   :  { %v40_v18 = vmul.f32 %v188_v16, %v32_v5 }
 0x139   :  { %v48_v20 = vmul.f32 %v155_v17, %v40_v18 }
 0x13b   :  { %v56_v21 = vadd.f32 %v156_v19, %v48_v20 }
 0x13d   :  { %v57_v22 = vpack.c.bf16 %v56_v21, %v56_v21 }
 0x13f   :  { %178 = vmatmul.mubr.msk.bf16.vlgmr.msra.gmra.mrb[0].mxu0 %vm26_vm0, %v57_v22 }
 0x212   :  { %v127_v24 = vpop.f32.mrb[0].mxu0 }
 0x213   :  { %v141_v26 = vmul.f32 %v162_v23, %v127_v24  ;;  %v179_v27 = vpop.f32.mrb[1].mxu0 }
 0x214   :  { %v130_v28 = vpop.f32.mrb[2].mxu0 }
 0x215   :  { %v148_v29 = vadd.f32 %v163_v25, %v141_v26  ;;  %v180_v30 = vpop.f32.mrb[3].mxu0 }
 0x217   :  { %v149_v31 = vpack.c.bf16 %v148_v29, %v148_v29 }
 0x219   :  { %150 = vst [vmem:[%s265_s6] sm:$0xf] %v149_v31 }

// kernel: volo_forward.50
= control target key start
LH: loop header
LB: loop body
LE: loop exit
PB: predicated region body
PF: predicated region fallthrough
CT: control target
= control target key end

     0   :  { %vm110_vm0 = vcmask 1041409   ;;  %vm113_vm1 = vcmask 1042434   ;;  %vm116_vm2 = vcmask 1043459   ;;  %vm119_vm3 = vcmask 1043456   ;;  %s291_s0 = inlined_call_operand.vmem [shape: bf16[1,16,128], index: 0, kind: input, shape index: {}]   ;;  %s292_s1 = inlined_call_operand.vmem [shape: bf16[4,16,128], index: 1, kind: input, shape index: {}]   ;;  %s293_s2 = inlined_call_operand.vmem [shape: bf16[4,16,128], index: 2, kind: input, shape index: {}]   ;;  %s294_s3 = inlined_call_operand.vmem [shape: bf16[1,16,128], index: 3, kind: output, shape index: {}]  }
   0x1   :  { %v185_v0 = vld [vmem:[%s291_s0] sm:$0xff]   ;;  %v225_v2 = vld [vmem:[%s292_s1 + $0x8] sm:$0xff]   ;;  %v226_v7 = vld [vmem:[%s292_s1 + $0x10] sm:$0xff]  }
   0x2   :  { %v189_v1 = vld [vmem:[%s292_s1] sm:$0xff]   ;;  %v186_v3 = vunpack.c.l.bf16 %v185_v0  ;;  %v187_v4 = vunpack.c.h.bf16 %v185_v0  ;;  %v227_v8 = vld [vmem:[%s292_s1 + $0x18] sm:$0xff]   ;;  %v194_v9 = vunpack.c.l.bf16 %v225_v2  ;;  %v195_v10 = vunpack.c.h.bf16 %v225_v2 }
   0x3   :  { %v190_v5 = vunpack.c.l.bf16 %v189_v1  ;;  %v191_v6 = vunpack.c.h.bf16 %v189_v1  ;;  %v198_v11 = vunpack.c.l.bf16 %v226_v7  ;;  %v199_v12 = vunpack.c.h.bf16 %v226_v7 }
   0x4   :  { %v202_v13 = vunpack.c.l.bf16 %v227_v8  ;;  %v203_v14 = vunpack.c.h.bf16 %v227_v8  ;;  %v52_v17 = vmul.f32 %v194_v9, %v186_v3  ;;  %v53_v18 = vmul.f32 %v195_v10, %v187_v4 }
   0x5   :  { %v50_v15 = vmul.f32 %v190_v5, %v186_v3  ;;  %v51_v16 = vmul.f32 %v191_v6, %v187_v4  ;;  %v54_v19 = vmul.f32 %v198_v11, %v186_v3  ;;  %v55_v20 = vmul.f32 %v199_v12, %v187_v4 }
   0x6   :  { %v56_v21 = vmul.f32 %v202_v13, %v186_v3  ;;  %v57_v22 = vmul.f32 %v203_v14, %v187_v4  ;;  %v65_v24 = vadd.f32 %v53_v18, %v52_v17 }
   0x7   :  { %v58_v23 = vadd.f32 %v51_v16, %v50_v15  ;;  %v72_v25 = vadd.f32 %v55_v20, %v54_v19  ;;  %v128_v19 = vlaneseq }
   0x8   :  { %v79_v27 = vadd.f32 %v57_v22, %v56_v21  ;;  %v66_v28 = vrot.slane %v65_v24, 4  ;;  %v205_v22 = vld [vmem:[%s293_s2] sm:$0xff]  }
   0x9   :  { %v59_v26 = vrot.slane %v58_v23, 4  ;;  %v73_v29 = vrot.slane %v72_v25, 4  ;;  %v129_v20 = vshrl.u32 %v128_v19, 7 }
   0xa   :  { %v80_v31 = vrot.slane %v79_v27, 4  ;;  %v67_v32 = vadd.f32 %v66_v28, %v65_v24  ;;  %v206_v28 = vunpack.c.l.bf16 %v205_v22 }
   0xb   :  { %v60_v30 = vadd.f32 %v59_v26, %v58_v23  ;;  %v74_v33 = vadd.f32 %v73_v29, %v72_v25  ;;  %v130_v21 = vsub.s32 0, %v129_v20  ;;  %v228_v23 = vld [vmem:[%s293_s2 + $0x8] sm:$0xff]   ;;  %v229_v25 = vld [vmem:[%s293_s2 + $0x10] sm:$0xff]   ;;  %v230_v26 = vld [vmem:[%s293_s2 + $0x18] sm:$0xff]   ;;  %v207_v29 = vunpack.c.h.bf16 %v205_v22 }
   0xc   :  { %v81_v35 = vadd.f32 %v80_v31, %v79_v27  ;;  %v68_v36 = vrot.slane %v67_v32, 2  ;;  %v211_v31 = vunpack.c.h.bf16 %v228_v23 }
   0xd   :  { %v61_v34 = vrot.slane %v60_v30, 2  ;;  %v75_v37 = vrot.slane %v74_v33, 2 }
   0xe   :  { %v82_v39 = vrot.slane %v81_v35, 2  ;;  %v69_v40 = vadd.f32 %v68_v36, %v67_v32  ;;  %v214_v36 = vunpack.c.l.bf16 %v229_v25 }
   0xf   :  { %v62_v38 = vadd.f32 %v61_v34, %v60_v30  ;;  %v76_v41 = vadd.f32 %v75_v37, %v74_v33  ;;  %v210_v30 = vunpack.c.l.bf16 %v228_v23  ;;  %v215_v37 = vunpack.c.h.bf16 %v229_v25 }
  0x10   :  { %v83_v43 = vadd.f32 %v82_v39, %v81_v35  ;;  %v70_v44 = vrot.slane %v69_v40, 1  ;;  %v219_v39 = vunpack.c.h.bf16 %v230_v26 }
  0x11   :  { %v63_v42 = vrot.slane %v62_v38, 1  ;;  %v77_v45 = vrot.slane %v76_v41, 1 }
  0x12   :  { %v84_v47 = vrot.slane %v83_v43, 1  ;;  %v71_v48 = vadd.f32 %v70_v44, %v69_v40 }
  0x13   :  { %v64_v46 = vadd.f32 %v63_v42, %v62_v38  ;;  %v78_v49 = vadd.f32 %v77_v45, %v76_v41  ;;  %v218_v38 = vunpack.c.l.bf16 %v230_v26 }
  0x14   :  { %v85_v50 = vadd.f32 %v84_v47, %v83_v43  ;;  %v87_v52 = vmul.f32 0.25, %v71_v48 }
  0x15   :  { %v86_v51 = vmul.f32 0.25, %v64_v46  ;;  %v88_v53 = vmul.f32 0.25, %v78_v49 }
  0x16   :  { %v89_v54 = vmul.f32 0.25, %v85_v50 }
  0x17   :  { %v90_v55 = vmax.f32 %v86_v51, %v87_v52 }
  0x18   :  { %v91_v56 = vmax.f32 %v88_v53, %v89_v54 }
  0x1a   :  { %v92_v57 = vmax.f32 %v90_v55, %v91_v56 }
  0x1c   :  { %v93_v58 = vsub.f32 %v86_v51, %v92_v57  ;;  %v94_v59 = vsub.f32 %v87_v52, %v92_v57  ;;  %v95_v60 = vsub.f32 %v88_v53, %v92_v57  ;;  %v96_v61 = vsub.f32 %v89_v54, %v92_v57 }
  0x1e   :  { %v97_v62 = vmul.f32 1.442695, %v93_v58  ;;  %v99_v63 = vmul.f32 1.442695, %v94_v59  ;;  %v101_v0 = vmul.f32 1.442695, %v95_v60 }
  0x1f   :  { %v103_v1 = vmul.f32 1.442695, %v96_v61 }
  0x20   :  { %231 = vpow2.f32 %v97_v62 }
  0x21   :  { %233 = vpow2.f32 %v99_v63 }
  0x22   :  { %235 = vpow2.f32 %v101_v0 }
  0x23   :  { %237 = vpow2.f32 %v103_v1 }
  0x2a   :  { %v232_v2 = vpop.eup %231 }
  0x2b   :  { %v234_v3 = vpop.eup %233 }
  0x2c   :  { %v236_v4 = vpop.eup %235  ;;  %v109_v5 = vrot.slane %v234_v3, 7 }
  0x2d   :  { %v238_v6 = vpop.eup %237  ;;  %v112_v7 = vrot.slane %v236_v4, 6 }
  0x2e   :  { %v111_v8 = vsel %vm110_vm0, %v109_v5, %v232_v2  ;;  %v115_v9 = vrot.slane %v238_v6, 5 }
  0x2f   :  { %v114_v10 = vsel %vm113_vm1, %v112_v7, %v111_v8 }
  0x30   :  { %v117_v11 = vsel %vm116_vm2, %v115_v9, %v114_v10 }
  0x31   :  { %v120_v12 = vsel %vm119_vm3, %v117_v11, 0.0 }
  0x32   :  { %v121_v13 = vrot.slane %v120_v12, 4 }
  0x34   :  { %v122_v14 = vadd.f32 %v121_v13, %v120_v12 }
  0x36   :  { %v123_v15 = vrot.slane %v122_v14, 2 }
  0x38   :  { %v124_v16 = vadd.f32 %v123_v15, %v122_v14 }
  0x3a   :  { %v125_v17 = vrot.slane %v124_v16, 1 }
  0x3c   :  { %v126_v18 = vadd.f32 %v125_v17, %v124_v16 }
  0x3e   :  { %239 = vrcp.f32 %v126_v18 }
  0x48   :  { %v240_v24 = vpop.eup %239 }
  0x49   :  { %v131_v27 = vrot.slane %v240_v24, %v130_v21 }
  0x4b   :  { %v132_v32 = vmul.f32 %v232_v2, %v131_v27  ;;  %v133_v33 = vmul.f32 %v234_v3, %v131_v27  ;;  %v134_v34 = vmul.f32 %v236_v4, %v131_v27  ;;  %v135_v35 = vmul.f32 %v238_v6, %v131_v27 }
  0x4d   :  { %v139_v40 = vrot.slane %v132_v32, %v130_v21  ;;  %v145_v41 = vrot.slane %v133_v33, %v130_v21  ;;  %v153_v42 = vrot.slane %v134_v34, %v130_v21  ;;  %v161_v43 = vrot.slane %v135_v35, %v130_v21 }
  0x4f   :  { %v140_v44 = vmul.f32 %v206_v28, %v139_v40  ;;  %v141_v45 = vmul.f32 %v207_v29, %v139_v40  ;;  %v146_v46 = vmul.f32 %v210_v30, %v145_v41  ;;  %v147_v47 = vmul.f32 %v211_v31, %v145_v41 }
  0x50   :  { %v154_v48 = vmul.f32 %v214_v36, %v153_v42  ;;  %v155_v49 = vmul.f32 %v215_v37, %v153_v42  ;;  %v162_v52 = vmul.f32 %v218_v38, %v161_v43  ;;  %v163_v53 = vmul.f32 %v219_v39, %v161_v43 }
  0x51   :  { %v148_v50 = vadd.f32 %v146_v46, %v140_v44  ;;  %v149_v51 = vadd.f32 %v147_v47, %v141_v45 }
  0x53   :  { %v156_v54 = vadd.f32 %v154_v48, %v148_v50  ;;  %v157_v55 = vadd.f32 %v155_v49, %v149_v51 }
  0x55   :  { %v164_v56 = vadd.f32 %v162_v52, %v156_v54  ;;  %v165_v57 = vadd.f32 %v163_v53, %v157_v55 }
  0x57   :  { %v223_v58 = vpack.c.bf16 %v165_v57, %v164_v56 }
  0x59   :  { %224 = vst [vmem:[%s294_s3] sm:$0xff] %v223_v58  }

// kernel: volo_forward.60
= control target key start
LH: loop header
LB: loop body
LE: loop exit
PB: predicated region body
PF: predicated region fallthrough
CT: control target
= control target key end

     0   :  { %vm26_vm0 = vcmask 523264   ;;  %v188_v9 = vmov 0.0   ;;  %vm189_vm1 = vmmov 0   ;;  %s258_s0 = inlined_call_operand.vmem [shape: bf16[8,64], index: 0, kind: input, shape index: {}]   ;;  %s259_s3 = inlined_call_operand.vmem [shape: bf16[64,128], index: 3, kind: input, shape index: {}]   ;;  %s260_s1 = inlined_call_operand.vmem [shape: f32[1,64], index: 1, kind: input, shape index: {}]   ;;  %s261_s2 = inlined_call_operand.vmem [shape: f32[1,64], index: 2, kind: input, shape index: {}]   ;;  %s262_s4 = inlined_call_operand.vmem [shape: f32[1,128], index: 4, kind: input, shape index: {}]   ;;  %s263_s5 = inlined_call_operand.vmem [shape: f32[1,128], index: 5, kind: input, shape index: {}]   ;;  %s264_s6 = inlined_call_operand.vmem [shape: f32[8,128], index: 6, kind: output, shape index: {}]  }
   0x1   :  { %v24_v0 = vld [vmem:[%s258_s0] sm:$0xf]  ;;  %168 = vmatprep.subr.bf16.mxu0 %v188_v9  ;;  %v183_v10 = vld [vmem:[%s259_s3 + $0x8] sm:$0xff]   ;;  %v184_v11 = vld [vmem:[%s259_s3 + $0x10] sm:$0xff]   ;;  %176 = vmatprep.mubr.msk.bf16.mxu0 %vm189_vm1, %v188_v9 }
   0x2   :  { %v25_v1 = vunpack.c.l.bf16 %v24_v0  ;;  %v182_v8 = vld [vmem:[%s259_s3] sm:$0xff]   ;;  %v185_v12 = vld [vmem:[%s259_s3 + $0x18] sm:$0xff]  }
   0x3   :  { %169 = vmatpush3.bf16.msra.mxu0 %v182_v8  ;;  %v154_v17 = vld [vmem:[%s260_s1] ss:$0 sm:$0xff] }
   0x4   :  { %v27_v2 = vsel %vm26_vm0, %v25_v1, 0.0  ;;  %170 = vmatprep.subr.bf16.mxu0 %v188_v9  ;;  %v155_v19 = vld [vmem:[%s261_s2] ss:$0 sm:$0xff] }
   0x5   :  { %28 = vadd.xlane.f32.xlu0 %v27_v2  ;;  %v161_v23 = vld [vmem:[%s262_s4] ss:$0 sm:$0xff] }
   0x6   :  { %v162_v25 = vld [vmem:[%s263_s5] ss:$0 sm:$0xff] }
   0x7   :  { %171 = vmatpush3.bf16.msra.mxu0 %v183_v10 }
   0x8   :  { %172 = vmatprep.subr.bf16.mxu0 %v188_v9 }
   0xb   :  { %173 = vmatpush3.bf16.msra.mxu0 %v184_v11 }
   0xc   :  { %174 = vmatprep.subr.bf16.mxu0 %v188_v9 }
   0xf   :  { %175 = vmatpush3.bf16.msra.mxu0 %v185_v12 }
  0x92   :  { %v29_v3 = vpop.xlane.xlu0 %28 }
  0x93   :  { %v31_v4 = vmul.f32 0.015625, %v29_v3 }
  0x95   :  { %v32_v5 = vsub.f32 %v25_v1, %v31_v4 }
  0x97   :  { %v33_v6 = vmul.f32 %v32_v5, %v32_v5 }
  0x99   :  { %v34_v7 = vsel %vm26_vm0, %v33_v6, 0.0 }
  0x9a   :  { %35 = vadd.xlane.f32.xlu0 %v34_v7 }
 0x127   :  { %v36_v13 = vpop.xlane.xlu0 %35 }
 0x128   :  { %v37_v14 = vmul.f32 0.015625, %v36_v13 }
 0x12a   :  { %v38_v15 = vadd.f32 1e-05, %v37_v14 }
 0x12c   :  { %186 = vrsqrt.f32 %v38_v15 }
 0x136   :  { %v187_v16 = vpop.eup %186 }
 0x137   :  { %v40_v18 = vmul.f32 %v187_v16, %v32_v5 }
 0x139   :  { %v48_v20 = vmul.f32 %v154_v17, %v40_v18 }
 0x13b   :  { %v56_v21 = vadd.f32 %v155_v19, %v48_v20 }
 0x13d   :  { %v57_v22 = vpack.c.bf16 %v56_v21, %v56_v21 }
 0x13f   :  { %177 = vmatmul.mubr.msk.bf16.vlgmr.msra.gmra.mrb[0].mxu0 %vm26_vm0, %v57_v22 }
 0x212   :  { %v127_v24 = vpop.f32.mrb[0].mxu0 }
 0x213   :  { %v141_v26 = vmul.f32 %v161_v23, %v127_v24  ;;  %v178_v27 = vpop.f32.mrb[1].mxu0 }
 0x214   :  { %v130_v28 = vpop.f32.mrb[2].mxu0 }
 0x215   :  { %v148_v29 = vadd.f32 %v162_v25, %v141_v26  ;;  %v179_v30 = vpop.f32.mrb[3].mxu0 }
 0x217   :  { %149 = vst [vmem:[%s264_s6] sm:$0xff] %v148_v29 }

</bundles_post_ra>
